<compile_context>
chip_gen: v7x
topology: tpu7x:2x2x1
jax: 0.10.0
libtpu: 0.0.40
codegen_flags: <defaults>
</compile_context>

<pallas_src>
import math
from functools import partial

import jax
import jax.numpy as jnp
from jax.experimental import pallas as pl
from jax.experimental.pallas import tpu as pltpu

H0 = W0 = 16  # input spatial size (required so features end at 128*2*2)


# ----------------------------------------------------------------------------
# The single fused kernel
# ----------------------------------------------------------------------------
def _fused_kernel(
    # inputs
    xpad_ref,            # (18, 18, N, 1) f32   zero-padded input, (h, w, n, c)
    w1_ref, b1_ref,      # (9, 64) f32, (1, 64) f32
    w2_ref, b2_ref,      # (9, 64, 128) bf16, (1, 128) f32
    w3_ref, b3_ref,      # (9, 128, 128) bf16, (1, 128) f32
    f1w_ref, f1b_ref,    # (512, 1024) bf16, (1, 1024) f32
    f2w_ref, f2b_ref,    # (1024, 1024) bf16, (1, 1024) f32
    a1w_ref, a1b_ref,    # (1024, 512) bf16, (1, 512) f32
    a2w_ref, a2b_ref,    # (1, 512) f32, (1, 1) f32
    tw_ref, tb_ref,      # (1024, nc) bf16, (1, nc) f32
    # outputs
    logits_ref,          # (1, nc) f32
    attw_ref,            # (N, 1) f32  softmax attention weights
    # scratch
    xp2_ref,             # (10, 10, N, 64) f32  padded pool1 output
    xp3_ref,             # (6, 6, N, 128) f32   padded pool2 output
    feat_ref,            # (N, 512) f32         flattened features
    *, without_atten,
):
    f32, bf16 = jnp.float32, jnp.bfloat16
    N = attw_ref.shape[0]

    # padded scratch activations: borders must be zero (conv padding=1)
    xp2_ref[...] = jnp.zeros(xp2_ref.shape, f32)
    xp3_ref[...] = jnp.zeros(xp3_ref.shape, f32)

    # ---- conv1 (1->64) + ReLU + 2x2 maxpool: VPU stencil, blocked over pooled rows
    def conv1_block(ho, carry):
        acc = jnp.zeros((2 * W0 * N, 64), f32)
        for k in range(9):
            kh, kw = k // 3, k % 3
            tap = xpad_ref[pl.ds(2 * ho + kh, 2), kw:kw + W0, :, :]
            tap = tap.reshape(2 * W0 * N, 1)
            acc = acc + tap * w1_ref[k:k + 1, :]          # broadcast FMA (VPU)
        y = jnp.maximum(acc + b1_ref[...], 0.0)
        t = y.reshape(2, W0, N, 64)                       # (dh, w, n, c)
        th = jnp.maximum(t[0], t[1])                      # pool along H
        for wo in range(W0 // 2):                         # pool along W + write
            xp2_ref[1 + ho, 1 + wo, :, :] = jnp.maximum(th[2 * wo], th[2 * wo + 1])
        return carry

    jax.lax.fori_loop(0, H0 // 2, conv1_block, 0)

    # ---- conv2 (64->128) + ReLU + pool: in-kernel im2col, 9 bf16 MXU matmuls/block
    def conv2_block(ho, carry):
        acc = jnp.zeros((2 * 8 * N, 128), f32)
        for k in range(9):
            kh, kw = k // 3, k % 3
            tap = xp2_ref[pl.ds(2 * ho + kh, 2), kw:kw + 8, :, :]
            tap = tap.reshape(2 * 8 * N, 64).astype(bf16)
            acc = acc + jnp.dot(tap, w2_ref[k], preferred_element_type=f32)
        y = jnp.maximum(acc + b2_ref[...], 0.0)
        t = y.reshape(2, 8, N, 128)
        th = jnp.maximum(t[0], t[1])
        for wo in range(4):
            xp3_ref[1 + ho, 1 + wo, :, :] = jnp.maximum(th[2 * wo], th[2 * wo + 1])
        return carry

    jax.lax.fori_loop(0, 4, conv2_block, 0)

    # ---- conv3 (128->128) + ReLU + pool + flatten into feat_ref ((h, w, c) order)
    acc = jnp.zeros((4 * 4 * N, 128), f32)
    for k in range(9):
        kh, kw = k // 3, k % 3
        tap = xp3_ref[kh:kh + 4, kw:kw + 4, :, :].reshape(4 * 4 * N, 128)
        acc = acc + jnp.dot(tap.astype(bf16), w3_ref[k], preferred_element_type=f32)
    y3 = jnp.maximum(acc + b3_ref[...], 0.0)              # rows ordered (h, w, n)
    y3 = y3.reshape(16, N, 128)
    for ho in range(2):
        for wo in range(2):
            p = y3[(2 * ho) * 4 + 2 * wo]
            p = jnp.maximum(p, y3[(2 * ho) * 4 + 2 * wo + 1])
            p = jnp.maximum(p, y3[(2 * ho + 1) * 4 + 2 * wo])
            p = jnp.maximum(p, y3[(2 * ho + 1) * 4 + 2 * wo + 1])
            off = 128 * (2 * ho + wo)
            feat_ref[:, off:off + 128] = p

    # ---- classifier -> attention -> softmax-pool -> top layer (Dropout = identity)
    feat = feat_ref[...]                                   # (N, 512) f32
    h = jnp.dot(feat.astype(bf16), f1w_ref[...], preferred_element_type=f32)
    h = jnp.maximum(h + f1b_ref[...], 0.0)
    h = jnp.dot(h.astype(bf16), f2w_ref[...], preferred_element_type=f32)
    h = jnp.maximum(h + f2b_ref[...], 0.0)                 # (N, 1024)

    a = jnp.dot(h.astype(bf16), a1w_ref[...], preferred_element_type=f32)
    a = jnp.tanh(a + a1b_ref[...])                         # (N, 512)
    logit = jnp.sum(a * a2w_ref[...], axis=1, keepdims=True) + a2b_ref[...]  # (N, 1)

    m = jnp.max(logit, axis=0, keepdims=True)
    e = jnp.exp(logit - m)
    wgt = e / jnp.sum(e, axis=0, keepdims=True)            # softmax over instances
    attw_ref[...] = wgt

    if without_atten:
        pooled = jnp.mean(h, axis=0, keepdims=True)        # (1, 1024)
    else:
        pooled = jnp.sum(wgt * h, axis=0, keepdims=True)   # == A @ h

    out = jnp.dot(pooled.astype(bf16), tw_ref[...], preferred_element_type=f32)
    logits_ref[...] = out + tb_ref[...]


def _full_spec(arr):
    nd = arr.ndim
    return pl.BlockSpec(arr.shape, lambda i, nd=nd: (0,) * nd)


# ----------------------------------------------------------------------------
# Forward wrapper (matches AlexNet_MNIST_attention.forward, returns (x, 0, A))
# ----------------------------------------------------------------------------
def alexnet_attention_forward(kp, x, without_atten=False):
    x = jnp.squeeze(x, axis=0)                             # (N, 1, 16, 16)
    assert x.shape[1:] == (1, H0, W0)
    N = x.shape[0]
    nc = kp["top_b"].shape[1]

    # (h, w, n, 1) layout + zero padding for conv1 (tiny wrapper-side prep)
    xh = jnp.transpose(x.reshape(N, H0, W0), (1, 2, 0))[..., None]
    xpad = jnp.pad(xh, ((1, 1), (1, 1), (0, 0), (0, 0)))

    inputs = (xpad, kp["w1"], kp["b1"], kp["w2"], kp["b2"], kp["w3"], kp["b3"],
              kp["fc1_w"], kp["fc1_b"], kp["fc2_w"], kp["fc2_b"],
              kp["att1_w"], kp["att1_b"], kp["att2_w"], kp["att2_b"],
              kp["top_w"], kp["top_b"])

    logits, attw = pl.pallas_call(
        partial(_fused_kernel, without_atten=without_atten),
        out_shape=(jax.ShapeDtypeStruct((1, nc), jnp.float32),
                   jax.ShapeDtypeStruct((N, 1), jnp.float32)),
        grid_spec=pltpu.PrefetchScalarGridSpec(
            num_scalar_prefetch=0,
            grid=(1,),
            in_specs=[_full_spec(a) for a in inputs],
            out_specs=[pl.BlockSpec((1, nc), lambda i: (0, 0)),
                       pl.BlockSpec((N, 1), lambda i: (0, 0))],
            scratch_shapes=[pltpu.VMEM((10, 10, N, 64), jnp.float32),
                            pltpu.VMEM((6, 6, N, 128), jnp.float32),
                            pltpu.VMEM((N, 512), jnp.float32)]),
        compiler_params=pltpu.CompilerParams(
            dimension_semantics=("arbitrary",),
            vmem_limit_bytes=40 * 1024 * 1024),
    )(*inputs)

    A = attw.reshape(1, N)                                 # == softmax(A_^T, dim=1)
    # TODO(synk): multi-head top_layer branch (len(num_classes) > 1) and the
    # returnBeforeSoftMaxA extra output are not implemented.
    return logits, 0, A


# ----------------------------------------------------------------------------
# Parameters (PyTorch-like init) and one-time kernel-layout preparation
# ----------------------------------------------------------------------------
def init_params(key, num_classes=10):
    ks = jax.random.split(key, 8)

    def conv_w(k, cout, cin):
        n = 3 * 3 * cout
        return jax.random.normal(k, (cout, cin, 3, 3), jnp.float32) * math.sqrt(2.0 / n)

    def lin_w(k, din, dout):   # stored (in, out); normal(0, 0.01) like _initialize_weights
        return jax.random.normal(k, (din, dout), jnp.float32) * 0.01

    return {
        "conv1_w": conv_w(ks[0], 64, 1),    "conv1_b": jnp.zeros((64,), jnp.float32),
        "conv2_w": conv_w(ks[1], 128, 64),  "conv2_b": jnp.zeros((128,), jnp.float32),
        "conv3_w": conv_w(ks[2], 128, 128), "conv3_b": jnp.zeros((128,), jnp.float32),
        "fc1_w": lin_w(ks[3], 512, 1024),   "fc1_b": jnp.zeros((1024,), jnp.float32),
        "fc2_w": lin_w(ks[4], 1024, 1024),  "fc2_b": jnp.zeros((1024,), jnp.float32),
        "att1_w": lin_w(ks[5], 1024, 512),  "att1_b": jnp.zeros((512,), jnp.float32),
        "att2_w": lin_w(ks[6], 512, 1),     "att2_b": jnp.zeros((1,), jnp.float32),
        "top_w": lin_w(ks[7], 1024, num_classes),
        "top_b": jnp.zeros((num_classes,), jnp.float32),
    }


def prepare_kernel_params(p):
    """One-time re-layout + bf16 cast of the weights for the fused kernel."""
    bf16, f32 = jnp.bfloat16, jnp.float32
    row = lambda b: b.reshape(1, -1).astype(f32)
    return {
        # conv weights as (tap, cin, cout) so each tap is a plain 2D matmul
        "w1": p["conv1_w"].reshape(64, 9).T.astype(f32),                       # (9, 64)
        "b1": row(p["conv1_b"]),
        "w2": p["conv2_w"].transpose(2, 3, 1, 0).reshape(9, 64, 128).astype(bf16),
        "b2": row(p["conv2_b"]),
        "w3": p["conv3_w"].transpose(2, 3, 1, 0).reshape(9, 128, 128).astype(bf16),
        "b3": row(p["conv3_b"]),
        # fc1 rows permuted from PyTorch's (c, h, w) flatten to the kernel's (h, w, c)
        "fc1_w": (p["fc1_w"].reshape(128, 2, 2, 1024).transpose(1, 2, 0, 3)
                  .reshape(512, 1024).astype(bf16)),
        "fc1_b": row(p["fc1_b"]),
        "fc2_w": p["fc2_w"].astype(bf16),   "fc2_b": row(p["fc2_b"]),
        "att1_w": p["att1_w"].astype(bf16), "att1_b": row(p["att1_b"]),
        "att2_w": p["att2_w"].reshape(1, 512).astype(f32),
        "att2_b": p["att2_b"].reshape(1, 1).astype(f32),
        "top_w": p["top_w"].astype(bf16),   "top_b": row(p["top_b"]),
    }


# ----------------------------------------------------------------------------
if __name__ == "__main__":
    root = jax.random.PRNGKey(0)
    k_params, k_x = jax.random.split(root)

    params = init_params(k_params, num_classes=10)
    kparams = prepare_kernel_params(params)

    # bag of 8 MNIST-like instances, 1 channel, 16x16 spatial
    x = jax.random.normal(k_x, (1, 8, 1, 16, 16), jnp.float32)

    fwd = jax.jit(alexnet_attention_forward)
    logits, zero, A = fwd(kparams, x)
    jax.block_until_ready((logits, A))

    assert logits.shape == (1, 10)
    assert A.shape == (1, 8)
    assert bool(jnp.all(jnp.isfinite(logits)))
    assert abs(float(jnp.sum(A)) - 1.0) < 1e-3   # attention weights sum to 1
    print("KERNEL_OK")
</pallas_src>

<mosaic_0001>
module attributes {stable_mosaic.version = 11 : i64} {
  func.func @_fused_kernel(%arg0: i32, %arg1: memref<18x18x8x1xf32, #tpu.memory_space<vmem>>, %arg2: memref<9x64xf32, #tpu.memory_space<vmem>>, %arg3: memref<1x64xf32, #tpu.memory_space<vmem>>, %arg4: memref<9x64x128xbf16, #tpu.memory_space<vmem>>, %arg5: memref<1x128xf32, #tpu.memory_space<vmem>>, %arg6: memref<9x128x128xbf16, #tpu.memory_space<vmem>>, %arg7: memref<1x128xf32, #tpu.memory_space<vmem>>, %arg8: memref<512x1024xbf16, #tpu.memory_space<vmem>>, %arg9: memref<1x1024xf32, #tpu.memory_space<vmem>>, %arg10: memref<1024x1024xbf16, #tpu.memory_space<vmem>>, %arg11: memref<1x1024xf32, #tpu.memory_space<vmem>>, %arg12: memref<1024x512xbf16, #tpu.memory_space<vmem>>, %arg13: memref<1x512xf32, #tpu.memory_space<vmem>>, %arg14: memref<1x512xf32, #tpu.memory_space<vmem>>, %arg15: memref<1x1xf32, #tpu.memory_space<vmem>>, %arg16: memref<1024x10xbf16, #tpu.memory_space<vmem>>, %arg17: memref<1x10xf32, #tpu.memory_space<vmem>>, %arg18: memref<1x10xf32, #tpu.memory_space<vmem>>, %arg19: memref<8x1xf32, #tpu.memory_space<vmem>>, %arg20: memref<10x10x8x64xf32, #tpu.memory_space<vmem>>, %arg21: memref<6x6x8x128xf32, #tpu.memory_space<vmem>>, %arg22: memref<8x512xf32, #tpu.memory_space<vmem>>) attributes {dimension_semantics = [#tpu.dimension_semantics<arbitrary>], iteration_bounds = array<i64: 1>, scalar_prefetch = 0 : i64, scratch_operands = 3 : i64, tpu.core_type = #tpu.core_type<tc>, window_params = [{pipeline_mode = #tpu.pipeline_mode<synchronous>, transform_indices = @transform_0, window_bounds = array<i64: 18, 18, 8, 1>}, {pipeline_mode = #tpu.pipeline_mode<synchronous>, transform_indices = @transform_1, window_bounds = array<i64: 9, 64>}, {pipeline_mode = #tpu.pipeline_mode<synchronous>, transform_indices = @transform_2, window_bounds = array<i64: 1, 64>}, {pipeline_mode = #tpu.pipeline_mode<synchronous>, transform_indices = @transform_3, window_bounds = array<i64: 9, 64, 128>}, {pipeline_mode = #tpu.pipeline_mode<synchronous>, transform_indices = @transform_4, window_bounds = array<i64: 1, 128>}, {pipeline_mode = #tpu.pipeline_mode<synchronous>, transform_indices = @transform_5, window_bounds = array<i64: 9, 128, 128>}, {pipeline_mode = #tpu.pipeline_mode<synchronous>, transform_indices = @transform_6, window_bounds = array<i64: 1, 128>}, {pipeline_mode = #tpu.pipeline_mode<synchronous>, transform_indices = @transform_7, window_bounds = array<i64: 512, 1024>}, {pipeline_mode = #tpu.pipeline_mode<synchronous>, transform_indices = @transform_8, window_bounds = array<i64: 1, 1024>}, {pipeline_mode = #tpu.pipeline_mode<synchronous>, transform_indices = @transform_9, window_bounds = array<i64: 1024, 1024>}, {pipeline_mode = #tpu.pipeline_mode<synchronous>, transform_indices = @transform_10, window_bounds = array<i64: 1, 1024>}, {pipeline_mode = #tpu.pipeline_mode<synchronous>, transform_indices = @transform_11, window_bounds = array<i64: 1024, 512>}, {pipeline_mode = #tpu.pipeline_mode<synchronous>, transform_indices = @transform_12, window_bounds = array<i64: 1, 512>}, {pipeline_mode = #tpu.pipeline_mode<synchronous>, transform_indices = @transform_13, window_bounds = array<i64: 1, 512>}, {pipeline_mode = #tpu.pipeline_mode<synchronous>, transform_indices = @transform_14, window_bounds = array<i64: 1, 1>}, {pipeline_mode = #tpu.pipeline_mode<synchronous>, transform_indices = @transform_15, window_bounds = array<i64: 1024, 10>}, {pipeline_mode = #tpu.pipeline_mode<synchronous>, transform_indices = @transform_16, window_bounds = array<i64: 1, 10>}, {pipeline_mode = #tpu.pipeline_mode<synchronous>, transform_indices = @transform_17, window_bounds = array<i64: 1, 10>}, {pipeline_mode = #tpu.pipeline_mode<synchronous>, transform_indices = @transform_18, window_bounds = array<i64: 8, 1>}]} {
    %cst = arith.constant 0.000000e+00 : f32
    %0 = vector.broadcast %cst : f32 to vector<10x10x8x64xf32>
    %c0 = arith.constant 0 : index
    %c0_0 = arith.constant 0 : index
    %c0_1 = arith.constant 0 : index
    %c0_2 = arith.constant 0 : index
    %1 = vector.load %arg20[%c0, %c0_0, %c0_1, %c0_2] : memref<10x10x8x64xf32, #tpu.memory_space<vmem>>, vector<10x10x8x64xf32>
    tpu.vector_store %arg20[%c0, %c0_0, %c0_1, %c0_2], %0 {strides = array<i32>} : memref<10x10x8x64xf32, #tpu.memory_space<vmem>>, vector<10x10x8x64xf32>,
    %cst_3 = arith.constant 0.000000e+00 : f32
    %2 = vector.broadcast %cst_3 : f32 to vector<6x6x8x128xf32>
    %c0_4 = arith.constant 0 : index
    %c0_5 = arith.constant 0 : index
    %c0_6 = arith.constant 0 : index
    %c0_7 = arith.constant 0 : index
    %3 = vector.load %arg21[%c0_4, %c0_5, %c0_6, %c0_7] : memref<6x6x8x128xf32, #tpu.memory_space<vmem>>, vector<6x6x8x128xf32>
    tpu.vector_store %arg21[%c0_4, %c0_5, %c0_6, %c0_7], %2 {strides = array<i32>} : memref<6x6x8x128xf32, #tpu.memory_space<vmem>>, vector<6x6x8x128xf32>,
    %c0_i32 = arith.constant 0 : i32
    %c8_i32 = arith.constant 8 : i32
    %4 = arith.addi %c0_i32, %c8_i32 : i32
    %c1_i32 = arith.constant 1 : i32
    scf.for %arg23 = %c0_i32 to %4 step %c1_i32  : i32 {
      %cst_121 = arith.constant 0.000000e+00 : f32
      %176 = vector.broadcast %cst_121 : f32 to vector<256x64xf32>
      %c2_i32 = arith.constant 2 : i32
      %177 = arith.muli %c2_i32, %arg23 : i32
      %c0_i32_122 = arith.constant 0 : i32
      %178 = arith.addi %177, %c0_i32_122 : i32
      %179 = arith.index_cast %178 : i32 to index
      %c0_123 = arith.constant 0 : index
      %c0_124 = arith.constant 0 : index
      %c0_125 = arith.constant 0 : index
      %180 = vector.load %arg1[%179, %c0_123, %c0_124, %c0_125] : memref<18x18x8x1xf32, #tpu.memory_space<vmem>>, vector<2x16x8x1xf32>
      %181 = vector.shape_cast %180 : vector<2x16x8x1xf32> to vector<256x1xf32>
      %c0_126 = arith.constant 0 : index
      %c0_127 = arith.constant 0 : index
      %182 = vector.load %arg2[%c0_126, %c0_127] : memref<9x64xf32, #tpu.memory_space<vmem>>, vector<1x64xf32>
      %183 = vector.broadcast %181 : vector<256x1xf32> to vector<256x64xf32>
      %184 = vector.broadcast %182 : vector<1x64xf32> to vector<256x64xf32>
      %185 = arith.mulf %183, %184 : vector<256x64xf32>
      %186 = arith.addf %176, %185 : vector<256x64xf32>
      %c2_i32_128 = arith.constant 2 : i32
      %187 = arith.muli %c2_i32_128, %arg23 : i32
      %c0_i32_129 = arith.constant 0 : i32
      %188 = arith.addi %187, %c0_i32_129 : i32
      %189 = arith.index_cast %188 : i32 to index
      %c1_130 = arith.constant 1 : index
      %c0_131 = arith.constant 0 : index
      %c0_132 = arith.constant 0 : index
      %190 = vector.load %arg1[%189, %c1_130, %c0_131, %c0_132] : memref<18x18x8x1xf32, #tpu.memory_space<vmem>>, vector<2x16x8x1xf32>
      %191 = vector.shape_cast %190 : vector<2x16x8x1xf32> to vector<256x1xf32>
      %c1_133 = arith.constant 1 : index
      %c0_134 = arith.constant 0 : index
      %192 = vector.load %arg2[%c1_133, %c0_134] : memref<9x64xf32, #tpu.memory_space<vmem>>, vector<1x64xf32>
      %193 = vector.broadcast %191 : vector<256x1xf32> to vector<256x64xf32>
      %194 = vector.broadcast %192 : vector<1x64xf32> to vector<256x64xf32>
      %195 = arith.mulf %193, %194 : vector<256x64xf32>
      %196 = arith.addf %186, %195 : vector<256x64xf32>
      %c2_i32_135 = arith.constant 2 : i32
      %197 = arith.muli %c2_i32_135, %arg23 : i32
      %c0_i32_136 = arith.constant 0 : i32
      %198 = arith.addi %197, %c0_i32_136 : i32
      %199 = arith.index_cast %198 : i32 to index
      %c2_137 = arith.constant 2 : index
      %c0_138 = arith.constant 0 : index
      %c0_139 = arith.constant 0 : index
      %200 = vector.load %arg1[%199, %c2_137, %c0_138, %c0_139] : memref<18x18x8x1xf32, #tpu.memory_space<vmem>>, vector<2x16x8x1xf32>
      %201 = vector.shape_cast %200 : vector<2x16x8x1xf32> to vector<256x1xf32>
      %c2_140 = arith.constant 2 : index
      %c0_141 = arith.constant 0 : index
      %202 = vector.load %arg2[%c2_140, %c0_141] : memref<9x64xf32, #tpu.memory_space<vmem>>, vector<1x64xf32>
      %203 = vector.broadcast %201 : vector<256x1xf32> to vector<256x64xf32>
      %204 = vector.broadcast %202 : vector<1x64xf32> to vector<256x64xf32>
      %205 = arith.mulf %203, %204 : vector<256x64xf32>
      %206 = arith.addf %196, %205 : vector<256x64xf32>
      %c2_i32_142 = arith.constant 2 : i32
      %207 = arith.muli %c2_i32_142, %arg23 : i32
      %c1_i32_143 = arith.constant 1 : i32
      %208 = arith.addi %207, %c1_i32_143 : i32
      %209 = arith.index_cast %208 : i32 to index
      %c0_144 = arith.constant 0 : index
      %c0_145 = arith.constant 0 : index
      %c0_146 = arith.constant 0 : index
      %210 = vector.load %arg1[%209, %c0_144, %c0_145, %c0_146] : memref<18x18x8x1xf32, #tpu.memory_space<vmem>>, vector<2x16x8x1xf32>
      %211 = vector.shape_cast %210 : vector<2x16x8x1xf32> to vector<256x1xf32>
      %c3_147 = arith.constant 3 : index
      %c0_148 = arith.constant 0 : index
      %212 = vector.load %arg2[%c3_147, %c0_148] : memref<9x64xf32, #tpu.memory_space<vmem>>, vector<1x64xf32>
      %213 = vector.broadcast %211 : vector<256x1xf32> to vector<256x64xf32>
      %214 = vector.broadcast %212 : vector<1x64xf32> to vector<256x64xf32>
      %215 = arith.mulf %213, %214 : vector<256x64xf32>
      %216 = arith.addf %206, %215 : vector<256x64xf32>
      %c2_i32_149 = arith.constant 2 : i32
      %217 = arith.muli %c2_i32_149, %arg23 : i32
      %c1_i32_150 = arith.constant 1 : i32
      %218 = arith.addi %217, %c1_i32_150 : i32
      %219 = arith.index_cast %218 : i32 to index
      %c1_151 = arith.constant 1 : index
      %c0_152 = arith.constant 0 : index
      %c0_153 = arith.constant 0 : index
      %220 = vector.load %arg1[%219, %c1_151, %c0_152, %c0_153] : memref<18x18x8x1xf32, #tpu.memory_space<vmem>>, vector<2x16x8x1xf32>
      %221 = vector.shape_cast %220 : vector<2x16x8x1xf32> to vector<256x1xf32>
      %c4_154 = arith.constant 4 : index
      %c0_155 = arith.constant 0 : index
      %222 = vector.load %arg2[%c4_154, %c0_155] : memref<9x64xf32, #tpu.memory_space<vmem>>, vector<1x64xf32>
      %223 = vector.broadcast %221 : vector<256x1xf32> to vector<256x64xf32>
      %224 = vector.broadcast %222 : vector<1x64xf32> to vector<256x64xf32>
      %225 = arith.mulf %223, %224 : vector<256x64xf32>
      %226 = arith.addf %216, %225 : vector<256x64xf32>
      %c2_i32_156 = arith.constant 2 : i32
      %227 = arith.muli %c2_i32_156, %arg23 : i32
      %c1_i32_157 = arith.constant 1 : i32
      %228 = arith.addi %227, %c1_i32_157 : i32
      %229 = arith.index_cast %228 : i32 to index
      %c2_158 = arith.constant 2 : index
      %c0_159 = arith.constant 0 : index
      %c0_160 = arith.constant 0 : index
      %230 = vector.load %arg1[%229, %c2_158, %c0_159, %c0_160] : memref<18x18x8x1xf32, #tpu.memory_space<vmem>>, vector<2x16x8x1xf32>
      %231 = vector.shape_cast %230 : vector<2x16x8x1xf32> to vector<256x1xf32>
      %c5_161 = arith.constant 5 : index
      %c0_162 = arith.constant 0 : index
      %232 = vector.load %arg2[%c5_161, %c0_162] : memref<9x64xf32, #tpu.memory_space<vmem>>, vector<1x64xf32>
      %233 = vector.broadcast %231 : vector<256x1xf32> to vector<256x64xf32>
      %234 = vector.broadcast %232 : vector<1x64xf32> to vector<256x64xf32>
      %235 = arith.mulf %233, %234 : vector<256x64xf32>
      %236 = arith.addf %226, %235 : vector<256x64xf32>
      %c2_i32_163 = arith.constant 2 : i32
      %237 = arith.muli %c2_i32_163, %arg23 : i32
      %c2_i32_164 = arith.constant 2 : i32
      %238 = arith.addi %237, %c2_i32_164 : i32
      %239 = arith.index_cast %238 : i32 to index
      %c0_165 = arith.constant 0 : index
      %c0_166 = arith.constant 0 : index
      %c0_167 = arith.constant 0 : index
      %240 = vector.load %arg1[%239, %c0_165, %c0_166, %c0_167] : memref<18x18x8x1xf32, #tpu.memory_space<vmem>>, vector<2x16x8x1xf32>
      %241 = vector.shape_cast %240 : vector<2x16x8x1xf32> to vector<256x1xf32>
      %c6_168 = arith.constant 6 : index
      %c0_169 = arith.constant 0 : index
      %242 = vector.load %arg2[%c6_168, %c0_169] : memref<9x64xf32, #tpu.memory_space<vmem>>, vector<1x64xf32>
      %243 = vector.broadcast %241 : vector<256x1xf32> to vector<256x64xf32>
      %244 = vector.broadcast %242 : vector<1x64xf32> to vector<256x64xf32>
      %245 = arith.mulf %243, %244 : vector<256x64xf32>
      %246 = arith.addf %236, %245 : vector<256x64xf32>
      %c2_i32_170 = arith.constant 2 : i32
      %247 = arith.muli %c2_i32_170, %arg23 : i32
      %c2_i32_171 = arith.constant 2 : i32
      %248 = arith.addi %247, %c2_i32_171 : i32
      %249 = arith.index_cast %248 : i32 to index
      %c1_172 = arith.constant 1 : index
      %c0_173 = arith.constant 0 : index
      %c0_174 = arith.constant 0 : index
      %250 = vector.load %arg1[%249, %c1_172, %c0_173, %c0_174] : memref<18x18x8x1xf32, #tpu.memory_space<vmem>>, vector<2x16x8x1xf32>
      %251 = vector.shape_cast %250 : vector<2x16x8x1xf32> to vector<256x1xf32>
      %c7_175 = arith.constant 7 : index
      %c0_176 = arith.constant 0 : index
      %252 = vector.load %arg2[%c7_175, %c0_176] : memref<9x64xf32, #tpu.memory_space<vmem>>, vector<1x64xf32>
      %253 = vector.broadcast %251 : vector<256x1xf32> to vector<256x64xf32>
      %254 = vector.broadcast %252 : vector<1x64xf32> to vector<256x64xf32>
      %255 = arith.mulf %253, %254 : vector<256x64xf32>
      %256 = arith.addf %246, %255 : vector<256x64xf32>
      %c2_i32_177 = arith.constant 2 : i32
      %257 = arith.muli %c2_i32_177, %arg23 : i32
      %c2_i32_178 = arith.constant 2 : i32
      %258 = arith.addi %257, %c2_i32_178 : i32
      %259 = arith.index_cast %258 : i32 to index
      %c2_179 = arith.constant 2 : index
      %c0_180 = arith.constant 0 : index
      %c0_181 = arith.constant 0 : index
      %260 = vector.load %arg1[%259, %c2_179, %c0_180, %c0_181] : memref<18x18x8x1xf32, #tpu.memory_space<vmem>>, vector<2x16x8x1xf32>
      %261 = vector.shape_cast %260 : vector<2x16x8x1xf32> to vector<256x1xf32>
      %c8_182 = arith.constant 8 : index
      %c0_183 = arith.constant 0 : index
      %262 = vector.load %arg2[%c8_182, %c0_183] : memref<9x64xf32, #tpu.memory_space<vmem>>, vector<1x64xf32>
      %263 = vector.broadcast %261 : vector<256x1xf32> to vector<256x64xf32>
      %264 = vector.broadcast %262 : vector<1x64xf32> to vector<256x64xf32>
      %265 = arith.mulf %263, %264 : vector<256x64xf32>
      %266 = arith.addf %256, %265 : vector<256x64xf32>
      %c0_184 = arith.constant 0 : index
      %c0_185 = arith.constant 0 : index
      %267 = vector.load %arg3[%c0_184, %c0_185] : memref<1x64xf32, #tpu.memory_space<vmem>>, vector<1x64xf32>
      %268 = vector.broadcast %267 : vector<1x64xf32> to vector<256x64xf32>
      %269 = arith.addf %266, %268 : vector<256x64xf32>
      %cst_186 = arith.constant 0.000000e+00 : f32
      %270 = vector.broadcast %cst_186 : f32 to vector<256x64xf32>
      %271 = arith.maximumf %269, %270 : vector<256x64xf32>
      %272 = vector.shape_cast %271 : vector<256x64xf32> to vector<2x16x8x64xf32>
      %273 = vector.extract_strided_slice %272 {offsets = [0, 0, 0, 0], sizes = [1, 16, 8, 64], strides = [1, 1, 1, 1]} : vector<2x16x8x64xf32> to vector<1x16x8x64xf32>
      %274 = vector.shape_cast %273 : vector<1x16x8x64xf32> to vector<16x8x64xf32>
      %275 = vector.extract_strided_slice %272 {offsets = [1, 0, 0, 0], sizes = [1, 16, 8, 64], strides = [1, 1, 1, 1]} : vector<2x16x8x64xf32> to vector<1x16x8x64xf32>
      %276 = vector.shape_cast %275 : vector<1x16x8x64xf32> to vector<16x8x64xf32>
      %277 = arith.maximumf %274, %276 : vector<16x8x64xf32>
      %278 = vector.extract_strided_slice %277 {offsets = [0, 0, 0], sizes = [1, 8, 64], strides = [1, 1, 1]} : vector<16x8x64xf32> to vector<1x8x64xf32>
      %279 = vector.shape_cast %278 : vector<1x8x64xf32> to vector<8x64xf32>
      %280 = vector.extract_strided_slice %277 {offsets = [1, 0, 0], sizes = [1, 8, 64], strides = [1, 1, 1]} : vector<16x8x64xf32> to vector<1x8x64xf32>
      %281 = vector.shape_cast %280 : vector<1x8x64xf32> to vector<8x64xf32>
      %282 = arith.maximumf %279, %281 : vector<8x64xf32>
      %c1_i32_187 = arith.constant 1 : i32
      %283 = arith.addi %c1_i32_187, %arg23 : i32
      %284 = arith.index_cast %283 : i32 to index
      %c1_188 = arith.constant 1 : index
      %c0_189 = arith.constant 0 : index
      %c0_190 = arith.constant 0 : index
      %285 = vector.load %arg20[%284, %c1_188, %c0_189, %c0_190] : memref<10x10x8x64xf32, #tpu.memory_space<vmem>>, vector<1x1x8x64xf32>
      %286 = vector.shape_cast %285 : vector<1x1x8x64xf32> to vector<8x64xf32>
      %287 = vector.shape_cast %282 : vector<8x64xf32> to vector<1x1x8x64xf32>
      tpu.vector_store %arg20[%284, %c1_188, %c0_189, %c0_190], %287 {strides = array<i32>} : memref<10x10x8x64xf32, #tpu.memory_space<vmem>>, vector<1x1x8x64xf32>,
      %288 = vector.extract_strided_slice %277 {offsets = [2, 0, 0], sizes = [1, 8, 64], strides = [1, 1, 1]} : vector<16x8x64xf32> to vector<1x8x64xf32>
      %289 = vector.shape_cast %288 : vector<1x8x64xf32> to vector<8x64xf32>
      %290 = vector.extract_strided_slice %277 {offsets = [3, 0, 0], sizes = [1, 8, 64], strides = [1, 1, 1]} : vector<16x8x64xf32> to vector<1x8x64xf32>
      %291 = vector.shape_cast %290 : vector<1x8x64xf32> to vector<8x64xf32>
      %292 = arith.maximumf %289, %291 : vector<8x64xf32>
      %c1_i32_191 = arith.constant 1 : i32
      %293 = arith.addi %c1_i32_191, %arg23 : i32
      %294 = arith.index_cast %293 : i32 to index
      %c2_192 = arith.constant 2 : index
      %c0_193 = arith.constant 0 : index
      %c0_194 = arith.constant 0 : index
      %295 = vector.load %arg20[%294, %c2_192, %c0_193, %c0_194] : memref<10x10x8x64xf32, #tpu.memory_space<vmem>>, vector<1x1x8x64xf32>
      %296 = vector.shape_cast %295 : vector<1x1x8x64xf32> to vector<8x64xf32>
      %297 = vector.shape_cast %292 : vector<8x64xf32> to vector<1x1x8x64xf32>
      tpu.vector_store %arg20[%294, %c2_192, %c0_193, %c0_194], %297 {strides = array<i32>} : memref<10x10x8x64xf32, #tpu.memory_space<vmem>>, vector<1x1x8x64xf32>,
      %298 = vector.extract_strided_slice %277 {offsets = [4, 0, 0], sizes = [1, 8, 64], strides = [1, 1, 1]} : vector<16x8x64xf32> to vector<1x8x64xf32>
      %299 = vector.shape_cast %298 : vector<1x8x64xf32> to vector<8x64xf32>
      %300 = vector.extract_strided_slice %277 {offsets = [5, 0, 0], sizes = [1, 8, 64], strides = [1, 1, 1]} : vector<16x8x64xf32> to vector<1x8x64xf32>
      %301 = vector.shape_cast %300 : vector<1x8x64xf32> to vector<8x64xf32>
      %302 = arith.maximumf %299, %301 : vector<8x64xf32>
      %c1_i32_195 = arith.constant 1 : i32
      %303 = arith.addi %c1_i32_195, %arg23 : i32
      %304 = arith.index_cast %303 : i32 to index
      %c3_196 = arith.constant 3 : index
      %c0_197 = arith.constant 0 : index
      %c0_198 = arith.constant 0 : index
      %305 = vector.load %arg20[%304, %c3_196, %c0_197, %c0_198] : memref<10x10x8x64xf32, #tpu.memory_space<vmem>>, vector<1x1x8x64xf32>
      %306 = vector.shape_cast %305 : vector<1x1x8x64xf32> to vector<8x64xf32>
      %307 = vector.shape_cast %302 : vector<8x64xf32> to vector<1x1x8x64xf32>
      tpu.vector_store %arg20[%304, %c3_196, %c0_197, %c0_198], %307 {strides = array<i32>} : memref<10x10x8x64xf32, #tpu.memory_space<vmem>>, vector<1x1x8x64xf32>,
      %308 = vector.extract_strided_slice %277 {offsets = [6, 0, 0], sizes = [1, 8, 64], strides = [1, 1, 1]} : vector<16x8x64xf32> to vector<1x8x64xf32>
      %309 = vector.shape_cast %308 : vector<1x8x64xf32> to vector<8x64xf32>
      %310 = vector.extract_strided_slice %277 {offsets = [7, 0, 0], sizes = [1, 8, 64], strides = [1, 1, 1]} : vector<16x8x64xf32> to vector<1x8x64xf32>
      %311 = vector.shape_cast %310 : vector<1x8x64xf32> to vector<8x64xf32>
      %312 = arith.maximumf %309, %311 : vector<8x64xf32>
      %c1_i32_199 = arith.constant 1 : i32
      %313 = arith.addi %c1_i32_199, %arg23 : i32
      %314 = arith.index_cast %313 : i32 to index
      %c4_200 = arith.constant 4 : index
      %c0_201 = arith.constant 0 : index
      %c0_202 = arith.constant 0 : index
      %315 = vector.load %arg20[%314, %c4_200, %c0_201, %c0_202] : memref<10x10x8x64xf32, #tpu.memory_space<vmem>>, vector<1x1x8x64xf32>
      %316 = vector.shape_cast %315 : vector<1x1x8x64xf32> to vector<8x64xf32>
      %317 = vector.shape_cast %312 : vector<8x64xf32> to vector<1x1x8x64xf32>
      tpu.vector_store %arg20[%314, %c4_200, %c0_201, %c0_202], %317 {strides = array<i32>} : memref<10x10x8x64xf32, #tpu.memory_space<vmem>>, vector<1x1x8x64xf32>,
      %318 = vector.extract_strided_slice %277 {offsets = [8, 0, 0], sizes = [1, 8, 64], strides = [1, 1, 1]} : vector<16x8x64xf32> to vector<1x8x64xf32>
      %319 = vector.shape_cast %318 : vector<1x8x64xf32> to vector<8x64xf32>
      %320 = vector.extract_strided_slice %277 {offsets = [9, 0, 0], sizes = [1, 8, 64], strides = [1, 1, 1]} : vector<16x8x64xf32> to vector<1x8x64xf32>
      %321 = vector.shape_cast %320 : vector<1x8x64xf32> to vector<8x64xf32>
      %322 = arith.maximumf %319, %321 : vector<8x64xf32>
      %c1_i32_203 = arith.constant 1 : i32
      %323 = arith.addi %c1_i32_203, %arg23 : i32
      %324 = arith.index_cast %323 : i32 to index
      %c5_204 = arith.constant 5 : index
      %c0_205 = arith.constant 0 : index
      %c0_206 = arith.constant 0 : index
      %325 = vector.load %arg20[%324, %c5_204, %c0_205, %c0_206] : memref<10x10x8x64xf32, #tpu.memory_space<vmem>>, vector<1x1x8x64xf32>
      %326 = vector.shape_cast %325 : vector<1x1x8x64xf32> to vector<8x64xf32>
      %327 = vector.shape_cast %322 : vector<8x64xf32> to vector<1x1x8x64xf32>
      tpu.vector_store %arg20[%324, %c5_204, %c0_205, %c0_206], %327 {strides = array<i32>} : memref<10x10x8x64xf32, #tpu.memory_space<vmem>>, vector<1x1x8x64xf32>,
      %328 = vector.extract_strided_slice %277 {offsets = [10, 0, 0], sizes = [1, 8, 64], strides = [1, 1, 1]} : vector<16x8x64xf32> to vector<1x8x64xf32>
      %329 = vector.shape_cast %328 : vector<1x8x64xf32> to vector<8x64xf32>
      %330 = vector.extract_strided_slice %277 {offsets = [11, 0, 0], sizes = [1, 8, 64], strides = [1, 1, 1]} : vector<16x8x64xf32> to vector<1x8x64xf32>
      %331 = vector.shape_cast %330 : vector<1x8x64xf32> to vector<8x64xf32>
      %332 = arith.maximumf %329, %331 : vector<8x64xf32>
      %c1_i32_207 = arith.constant 1 : i32
      %333 = arith.addi %c1_i32_207, %arg23 : i32
      %334 = arith.index_cast %333 : i32 to index
      %c6_208 = arith.constant 6 : index
      %c0_209 = arith.constant 0 : index
      %c0_210 = arith.constant 0 : index
      %335 = vector.load %arg20[%334, %c6_208, %c0_209, %c0_210] : memref<10x10x8x64xf32, #tpu.memory_space<vmem>>, vector<1x1x8x64xf32>
      %336 = vector.shape_cast %335 : vector<1x1x8x64xf32> to vector<8x64xf32>
      %337 = vector.shape_cast %332 : vector<8x64xf32> to vector<1x1x8x64xf32>
      tpu.vector_store %arg20[%334, %c6_208, %c0_209, %c0_210], %337 {strides = array<i32>} : memref<10x10x8x64xf32, #tpu.memory_space<vmem>>, vector<1x1x8x64xf32>,
      %338 = vector.extract_strided_slice %277 {offsets = [12, 0, 0], sizes = [1, 8, 64], strides = [1, 1, 1]} : vector<16x8x64xf32> to vector<1x8x64xf32>
      %339 = vector.shape_cast %338 : vector<1x8x64xf32> to vector<8x64xf32>
      %340 = vector.extract_strided_slice %277 {offsets = [13, 0, 0], sizes = [1, 8, 64], strides = [1, 1, 1]} : vector<16x8x64xf32> to vector<1x8x64xf32>
      %341 = vector.shape_cast %340 : vector<1x8x64xf32> to vector<8x64xf32>
      %342 = arith.maximumf %339, %341 : vector<8x64xf32>
      %c1_i32_211 = arith.constant 1 : i32
      %343 = arith.addi %c1_i32_211, %arg23 : i32
      %344 = arith.index_cast %343 : i32 to index
      %c7_212 = arith.constant 7 : index
      %c0_213 = arith.constant 0 : index
      %c0_214 = arith.constant 0 : index
      %345 = vector.load %arg20[%344, %c7_212, %c0_213, %c0_214] : memref<10x10x8x64xf32, #tpu.memory_space<vmem>>, vector<1x1x8x64xf32>
      %346 = vector.shape_cast %345 : vector<1x1x8x64xf32> to vector<8x64xf32>
      %347 = vector.shape_cast %342 : vector<8x64xf32> to vector<1x1x8x64xf32>
      tpu.vector_store %arg20[%344, %c7_212, %c0_213, %c0_214], %347 {strides = array<i32>} : memref<10x10x8x64xf32, #tpu.memory_space<vmem>>, vector<1x1x8x64xf32>,
      %348 = vector.extract_strided_slice %277 {offsets = [14, 0, 0], sizes = [1, 8, 64], strides = [1, 1, 1]} : vector<16x8x64xf32> to vector<1x8x64xf32>
      %349 = vector.shape_cast %348 : vector<1x8x64xf32> to vector<8x64xf32>
      %350 = vector.extract_strided_slice %277 {offsets = [15, 0, 0], sizes = [1, 8, 64], strides = [1, 1, 1]} : vector<16x8x64xf32> to vector<1x8x64xf32>
      %351 = vector.shape_cast %350 : vector<1x8x64xf32> to vector<8x64xf32>
      %352 = arith.maximumf %349, %351 : vector<8x64xf32>
      %c1_i32_215 = arith.constant 1 : i32
      %353 = arith.addi %c1_i32_215, %arg23 : i32
      %354 = arith.index_cast %353 : i32 to index
      %c8_216 = arith.constant 8 : index
      %c0_217 = arith.constant 0 : index
      %c0_218 = arith.constant 0 : index
      %355 = vector.load %arg20[%354, %c8_216, %c0_217, %c0_218] : memref<10x10x8x64xf32, #tpu.memory_space<vmem>>, vector<1x1x8x64xf32>
      %356 = vector.shape_cast %355 : vector<1x1x8x64xf32> to vector<8x64xf32>
      %357 = vector.shape_cast %352 : vector<8x64xf32> to vector<1x1x8x64xf32>
      tpu.vector_store %arg20[%354, %c8_216, %c0_217, %c0_218], %357 {strides = array<i32>} : memref<10x10x8x64xf32, #tpu.memory_space<vmem>>, vector<1x1x8x64xf32>,
    }
    %c8_i32_8 = arith.constant 8 : i32
    %c0_i32_9 = arith.constant 0 : i32
    %c4_i32 = arith.constant 4 : i32
    %5 = arith.addi %c0_i32_9, %c4_i32 : i32
    %c1_i32_10 = arith.constant 1 : i32
    scf.for %arg23 = %c0_i32_9 to %5 step %c1_i32_10  : i32 {
      %cst_121 = arith.constant 0.000000e+00 : f32
      %176 = vector.broadcast %cst_121 : f32 to vector<128x128xf32>
      %c2_i32 = arith.constant 2 : i32
      %177 = arith.muli %c2_i32, %arg23 : i32
      %c0_i32_122 = arith.constant 0 : i32
      %178 = arith.addi %177, %c0_i32_122 : i32
      %179 = arith.index_cast %178 : i32 to index
      %c0_123 = arith.constant 0 : index
      %c0_124 = arith.constant 0 : index
      %c0_125 = arith.constant 0 : index
      %180 = vector.load %arg20[%179, %c0_123, %c0_124, %c0_125] : memref<10x10x8x64xf32, #tpu.memory_space<vmem>>, vector<2x8x8x64xf32>
      %181 = vector.shape_cast %180 : vector<2x8x8x64xf32> to vector<128x64xf32>
      %182 = arith.truncf %181 : vector<128x64xf32> to vector<128x64xbf16>
      %c0_126 = arith.constant 0 : index
      %c0_127 = arith.constant 0 : index
      %c0_128 = arith.constant 0 : index
      %183 = vector.load %arg4[%c0_126, %c0_127, %c0_128] : memref<9x64x128xbf16, #tpu.memory_space<vmem>>, vector<1x64x128xbf16>
      %184 = vector.shape_cast %183 : vector<1x64x128xbf16> to vector<64x128xbf16>
      %cst_129 = arith.constant dense<0.000000e+00> : vector<128x128xf32>
      %185 = tpu.matmul %182, %184, %cst_129 {dimension_numbers = #tpu.dot_dimension_numbers<[1], [0], [0], [1], [0, 0, 1, 1], [], []>} : vector<128x64xbf16>, vector<64x128xbf16>, vector<128x128xf32> -> vector<128x128xf32>
      %186 = arith.addf %176, %185 : vector<128x128xf32>
      %c2_i32_130 = arith.constant 2 : i32
      %187 = arith.muli %c2_i32_130, %arg23 : i32
      %c0_i32_131 = arith.constant 0 : i32
      %188 = arith.addi %187, %c0_i32_131 : i32
      %189 = arith.index_cast %188 : i32 to index
      %c1_132 = arith.constant 1 : index
      %c0_133 = arith.constant 0 : index
      %c0_134 = arith.constant 0 : index
      %190 = vector.load %arg20[%189, %c1_132, %c0_133, %c0_134] : memref<10x10x8x64xf32, #tpu.memory_space<vmem>>, vector<2x8x8x64xf32>
      %191 = vector.shape_cast %190 : vector<2x8x8x64xf32> to vector<128x64xf32>
      %192 = arith.truncf %191 : vector<128x64xf32> to vector<128x64xbf16>
      %c1_135 = arith.constant 1 : index
      %c0_136 = arith.constant 0 : index
      %c0_137 = arith.constant 0 : index
      %193 = vector.load %arg4[%c1_135, %c0_136, %c0_137] : memref<9x64x128xbf16, #tpu.memory_space<vmem>>, vector<1x64x128xbf16>
      %194 = vector.shape_cast %193 : vector<1x64x128xbf16> to vector<64x128xbf16>
      %cst_138 = arith.constant dense<0.000000e+00> : vector<128x128xf32>
      %195 = tpu.matmul %192, %194, %cst_138 {dimension_numbers = #tpu.dot_dimension_numbers<[1], [0], [0], [1], [0, 0, 1, 1], [], []>} : vector<128x64xbf16>, vector<64x128xbf16>, vector<128x128xf32> -> vector<128x128xf32>
      %196 = arith.addf %186, %195 : vector<128x128xf32>
      %c2_i32_139 = arith.constant 2 : i32
      %197 = arith.muli %c2_i32_139, %arg23 : i32
      %c0_i32_140 = arith.constant 0 : i32
      %198 = arith.addi %197, %c0_i32_140 : i32
      %199 = arith.index_cast %198 : i32 to index
      %c2_141 = arith.constant 2 : index
      %c0_142 = arith.constant 0 : index
      %c0_143 = arith.constant 0 : index
      %200 = vector.load %arg20[%199, %c2_141, %c0_142, %c0_143] : memref<10x10x8x64xf32, #tpu.memory_space<vmem>>, vector<2x8x8x64xf32>
      %201 = vector.shape_cast %200 : vector<2x8x8x64xf32> to vector<128x64xf32>
      %202 = arith.truncf %201 : vector<128x64xf32> to vector<128x64xbf16>
      %c2_144 = arith.constant 2 : index
      %c0_145 = arith.constant 0 : index
      %c0_146 = arith.constant 0 : index
      %203 = vector.load %arg4[%c2_144, %c0_145, %c0_146] : memref<9x64x128xbf16, #tpu.memory_space<vmem>>, vector<1x64x128xbf16>
      %204 = vector.shape_cast %203 : vector<1x64x128xbf16> to vector<64x128xbf16>
      %cst_147 = arith.constant dense<0.000000e+00> : vector<128x128xf32>
      %205 = tpu.matmul %202, %204, %cst_147 {dimension_numbers = #tpu.dot_dimension_numbers<[1], [0], [0], [1], [0, 0, 1, 1], [], []>} : vector<128x64xbf16>, vector<64x128xbf16>, vector<128x128xf32> -> vector<128x128xf32>
      %206 = arith.addf %196, %205 : vector<128x128xf32>
      %c2_i32_148 = arith.constant 2 : i32
      %207 = arith.muli %c2_i32_148, %arg23 : i32
      %c1_i32_149 = arith.constant 1 : i32
      %208 = arith.addi %207, %c1_i32_149 : i32
      %209 = arith.index_cast %208 : i32 to index
      %c0_150 = arith.constant 0 : index
      %c0_151 = arith.constant 0 : index
      %c0_152 = arith.constant 0 : index
      %210 = vector.load %arg20[%209, %c0_150, %c0_151, %c0_152] : memref<10x10x8x64xf32, #tpu.memory_space<vmem>>, vector<2x8x8x64xf32>
      %211 = vector.shape_cast %210 : vector<2x8x8x64xf32> to vector<128x64xf32>
      %212 = arith.truncf %211 : vector<128x64xf32> to vector<128x64xbf16>
      %c3_153 = arith.constant 3 : index
      %c0_154 = arith.constant 0 : index
      %c0_155 = arith.constant 0 : index
      %213 = vector.load %arg4[%c3_153, %c0_154, %c0_155] : memref<9x64x128xbf16, #tpu.memory_space<vmem>>, vector<1x64x128xbf16>
      %214 = vector.shape_cast %213 : vector<1x64x128xbf16> to vector<64x128xbf16>
      %cst_156 = arith.constant dense<0.000000e+00> : vector<128x128xf32>
      %215 = tpu.matmul %212, %214, %cst_156 {dimension_numbers = #tpu.dot_dimension_numbers<[1], [0], [0], [1], [0, 0, 1, 1], [], []>} : vector<128x64xbf16>, vector<64x128xbf16>, vector<128x128xf32> -> vector<128x128xf32>
      %216 = arith.addf %206, %215 : vector<128x128xf32>
      %c2_i32_157 = arith.constant 2 : i32
      %217 = arith.muli %c2_i32_157, %arg23 : i32
      %c1_i32_158 = arith.constant 1 : i32
      %218 = arith.addi %217, %c1_i32_158 : i32
      %219 = arith.index_cast %218 : i32 to index
      %c1_159 = arith.constant 1 : index
      %c0_160 = arith.constant 0 : index
      %c0_161 = arith.constant 0 : index
      %220 = vector.load %arg20[%219, %c1_159, %c0_160, %c0_161] : memref<10x10x8x64xf32, #tpu.memory_space<vmem>>, vector<2x8x8x64xf32>
      %221 = vector.shape_cast %220 : vector<2x8x8x64xf32> to vector<128x64xf32>
      %222 = arith.truncf %221 : vector<128x64xf32> to vector<128x64xbf16>
      %c4_162 = arith.constant 4 : index
      %c0_163 = arith.constant 0 : index
      %c0_164 = arith.constant 0 : index
      %223 = vector.load %arg4[%c4_162, %c0_163, %c0_164] : memref<9x64x128xbf16, #tpu.memory_space<vmem>>, vector<1x64x128xbf16>
      %224 = vector.shape_cast %223 : vector<1x64x128xbf16> to vector<64x128xbf16>
      %cst_165 = arith.constant dense<0.000000e+00> : vector<128x128xf32>
      %225 = tpu.matmul %222, %224, %cst_165 {dimension_numbers = #tpu.dot_dimension_numbers<[1], [0], [0], [1], [0, 0, 1, 1], [], []>} : vector<128x64xbf16>, vector<64x128xbf16>, vector<128x128xf32> -> vector<128x128xf32>
      %226 = arith.addf %216, %225 : vector<128x128xf32>
      %c2_i32_166 = arith.constant 2 : i32
      %227 = arith.muli %c2_i32_166, %arg23 : i32
      %c1_i32_167 = arith.constant 1 : i32
      %228 = arith.addi %227, %c1_i32_167 : i32
      %229 = arith.index_cast %228 : i32 to index
      %c2_168 = arith.constant 2 : index
      %c0_169 = arith.constant 0 : index
      %c0_170 = arith.constant 0 : index
      %230 = vector.load %arg20[%229, %c2_168, %c0_169, %c0_170] : memref<10x10x8x64xf32, #tpu.memory_space<vmem>>, vector<2x8x8x64xf32>
      %231 = vector.shape_cast %230 : vector<2x8x8x64xf32> to vector<128x64xf32>
      %232 = arith.truncf %231 : vector<128x64xf32> to vector<128x64xbf16>
      %c5_171 = arith.constant 5 : index
      %c0_172 = arith.constant 0 : index
      %c0_173 = arith.constant 0 : index
      %233 = vector.load %arg4[%c5_171, %c0_172, %c0_173] : memref<9x64x128xbf16, #tpu.memory_space<vmem>>, vector<1x64x128xbf16>
      %234 = vector.shape_cast %233 : vector<1x64x128xbf16> to vector<64x128xbf16>
      %cst_174 = arith.constant dense<0.000000e+00> : vector<128x128xf32>
      %235 = tpu.matmul %232, %234, %cst_174 {dimension_numbers = #tpu.dot_dimension_numbers<[1], [0], [0], [1], [0, 0, 1, 1], [], []>} : vector<128x64xbf16>, vector<64x128xbf16>, vector<128x128xf32> -> vector<128x128xf32>
      %236 = arith.addf %226, %235 : vector<128x128xf32>
      %c2_i32_175 = arith.constant 2 : i32
      %237 = arith.muli %c2_i32_175, %arg23 : i32
      %c2_i32_176 = arith.constant 2 : i32
      %238 = arith.addi %237, %c2_i32_176 : i32
      %239 = arith.index_cast %238 : i32 to index
      %c0_177 = arith.constant 0 : index
      %c0_178 = arith.constant 0 : index
      %c0_179 = arith.constant 0 : index
      %240 = vector.load %arg20[%239, %c0_177, %c0_178, %c0_179] : memref<10x10x8x64xf32, #tpu.memory_space<vmem>>, vector<2x8x8x64xf32>
      %241 = vector.shape_cast %240 : vector<2x8x8x64xf32> to vector<128x64xf32>
      %242 = arith.truncf %241 : vector<128x64xf32> to vector<128x64xbf16>
      %c6_180 = arith.constant 6 : index
      %c0_181 = arith.constant 0 : index
      %c0_182 = arith.constant 0 : index
      %243 = vector.load %arg4[%c6_180, %c0_181, %c0_182] : memref<9x64x128xbf16, #tpu.memory_space<vmem>>, vector<1x64x128xbf16>
      %244 = vector.shape_cast %243 : vector<1x64x128xbf16> to vector<64x128xbf16>
      %cst_183 = arith.constant dense<0.000000e+00> : vector<128x128xf32>
      %245 = tpu.matmul %242, %244, %cst_183 {dimension_numbers = #tpu.dot_dimension_numbers<[1], [0], [0], [1], [0, 0, 1, 1], [], []>} : vector<128x64xbf16>, vector<64x128xbf16>, vector<128x128xf32> -> vector<128x128xf32>
      %246 = arith.addf %236, %245 : vector<128x128xf32>
      %c2_i32_184 = arith.constant 2 : i32
      %247 = arith.muli %c2_i32_184, %arg23 : i32
      %c2_i32_185 = arith.constant 2 : i32
      %248 = arith.addi %247, %c2_i32_185 : i32
      %249 = arith.index_cast %248 : i32 to index
      %c1_186 = arith.constant 1 : index
      %c0_187 = arith.constant 0 : index
      %c0_188 = arith.constant 0 : index
      %250 = vector.load %arg20[%249, %c1_186, %c0_187, %c0_188] : memref<10x10x8x64xf32, #tpu.memory_space<vmem>>, vector<2x8x8x64xf32>
      %251 = vector.shape_cast %250 : vector<2x8x8x64xf32> to vector<128x64xf32>
      %252 = arith.truncf %251 : vector<128x64xf32> to vector<128x64xbf16>
      %c7_189 = arith.constant 7 : index
      %c0_190 = arith.constant 0 : index
      %c0_191 = arith.constant 0 : index
      %253 = vector.load %arg4[%c7_189, %c0_190, %c0_191] : memref<9x64x128xbf16, #tpu.memory_space<vmem>>, vector<1x64x128xbf16>
      %254 = vector.shape_cast %253 : vector<1x64x128xbf16> to vector<64x128xbf16>
      %cst_192 = arith.constant dense<0.000000e+00> : vector<128x128xf32>
      %255 = tpu.matmul %252, %254, %cst_192 {dimension_numbers = #tpu.dot_dimension_numbers<[1], [0], [0], [1], [0, 0, 1, 1], [], []>} : vector<128x64xbf16>, vector<64x128xbf16>, vector<128x128xf32> -> vector<128x128xf32>
      %256 = arith.addf %246, %255 : vector<128x128xf32>
      %c2_i32_193 = arith.constant 2 : i32
      %257 = arith.muli %c2_i32_193, %arg23 : i32
      %c2_i32_194 = arith.constant 2 : i32
      %258 = arith.addi %257, %c2_i32_194 : i32
      %259 = arith.index_cast %258 : i32 to index
      %c2_195 = arith.constant 2 : index
      %c0_196 = arith.constant 0 : index
      %c0_197 = arith.constant 0 : index
      %260 = vector.load %arg20[%259, %c2_195, %c0_196, %c0_197] : memref<10x10x8x64xf32, #tpu.memory_space<vmem>>, vector<2x8x8x64xf32>
      %261 = vector.shape_cast %260 : vector<2x8x8x64xf32> to vector<128x64xf32>
      %262 = arith.truncf %261 : vector<128x64xf32> to vector<128x64xbf16>
      %c8_198 = arith.constant 8 : index
      %c0_199 = arith.constant 0 : index
      %c0_200 = arith.constant 0 : index
      %263 = vector.load %arg4[%c8_198, %c0_199, %c0_200] : memref<9x64x128xbf16, #tpu.memory_space<vmem>>, vector<1x64x128xbf16>
      %264 = vector.shape_cast %263 : vector<1x64x128xbf16> to vector<64x128xbf16>
      %cst_201 = arith.constant dense<0.000000e+00> : vector<128x128xf32>
      %265 = tpu.matmul %262, %264, %cst_201 {dimension_numbers = #tpu.dot_dimension_numbers<[1], [0], [0], [1], [0, 0, 1, 1], [], []>} : vector<128x64xbf16>, vector<64x128xbf16>, vector<128x128xf32> -> vector<128x128xf32>
      %266 = arith.addf %256, %265 : vector<128x128xf32>
      %c0_202 = arith.constant 0 : index
      %c0_203 = arith.constant 0 : index
      %267 = vector.load %arg5[%c0_202, %c0_203] : memref<1x128xf32, #tpu.memory_space<vmem>>, vector<1x128xf32>
      %268 = vector.broadcast %267 : vector<1x128xf32> to vector<128x128xf32>
      %269 = arith.addf %266, %268 : vector<128x128xf32>
      %cst_204 = arith.constant 0.000000e+00 : f32
      %270 = vector.broadcast %cst_204 : f32 to vector<128x128xf32>
      %271 = arith.maximumf %269, %270 : vector<128x128xf32>
      %272 = vector.shape_cast %271 : vector<128x128xf32> to vector<2x8x8x128xf32>
      %273 = vector.extract_strided_slice %272 {offsets = [0, 0, 0, 0], sizes = [1, 8, 8, 128], strides = [1, 1, 1, 1]} : vector<2x8x8x128xf32> to vector<1x8x8x128xf32>
      %274 = vector.shape_cast %273 : vector<1x8x8x128xf32> to vector<8x8x128xf32>
      %275 = vector.extract_strided_slice %272 {offsets = [1, 0, 0, 0], sizes = [1, 8, 8, 128], strides = [1, 1, 1, 1]} : vector<2x8x8x128xf32> to vector<1x8x8x128xf32>
      %276 = vector.shape_cast %275 : vector<1x8x8x128xf32> to vector<8x8x128xf32>
      %277 = arith.maximumf %274, %276 : vector<8x8x128xf32>
      %278 = vector.extract_strided_slice %277 {offsets = [0, 0, 0], sizes = [1, 8, 128], strides = [1, 1, 1]} : vector<8x8x128xf32> to vector<1x8x128xf32>
      %279 = vector.shape_cast %278 : vector<1x8x128xf32> to vector<8x128xf32>
      %280 = vector.extract_strided_slice %277 {offsets = [1, 0, 0], sizes = [1, 8, 128], strides = [1, 1, 1]} : vector<8x8x128xf32> to vector<1x8x128xf32>
      %281 = vector.shape_cast %280 : vector<1x8x128xf32> to vector<8x128xf32>
      %282 = arith.maximumf %279, %281 : vector<8x128xf32>
      %c1_i32_205 = arith.constant 1 : i32
      %283 = arith.addi %c1_i32_205, %arg23 : i32
      %284 = arith.index_cast %283 : i32 to index
      %c1_206 = arith.constant 1 : index
      %c0_207 = arith.constant 0 : index
      %c0_208 = arith.constant 0 : index
      %285 = vector.load %arg21[%284, %c1_206, %c0_207, %c0_208] : memref<6x6x8x128xf32, #tpu.memory_space<vmem>>, vector<1x1x8x128xf32>
      %286 = vector.shape_cast %285 : vector<1x1x8x128xf32> to vector<8x128xf32>
      %287 = vector.shape_cast %282 : vector<8x128xf32> to vector<1x1x8x128xf32>
      tpu.vector_store %arg21[%284, %c1_206, %c0_207, %c0_208], %287 {strides = array<i32>} : memref<6x6x8x128xf32, #tpu.memory_space<vmem>>, vector<1x1x8x128xf32>,
      %288 = vector.extract_strided_slice %277 {offsets = [2, 0, 0], sizes = [1, 8, 128], strides = [1, 1, 1]} : vector<8x8x128xf32> to vector<1x8x128xf32>
      %289 = vector.shape_cast %288 : vector<1x8x128xf32> to vector<8x128xf32>
      %290 = vector.extract_strided_slice %277 {offsets = [3, 0, 0], sizes = [1, 8, 128], strides = [1, 1, 1]} : vector<8x8x128xf32> to vector<1x8x128xf32>
      %291 = vector.shape_cast %290 : vector<1x8x128xf32> to vector<8x128xf32>
      %292 = arith.maximumf %289, %291 : vector<8x128xf32>
      %c1_i32_209 = arith.constant 1 : i32
      %293 = arith.addi %c1_i32_209, %arg23 : i32
      %294 = arith.index_cast %293 : i32 to index
      %c2_210 = arith.constant 2 : index
      %c0_211 = arith.constant 0 : index
      %c0_212 = arith.constant 0 : index
      %295 = vector.load %arg21[%294, %c2_210, %c0_211, %c0_212] : memref<6x6x8x128xf32, #tpu.memory_space<vmem>>, vector<1x1x8x128xf32>
      %296 = vector.shape_cast %295 : vector<1x1x8x128xf32> to vector<8x128xf32>
      %297 = vector.shape_cast %292 : vector<8x128xf32> to vector<1x1x8x128xf32>
      tpu.vector_store %arg21[%294, %c2_210, %c0_211, %c0_212], %297 {strides = array<i32>} : memref<6x6x8x128xf32, #tpu.memory_space<vmem>>, vector<1x1x8x128xf32>,
      %298 = vector.extract_strided_slice %277 {offsets = [4, 0, 0], sizes = [1, 8, 128], strides = [1, 1, 1]} : vector<8x8x128xf32> to vector<1x8x128xf32>
      %299 = vector.shape_cast %298 : vector<1x8x128xf32> to vector<8x128xf32>
      %300 = vector.extract_strided_slice %277 {offsets = [5, 0, 0], sizes = [1, 8, 128], strides = [1, 1, 1]} : vector<8x8x128xf32> to vector<1x8x128xf32>
      %301 = vector.shape_cast %300 : vector<1x8x128xf32> to vector<8x128xf32>
      %302 = arith.maximumf %299, %301 : vector<8x128xf32>
      %c1_i32_213 = arith.constant 1 : i32
      %303 = arith.addi %c1_i32_213, %arg23 : i32
      %304 = arith.index_cast %303 : i32 to index
      %c3_214 = arith.constant 3 : index
      %c0_215 = arith.constant 0 : index
      %c0_216 = arith.constant 0 : index
      %305 = vector.load %arg21[%304, %c3_214, %c0_215, %c0_216] : memref<6x6x8x128xf32, #tpu.memory_space<vmem>>, vector<1x1x8x128xf32>
      %306 = vector.shape_cast %305 : vector<1x1x8x128xf32> to vector<8x128xf32>
      %307 = vector.shape_cast %302 : vector<8x128xf32> to vector<1x1x8x128xf32>
      tpu.vector_store %arg21[%304, %c3_214, %c0_215, %c0_216], %307 {strides = array<i32>} : memref<6x6x8x128xf32, #tpu.memory_space<vmem>>, vector<1x1x8x128xf32>,
      %308 = vector.extract_strided_slice %277 {offsets = [6, 0, 0], sizes = [1, 8, 128], strides = [1, 1, 1]} : vector<8x8x128xf32> to vector<1x8x128xf32>
      %309 = vector.shape_cast %308 : vector<1x8x128xf32> to vector<8x128xf32>
      %310 = vector.extract_strided_slice %277 {offsets = [7, 0, 0], sizes = [1, 8, 128], strides = [1, 1, 1]} : vector<8x8x128xf32> to vector<1x8x128xf32>
      %311 = vector.shape_cast %310 : vector<1x8x128xf32> to vector<8x128xf32>
      %312 = arith.maximumf %309, %311 : vector<8x128xf32>
      %c1_i32_217 = arith.constant 1 : i32
      %313 = arith.addi %c1_i32_217, %arg23 : i32
      %314 = arith.index_cast %313 : i32 to index
      %c4_218 = arith.constant 4 : index
      %c0_219 = arith.constant 0 : index
      %c0_220 = arith.constant 0 : index
      %315 = vector.load %arg21[%314, %c4_218, %c0_219, %c0_220] : memref<6x6x8x128xf32, #tpu.memory_space<vmem>>, vector<1x1x8x128xf32>
      %316 = vector.shape_cast %315 : vector<1x1x8x128xf32> to vector<8x128xf32>
      %317 = vector.shape_cast %312 : vector<8x128xf32> to vector<1x1x8x128xf32>
      tpu.vector_store %arg21[%314, %c4_218, %c0_219, %c0_220], %317 {strides = array<i32>} : memref<6x6x8x128xf32, #tpu.memory_space<vmem>>, vector<1x1x8x128xf32>,
    }
    %c4_i32_11 = arith.constant 4 : i32
    %cst_12 = arith.constant 0.000000e+00 : f32
    %6 = vector.broadcast %cst_12 : f32 to vector<128x128xf32>
    %c0_13 = arith.constant 0 : index
    %c0_14 = arith.constant 0 : index
    %c0_15 = arith.constant 0 : index
    %c0_16 = arith.constant 0 : index
    %7 = vector.load %arg21[%c0_13, %c0_14, %c0_15, %c0_16] : memref<6x6x8x128xf32, #tpu.memory_space<vmem>>, vector<4x4x8x128xf32>
    %8 = vector.shape_cast %7 : vector<4x4x8x128xf32> to vector<128x128xf32>
    %9 = arith.truncf %8 : vector<128x128xf32> to vector<128x128xbf16>
    %c0_17 = arith.constant 0 : index
    %c0_18 = arith.constant 0 : index
    %c0_19 = arith.constant 0 : index
    %10 = vector.load %arg6[%c0_17, %c0_18, %c0_19] : memref<9x128x128xbf16, #tpu.memory_space<vmem>>, vector<1x128x128xbf16>
    %11 = vector.shape_cast %10 : vector<1x128x128xbf16> to vector<128x128xbf16>
    %cst_20 = arith.constant dense<0.000000e+00> : vector<128x128xf32>
    %12 = tpu.matmul %9, %11, %cst_20 {dimension_numbers = #tpu.dot_dimension_numbers<[1], [0], [0], [1], [0, 0, 1, 1], [], []>} : vector<128x128xbf16>, vector<128x128xbf16>, vector<128x128xf32> -> vector<128x128xf32>
    %13 = arith.addf %6, %12 : vector<128x128xf32>
    %c0_21 = arith.constant 0 : index
    %c1 = arith.constant 1 : index
    %c0_22 = arith.constant 0 : index
    %c0_23 = arith.constant 0 : index
    %14 = vector.load %arg21[%c0_21, %c1, %c0_22, %c0_23] : memref<6x6x8x128xf32, #tpu.memory_space<vmem>>, vector<4x4x8x128xf32>
    %15 = vector.shape_cast %14 : vector<4x4x8x128xf32> to vector<128x128xf32>
    %16 = arith.truncf %15 : vector<128x128xf32> to vector<128x128xbf16>
    %c1_24 = arith.constant 1 : index
    %c0_25 = arith.constant 0 : index
    %c0_26 = arith.constant 0 : index
    %17 = vector.load %arg6[%c1_24, %c0_25, %c0_26] : memref<9x128x128xbf16, #tpu.memory_space<vmem>>, vector<1x128x128xbf16>
    %18 = vector.shape_cast %17 : vector<1x128x128xbf16> to vector<128x128xbf16>
    %cst_27 = arith.constant dense<0.000000e+00> : vector<128x128xf32>
    %19 = tpu.matmul %16, %18, %cst_27 {dimension_numbers = #tpu.dot_dimension_numbers<[1], [0], [0], [1], [0, 0, 1, 1], [], []>} : vector<128x128xbf16>, vector<128x128xbf16>, vector<128x128xf32> -> vector<128x128xf32>
    %20 = arith.addf %13, %19 : vector<128x128xf32>
    %c0_28 = arith.constant 0 : index
    %c2 = arith.constant 2 : index
    %c0_29 = arith.constant 0 : index
    %c0_30 = arith.constant 0 : index
    %21 = vector.load %arg21[%c0_28, %c2, %c0_29, %c0_30] : memref<6x6x8x128xf32, #tpu.memory_space<vmem>>, vector<4x4x8x128xf32>
    %22 = vector.shape_cast %21 : vector<4x4x8x128xf32> to vector<128x128xf32>
    %23 = arith.truncf %22 : vector<128x128xf32> to vector<128x128xbf16>
    %c2_31 = arith.constant 2 : index
    %c0_32 = arith.constant 0 : index
    %c0_33 = arith.constant 0 : index
    %24 = vector.load %arg6[%c2_31, %c0_32, %c0_33] : memref<9x128x128xbf16, #tpu.memory_space<vmem>>, vector<1x128x128xbf16>
    %25 = vector.shape_cast %24 : vector<1x128x128xbf16> to vector<128x128xbf16>
    %cst_34 = arith.constant dense<0.000000e+00> : vector<128x128xf32>
    %26 = tpu.matmul %23, %25, %cst_34 {dimension_numbers = #tpu.dot_dimension_numbers<[1], [0], [0], [1], [0, 0, 1, 1], [], []>} : vector<128x128xbf16>, vector<128x128xbf16>, vector<128x128xf32> -> vector<128x128xf32>
    %27 = arith.addf %20, %26 : vector<128x128xf32>
    %c1_35 = arith.constant 1 : index
    %c0_36 = arith.constant 0 : index
    %c0_37 = arith.constant 0 : index
    %c0_38 = arith.constant 0 : index
    %28 = vector.load %arg21[%c1_35, %c0_36, %c0_37, %c0_38] : memref<6x6x8x128xf32, #tpu.memory_space<vmem>>, vector<4x4x8x128xf32>
    %29 = vector.shape_cast %28 : vector<4x4x8x128xf32> to vector<128x128xf32>
    %30 = arith.truncf %29 : vector<128x128xf32> to vector<128x128xbf16>
    %c3 = arith.constant 3 : index
    %c0_39 = arith.constant 0 : index
    %c0_40 = arith.constant 0 : index
    %31 = vector.load %arg6[%c3, %c0_39, %c0_40] : memref<9x128x128xbf16, #tpu.memory_space<vmem>>, vector<1x128x128xbf16>
    %32 = vector.shape_cast %31 : vector<1x128x128xbf16> to vector<128x128xbf16>
    %cst_41 = arith.constant dense<0.000000e+00> : vector<128x128xf32>
    %33 = tpu.matmul %30, %32, %cst_41 {dimension_numbers = #tpu.dot_dimension_numbers<[1], [0], [0], [1], [0, 0, 1, 1], [], []>} : vector<128x128xbf16>, vector<128x128xbf16>, vector<128x128xf32> -> vector<128x128xf32>
    %34 = arith.addf %27, %33 : vector<128x128xf32>
    %c1_42 = arith.constant 1 : index
    %c1_43 = arith.constant 1 : index
    %c0_44 = arith.constant 0 : index
    %c0_45 = arith.constant 0 : index
    %35 = vector.load %arg21[%c1_42, %c1_43, %c0_44, %c0_45] : memref<6x6x8x128xf32, #tpu.memory_space<vmem>>, vector<4x4x8x128xf32>
    %36 = vector.shape_cast %35 : vector<4x4x8x128xf32> to vector<128x128xf32>
    %37 = arith.truncf %36 : vector<128x128xf32> to vector<128x128xbf16>
    %c4 = arith.constant 4 : index
    %c0_46 = arith.constant 0 : index
    %c0_47 = arith.constant 0 : index
    %38 = vector.load %arg6[%c4, %c0_46, %c0_47] : memref<9x128x128xbf16, #tpu.memory_space<vmem>>, vector<1x128x128xbf16>
    %39 = vector.shape_cast %38 : vector<1x128x128xbf16> to vector<128x128xbf16>
    %cst_48 = arith.constant dense<0.000000e+00> : vector<128x128xf32>
    %40 = tpu.matmul %37, %39, %cst_48 {dimension_numbers = #tpu.dot_dimension_numbers<[1], [0], [0], [1], [0, 0, 1, 1], [], []>} : vector<128x128xbf16>, vector<128x128xbf16>, vector<128x128xf32> -> vector<128x128xf32>
    %41 = arith.addf %34, %40 : vector<128x128xf32>
    %c1_49 = arith.constant 1 : index
    %c2_50 = arith.constant 2 : index
    %c0_51 = arith.constant 0 : index
    %c0_52 = arith.constant 0 : index
    %42 = vector.load %arg21[%c1_49, %c2_50, %c0_51, %c0_52] : memref<6x6x8x128xf32, #tpu.memory_space<vmem>>, vector<4x4x8x128xf32>
    %43 = vector.shape_cast %42 : vector<4x4x8x128xf32> to vector<128x128xf32>
    %44 = arith.truncf %43 : vector<128x128xf32> to vector<128x128xbf16>
    %c5 = arith.constant 5 : index
    %c0_53 = arith.constant 0 : index
    %c0_54 = arith.constant 0 : index
    %45 = vector.load %arg6[%c5, %c0_53, %c0_54] : memref<9x128x128xbf16, #tpu.memory_space<vmem>>, vector<1x128x128xbf16>
    %46 = vector.shape_cast %45 : vector<1x128x128xbf16> to vector<128x128xbf16>
    %cst_55 = arith.constant dense<0.000000e+00> : vector<128x128xf32>
    %47 = tpu.matmul %44, %46, %cst_55 {dimension_numbers = #tpu.dot_dimension_numbers<[1], [0], [0], [1], [0, 0, 1, 1], [], []>} : vector<128x128xbf16>, vector<128x128xbf16>, vector<128x128xf32> -> vector<128x128xf32>
    %48 = arith.addf %41, %47 : vector<128x128xf32>
    %c2_56 = arith.constant 2 : index
    %c0_57 = arith.constant 0 : index
    %c0_58 = arith.constant 0 : index
    %c0_59 = arith.constant 0 : index
    %49 = vector.load %arg21[%c2_56, %c0_57, %c0_58, %c0_59] : memref<6x6x8x128xf32, #tpu.memory_space<vmem>>, vector<4x4x8x128xf32>
    %50 = vector.shape_cast %49 : vector<4x4x8x128xf32> to vector<128x128xf32>
    %51 = arith.truncf %50 : vector<128x128xf32> to vector<128x128xbf16>
    %c6 = arith.constant 6 : index
    %c0_60 = arith.constant 0 : index
    %c0_61 = arith.constant 0 : index
    %52 = vector.load %arg6[%c6, %c0_60, %c0_61] : memref<9x128x128xbf16, #tpu.memory_space<vmem>>, vector<1x128x128xbf16>
    %53 = vector.shape_cast %52 : vector<1x128x128xbf16> to vector<128x128xbf16>
    %cst_62 = arith.constant dense<0.000000e+00> : vector<128x128xf32>
    %54 = tpu.matmul %51, %53, %cst_62 {dimension_numbers = #tpu.dot_dimension_numbers<[1], [0], [0], [1], [0, 0, 1, 1], [], []>} : vector<128x128xbf16>, vector<128x128xbf16>, vector<128x128xf32> -> vector<128x128xf32>
    %55 = arith.addf %48, %54 : vector<128x128xf32>
    %c2_63 = arith.constant 2 : index
    %c1_64 = arith.constant 1 : index
    %c0_65 = arith.constant 0 : index
    %c0_66 = arith.constant 0 : index
    %56 = vector.load %arg21[%c2_63, %c1_64, %c0_65, %c0_66] : memref<6x6x8x128xf32, #tpu.memory_space<vmem>>, vector<4x4x8x128xf32>
    %57 = vector.shape_cast %56 : vector<4x4x8x128xf32> to vector<128x128xf32>
    %58 = arith.truncf %57 : vector<128x128xf32> to vector<128x128xbf16>
    %c7 = arith.constant 7 : index
    %c0_67 = arith.constant 0 : index
    %c0_68 = arith.constant 0 : index
    %59 = vector.load %arg6[%c7, %c0_67, %c0_68] : memref<9x128x128xbf16, #tpu.memory_space<vmem>>, vector<1x128x128xbf16>
    %60 = vector.shape_cast %59 : vector<1x128x128xbf16> to vector<128x128xbf16>
    %cst_69 = arith.constant dense<0.000000e+00> : vector<128x128xf32>
    %61 = tpu.matmul %58, %60, %cst_69 {dimension_numbers = #tpu.dot_dimension_numbers<[1], [0], [0], [1], [0, 0, 1, 1], [], []>} : vector<128x128xbf16>, vector<128x128xbf16>, vector<128x128xf32> -> vector<128x128xf32>
    %62 = arith.addf %55, %61 : vector<128x128xf32>
    %c2_70 = arith.constant 2 : index
    %c2_71 = arith.constant 2 : index
    %c0_72 = arith.constant 0 : index
    %c0_73 = arith.constant 0 : index
    %63 = vector.load %arg21[%c2_70, %c2_71, %c0_72, %c0_73] : memref<6x6x8x128xf32, #tpu.memory_space<vmem>>, vector<4x4x8x128xf32>
    %64 = vector.shape_cast %63 : vector<4x4x8x128xf32> to vector<128x128xf32>
    %65 = arith.truncf %64 : vector<128x128xf32> to vector<128x128xbf16>
    %c8 = arith.constant 8 : index
    %c0_74 = arith.constant 0 : index
    %c0_75 = arith.constant 0 : index
    %66 = vector.load %arg6[%c8, %c0_74, %c0_75] : memref<9x128x128xbf16, #tpu.memory_space<vmem>>, vector<1x128x128xbf16>
    %67 = vector.shape_cast %66 : vector<1x128x128xbf16> to vector<128x128xbf16>
    %cst_76 = arith.constant dense<0.000000e+00> : vector<128x128xf32>
    %68 = tpu.matmul %65, %67, %cst_76 {dimension_numbers = #tpu.dot_dimension_numbers<[1], [0], [0], [1], [0, 0, 1, 1], [], []>} : vector<128x128xbf16>, vector<128x128xbf16>, vector<128x128xf32> -> vector<128x128xf32>
    %69 = arith.addf %62, %68 : vector<128x128xf32>
    %c0_77 = arith.constant 0 : index
    %c0_78 = arith.constant 0 : index
    %70 = vector.load %arg7[%c0_77, %c0_78] : memref<1x128xf32, #tpu.memory_space<vmem>>, vector<1x128xf32>
    %71 = vector.broadcast %70 : vector<1x128xf32> to vector<128x128xf32>
    %72 = arith.addf %69, %71 : vector<128x128xf32>
    %cst_79 = arith.constant 0.000000e+00 : f32
    %73 = vector.broadcast %cst_79 : f32 to vector<128x128xf32>
    %74 = arith.maximumf %72, %73 : vector<128x128xf32>
    %75 = vector.shape_cast %74 : vector<128x128xf32> to vector<16x8x128xf32>
    %76 = vector.extract_strided_slice %75 {offsets = [0, 0, 0], sizes = [1, 8, 128], strides = [1, 1, 1]} : vector<16x8x128xf32> to vector<1x8x128xf32>
    %77 = vector.shape_cast %76 : vector<1x8x128xf32> to vector<8x128xf32>
    %78 = vector.extract_strided_slice %75 {offsets = [1, 0, 0], sizes = [1, 8, 128], strides = [1, 1, 1]} : vector<16x8x128xf32> to vector<1x8x128xf32>
    %79 = vector.shape_cast %78 : vector<1x8x128xf32> to vector<8x128xf32>
    %80 = arith.maximumf %77, %79 : vector<8x128xf32>
    %81 = vector.extract_strided_slice %75 {offsets = [4, 0, 0], sizes = [1, 8, 128], strides = [1, 1, 1]} : vector<16x8x128xf32> to vector<1x8x128xf32>
    %82 = vector.shape_cast %81 : vector<1x8x128xf32> to vector<8x128xf32>
    %83 = arith.maximumf %80, %82 : vector<8x128xf32>
    %84 = vector.extract_strided_slice %75 {offsets = [5, 0, 0], sizes = [1, 8, 128], strides = [1, 1, 1]} : vector<16x8x128xf32> to vector<1x8x128xf32>
    %85 = vector.shape_cast %84 : vector<1x8x128xf32> to vector<8x128xf32>
    %86 = arith.maximumf %83, %85 : vector<8x128xf32>
    %c0_80 = arith.constant 0 : index
    %c0_81 = arith.constant 0 : index
    %87 = vector.load %arg22[%c0_80, %c0_81] : memref<8x512xf32, #tpu.memory_space<vmem>>, vector<8x128xf32>
    tpu.vector_store %arg22[%c0_80, %c0_81], %86 {strides = array<i32>} : memref<8x512xf32, #tpu.memory_space<vmem>>, vector<8x128xf32>,
    %88 = vector.extract_strided_slice %75 {offsets = [2, 0, 0], sizes = [1, 8, 128], strides = [1, 1, 1]} : vector<16x8x128xf32> to vector<1x8x128xf32>
    %89 = vector.shape_cast %88 : vector<1x8x128xf32> to vector<8x128xf32>
    %90 = vector.extract_strided_slice %75 {offsets = [3, 0, 0], sizes = [1, 8, 128], strides = [1, 1, 1]} : vector<16x8x128xf32> to vector<1x8x128xf32>
    %91 = vector.shape_cast %90 : vector<1x8x128xf32> to vector<8x128xf32>
    %92 = arith.maximumf %89, %91 : vector<8x128xf32>
    %93 = vector.extract_strided_slice %75 {offsets = [6, 0, 0], sizes = [1, 8, 128], strides = [1, 1, 1]} : vector<16x8x128xf32> to vector<1x8x128xf32>
    %94 = vector.shape_cast %93 : vector<1x8x128xf32> to vector<8x128xf32>
    %95 = arith.maximumf %92, %94 : vector<8x128xf32>
    %96 = vector.extract_strided_slice %75 {offsets = [7, 0, 0], sizes = [1, 8, 128], strides = [1, 1, 1]} : vector<16x8x128xf32> to vector<1x8x128xf32>
    %97 = vector.shape_cast %96 : vector<1x8x128xf32> to vector<8x128xf32>
    %98 = arith.maximumf %95, %97 : vector<8x128xf32>
    %c0_82 = arith.constant 0 : index
    %c128 = arith.constant 128 : index
    %99 = vector.load %arg22[%c0_82, %c128] : memref<8x512xf32, #tpu.memory_space<vmem>>, vector<8x128xf32>
    tpu.vector_store %arg22[%c0_82, %c128], %98 {strides = array<i32>} : memref<8x512xf32, #tpu.memory_space<vmem>>, vector<8x128xf32>,
    %100 = vector.extract_strided_slice %75 {offsets = [8, 0, 0], sizes = [1, 8, 128], strides = [1, 1, 1]} : vector<16x8x128xf32> to vector<1x8x128xf32>
    %101 = vector.shape_cast %100 : vector<1x8x128xf32> to vector<8x128xf32>
    %102 = vector.extract_strided_slice %75 {offsets = [9, 0, 0], sizes = [1, 8, 128], strides = [1, 1, 1]} : vector<16x8x128xf32> to vector<1x8x128xf32>
    %103 = vector.shape_cast %102 : vector<1x8x128xf32> to vector<8x128xf32>
    %104 = arith.maximumf %101, %103 : vector<8x128xf32>
    %105 = vector.extract_strided_slice %75 {offsets = [12, 0, 0], sizes = [1, 8, 128], strides = [1, 1, 1]} : vector<16x8x128xf32> to vector<1x8x128xf32>
    %106 = vector.shape_cast %105 : vector<1x8x128xf32> to vector<8x128xf32>
    %107 = arith.maximumf %104, %106 : vector<8x128xf32>
    %108 = vector.extract_strided_slice %75 {offsets = [13, 0, 0], sizes = [1, 8, 128], strides = [1, 1, 1]} : vector<16x8x128xf32> to vector<1x8x128xf32>
    %109 = vector.shape_cast %108 : vector<1x8x128xf32> to vector<8x128xf32>
    %110 = arith.maximumf %107, %109 : vector<8x128xf32>
    %c0_83 = arith.constant 0 : index
    %c256 = arith.constant 256 : index
    %111 = vector.load %arg22[%c0_83, %c256] : memref<8x512xf32, #tpu.memory_space<vmem>>, vector<8x128xf32>
    tpu.vector_store %arg22[%c0_83, %c256], %110 {strides = array<i32>} : memref<8x512xf32, #tpu.memory_space<vmem>>, vector<8x128xf32>,
    %112 = vector.extract_strided_slice %75 {offsets = [10, 0, 0], sizes = [1, 8, 128], strides = [1, 1, 1]} : vector<16x8x128xf32> to vector<1x8x128xf32>
    %113 = vector.shape_cast %112 : vector<1x8x128xf32> to vector<8x128xf32>
    %114 = vector.extract_strided_slice %75 {offsets = [11, 0, 0], sizes = [1, 8, 128], strides = [1, 1, 1]} : vector<16x8x128xf32> to vector<1x8x128xf32>
    %115 = vector.shape_cast %114 : vector<1x8x128xf32> to vector<8x128xf32>
    %116 = arith.maximumf %113, %115 : vector<8x128xf32>
    %117 = vector.extract_strided_slice %75 {offsets = [14, 0, 0], sizes = [1, 8, 128], strides = [1, 1, 1]} : vector<16x8x128xf32> to vector<1x8x128xf32>
    %118 = vector.shape_cast %117 : vector<1x8x128xf32> to vector<8x128xf32>
    %119 = arith.maximumf %116, %118 : vector<8x128xf32>
    %120 = vector.extract_strided_slice %75 {offsets = [15, 0, 0], sizes = [1, 8, 128], strides = [1, 1, 1]} : vector<16x8x128xf32> to vector<1x8x128xf32>
    %121 = vector.shape_cast %120 : vector<1x8x128xf32> to vector<8x128xf32>
    %122 = arith.maximumf %119, %121 : vector<8x128xf32>
    %c0_84 = arith.constant 0 : index
    %c384 = arith.constant 384 : index
    %123 = vector.load %arg22[%c0_84, %c384] : memref<8x512xf32, #tpu.memory_space<vmem>>, vector<8x128xf32>
    tpu.vector_store %arg22[%c0_84, %c384], %122 {strides = array<i32>} : memref<8x512xf32, #tpu.memory_space<vmem>>, vector<8x128xf32>,
    %c0_85 = arith.constant 0 : index
    %c0_86 = arith.constant 0 : index
    %124 = vector.load %arg22[%c0_85, %c0_86] : memref<8x512xf32, #tpu.memory_space<vmem>>, vector<8x512xf32>
    %125 = arith.truncf %124 : vector<8x512xf32> to vector<8x512xbf16>
    %c0_87 = arith.constant 0 : index
    %c0_88 = arith.constant 0 : index
    %126 = vector.load %arg8[%c0_87, %c0_88] : memref<512x1024xbf16, #tpu.memory_space<vmem>>, vector<512x1024xbf16>
    %cst_89 = arith.constant dense<0.000000e+00> : vector<8x1024xf32>
    %127 = tpu.matmul %125, %126, %cst_89 {dimension_numbers = #tpu.dot_dimension_numbers<[1], [0], [0], [1], [0, 0, 1, 1], [], []>} : vector<8x512xbf16>, vector<512x1024xbf16>, vector<8x1024xf32> -> vector<8x1024xf32>
    %c0_90 = arith.constant 0 : index
    %c0_91 = arith.constant 0 : index
    %128 = vector.load %arg9[%c0_90, %c0_91] : memref<1x1024xf32, #tpu.memory_space<vmem>>, vector<1x1024xf32>
    %129 = vector.broadcast %128 : vector<1x1024xf32> to vector<8x1024xf32>
    %130 = arith.addf %127, %129 : vector<8x1024xf32>
    %cst_92 = arith.constant 0.000000e+00 : f32
    %131 = vector.broadcast %cst_92 : f32 to vector<8x1024xf32>
    %132 = arith.maximumf %130, %131 : vector<8x1024xf32>
    %133 = arith.truncf %132 : vector<8x1024xf32> to vector<8x1024xbf16>
    %c0_93 = arith.constant 0 : index
    %c0_94 = arith.constant 0 : index
    %134 = vector.load %arg10[%c0_93, %c0_94] : memref<1024x1024xbf16, #tpu.memory_space<vmem>>, vector<1024x1024xbf16>
    %cst_95 = arith.constant dense<0.000000e+00> : vector<8x1024xf32>
    %135 = tpu.matmul %133, %134, %cst_95 {dimension_numbers = #tpu.dot_dimension_numbers<[1], [0], [0], [1], [0, 0, 1, 1], [], []>} : vector<8x1024xbf16>, vector<1024x1024xbf16>, vector<8x1024xf32> -> vector<8x1024xf32>
    %c0_96 = arith.constant 0 : index
    %c0_97 = arith.constant 0 : index
    %136 = vector.load %arg11[%c0_96, %c0_97] : memref<1x1024xf32, #tpu.memory_space<vmem>>, vector<1x1024xf32>
    %137 = vector.broadcast %136 : vector<1x1024xf32> to vector<8x1024xf32>
    %138 = arith.addf %135, %137 : vector<8x1024xf32>
    %cst_98 = arith.constant 0.000000e+00 : f32
    %139 = vector.broadcast %cst_98 : f32 to vector<8x1024xf32>
    %140 = arith.maximumf %138, %139 : vector<8x1024xf32>
    %141 = arith.truncf %140 : vector<8x1024xf32> to vector<8x1024xbf16>
    %c0_99 = arith.constant 0 : index
    %c0_100 = arith.constant 0 : index
    %142 = vector.load %arg12[%c0_99, %c0_100] : memref<1024x512xbf16, #tpu.memory_space<vmem>>, vector<1024x512xbf16>
    %cst_101 = arith.constant dense<0.000000e+00> : vector<8x512xf32>
    %143 = tpu.matmul %141, %142, %cst_101 {dimension_numbers = #tpu.dot_dimension_numbers<[1], [0], [0], [1], [0, 0, 1, 1], [], []>} : vector<8x1024xbf16>, vector<1024x512xbf16>, vector<8x512xf32> -> vector<8x512xf32>
    %c0_102 = arith.constant 0 : index
    %c0_103 = arith.constant 0 : index
    %144 = vector.load %arg13[%c0_102, %c0_103] : memref<1x512xf32, #tpu.memory_space<vmem>>, vector<1x512xf32>
    %145 = vector.broadcast %144 : vector<1x512xf32> to vector<8x512xf32>
    %146 = arith.addf %143, %145 : vector<8x512xf32>
    %147 = math.tanh %146 : vector<8x512xf32>
    %c0_104 = arith.constant 0 : index
    %c0_105 = arith.constant 0 : index
    %148 = vector.load %arg14[%c0_104, %c0_105] : memref<1x512xf32, #tpu.memory_space<vmem>>, vector<1x512xf32>
    %149 = vector.broadcast %148 : vector<1x512xf32> to vector<8x512xf32>
    %150 = arith.mulf %147, %149 : vector<8x512xf32>
    %cst_106 = arith.constant dense<0.000000e+00> : vector<8xf32>
    %151 = vector.multi_reduction <add>, %150, %cst_106 [1] : vector<8x512xf32> to vector<8xf32>
    %152 = vector.shape_cast %151 : vector<8xf32> to vector<8x1xf32>
    %c0_107 = arith.constant 0 : index
    %c0_108 = arith.constant 0 : index
    %153 = vector.load %arg15[%c0_107, %c0_108] : memref<1x1xf32, #tpu.memory_space<vmem>>, vector<1x1xf32>
    %154 = vector.broadcast %153 : vector<1x1xf32> to vector<8x1xf32>
    %155 = arith.addf %152, %154 : vector<8x1xf32>
    %cst_109 = arith.constant dense<0xFF800000> : vector<1xf32>
    %156 = vector.multi_reduction <maximumf>, %155, %cst_109 [0] : vector<8x1xf32> to vector<1xf32>
    %157 = vector.shape_cast %156 : vector<1xf32> to vector<1x1xf32>
    %158 = vector.broadcast %157 : vector<1x1xf32> to vector<8x1xf32>
    %159 = arith.subf %155, %158 : vector<8x1xf32>
    %160 = math.exp %159 : vector<8x1xf32>
    %cst_110 = arith.constant dense<0.000000e+00> : vector<1xf32>
    %161 = vector.multi_reduction <add>, %160, %cst_110 [0] : vector<8x1xf32> to vector<1xf32>
    %162 = vector.shape_cast %161 : vector<1xf32> to vector<1x1xf32>
    %163 = vector.broadcast %162 : vector<1x1xf32> to vector<8x1xf32>
    %164 = arith.divf %160, %163 : vector<8x1xf32>
    %c0_111 = arith.constant 0 : index
    %c0_112 = arith.constant 0 : index
    %165 = vector.load %arg19[%c0_111, %c0_112] : memref<8x1xf32, #tpu.memory_space<vmem>>, vector<8x1xf32>
    tpu.vector_store %arg19[%c0_111, %c0_112], %164 {strides = array<i32>} : memref<8x1xf32, #tpu.memory_space<vmem>>, vector<8x1xf32>,
    %166 = vector.broadcast %164 : vector<8x1xf32> to vector<8x1024xf32>
    %167 = arith.mulf %166, %140 : vector<8x1024xf32>
    %cst_113 = arith.constant dense<0.000000e+00> : vector<1024xf32>
    %168 = vector.multi_reduction <add>, %167, %cst_113 [0] : vector<8x1024xf32> to vector<1024xf32>
    %169 = vector.shape_cast %168 : vector<1024xf32> to vector<1x1024xf32>
    %170 = arith.truncf %169 : vector<1x1024xf32> to vector<1x1024xbf16>
    %c0_114 = arith.constant 0 : index
    %c0_115 = arith.constant 0 : index
    %171 = vector.load %arg16[%c0_114, %c0_115] : memref<1024x10xbf16, #tpu.memory_space<vmem>>, vector<1024x10xbf16>
    %cst_116 = arith.constant dense<0.000000e+00> : vector<1x10xf32>
    %172 = tpu.matmul %170, %171, %cst_116 {dimension_numbers = #tpu.dot_dimension_numbers<[1], [0], [0], [1], [0, 0, 1, 1], [], []>} : vector<1x1024xbf16>, vector<1024x10xbf16>, vector<1x10xf32> -> vector<1x10xf32>
    %c0_117 = arith.constant 0 : index
    %c0_118 = arith.constant 0 : index
    %173 = vector.load %arg17[%c0_117, %c0_118] : memref<1x10xf32, #tpu.memory_space<vmem>>, vector<1x10xf32>
    %174 = arith.addf %172, %173 : vector<1x10xf32>
    %c0_119 = arith.constant 0 : index
    %c0_120 = arith.constant 0 : index
    %175 = vector.load %arg18[%c0_119, %c0_120] : memref<1x10xf32, #tpu.memory_space<vmem>>, vector<1x10xf32>
    tpu.vector_store %arg18[%c0_119, %c0_120], %174 {strides = array<i32>} : memref<1x10xf32, #tpu.memory_space<vmem>>, vector<1x10xf32>,
    return
  }
  func.func @transform_0(%arg0: i32) -> (i32, i32, i32, i32) {
    %c0_i32 = arith.constant 0 : i32
    %c0_i32_0 = arith.constant 0 : i32
    %c0_i32_1 = arith.constant 0 : i32
    %c0_i32_2 = arith.constant 0 : i32
    %c0_i32_3 = arith.constant 0 : i32
    return %c0_i32, %c0_i32_0, %c0_i32_1, %c0_i32_2 : i32, i32, i32, i32
  }
  func.func @transform_1(%arg0: i32) -> (i32, i32) {
    %c0_i32 = arith.constant 0 : i32
    %c0_i32_0 = arith.constant 0 : i32
    %c0_i32_1 = arith.constant 0 : i32
    return %c0_i32, %c0_i32_0 : i32, i32
  }
  func.func @transform_2(%arg0: i32) -> (i32, i32) {
    %c0_i32 = arith.constant 0 : i32
    %c0_i32_0 = arith.constant 0 : i32
    %c0_i32_1 = arith.constant 0 : i32
    return %c0_i32, %c0_i32_0 : i32, i32
  }
  func.func @transform_3(%arg0: i32) -> (i32, i32, i32) {
    %c0_i32 = arith.constant 0 : i32
    %c0_i32_0 = arith.constant 0 : i32
    %c0_i32_1 = arith.constant 0 : i32
    %c0_i32_2 = arith.constant 0 : i32
    return %c0_i32, %c0_i32_0, %c0_i32_1 : i32, i32, i32
  }
  func.func @transform_4(%arg0: i32) -> (i32, i32) {
    %c0_i32 = arith.constant 0 : i32
    %c0_i32_0 = arith.constant 0 : i32
    %c0_i32_1 = arith.constant 0 : i32
    return %c0_i32, %c0_i32_0 : i32, i32
  }
  func.func @transform_5(%arg0: i32) -> (i32, i32, i32) {
    %c0_i32 = arith.constant 0 : i32
    %c0_i32_0 = arith.constant 0 : i32
    %c0_i32_1 = arith.constant 0 : i32
    %c0_i32_2 = arith.constant 0 : i32
    return %c0_i32, %c0_i32_0, %c0_i32_1 : i32, i32, i32
  }
  func.func @transform_6(%arg0: i32) -> (i32, i32) {
    %c0_i32 = arith.constant 0 : i32
    %c0_i32_0 = arith.constant 0 : i32
    %c0_i32_1 = arith.constant 0 : i32
    return %c0_i32, %c0_i32_0 : i32, i32
  }
  func.func @transform_7(%arg0: i32) -> (i32, i32) {
    %c0_i32 = arith.constant 0 : i32
    %c0_i32_0 = arith.constant 0 : i32
    %c0_i32_1 = arith.constant 0 : i32
    return %c0_i32, %c0_i32_0 : i32, i32
  }
  func.func @transform_8(%arg0: i32) -> (i32, i32) {
    %c0_i32 = arith.constant 0 : i32
    %c0_i32_0 = arith.constant 0 : i32
    %c0_i32_1 = arith.constant 0 : i32
    return %c0_i32, %c0_i32_0 : i32, i32
  }
  func.func @transform_9(%arg0: i32) -> (i32, i32) {
    %c0_i32 = arith.constant 0 : i32
    %c0_i32_0 = arith.constant 0 : i32
    %c0_i32_1 = arith.constant 0 : i32
    return %c0_i32, %c0_i32_0 : i32, i32
  }
  func.func @transform_10(%arg0: i32) -> (i32, i32) {
    %c0_i32 = arith.constant 0 : i32
    %c0_i32_0 = arith.constant 0 : i32
    %c0_i32_1 = arith.constant 0 : i32
    return %c0_i32, %c0_i32_0 : i32, i32
  }
  func.func @transform_11(%arg0: i32) -> (i32, i32) {
    %c0_i32 = arith.constant 0 : i32
    %c0_i32_0 = arith.constant 0 : i32
    %c0_i32_1 = arith.constant 0 : i32
    return %c0_i32, %c0_i32_0 : i32, i32
  }
  func.func @transform_12(%arg0: i32) -> (i32, i32) {
    %c0_i32 = arith.constant 0 : i32
    %c0_i32_0 = arith.constant 0 : i32
    %c0_i32_1 = arith.constant 0 : i32
    return %c0_i32, %c0_i32_0 : i32, i32
  }
  func.func @transform_13(%arg0: i32) -> (i32, i32) {
    %c0_i32 = arith.constant 0 : i32
    %c0_i32_0 = arith.constant 0 : i32
    %c0_i32_1 = arith.constant 0 : i32
    return %c0_i32, %c0_i32_0 : i32, i32
  }
  func.func @transform_14(%arg0: i32) -> (i32, i32) {
    %c0_i32 = arith.constant 0 : i32
    %c0_i32_0 = arith.constant 0 : i32
    %c0_i32_1 = arith.constant 0 : i32
    return %c0_i32, %c0_i32_0 : i32, i32
  }
  func.func @transform_15(%arg0: i32) -> (i32, i32) {
    %c0_i32 = arith.constant 0 : i32
    %c0_i32_0 = arith.constant 0 : i32
    %c0_i32_1 = arith.constant 0 : i32
    return %c0_i32, %c0_i32_0 : i32, i32
  }
  func.func @transform_16(%arg0: i32) -> (i32, i32) {
    %c0_i32 = arith.constant 0 : i32
    %c0_i32_0 = arith.constant 0 : i32
    %c0_i32_1 = arith.constant 0 : i32
    return %c0_i32, %c0_i32_0 : i32, i32
  }
  func.func @transform_17(%arg0: i32) -> (i32, i32) {
    %c0_i32 = arith.constant 0 : i32
    %c0_i32_0 = arith.constant 0 : i32
    %c0_i32_1 = arith.constant 0 : i32
    return %c0_i32, %c0_i32_0 : i32, i32
  }
  func.func @transform_18(%arg0: i32) -> (i32, i32) {
    %c0_i32 = arith.constant 0 : i32
    %c0_i32_0 = arith.constant 0 : i32
    %c0_i32_1 = arith.constant 0 : i32
    return %c0_i32, %c0_i32_0 : i32, i32
  }
}

</mosaic_0001>

<bundles_post_ra>
// kernel: alexnet_attention_forward.1
= control target key start
LH: loop header
LB: loop body
LE: loop exit
PB: predicated region body
PF: predicated region fallthrough
CT: control target
= control target key end

     0   :  { %s24469_s0 = inlined_call_operand.vmem [shape: f32[18,18,8,1], index: 0, kind: input, shape index: {}]   ;;  %s24470_s1 = inlined_call_operand.vmem [shape: f32[9,64], index: 1, kind: input, shape index: {}]   ;;  %s24471_s2 = inlined_call_operand.vmem [shape: f32[1,64], index: 2, kind: input, shape index: {}]   ;;  %s24472_s3 = inlined_call_operand.vmem [shape: bf16[9,64,128], index: 3, kind: input, shape index: {}]   ;;  %s24473_s4 = inlined_call_operand.vmem [shape: f32[1,128], index: 4, kind: input, shape index: {}]   ;;  %s24474_s5 = inlined_call_operand.vmem [shape: bf16[9,128,128], index: 5, kind: input, shape index: {}]   ;;  %s24475_s6 = inlined_call_operand.vmem [shape: f32[1,128], index: 6, kind: input, shape index: {}]   ;;  %s24476_s7 = inlined_call_operand.vmem [shape: bf16[512,1024], index: 7, kind: input, shape index: {}]   ;;  %s24477_s8 = inlined_call_operand.vmem [shape: f32[1,1024], index: 8, kind: input, shape index: {}]   ;;  %s24478_s9 = inlined_call_operand.vmem [shape: bf16[1024,1024], index: 9, kind: input, shape index: {}]   ;;  %s24479_s10 = inlined_call_operand.vmem [shape: f32[1,1024], index: 10, kind: input, shape index: {}]   ;;  %s24480_s11 = inlined_call_operand.hbm [shape: bf16[1024,512], index: 11, kind: input, shape index: {}]   ;;  %s24481_s12 = inlined_call_operand.vmem [shape: f32[1,512], index: 12, kind: input, shape index: {}]   ;;  %s24482_s13 = inlined_call_operand.vmem [shape: f32[1,512], index: 13, kind: input, shape index: {}]   ;;  %s24483_s14 = inlined_call_operand.<no memory space> [shape: f32[1,1], index: 14, kind: input, shape index: {}]   ;;  %s24484_s15 = inlined_call_operand.vmem [shape: bf16[1024,10], index: 15, kind: input, shape index: {}]   ;;  %s24485_s16 = inlined_call_operand.vmem [shape: f32[1,10], index: 16, kind: input, shape index: {}]   ;;  %s24486_s17 = inlined_call_operand.hbm [shape: f32[1,10], index: 17, kind: output, shape index: {0}]   ;;  %s24487_s18 = inlined_call_operand.vmem [shape: f32[8,1], index: 18, kind: output, shape index: {1}]  }
   0x1   :  { %24490 = sst [smem:[#allocation189_spill]] %s24469_s0  ;;  %v24_v0 = vstv %s24483_s14 }
   0x2   :  { %24491 = sst [smem:[#allocation190_spill]] %s24470_s1  ;;  %25 = vst [vmem:[#allocation5] sm:$0x1] %v24_v0 }
   0x3   :  { %24492 = sst [smem:[#allocation191_spill]] %s24471_s2 }
   0x4   :  { %26 = vsyncpa [#allocation7], 0 }
   0x5   :  { %27 = vsyncpa [#allocation8], 0  ;;  %s18677_s29 = smov [#allocation6]   ;;  %s18613_s1 = scalar_lea.hbm %s24480_s11, 32768 }
   0x6   :  { %s55_s30 = sshll.u32 %s18677_s29, 4  ;;  %p18614_p0 = scmp.ne.s32.totalorder %s24480_s11, %s18613_s1  ;;  %s56_s30 = int_to_ptr.vmem [resolvable:$true] %s55_s30 }
   0x7   :  { %p18617_p1 = scmp.lt.u32.totalorder %s18613_s1, %s24480_s11 }
   0x9   :  { %p18619_p2 = pnand %p18617_p1, %p18614_p0 }
   0xb   :  { %18622 = shalt.err (!%p18619_p2)
}
   0xc   :  { %s18623_s14 = scalar_lea.vmem %s56_s30, 32768  ;;  %p18628_p4 = scmp.lt.s32.totalorder %s56_s30, %s56_s30 }
   0xd   :  { %p18624_p3 = scmp.ne.s32.totalorder %s56_s30, %s18623_s14  ;;  %p18629_p5 = scmp.lt.s32.totalorder %s18623_s14, %s18623_s14 }
   0xf   :  { %p18630_p6 = por %p18629_p5, %p18628_p4 }
  0x11   :  { %p18631_p7 = pnand %p18630_p6, %p18624_p3 }
  0x13   :  { %18634 = shalt.err (!%p18631_p7)
}
  0x14   :  { %s18678_s23 = smov 256   ;;  %s18679_s24 = smov 16  }
  0x15   :  { %61 = dma.hbm_to_vmem [thread:$0]  %s24480_s11, 32768, %s56_s30, [#allocation7], %s18678_s23, %s18678_s23, %s18679_s24  }
  0x16   :  { %18665 = dma.done.wait [#allocation7], 32768  }
  0x17   :  { %18666 = vsyncadd [#allocation7], 4294934528  ;;  %vm76_vm0 = vcmask 523264   ;;  %v18680_v1 = vmov 0.0   ;;  %s19030_s11 = smov 0  }
  0x18   :  { %77 = vst.msk [vmem:[#allocation2] sm:$0xff] %vm76_vm0, %v18680_v1  ;;  %78 = vst.msk [vmem:[#allocation2 + $0x8] sm:$0xff] %vm76_vm0, %v18680_v1 }
  0x19   :  { %79 = vst.msk [vmem:[#allocation2 + $0x10] sm:$0xff] %vm76_vm0, %v18680_v1  ;;  %80 = vst.msk [vmem:[#allocation2 + $0x18] sm:$0xff] %vm76_vm0, %v18680_v1 }
  0x1a   :  { %81 = vst.msk [vmem:[#allocation2 + $0x20] sm:$0xff] %vm76_vm0, %v18680_v1  ;;  %82 = vst.msk [vmem:[#allocation2 + $0x28] sm:$0xff] %vm76_vm0, %v18680_v1 }
  0x1b   :  { %83 = vst.msk [vmem:[#allocation2 + $0x30] sm:$0xff] %vm76_vm0, %v18680_v1  ;;  %84 = vst.msk [vmem:[#allocation2 + $0x38] sm:$0xff] %vm76_vm0, %v18680_v1 }
  0x1c   :  { %85 = vst.msk [vmem:[#allocation2 + $0x40] sm:$0xff] %vm76_vm0, %v18680_v1  ;;  %86 = vst.msk [vmem:[#allocation2 + $0x48] sm:$0xff] %vm76_vm0, %v18680_v1 }
  0x1d   :  { %87 = vst.msk [vmem:[#allocation2 + $0x50] sm:$0xff] %vm76_vm0, %v18680_v1  ;;  %88 = vst.msk [vmem:[#allocation2 + $0x58] sm:$0xff] %vm76_vm0, %v18680_v1 }
  0x1e   :  { %89 = vst.msk [vmem:[#allocation2 + $0x60] sm:$0xff] %vm76_vm0, %v18680_v1  ;;  %90 = vst.msk [vmem:[#allocation2 + $0x68] sm:$0xff] %vm76_vm0, %v18680_v1 }
  0x1f   :  { %91 = vst.msk [vmem:[#allocation2 + $0x70] sm:$0xff] %vm76_vm0, %v18680_v1  ;;  %92 = vst.msk [vmem:[#allocation2 + $0x78] sm:$0xff] %vm76_vm0, %v18680_v1 }
  0x20   :  { %93 = vst.msk [vmem:[#allocation2 + $0x80] sm:$0xff] %vm76_vm0, %v18680_v1  ;;  %94 = vst.msk [vmem:[#allocation2 + $0x88] sm:$0xff] %vm76_vm0, %v18680_v1 }
  0x21   :  { %95 = vst.msk [vmem:[#allocation2 + $0x90] sm:$0xff] %vm76_vm0, %v18680_v1  ;;  %96 = vst.msk [vmem:[#allocation2 + $0x98] sm:$0xff] %vm76_vm0, %v18680_v1 }
  0x22   :  { %97 = vst.msk [vmem:[#allocation2 + $0xa0] sm:$0xff] %vm76_vm0, %v18680_v1  ;;  %98 = vst.msk [vmem:[#allocation2 + $0xa8] sm:$0xff] %vm76_vm0, %v18680_v1 }
  0x23   :  { %99 = vst.msk [vmem:[#allocation2 + $0xb0] sm:$0xff] %vm76_vm0, %v18680_v1  ;;  %100 = vst.msk [vmem:[#allocation2 + $0xb8] sm:$0xff] %vm76_vm0, %v18680_v1 }
  0x24   :  { %101 = vst.msk [vmem:[#allocation2 + $0xc0] sm:$0xff] %vm76_vm0, %v18680_v1  ;;  %102 = vst.msk [vmem:[#allocation2 + $0xc8] sm:$0xff] %vm76_vm0, %v18680_v1 }
  0x25   :  { %103 = vst.msk [vmem:[#allocation2 + $0xd0] sm:$0xff] %vm76_vm0, %v18680_v1  ;;  %104 = vst.msk [vmem:[#allocation2 + $0xd8] sm:$0xff] %vm76_vm0, %v18680_v1 }
  0x26   :  { %105 = vst.msk [vmem:[#allocation2 + $0xe0] sm:$0xff] %vm76_vm0, %v18680_v1  ;;  %106 = vst.msk [vmem:[#allocation2 + $0xe8] sm:$0xff] %vm76_vm0, %v18680_v1 }
  0x27   :  { %107 = vst.msk [vmem:[#allocation2 + $0xf0] sm:$0xff] %vm76_vm0, %v18680_v1  ;;  %108 = vst.msk [vmem:[#allocation2 + $0xf8] sm:$0xff] %vm76_vm0, %v18680_v1 }
  0x28   :  { %109 = vst.msk [vmem:[#allocation2 + $0x100] sm:$0xff] %vm76_vm0, %v18680_v1  ;;  %110 = vst.msk [vmem:[#allocation2 + $0x108] sm:$0xff] %vm76_vm0, %v18680_v1 }
  0x29   :  { %111 = vst.msk [vmem:[#allocation2 + $0x110] sm:$0xff] %vm76_vm0, %v18680_v1  ;;  %112 = vst.msk [vmem:[#allocation2 + $0x118] sm:$0xff] %vm76_vm0, %v18680_v1 }
  0x2a   :  { %113 = vst.msk [vmem:[#allocation2 + $0x120] sm:$0xff] %vm76_vm0, %v18680_v1  ;;  %114 = vst.msk [vmem:[#allocation2 + $0x128] sm:$0xff] %vm76_vm0, %v18680_v1 }
  0x2b   :  { %115 = vst.msk [vmem:[#allocation2 + $0x130] sm:$0xff] %vm76_vm0, %v18680_v1  ;;  %116 = vst.msk [vmem:[#allocation2 + $0x138] sm:$0xff] %vm76_vm0, %v18680_v1 }
  0x2c   :  { %117 = vst.msk [vmem:[#allocation2 + $0x140] sm:$0xff] %vm76_vm0, %v18680_v1  ;;  %118 = vst.msk [vmem:[#allocation2 + $0x148] sm:$0xff] %vm76_vm0, %v18680_v1 }
  0x2d   :  { %119 = vst.msk [vmem:[#allocation2 + $0x150] sm:$0xff] %vm76_vm0, %v18680_v1  ;;  %120 = vst.msk [vmem:[#allocation2 + $0x158] sm:$0xff] %vm76_vm0, %v18680_v1 }
  0x2e   :  { %121 = vst.msk [vmem:[#allocation2 + $0x160] sm:$0xff] %vm76_vm0, %v18680_v1  ;;  %122 = vst.msk [vmem:[#allocation2 + $0x168] sm:$0xff] %vm76_vm0, %v18680_v1 }
  0x2f   :  { %123 = vst.msk [vmem:[#allocation2 + $0x170] sm:$0xff] %vm76_vm0, %v18680_v1  ;;  %124 = vst.msk [vmem:[#allocation2 + $0x178] sm:$0xff] %vm76_vm0, %v18680_v1 }
  0x30   :  { %125 = vst.msk [vmem:[#allocation2 + $0x180] sm:$0xff] %vm76_vm0, %v18680_v1  ;;  %126 = vst.msk [vmem:[#allocation2 + $0x188] sm:$0xff] %vm76_vm0, %v18680_v1 }
  0x31   :  { %127 = vst.msk [vmem:[#allocation2 + $0x190] sm:$0xff] %vm76_vm0, %v18680_v1  ;;  %128 = vst.msk [vmem:[#allocation2 + $0x198] sm:$0xff] %vm76_vm0, %v18680_v1 }
  0x32   :  { %129 = vst.msk [vmem:[#allocation2 + $0x1a0] sm:$0xff] %vm76_vm0, %v18680_v1  ;;  %130 = vst.msk [vmem:[#allocation2 + $0x1a8] sm:$0xff] %vm76_vm0, %v18680_v1 }
  0x33   :  { %131 = vst.msk [vmem:[#allocation2 + $0x1b0] sm:$0xff] %vm76_vm0, %v18680_v1  ;;  %132 = vst.msk [vmem:[#allocation2 + $0x1b8] sm:$0xff] %vm76_vm0, %v18680_v1 }
  0x34   :  { %133 = vst.msk [vmem:[#allocation2 + $0x1c0] sm:$0xff] %vm76_vm0, %v18680_v1  ;;  %134 = vst.msk [vmem:[#allocation2 + $0x1c8] sm:$0xff] %vm76_vm0, %v18680_v1 }
  0x35   :  { %135 = vst.msk [vmem:[#allocation2 + $0x1d0] sm:$0xff] %vm76_vm0, %v18680_v1  ;;  %136 = vst.msk [vmem:[#allocation2 + $0x1d8] sm:$0xff] %vm76_vm0, %v18680_v1 }
  0x36   :  { %137 = vst.msk [vmem:[#allocation2 + $0x1e0] sm:$0xff] %vm76_vm0, %v18680_v1  ;;  %138 = vst.msk [vmem:[#allocation2 + $0x1e8] sm:$0xff] %vm76_vm0, %v18680_v1 }
  0x37   :  { %139 = vst.msk [vmem:[#allocation2 + $0x1f0] sm:$0xff] %vm76_vm0, %v18680_v1  ;;  %140 = vst.msk [vmem:[#allocation2 + $0x1f8] sm:$0xff] %vm76_vm0, %v18680_v1 }
  0x38   :  { %141 = vst.msk [vmem:[#allocation2 + $0x200] sm:$0xff] %vm76_vm0, %v18680_v1  ;;  %142 = vst.msk [vmem:[#allocation2 + $0x208] sm:$0xff] %vm76_vm0, %v18680_v1 }
  0x39   :  { %143 = vst.msk [vmem:[#allocation2 + $0x210] sm:$0xff] %vm76_vm0, %v18680_v1  ;;  %144 = vst.msk [vmem:[#allocation2 + $0x218] sm:$0xff] %vm76_vm0, %v18680_v1 }
  0x3a   :  { %145 = vst.msk [vmem:[#allocation2 + $0x220] sm:$0xff] %vm76_vm0, %v18680_v1  ;;  %146 = vst.msk [vmem:[#allocation2 + $0x228] sm:$0xff] %vm76_vm0, %v18680_v1 }
  0x3b   :  { %147 = vst.msk [vmem:[#allocation2 + $0x230] sm:$0xff] %vm76_vm0, %v18680_v1  ;;  %148 = vst.msk [vmem:[#allocation2 + $0x238] sm:$0xff] %vm76_vm0, %v18680_v1 }
  0x3c   :  { %149 = vst.msk [vmem:[#allocation2 + $0x240] sm:$0xff] %vm76_vm0, %v18680_v1  ;;  %150 = vst.msk [vmem:[#allocation2 + $0x248] sm:$0xff] %vm76_vm0, %v18680_v1 }
  0x3d   :  { %151 = vst.msk [vmem:[#allocation2 + $0x250] sm:$0xff] %vm76_vm0, %v18680_v1  ;;  %152 = vst.msk [vmem:[#allocation2 + $0x258] sm:$0xff] %vm76_vm0, %v18680_v1 }
  0x3e   :  { %153 = vst.msk [vmem:[#allocation2 + $0x260] sm:$0xff] %vm76_vm0, %v18680_v1  ;;  %154 = vst.msk [vmem:[#allocation2 + $0x268] sm:$0xff] %vm76_vm0, %v18680_v1 }
  0x3f   :  { %155 = vst.msk [vmem:[#allocation2 + $0x270] sm:$0xff] %vm76_vm0, %v18680_v1  ;;  %156 = vst.msk [vmem:[#allocation2 + $0x278] sm:$0xff] %vm76_vm0, %v18680_v1 }
  0x40   :  { %157 = vst.msk [vmem:[#allocation2 + $0x280] sm:$0xff] %vm76_vm0, %v18680_v1  ;;  %158 = vst.msk [vmem:[#allocation2 + $0x288] sm:$0xff] %vm76_vm0, %v18680_v1 }
  0x41   :  { %159 = vst.msk [vmem:[#allocation2 + $0x290] sm:$0xff] %vm76_vm0, %v18680_v1  ;;  %160 = vst.msk [vmem:[#allocation2 + $0x298] sm:$0xff] %vm76_vm0, %v18680_v1 }
  0x42   :  { %161 = vst.msk [vmem:[#allocation2 + $0x2a0] sm:$0xff] %vm76_vm0, %v18680_v1  ;;  %162 = vst.msk [vmem:[#allocation2 + $0x2a8] sm:$0xff] %vm76_vm0, %v18680_v1 }
  0x43   :  { %163 = vst.msk [vmem:[#allocation2 + $0x2b0] sm:$0xff] %vm76_vm0, %v18680_v1  ;;  %164 = vst.msk [vmem:[#allocation2 + $0x2b8] sm:$0xff] %vm76_vm0, %v18680_v1 }
  0x44   :  { %165 = vst.msk [vmem:[#allocation2 + $0x2c0] sm:$0xff] %vm76_vm0, %v18680_v1  ;;  %166 = vst.msk [vmem:[#allocation2 + $0x2c8] sm:$0xff] %vm76_vm0, %v18680_v1 }
  0x45   :  { %167 = vst.msk [vmem:[#allocation2 + $0x2d0] sm:$0xff] %vm76_vm0, %v18680_v1  ;;  %168 = vst.msk [vmem:[#allocation2 + $0x2d8] sm:$0xff] %vm76_vm0, %v18680_v1 }
  0x46   :  { %169 = vst.msk [vmem:[#allocation2 + $0x2e0] sm:$0xff] %vm76_vm0, %v18680_v1  ;;  %170 = vst.msk [vmem:[#allocation2 + $0x2e8] sm:$0xff] %vm76_vm0, %v18680_v1 }
  0x47   :  { %171 = vst.msk [vmem:[#allocation2 + $0x2f0] sm:$0xff] %vm76_vm0, %v18680_v1  ;;  %172 = vst.msk [vmem:[#allocation2 + $0x2f8] sm:$0xff] %vm76_vm0, %v18680_v1 }
  0x48   :  { %173 = vst.msk [vmem:[#allocation2 + $0x300] sm:$0xff] %vm76_vm0, %v18680_v1  ;;  %174 = vst.msk [vmem:[#allocation2 + $0x308] sm:$0xff] %vm76_vm0, %v18680_v1 }
  0x49   :  { %175 = vst.msk [vmem:[#allocation2 + $0x310] sm:$0xff] %vm76_vm0, %v18680_v1  ;;  %176 = vst.msk [vmem:[#allocation2 + $0x318] sm:$0xff] %vm76_vm0, %v18680_v1 }
  0x4a   :  { %177 = vst [vmem:[#allocation3] sm:$0xff] %v18680_v1  ;;  %178 = vst [vmem:[#allocation3 + $0x8] sm:$0xff] %v18680_v1 }
  0x4b   :  { %179 = vst [vmem:[#allocation3 + $0x10] sm:$0xff] %v18680_v1  ;;  %180 = vst [vmem:[#allocation3 + $0x18] sm:$0xff] %v18680_v1 }
  0x4c   :  { %181 = vst [vmem:[#allocation3 + $0x20] sm:$0xff] %v18680_v1  ;;  %182 = vst [vmem:[#allocation3 + $0x28] sm:$0xff] %v18680_v1 }
  0x4d   :  { %183 = vst [vmem:[#allocation3 + $0x30] sm:$0xff] %v18680_v1  ;;  %184 = vst [vmem:[#allocation3 + $0x38] sm:$0xff] %v18680_v1 }
  0x4e   :  { %185 = vst [vmem:[#allocation3 + $0x40] sm:$0xff] %v18680_v1  ;;  %186 = vst [vmem:[#allocation3 + $0x48] sm:$0xff] %v18680_v1 }
  0x4f   :  { %187 = vst [vmem:[#allocation3 + $0x50] sm:$0xff] %v18680_v1  ;;  %188 = vst [vmem:[#allocation3 + $0x58] sm:$0xff] %v18680_v1 }
  0x50   :  { %189 = vst [vmem:[#allocation3 + $0x60] sm:$0xff] %v18680_v1  ;;  %190 = vst [vmem:[#allocation3 + $0x68] sm:$0xff] %v18680_v1 }
  0x51   :  { %191 = vst [vmem:[#allocation3 + $0x70] sm:$0xff] %v18680_v1  ;;  %192 = vst [vmem:[#allocation3 + $0x78] sm:$0xff] %v18680_v1 }
  0x52   :  { %193 = vst [vmem:[#allocation3 + $0x80] sm:$0xff] %v18680_v1  ;;  %194 = vst [vmem:[#allocation3 + $0x88] sm:$0xff] %v18680_v1 }
  0x53   :  { %195 = vst [vmem:[#allocation3 + $0x90] sm:$0xff] %v18680_v1  ;;  %196 = vst [vmem:[#allocation3 + $0x98] sm:$0xff] %v18680_v1 }
  0x54   :  { %197 = vst [vmem:[#allocation3 + $0xa0] sm:$0xff] %v18680_v1  ;;  %198 = vst [vmem:[#allocation3 + $0xa8] sm:$0xff] %v18680_v1 }
  0x55   :  { %199 = vst [vmem:[#allocation3 + $0xb0] sm:$0xff] %v18680_v1  ;;  %200 = vst [vmem:[#allocation3 + $0xb8] sm:$0xff] %v18680_v1 }
  0x56   :  { %201 = vst [vmem:[#allocation3 + $0xc0] sm:$0xff] %v18680_v1  ;;  %202 = vst [vmem:[#allocation3 + $0xc8] sm:$0xff] %v18680_v1 }
  0x57   :  { %203 = vst [vmem:[#allocation3 + $0xd0] sm:$0xff] %v18680_v1  ;;  %204 = vst [vmem:[#allocation3 + $0xd8] sm:$0xff] %v18680_v1 }
  0x58   :  { %205 = vst [vmem:[#allocation3 + $0xe0] sm:$0xff] %v18680_v1  ;;  %206 = vst [vmem:[#allocation3 + $0xe8] sm:$0xff] %v18680_v1 }
  0x59   :  { %207 = vst [vmem:[#allocation3 + $0xf0] sm:$0xff] %v18680_v1  ;;  %208 = vst [vmem:[#allocation3 + $0xf8] sm:$0xff] %v18680_v1 }
  0x5a   :  { %209 = vst [vmem:[#allocation3 + $0x100] sm:$0xff] %v18680_v1  ;;  %210 = vst [vmem:[#allocation3 + $0x108] sm:$0xff] %v18680_v1 }
  0x5b   :  { %211 = vst [vmem:[#allocation3 + $0x110] sm:$0xff] %v18680_v1  ;;  %212 = vst [vmem:[#allocation3 + $0x118] sm:$0xff] %v18680_v1 }
  0x5c LB: > { %v18681_v2 = vmov 0   ;;  %s14903_s27 = smul.u32 288, %s18671_s11  ;;  %s24493_s30 = sld [smem:[#allocation189_spill]]  ;;  %s18671_s11 = sphi %s19030_s11, %s218_s11  }
  0x5d   : > { %18039 = vset.pattern.permute.xlu1 %v18681_v2  ;;  %18038 = vset.pattern.permute.xlu0 %v18681_v2  ;;  %s24665_s20 = sld [smem:[#allocation190_spill]]  ;;  %s24897_s14 = sld [smem:[#allocation191_spill]] }
  0x5e   : > { %s14824_s23 = smul.u32 80, %s18671_s11  ;;  %s218_s11 = sadd.s32 1, %s18671_s11  }
  0x5f   : > { %p215_p8 = scmp.ge.s32.totalorder %s218_s11, 8  }
  0x60   : > { %s20808_s24 = scalar_lea.vmem [#allocation2], %s14824_s23  ;;  %s20883_s25 = smov (%p215_p8), 0  }
  0x62   : > { %s19039_s0 = scalar_lea.vmem %s24493_s30, %s14903_s27 }
  0x63   : > { %v19042_v3 = vld [vmem:[%s19039_s0 + $0x10] sm:$0xff]  ;;  %v222_v4 = vld [vmem:[%s19039_s0] sm:$0xff]  ;;  %v19047_v5 = vld [vmem:[%s19039_s0 + $0x18] sm:$0xff] }
  0x64   : > { %267 = vperm.xlu1 %18039, %v19042_v3   ;;  %257 = vperm.xlu0 %18038, %v222_v4   ;;  %v223_v6 = vld [vmem:[%s19039_s0 + $0x8] sm:$0xff]  ;;  %v19055_v8 = vld [vmem:[%s19039_s0 + $0x20] sm:$0xff]  ;;  %v19060_v9 = vld [vmem:[%s19039_s0 + $0x38] sm:$0xff] }
  0x65   : > { %v19052_v7 = vld [vmem:[%s19039_s0 + $0x28] sm:$0xff]  ;;  %v19063_v10 = vld [vmem:[%s19039_s0 + $0x30] sm:$0xff]  ;;  %v19071_v12 = vld [vmem:[%s19039_s0 + $0x40] sm:$0xff] }
  0x66   : > { %v19068_v11 = vld [vmem:[%s19039_s0 + $0x48] sm:$0xff]  ;;  %v19076_v13 = vld [vmem:[%s19039_s0 + $0x58] sm:$0xff]  ;;  %v19079_v14 = vld [vmem:[%s19039_s0 + $0x50] sm:$0xff] }
  0x67   : > { %v19084_v15 = vld [vmem:[%s19039_s0 + $0x68] sm:$0xff]  ;;  %v19087_v16 = vld [vmem:[%s19039_s0 + $0x60] sm:$0xff]  ;;  %v19092_v17 = vld [vmem:[%s19039_s0 + $0x78] sm:$0xff] }
  0x68   : > { %272 = vperm.xlu1 %18039, %v19047_v5   ;;  %262 = vperm.xlu0 %18038, %v223_v6   ;;  %v19095_v18 = vld [vmem:[%s19039_s0 + $0x70] sm:$0xff]  ;;  %v19100_v19 = vld [vmem:[%s19039_s0 + $0x98] sm:$0xff]  ;;  %v19108_v21 = vld [vmem:[%s19039_s0 + $0xa8] sm:$0xff] }
  0x69   : > { %v19103_v20 = vld [vmem:[%s19039_s0 + $0x90] sm:$0xff]  ;;  %v19111_v22 = vld [vmem:[%s19039_s0 + $0xa0] sm:$0xff]  ;;  %v19116_v23 = vld [vmem:[%s19039_s0 + $0xb8] sm:$0xff] }
  0x6a   : > { %v19119_v24 = vld [vmem:[%s19039_s0 + $0xb0] sm:$0xff]  ;;  %v19124_v25 = vld [vmem:[%s19039_s0 + $0xc8] sm:$0xff]  ;;  %v19127_v26 = vld [vmem:[%s19039_s0 + $0xc0] sm:$0xff] }
  0x6b   : > { %v19132_v27 = vld [vmem:[%s19039_s0 + $0xd8] sm:$0xff]  ;;  %v19135_v28 = vld [vmem:[%s19039_s0 + $0xd0] sm:$0xff]  ;;  %v19140_v29 = vld [vmem:[%s19039_s0 + $0xe8] sm:$0xff] }
  0x6c   : > { %282 = vperm.xlu1 %18039, %v19052_v7   ;;  %277 = vperm.xlu0 %18038, %v19055_v8   ;;  %v19143_v30 = vld [vmem:[%s19039_s0 + $0xe0] sm:$0xff]  ;;  %v19148_v31 = vld [vmem:[%s19039_s0 + $0xf8] sm:$0xff]  ;;  %v19151_v32 = vld [vmem:[%s19039_s0 + $0xf0] sm:$0xff] }
  0x6d   : > { %v19156_v33 = vld [vmem:[%s19039_s0 + $0x108] sm:$0xff]  ;;  %v19159_v34 = vld [vmem:[%s19039_s0 + $0x100] sm:$0xff]  ;;  %v19193_v36 = vld [vmem:[%s19039_s0 + $0x110] sm:$0xff] }
  0x6e   : > { %v14920_v35 = vld [vmem:[%s19039_s0 + $0x80] sm:$0xff]  ;;  %v14953_v51 = vld [vmem:[%s19039_s0 + $0x88] sm:$0xff]  ;;  %v19287_v4 = vld [vmem:[%s19039_s0 + $0x118] sm:$0xff] }
  0x70   : > { %292 = vperm.xlu1 %18039, %v19060_v9   ;;  %287 = vperm.xlu0 %18038, %v19063_v10  }
  0x74   : > { %302 = vperm.xlu1 %18039, %v19068_v11   ;;  %297 = vperm.xlu0 %18038, %v19071_v12  }
  0x78   : > { %312 = vperm.xlu1 %18039, %v19076_v13   ;;  %307 = vperm.xlu0 %18038, %v19079_v14  }
  0x7c   : > { %322 = vperm.xlu1 %18039, %v19084_v15   ;;  %317 = vperm.xlu0 %18038, %v19087_v16  }
  0x80   : > { %332 = vperm.xlu1 %18039, %v19092_v17   ;;  %327 = vperm.xlu0 %18038, %v19095_v18  }
  0x84   : > { %342 = vperm.xlu1 %18039, %v19100_v19   ;;  %337 = vperm.xlu0 %18038, %v19103_v20  }
  0x88   : > { %352 = vperm.xlu1 %18039, %v19108_v21   ;;  %347 = vperm.xlu0 %18038, %v19111_v22  }
  0x8c   : > { %362 = vperm.xlu1 %18039, %v19116_v23   ;;  %357 = vperm.xlu0 %18038, %v19119_v24  }
  0x90   : > { %372 = vperm.xlu1 %18039, %v19124_v25   ;;  %367 = vperm.xlu0 %18038, %v19127_v26  }
  0x94   : > { %382 = vperm.xlu1 %18039, %v19132_v27   ;;  %377 = vperm.xlu0 %18038, %v19135_v28  }
  0x98   : > { %392 = vperm.xlu1 %18039, %v19140_v29   ;;  %387 = vperm.xlu0 %18038, %v19143_v30  }
  0x9c   : > { %402 = vperm.xlu1 %18039, %v19148_v31   ;;  %397 = vperm.xlu0 %18038, %v19151_v32  }
  0xa0   : > { %412 = vperm.xlu1 %18039, %v19156_v33   ;;  %407 = vperm.xlu0 %18038, %v19159_v34  }
  0xa4   : > { %525 = vperm.xlu1 %18039, %v19042_v3   ;;  %520 = vperm.xlu0 %18038, %v223_v6  }
  0xa8   : > { %535 = vperm.xlu1 %18039, %v19055_v8   ;;  %530 = vperm.xlu0 %18038, %v19047_v5  }
  0xac   : > { %545 = vperm.xlu1 %18039, %v19063_v10   ;;  %540 = vperm.xlu0 %18038, %v19052_v7  }
  0xb0   : > { %555 = vperm.xlu1 %18039, %v19071_v12   ;;  %550 = vperm.xlu0 %18038, %v19060_v9  }
  0xb4   : > { %565 = vperm.xlu1 %18039, %v19079_v14   ;;  %560 = vperm.xlu0 %18038, %v19068_v11  }
  0xb8   : > { %575 = vperm.xlu1 %18039, %v19087_v16   ;;  %570 = vperm.xlu0 %18038, %v19076_v13  }
  0xbc   : > { %585 = vperm.xlu1 %18039, %v19095_v18   ;;  %580 = vperm.xlu0 %18038, %v19084_v15  }
  0xc0   : > { %595 = vperm.xlu1 %18039, %v14920_v35   ;;  %590 = vperm.xlu0 %18038, %v19092_v17  }
  0xc4   : > { %605 = vperm.xlu1 %18039, %v19111_v22   ;;  %600 = vperm.xlu0 %18038, %v19100_v19  }
  0xc8   : > { %615 = vperm.xlu1 %18039, %v19119_v24   ;;  %610 = vperm.xlu0 %18038, %v19108_v21  }
  0xcc   : > { %625 = vperm.xlu1 %18039, %v19127_v26   ;;  %620 = vperm.xlu0 %18038, %v19116_v23  }
  0xd0   : > { %635 = vperm.xlu1 %18039, %v19135_v28   ;;  %630 = vperm.xlu0 %18038, %v19124_v25  }
  0xd4   : > { %645 = vperm.xlu1 %18039, %v19143_v30   ;;  %640 = vperm.xlu0 %18038, %v19132_v27  }
  0xd8   : > { %655 = vperm.xlu1 %18039, %v19151_v32   ;;  %650 = vperm.xlu0 %18038, %v19140_v29  }
  0xdc   : > { %665 = vperm.xlu1 %18039, %v19159_v34   ;;  %660 = vperm.xlu0 %18038, %v19148_v31  }
  0xe0   : > { %675 = vperm.xlu1 %18039, %v19193_v36   ;;  %670 = vperm.xlu0 %18038, %v19156_v33  }
  0xe3   : > { %v19197_v37 = vpop.permute.xlu1 %267  ;;  %v19199_v38 = vpop.permute.xlu0 %257 }
  0xe4   : > { %788 = vperm.xlu1 %18039, %v19047_v5   ;;  %783 = vperm.xlu0 %18038, %v19042_v3  }
  0xe7   : > { %v19203_v39 = vpop.permute.xlu1 %272  ;;  %v19205_v40 = vpop.permute.xlu0 %262 }
  0xe8   : > { %798 = vperm.xlu1 %18039, %v19052_v7   ;;  %793 = vperm.xlu0 %18038, %v19055_v8  }
  0xeb   : > { %v19209_v41 = vpop.permute.xlu1 %282  ;;  %v19211_v42 = vpop.permute.xlu0 %277 }
  0xec   : > { %808 = vperm.xlu1 %18039, %v19060_v9   ;;  %803 = vperm.xlu0 %18038, %v19063_v10  }
  0xef   : > { %v19215_v43 = vpop.permute.xlu1 %292  ;;  %v19217_v44 = vpop.permute.xlu0 %287 }
  0xf0   : > { %818 = vperm.xlu1 %18039, %v19068_v11   ;;  %813 = vperm.xlu0 %18038, %v19071_v12  }
  0xf3   : > { %v19221_v45 = vpop.permute.xlu1 %302  ;;  %v19223_v46 = vpop.permute.xlu0 %297 }
  0xf4   : > { %828 = vperm.xlu1 %18039, %v19076_v13   ;;  %823 = vperm.xlu0 %18038, %v19079_v14  }
  0xf7   : > { %v19227_v47 = vpop.permute.xlu1 %312  ;;  %v19229_v48 = vpop.permute.xlu0 %307 }
  0xf8   : > { %838 = vperm.xlu1 %18039, %v19084_v15   ;;  %833 = vperm.xlu0 %18038, %v19087_v16  }
  0xfb   : > { %v19233_v49 = vpop.permute.xlu1 %322  ;;  %v19235_v50 = vpop.permute.xlu0 %317 }
  0xfc   : > { %848 = vperm.xlu1 %18039, %v19092_v17   ;;  %843 = vperm.xlu0 %18038, %v19095_v18  }
  0xff   : > { %v19240_v52 = vpop.permute.xlu1 %332  ;;  %v19242_v53 = vpop.permute.xlu0 %327 }
 0x100   : > { %858 = vperm.xlu1 %18039, %v14953_v51   ;;  %853 = vperm.xlu0 %18038, %v14920_v35  }
 0x103   : > { %v19244_v54 = vpop.permute.xlu1 %342  ;;  %v19246_v55 = vpop.permute.xlu0 %337 }
 0x104   : > { %24494 = vst [vmem:[#allocation12_spill] sm:$0xff] %v19244_v54  ;;  %24495 = vst [vmem:[#allocation13_spill] sm:$0xff] %v19246_v55  ;;  %868 = vperm.xlu1 %18039, %v19108_v21   ;;  %863 = vperm.xlu0 %18038, %v19111_v22  }
 0x107   : > { %v19250_v56 = vpop.permute.xlu1 %352  ;;  %v19252_v57 = vpop.permute.xlu0 %347 }
 0x108   : > { %24496 = vst [vmem:[#allocation14_spill] sm:$0xff] %v19250_v56  ;;  %24497 = vst [vmem:[#allocation15_spill] sm:$0xff] %v19252_v57  ;;  %878 = vperm.xlu1 %18039, %v19116_v23   ;;  %873 = vperm.xlu0 %18038, %v19119_v24  }
 0x10b   : > { %v19256_v58 = vpop.permute.xlu1 %362  ;;  %v19258_v59 = vpop.permute.xlu0 %357 }
 0x10c   : > { %24498 = vst [vmem:[#allocation16_spill] sm:$0xff] %v19256_v58  ;;  %24499 = vst [vmem:[#allocation17_spill] sm:$0xff] %v19258_v59  ;;  %888 = vperm.xlu1 %18039, %v19124_v25   ;;  %883 = vperm.xlu0 %18038, %v19127_v26  }
 0x10f   : > { %v19262_v60 = vpop.permute.xlu1 %372  ;;  %v19264_v61 = vpop.permute.xlu0 %367 }
 0x110   : > { %24500 = vst [vmem:[#allocation18_spill] sm:$0xff] %v19262_v60  ;;  %24501 = vst [vmem:[#allocation19_spill] sm:$0xff] %v19264_v61  ;;  %898 = vperm.xlu1 %18039, %v19132_v27   ;;  %893 = vperm.xlu0 %18038, %v19135_v28   ;;  %v19359_v61 = vld [vmem:[%s19039_s0 + $0x130] sm:$0xff] }
 0x113   : > { %v19268_v62 = vpop.permute.xlu1 %382  ;;  %v19270_v63 = vpop.permute.xlu0 %377 }
 0x114   : > { %24502 = vst [vmem:[#allocation20_spill] sm:$0xff] %v19268_v62  ;;  %24503 = vst [vmem:[#allocation21_spill] sm:$0xff] %v19270_v63  ;;  %908 = vperm.xlu1 %18039, %v19140_v29   ;;  %903 = vperm.xlu0 %18038, %v19143_v30   ;;  %v19356_v62 = vld [vmem:[%s19039_s0 + $0x138] sm:$0xff] }
 0x117   : > { %v19274_v0 = vpop.permute.xlu1 %392  ;;  %v19276_v1 = vpop.permute.xlu0 %387 }
 0x118   : > { %24504 = vst [vmem:[#allocation22_spill] sm:$0xff] %v19274_v0  ;;  %24505 = vst [vmem:[#allocation23_spill] sm:$0xff] %v19276_v1  ;;  %918 = vperm.xlu1 %18039, %v19148_v31   ;;  %913 = vperm.xlu0 %18038, %v19151_v32   ;;  %v19347_v1 = vld [vmem:[%s19039_s0 + $0x120] sm:$0xff] }
 0x11b   : > { %v19280_v2 = vpop.permute.xlu1 %402  ;;  %v19282_v3 = vpop.permute.xlu0 %397 }
 0x11c   : > { %24506 = vst [vmem:[#allocation24_spill] sm:$0xff] %v19280_v2  ;;  %24507 = vst [vmem:[#allocation25_spill] sm:$0xff] %v19282_v3  ;;  %928 = vperm.xlu1 %18039, %v19156_v33   ;;  %923 = vperm.xlu0 %18038, %v19159_v34   ;;  %v19344_v2 = vld [vmem:[%s19039_s0 + $0x128] sm:$0xff] }
 0x11f   : > { %v19289_v5 = vpop.permute.xlu1 %412  ;;  %v19291_v6 = vpop.permute.xlu0 %407 }
 0x120   : > { %938 = vperm.xlu1 %18039, %v19287_v4   ;;  %933 = vperm.xlu0 %18038, %v19193_v36  }
 0x123   : > { %v19295_v7 = vpop.permute.xlu1 %525  ;;  %v19297_v8 = vpop.permute.xlu0 %520 }
 0x124   : > { %1052 = vperm.xlu1 %18039, %v19100_v19   ;;  %1047 = vperm.xlu0 %18038, %v19103_v20  }
 0x127   : > { %v19301_v9 = vpop.permute.xlu1 %535  ;;  %v19303_v10 = vpop.permute.xlu0 %530 }
 0x128   : > { %1062 = vperm.xlu1 %18039, %v19108_v21   ;;  %1057 = vperm.xlu0 %18038, %v19111_v22  }
 0x12b   : > { %v19307_v11 = vpop.permute.xlu1 %545  ;;  %v19309_v12 = vpop.permute.xlu0 %540 }
 0x12c   : > { %1072 = vperm.xlu1 %18039, %v19116_v23   ;;  %1067 = vperm.xlu0 %18038, %v19119_v24  }
 0x12f   : > { %v19313_v13 = vpop.permute.xlu1 %555  ;;  %v19315_v14 = vpop.permute.xlu0 %550 }
 0x130   : > { %24508 = vst [vmem:[#allocation26_spill] sm:$0xff] %v19315_v14  ;;  %1082 = vperm.xlu1 %18039, %v19124_v25   ;;  %1077 = vperm.xlu0 %18038, %v19127_v26  }
 0x133   : > { %v19319_v15 = vpop.permute.xlu1 %565  ;;  %v19321_v16 = vpop.permute.xlu0 %560 }
 0x134   : > { %24509 = vst [vmem:[#allocation27_spill] sm:$0xff] %v19319_v15  ;;  %24510 = vst [vmem:[#allocation28_spill] sm:$0xff] %v19321_v16  ;;  %1092 = vperm.xlu1 %18039, %v19132_v27   ;;  %1087 = vperm.xlu0 %18038, %v19135_v28  }
 0x137   : > { %v19325_v17 = vpop.permute.xlu1 %575  ;;  %v19327_v18 = vpop.permute.xlu0 %570 }
 0x138   : > { %24511 = vst [vmem:[#allocation29_spill] sm:$0xff] %v19325_v17  ;;  %24512 = vst [vmem:[#allocation30_spill] sm:$0xff] %v19327_v18  ;;  %1102 = vperm.xlu1 %18039, %v19140_v29   ;;  %1097 = vperm.xlu0 %18038, %v19143_v30   ;;  %v19428_v17 = vld [vmem:[%s19039_s0 + $0x198] sm:$0xff] }
 0x13b   : > { %v19331_v20 = vpop.permute.xlu1 %585  ;;  %v19333_v35 = vpop.permute.xlu0 %580 }
 0x13c   : > { %24513 = vst [vmem:[#allocation31_spill] sm:$0xff] %v19331_v20  ;;  %24514 = vst [vmem:[#allocation32_spill] sm:$0xff] %v19333_v35  ;;  %1112 = vperm.xlu1 %18039, %v19148_v31   ;;  %1107 = vperm.xlu0 %18038, %v19151_v32  }
 0x13f   : > { %v19337_v51 = vpop.permute.xlu1 %595  ;;  %v19339_v3 = vpop.permute.xlu0 %590 }
 0x140   : > { %24515 = vst [vmem:[#allocation33_spill] sm:$0xff] %v19337_v51  ;;  %24516 = vst [vmem:[#allocation34_spill] sm:$0xff] %v19339_v3  ;;  %1122 = vperm.xlu1 %18039, %v19156_v33   ;;  %1117 = vperm.xlu0 %18038, %v19159_v34  }
 0x143   : > { %v19349_v0 = vpop.permute.xlu1 %605  ;;  %v19351_v63 = vpop.permute.xlu0 %600 }
 0x144   : > { %24517 = vst [vmem:[#allocation35_spill] sm:$0xff] %v19349_v0  ;;  %24518 = vst [vmem:[#allocation36_spill] sm:$0xff] %v19351_v63  ;;  %1132 = vperm.xlu1 %18039, %v19344_v2   ;;  %1127 = vperm.xlu0 %18038, %v19347_v1   ;;  %v19368_v63 = vld [vmem:[%s19039_s0 + $0x148] sm:$0xff]  ;;  %v19371_v0 = vld [vmem:[%s19039_s0 + $0x140] sm:$0xff] }
 0x147   : > { %v19361_v60 = vpop.permute.xlu1 %615  ;;  %v19363_v59 = vpop.permute.xlu0 %610 }
 0x148   : > { %24519 = vst [vmem:[#allocation37_spill] sm:$0xff] %v19361_v60  ;;  %24520 = vst [vmem:[#allocation38_spill] sm:$0xff] %v19363_v59  ;;  %1142 = vperm.xlu1 %18039, %v19356_v62   ;;  %1137 = vperm.xlu0 %18038, %v19359_v61   ;;  %v19380_v59 = vld [vmem:[%s19039_s0 + $0x158] sm:$0xff]  ;;  %v19383_v60 = vld [vmem:[%s19039_s0 + $0x150] sm:$0xff] }
 0x14b   : > { %v19373_v58 = vpop.permute.xlu1 %625  ;;  %v19375_v57 = vpop.permute.xlu0 %620 }
 0x14c   : > { %24521 = vst [vmem:[#allocation39_spill] sm:$0xff] %v19373_v58  ;;  %24522 = vst [vmem:[#allocation40_spill] sm:$0xff] %v19375_v57  ;;  %1152 = vperm.xlu1 %18039, %v19368_v63   ;;  %1147 = vperm.xlu0 %18038, %v19371_v0   ;;  %v19392_v57 = vld [vmem:[%s19039_s0 + $0x168] sm:$0xff]  ;;  %v19395_v58 = vld [vmem:[%s19039_s0 + $0x160] sm:$0xff] }
 0x14f   : > { %v19385_v56 = vpop.permute.xlu1 %635  ;;  %v19387_v55 = vpop.permute.xlu0 %630 }
 0x150   : > { %24523 = vst [vmem:[#allocation41_spill] sm:$0xff] %v19385_v56  ;;  %24524 = vst [vmem:[#allocation42_spill] sm:$0xff] %v19387_v55  ;;  %1162 = vperm.xlu1 %18039, %v19380_v59   ;;  %1157 = vperm.xlu0 %18038, %v19383_v60   ;;  %v19404_v55 = vld [vmem:[%s19039_s0 + $0x178] sm:$0xff]  ;;  %v19407_v56 = vld [vmem:[%s19039_s0 + $0x170] sm:$0xff] }
 0x153   : > { %v19397_v54 = vpop.permute.xlu1 %645  ;;  %v19399_v3 = vpop.permute.xlu0 %640 }
 0x154   : > { %24525 = vst [vmem:[#allocation43_spill] sm:$0xff] %v19397_v54  ;;  %24526 = vst [vmem:[#allocation44_spill] sm:$0xff] %v19399_v3  ;;  %1172 = vperm.xlu1 %18039, %v19392_v57   ;;  %1167 = vperm.xlu0 %18038, %v19395_v58   ;;  %v19416_v54 = vld [vmem:[%s19039_s0 + $0x188] sm:$0xff]  ;;  %v19419_v3 = vld [vmem:[%s19039_s0 + $0x180] sm:$0xff] }
 0x157   : > { %v19409_v51 = vpop.permute.xlu1 %655  ;;  %v19411_v35 = vpop.permute.xlu0 %650 }
 0x158   : > { %24527 = vst [vmem:[#allocation45_spill] sm:$0xff] %v19409_v51  ;;  %24528 = vst [vmem:[#allocation46_spill] sm:$0xff] %v19411_v35  ;;  %1182 = vperm.xlu1 %18039, %v19404_v55   ;;  %1177 = vperm.xlu0 %18038, %v19407_v56   ;;  %v19431_v51 = vld [vmem:[%s19039_s0 + $0x190] sm:$0xff] }
 0x15b   : > { %v19421_v20 = vpop.permute.xlu1 %665  ;;  %v19423_v18 = vpop.permute.xlu0 %660 }
 0x15c   : > { %24529 = vst [vmem:[#allocation47_spill] sm:$0xff] %v19421_v20  ;;  %24530 = vst [vmem:[#allocation48_spill] sm:$0xff] %v19423_v18  ;;  %1192 = vperm.xlu1 %18039, %v19416_v54   ;;  %1187 = vperm.xlu0 %18038, %v19419_v3  }
 0x15f   : > { %v19433_v35 = vpop.permute.xlu1 %675  ;;  %v19435_v16 = vpop.permute.xlu0 %670 }
 0x160   : > { %24531 = vst [vmem:[#allocation49_spill] sm:$0xff] %v19433_v35  ;;  %24532 = vst [vmem:[#allocation50_spill] sm:$0xff] %v19435_v16  ;;  %1202 = vperm.xlu1 %18039, %v19428_v17   ;;  %1197 = vperm.xlu0 %18038, %v19431_v51  }
 0x163   : > { %v19439_v15 = vpop.permute.xlu1 %788  ;;  %v19441_v20 = vpop.permute.xlu0 %783 }
 0x164   : > { %24533 = vst [vmem:[#allocation51_spill] sm:$0xff] %v19441_v20  ;;  %1315 = vperm.xlu1 %18039, %v19111_v22   ;;  %1310 = vperm.xlu0 %18038, %v19100_v19  }
 0x167   : > { %v19445_v18 = vpop.permute.xlu1 %798  ;;  %v19447_v14 = vpop.permute.xlu0 %793 }
 0x168   : > { %24534 = vst [vmem:[#allocation52_spill] sm:$0xff] %v19447_v14  ;;  %1325 = vperm.xlu1 %18039, %v19119_v24   ;;  %1320 = vperm.xlu0 %18038, %v19108_v21  }
 0x16b   : > { %v19451_v16 = vpop.permute.xlu1 %808  ;;  %v19453_v35 = vpop.permute.xlu0 %803 }
 0x16c   : > { %24535 = vst [vmem:[#allocation53_spill] sm:$0xff] %v19451_v16  ;;  %24536 = vst [vmem:[#allocation54_spill] sm:$0xff] %v19453_v35  ;;  %1335 = vperm.xlu1 %18039, %v19127_v26   ;;  %1330 = vperm.xlu0 %18038, %v19116_v23   ;;  %v19860_v35 = vld [vmem:[%s19039_s0 + $0x198] sm:$0xff] }
 0x16f   : > { %v19457_v20 = vpop.permute.xlu1 %818  ;;  %v19459_v22 = vpop.permute.xlu0 %813 }
 0x170   : > { %24537 = vst [vmem:[#allocation55_spill] sm:$0xff] %v19457_v20  ;;  %24538 = vst [vmem:[#allocation56_spill] sm:$0xff] %v19459_v22  ;;  %1345 = vperm.xlu1 %18039, %v19135_v28   ;;  %1340 = vperm.xlu0 %18038, %v19124_v25   ;;  %v19851_v22 = vld [vmem:[%s19039_s0 + $0x188] sm:$0xff] }
 0x173   : > { %v19463_v19 = vpop.permute.xlu1 %828  ;;  %v19465_v24 = vpop.permute.xlu0 %823 }
 0x174   : > { %24539 = vst [vmem:[#allocation57_spill] sm:$0xff] %v19463_v19  ;;  %24540 = vst [vmem:[#allocation58_spill] sm:$0xff] %v19465_v24  ;;  %1355 = vperm.xlu1 %18039, %v19143_v30   ;;  %1350 = vperm.xlu0 %18038, %v19132_v27  }
 0x177   : > { %v19469_v21 = vpop.permute.xlu1 %838  ;;  %v19471_v26 = vpop.permute.xlu0 %833 }
 0x178   : > { %24541 = vst [vmem:[#allocation59_spill] sm:$0xff] %v19469_v21  ;;  %24542 = vst [vmem:[#allocation60_spill] sm:$0xff] %v19471_v26  ;;  %1365 = vperm.xlu1 %18039, %v19151_v32   ;;  %1360 = vperm.xlu0 %18038, %v19140_v29  }
 0x17b   : > { %v19475_v23 = vpop.permute.xlu1 %848  ;;  %v19477_v28 = vpop.permute.xlu0 %843 }
 0x17c   : > { %24543 = vst [vmem:[#allocation61_spill] sm:$0xff] %v19475_v23  ;;  %24544 = vst [vmem:[#allocation62_spill] sm:$0xff] %v19477_v28  ;;  %1375 = vperm.xlu1 %18039, %v19159_v34   ;;  %1370 = vperm.xlu0 %18038, %v19148_v31   ;;  %v15048_v28 = vld [vmem:[%s19039_s0 + $0xc8] sm:$0xff]  ;;  %v15047_v23 = vld [vmem:[%s19039_s0 + $0xc0] sm:$0xff] }
 0x17f   : > { %v19481_v25 = vpop.permute.xlu1 %858  ;;  %v19483_v30 = vpop.permute.xlu0 %853 }
 0x180   : > { %24545 = vst [vmem:[#allocation63_spill] sm:$0xff] %v19481_v25  ;;  %24546 = vst [vmem:[#allocation64_spill] sm:$0xff] %v19483_v30  ;;  %1385 = vperm.xlu1 %18039, %v19193_v36   ;;  %1380 = vperm.xlu0 %18038, %v19156_v33   ;;  %v15046_v30 = vld [vmem:[%s19039_s0 + $0xb8] sm:$0xff] }
 0x183   : > { %v19487_v27 = vpop.permute.xlu1 %868  ;;  %v19489_v32 = vpop.permute.xlu0 %863 }
 0x184   : > { %24547 = vst [vmem:[#allocation65_spill] sm:$0xff] %v19487_v27  ;;  %24548 = vst [vmem:[#allocation66_spill] sm:$0xff] %v19489_v32  ;;  %1395 = vperm.xlu1 %18039, %v19359_v61   ;;  %1390 = vperm.xlu0 %18038, %v19344_v2  }
 0x187   : > { %v19493_v29 = vpop.permute.xlu1 %878  ;;  %v19495_v34 = vpop.permute.xlu0 %873 }
 0x188   : > { %24549 = vst [vmem:[#allocation67_spill] sm:$0xff] %v19493_v29  ;;  %24550 = vst [vmem:[#allocation68_spill] sm:$0xff] %v19495_v34  ;;  %1405 = vperm.xlu1 %18039, %v19371_v0   ;;  %1400 = vperm.xlu0 %18038, %v19356_v62  }
 0x18b   : > { %v19499_v31 = vpop.permute.xlu1 %888  ;;  %v19501_v36 = vpop.permute.xlu0 %883 }
 0x18c   : > { %24551 = vst [vmem:[#allocation69_spill] sm:$0xff] %v19499_v31  ;;  %24552 = vst [vmem:[#allocation70_spill] sm:$0xff] %v19501_v36  ;;  %1415 = vperm.xlu1 %18039, %v19383_v60   ;;  %1410 = vperm.xlu0 %18038, %v19368_v63  }
 0x18f   : > { %v19505_v33 = vpop.permute.xlu1 %898  ;;  %v19507_v32 = vpop.permute.xlu0 %893 }
 0x190   : > { %24553 = vst [vmem:[#allocation71_spill] sm:$0xff] %v19505_v33  ;;  %24554 = vst [vmem:[#allocation72_spill] sm:$0xff] %v19507_v32  ;;  %1425 = vperm.xlu1 %18039, %v19395_v58   ;;  %1420 = vperm.xlu0 %18038, %v19380_v59  }
 0x193   : > { %v19511_v34 = vpop.permute.xlu1 %908  ;;  %v19513_v29 = vpop.permute.xlu0 %903 }
 0x194   : > { %24555 = vst [vmem:[#allocation73_spill] sm:$0xff] %v19511_v34  ;;  %24556 = vst [vmem:[#allocation74_spill] sm:$0xff] %v19513_v29  ;;  %1435 = vperm.xlu1 %18039, %v19407_v56   ;;  %1430 = vperm.xlu0 %18038, %v19392_v57   ;;  %v19530_v29 = vld [vmem:[%s19039_s0 + $0x1a0] sm:$0xff] }
 0x197   : > { %v19517_v36 = vpop.permute.xlu1 %918  ;;  %v19519_v33 = vpop.permute.xlu0 %913 }
 0x198   : > { %24557 = vst [vmem:[#allocation75_spill] sm:$0xff] %v19517_v36  ;;  %24558 = vst [vmem:[#allocation76_spill] sm:$0xff] %v19519_v33  ;;  %1445 = vperm.xlu1 %18039, %v19419_v3   ;;  %1440 = vperm.xlu0 %18038, %v19404_v55   ;;  %v15043_v36 = vld [vmem:[%s19039_s0 + $0xa0] sm:$0xff] }
 0x19b   : > { %v19523_v32 = vpop.permute.xlu1 %928  ;;  %v19525_v34 = vpop.permute.xlu0 %923 }
 0x19c   : > { %24559 = vst [vmem:[#allocation77_spill] sm:$0xff] %v19523_v32  ;;  %24560 = vst [vmem:[#allocation78_spill] sm:$0xff] %v19525_v34  ;;  %1455 = vperm.xlu1 %18039, %v19431_v51   ;;  %1450 = vperm.xlu0 %18038, %v19416_v54   ;;  %v15044_v32 = vld [vmem:[%s19039_s0 + $0xa8] sm:$0xff] }
 0x19f   : > { %v19532_v31 = vpop.permute.xlu1 %938  ;;  %v19534_v33 = vpop.permute.xlu0 %933 }
 0x1a0   : > { %24561 = vst [vmem:[#allocation79_spill] sm:$0xff] %v19532_v31  ;;  %24562 = vst [vmem:[#allocation80_spill] sm:$0xff] %v19534_v33  ;;  %1465 = vperm.xlu1 %18039, %v19530_v29   ;;  %1460 = vperm.xlu0 %18038, %v19428_v17   ;;  %v15045_v31 = vld [vmem:[%s19039_s0 + $0xb0] sm:$0xff] }
 0x1a3   : > { %v19540_v27 = vpop.permute.xlu1 %1052  ;;  %v19542_v34 = vpop.permute.xlu0 %1047 }
 0x1a4   : > { %24563 = vst [vmem:[#allocation81_spill] sm:$0xff] %v19540_v27  ;;  %24564 = vst [vmem:[#allocation82_spill] sm:$0xff] %v19542_v34  ;;  %1578 = vperm.xlu1 %18039, %v15044_v32   ;;  %1573 = vperm.xlu0 %18038, %v15043_v36   ;;  %v15050_v32 = vld [vmem:[%s19039_s0 + $0xd8] sm:$0xff]  ;;  %v15049_v36 = vld [vmem:[%s19039_s0 + $0xd0] sm:$0xff] }
 0x1a7   : > { %v19546_v25 = vpop.permute.xlu1 %1062  ;;  %v19548_v33 = vpop.permute.xlu0 %1057 }
 0x1a8   : > { %24565 = vst [vmem:[#allocation83_spill] sm:$0xff] %v19546_v25  ;;  %24566 = vst [vmem:[#allocation84_spill] sm:$0xff] %v19548_v33  ;;  %1588 = vperm.xlu1 %18039, %v15046_v30   ;;  %1583 = vperm.xlu0 %18038, %v15045_v31   ;;  %v15052_v30 = vld [vmem:[%s19039_s0 + $0xe8] sm:$0xff]  ;;  %v15051_v31 = vld [vmem:[%s19039_s0 + $0xe0] sm:$0xff] }
 0x1ab   : > { %v19552_v26 = vpop.permute.xlu1 %1072  ;;  %v19554_v27 = vpop.permute.xlu0 %1067 }
 0x1ac   : > { %24567 = vst [vmem:[#allocation85_spill] sm:$0xff] %v19552_v26  ;;  %24568 = vst [vmem:[#allocation86_spill] sm:$0xff] %v19554_v27  ;;  %1598 = vperm.xlu1 %18039, %v15048_v28   ;;  %1593 = vperm.xlu0 %18038, %v15047_v23   ;;  %v15054_v23 = vld [vmem:[%s19039_s0 + $0xf8] sm:$0xff]  ;;  %v15053_v28 = vld [vmem:[%s19039_s0 + $0xf0] sm:$0xff] }
 0x1af   : > { %v19558_v34 = vpop.permute.xlu1 %1082  ;;  %v19560_v25 = vpop.permute.xlu0 %1077 }
 0x1b0   : > { %24569 = vst [vmem:[#allocation87_spill] sm:$0xff] %v19558_v34  ;;  %24570 = vst [vmem:[#allocation88_spill] sm:$0xff] %v19560_v25  ;;  %1608 = vperm.xlu1 %18039, %v15050_v32   ;;  %1603 = vperm.xlu0 %18038, %v15049_v36   ;;  %v15056_v25 = vld [vmem:[%s19039_s0 + $0x108] sm:$0xff]  ;;  %v15055_v32 = vld [vmem:[%s19039_s0 + $0x100] sm:$0xff] }
 0x1b3   : > { %v19564_v33 = vpop.permute.xlu1 %1092  ;;  %v19566_v26 = vpop.permute.xlu0 %1087 }
 0x1b4   : > { %24571 = vst [vmem:[#allocation89_spill] sm:$0xff] %v19564_v33  ;;  %24572 = vst [vmem:[#allocation90_spill] sm:$0xff] %v19566_v26  ;;  %1618 = vperm.xlu1 %18039, %v15052_v30   ;;  %1613 = vperm.xlu0 %18038, %v15051_v31   ;;  %v15057_v33 = vld [vmem:[%s19039_s0 + $0x110] sm:$0xff] }
 0x1b7   : > { %v19570_v27 = vpop.permute.xlu1 %1102  ;;  %v19572_v34 = vpop.permute.xlu0 %1097 }
 0x1b8   : > { %24573 = vst [vmem:[#allocation91_spill] sm:$0xff] %v19570_v27  ;;  %24574 = vst [vmem:[#allocation92_spill] sm:$0xff] %v19572_v34  ;;  %1628 = vperm.xlu1 %18039, %v15054_v23   ;;  %1623 = vperm.xlu0 %18038, %v15053_v28  }
 0x1bb   : > { %v19576_v36 = vpop.permute.xlu1 %1112  ;;  %v19578_v21 = vpop.permute.xlu0 %1107 }
 0x1bc   : > { %24575 = vst [vmem:[#allocation93_spill] sm:$0xff] %v19576_v36  ;;  %24576 = vst [vmem:[#allocation94_spill] sm:$0xff] %v19578_v21  ;;  %1638 = vperm.xlu1 %18039, %v15056_v25   ;;  %1633 = vperm.xlu0 %18038, %v15055_v32  }
 0x1bf   : > { %v19581_v26 = vpop.permute.xlu1 %1122  ;;  %v19583_v30 = vpop.permute.xlu0 %1117 }
 0x1c0   : > { %24577 = vst [vmem:[#allocation95_spill] sm:$0xff] %v19581_v26  ;;  %24578 = vst [vmem:[#allocation96_spill] sm:$0xff] %v19583_v30  ;;  %1648 = vperm.xlu1 %18039, %v19287_v4   ;;  %1643 = vperm.xlu0 %18038, %v15057_v33  }
 0x1c3   : > { %v19586_v31 = vpop.permute.xlu1 %1132  ;;  %v19588_v23 = vpop.permute.xlu0 %1127 }
 0x1c4   : > { %24579 = vst [vmem:[#allocation97_spill] sm:$0xff] %v19586_v31  ;;  %24580 = vst [vmem:[#allocation98_spill] sm:$0xff] %v19588_v23  ;;  %1658 = vperm.xlu1 %18039, %v19356_v62   ;;  %1653 = vperm.xlu0 %18038, %v19359_v61  }
 0x1c7   : > { %v19592_v28 = vpop.permute.xlu1 %1142  ;;  %v19594_v25 = vpop.permute.xlu0 %1137 }
 0x1c8   : > { %24581 = vst [vmem:[#allocation99_spill] sm:$0xff] %v19592_v28  ;;  %24582 = vst [vmem:[#allocation100_spill] sm:$0xff] %v19594_v25  ;;  %1668 = vperm.xlu1 %18039, %v19368_v63   ;;  %1663 = vperm.xlu0 %18038, %v19371_v0  }
 0x1cb   : > { %v19598_v32 = vpop.permute.xlu1 %1152  ;;  %v19600_v4 = vpop.permute.xlu0 %1147 }
 0x1cc   : > { %24583 = vst [vmem:[#allocation101_spill] sm:$0xff] %v19598_v32  ;;  %24584 = vst [vmem:[#allocation102_spill] sm:$0xff] %v19600_v4  ;;  %1678 = vperm.xlu1 %18039, %v19380_v59   ;;  %1673 = vperm.xlu0 %18038, %v19383_v60  }
 0x1cf   : > { %v19604_v33 = vpop.permute.xlu1 %1162  ;;  %v19606_v23 = vpop.permute.xlu0 %1157 }
 0x1d0   : > { %24585 = vst [vmem:[#allocation103_spill] sm:$0xff] %v19604_v33  ;;  %24586 = vst [vmem:[#allocation104_spill] sm:$0xff] %v19606_v23  ;;  %1688 = vperm.xlu1 %18039, %v19392_v57   ;;  %1683 = vperm.xlu0 %18038, %v19395_v58  }
 0x1d3   : > { %v19610_v25 = vpop.permute.xlu1 %1172  ;;  %v19612_v28 = vpop.permute.xlu0 %1167 }
 0x1d4   : > { %24587 = vst [vmem:[#allocation105_spill] sm:$0xff] %v19610_v25  ;;  %24588 = vst [vmem:[#allocation106_spill] sm:$0xff] %v19612_v28  ;;  %1698 = vperm.xlu1 %18039, %v19404_v55   ;;  %1693 = vperm.xlu0 %18038, %v19407_v56   ;;  %v19629_v28 = vld [vmem:[%s19039_s0 + $0x1a8] sm:$0xff] }
 0x1d7   : > { %v19616_v4 = vpop.permute.xlu1 %1182  ;;  %v19618_v32 = vpop.permute.xlu0 %1177 }
 0x1d8   : > { %24589 = vst [vmem:[#allocation107_spill] sm:$0xff] %v19616_v4  ;;  %24590 = vst [vmem:[#allocation108_spill] sm:$0xff] %v19618_v32  ;;  %1708 = vperm.xlu1 %18039, %v19416_v54   ;;  %1703 = vperm.xlu0 %18038, %v19419_v3  }
 0x1db   : > { %v19622_v23 = vpop.permute.xlu1 %1192  ;;  %v19624_v33 = vpop.permute.xlu0 %1187 }
 0x1dc   : > { %24591 = vst [vmem:[#allocation109_spill] sm:$0xff] %v19622_v23  ;;  %24592 = vst [vmem:[#allocation110_spill] sm:$0xff] %v19624_v33  ;;  %1718 = vperm.xlu1 %18039, %v19428_v17   ;;  %1713 = vperm.xlu0 %18038, %v19431_v51  }
 0x1df   : > { %v19631_v25 = vpop.permute.xlu1 %1202  ;;  %v19633_v31 = vpop.permute.xlu0 %1197 }
 0x1e0   : > { %24593 = vst [vmem:[#allocation111_spill] sm:$0xff] %v19631_v25  ;;  %24594 = vst [vmem:[#allocation112_spill] sm:$0xff] %v19633_v31  ;;  %1728 = vperm.xlu1 %18039, %v19629_v28   ;;  %1723 = vperm.xlu0 %18038, %v19530_v29  }
 0x1e3   : > { %v19637_v32 = vpop.permute.xlu1 %1315  ;;  %v19639_v4 = vpop.permute.xlu0 %1310 }
 0x1e4   : > { %24595 = vst [vmem:[#allocation113_spill] sm:$0xff] %v19637_v32  ;;  %24596 = vst [vmem:[#allocation114_spill] sm:$0xff] %v19639_v4  ;;  %1842 = vperm.xlu1 %18039, %v19344_v2   ;;  %1837 = vperm.xlu0 %18038, %v19347_v1   ;;  %v19788_v32 = vld [vmem:[%s19039_s0 + $0x140] sm:$0xff] }
 0x1e7   : > { %v19643_v33 = vpop.permute.xlu1 %1325  ;;  %v19645_v23 = vpop.permute.xlu0 %1320 }
 0x1e8   : > { %24597 = vst [vmem:[#allocation115_spill] sm:$0xff] %v19643_v33  ;;  %24598 = vst [vmem:[#allocation116_spill] sm:$0xff] %v19645_v23  ;;  %1852 = vperm.xlu1 %18039, %v19356_v62   ;;  %1847 = vperm.xlu0 %18038, %v19359_v61  }
 0x1eb   : > { %v19649_v30 = vpop.permute.xlu1 %1335  ;;  %v19651_v26 = vpop.permute.xlu0 %1330 }
 0x1ec   : > { %24599 = vst [vmem:[#allocation117_spill] sm:$0xff] %v19649_v30  ;;  %24600 = vst [vmem:[#allocation118_spill] sm:$0xff] %v19651_v26  ;;  %1862 = vperm.xlu1 %18039, %v19368_v63   ;;  %1857 = vperm.xlu0 %18038, %v19371_v0  }
 0x1ef   : > { %v19655_v4 = vpop.permute.xlu1 %1345  ;;  %v19657_v2 = vpop.permute.xlu0 %1340 }
 0x1f0   : > { %24601 = vst [vmem:[#allocation119_spill] sm:$0xff] %v19655_v4  ;;  %24602 = vst [vmem:[#allocation120_spill] sm:$0xff] %v19657_v2  ;;  %1872 = vperm.xlu1 %18039, %v19380_v59   ;;  %1867 = vperm.xlu0 %18038, %v19383_v60  }
 0x1f3   : > { %v19661_v1 = vpop.permute.xlu1 %1355  ;;  %v19663_v61 = vpop.permute.xlu0 %1350 }
 0x1f4   : > { %24603 = vst [vmem:[#allocation121_spill] sm:$0xff] %v19661_v1  ;;  %24604 = vst [vmem:[#allocation122_spill] sm:$0xff] %v19663_v61  ;;  %1882 = vperm.xlu1 %18039, %v19392_v57   ;;  %1877 = vperm.xlu0 %18038, %v19395_v58  }
 0x1f7   : > { %v19667_v62 = vpop.permute.xlu1 %1365  ;;  %v19669_v63 = vpop.permute.xlu0 %1360 }
 0x1f8   : > { %24605 = vst [vmem:[#allocation123_spill] sm:$0xff] %v19667_v62  ;;  %24606 = vst [vmem:[#allocation124_spill] sm:$0xff] %v19669_v63  ;;  %1892 = vperm.xlu1 %18039, %v19404_v55   ;;  %1887 = vperm.xlu0 %18038, %v19407_v56   ;;  %v19686_v55 = vld [vmem:[%s19039_s0 + $0x1b8] sm:$0xff]  ;;  %v15094_v56 = vld [vmem:[%s19039_s0 + $0x1b0] sm:$0xff] }
 0x1fb   : > { %v19673_v59 = vpop.permute.xlu1 %1375  ;;  %v19675_v60 = vpop.permute.xlu0 %1370 }
 0x1fc   : > { %24607 = vst [vmem:[#allocation125_spill] sm:$0xff] %v19673_v59  ;;  %24608 = vst [vmem:[#allocation126_spill] sm:$0xff] %v19675_v60  ;;  %1902 = vperm.xlu1 %18039, %v19416_v54   ;;  %1897 = vperm.xlu0 %18038, %v19419_v3   ;;  %v19695_v54 = vld [vmem:[%s19039_s0 + $0x1c8] sm:$0xff]  ;;  %v19698_v3 = vld [vmem:[%s19039_s0 + $0x1c0] sm:$0xff] }
 0x1ff   : > { %v19679_v57 = vpop.permute.xlu1 %1385  ;;  %v19681_v58 = vpop.permute.xlu0 %1380 }
 0x200   : > { %24609 = vst [vmem:[#allocation127_spill] sm:$0xff] %v19679_v57  ;;  %24610 = vst [vmem:[#allocation128_spill] sm:$0xff] %v19681_v58  ;;  %1912 = vperm.xlu1 %18039, %v19428_v17   ;;  %1907 = vperm.xlu0 %18038, %v19431_v51   ;;  %v19707_v51 = vld [vmem:[%s19039_s0 + $0x1d8] sm:$0xff] }
 0x203   : > { %v19689_v0 = vpop.permute.xlu1 %1395  ;;  %v19691_v60 = vpop.permute.xlu0 %1390 }
 0x204   : > { %24611 = vst [vmem:[#allocation129_spill] sm:$0xff] %v19689_v0  ;;  %24612 = vst [vmem:[#allocation130_spill] sm:$0xff] %v19691_v60  ;;  %1922 = vperm.xlu1 %18039, %v19686_v55   ;;  %1917 = vperm.xlu0 %18038, %v15094_v56   ;;  %v19710_v60 = vld [vmem:[%s19039_s0 + $0x1d0] sm:$0xff] }
 0x207   : > { %v19700_v58 = vpop.permute.xlu1 %1405  ;;  %v19702_v17 = vpop.permute.xlu0 %1400 }
 0x208   : > { %24613 = vst [vmem:[#allocation131_spill] sm:$0xff] %v19700_v58  ;;  %24614 = vst [vmem:[#allocation132_spill] sm:$0xff] %v19702_v17  ;;  %1932 = vperm.xlu1 %18039, %v19695_v54   ;;  %1927 = vperm.xlu0 %18038, %v19698_v3   ;;  %v19719_v17 = vld [vmem:[%s19039_s0 + $0x1e8] sm:$0xff]  ;;  %v19722_v58 = vld [vmem:[%s19039_s0 + $0x1e0] sm:$0xff] }
 0x20b   : > { %v19712_v0 = vpop.permute.xlu1 %1415  ;;  %v19714_v56 = vpop.permute.xlu0 %1410 }
 0x20c   : > { %24615 = vst [vmem:[#allocation133_spill] sm:$0xff] %v19712_v0  ;;  %24616 = vst [vmem:[#allocation134_spill] sm:$0xff] %v19714_v56  ;;  %1942 = vperm.xlu1 %18039, %v19707_v51   ;;  %1937 = vperm.xlu0 %18038, %v19710_v60   ;;  %v19731_v56 = vld [vmem:[%s19039_s0 + $0x1f8] sm:$0xff]  ;;  %v19734_v0 = vld [vmem:[%s19039_s0 + $0x1f0] sm:$0xff] }
 0x20f   : > { %v19724_v57 = vpop.permute.xlu1 %1425  ;;  %v19726_v59 = vpop.permute.xlu0 %1420 }
 0x210   : > { %24617 = vst [vmem:[#allocation135_spill] sm:$0xff] %v19724_v57  ;;  %24618 = vst [vmem:[#allocation136_spill] sm:$0xff] %v19726_v59  ;;  %1952 = vperm.xlu1 %18039, %v19719_v17   ;;  %1947 = vperm.xlu0 %18038, %v19722_v58   ;;  %v19743_v59 = vld [vmem:[%s19039_s0 + $0x208] sm:$0xff]  ;;  %v19746_v57 = vld [vmem:[%s19039_s0 + $0x200] sm:$0xff] }
 0x213   : > { %v19736_v63 = vpop.permute.xlu1 %1435  ;;  %v19738_v62 = vpop.permute.xlu0 %1430 }
 0x214   : > { %24619 = vst [vmem:[#allocation137_spill] sm:$0xff] %v19736_v63  ;;  %24620 = vst [vmem:[#allocation138_spill] sm:$0xff] %v19738_v62  ;;  %1962 = vperm.xlu1 %18039, %v19731_v56   ;;  %1957 = vperm.xlu0 %18038, %v19734_v0   ;;  %v19755_v62 = vld [vmem:[%s19039_s0 + $0x218] sm:$0xff]  ;;  %v19758_v63 = vld [vmem:[%s19039_s0 + $0x210] sm:$0xff] }
 0x217   : > { %v19748_v61 = vpop.permute.xlu1 %1445  ;;  %v19750_v1 = vpop.permute.xlu0 %1440 }
 0x218   : > { %24621 = vst [vmem:[#allocation139_spill] sm:$0xff] %v19748_v61  ;;  %24622 = vst [vmem:[#allocation140_spill] sm:$0xff] %v19750_v1  ;;  %1972 = vperm.xlu1 %18039, %v19743_v59   ;;  %1967 = vperm.xlu0 %18038, %v19746_v57   ;;  %v19767_v1 = vld [vmem:[%s19039_s0 + $0x228] sm:$0xff]  ;;  %v19770_v61 = vld [vmem:[%s19039_s0 + $0x220] sm:$0xff] }
 0x21b   : > { %v19760_v2 = vpop.permute.xlu1 %1455  ;;  %v19762_v4 = vpop.permute.xlu0 %1450 }
 0x21c   : > { %24623 = vst [vmem:[#allocation141_spill] sm:$0xff] %v19760_v2  ;;  %24624 = vst [vmem:[#allocation142_spill] sm:$0xff] %v19762_v4  ;;  %1982 = vperm.xlu1 %18039, %v19755_v62   ;;  %1977 = vperm.xlu0 %18038, %v19758_v63   ;;  %v19779_v4 = vld [vmem:[%s19039_s0 + $0x130] sm:$0xff]  ;;  %v15113_v2 = vld [vmem:[%s19039_s0 + $0x128] sm:$0xff] }
 0x21f   : > { %v19772_v26 = vpop.permute.xlu1 %1465  ;;  %v19774_v30 = vpop.permute.xlu0 %1460 }
 0x220   : > { %24625 = vst [vmem:[#allocation143_spill] sm:$0xff] %v19772_v26  ;;  %24626 = vst [vmem:[#allocation144_spill] sm:$0xff] %v19774_v30  ;;  %1992 = vperm.xlu1 %18039, %v19767_v1   ;;  %1987 = vperm.xlu0 %18038, %v19770_v61   ;;  %v19791_v30 = vld [vmem:[%s19039_s0 + $0x138] sm:$0xff] }
 0x223   : > { %v19782_v23 = vpop.permute.xlu1 %1578  ;;  %v19784_v33 = vpop.permute.xlu0 %1573 }
 0x224   : > { %24627 = vst [vmem:[#allocation145_spill] sm:$0xff] %v19782_v23  ;;  %24628 = vst [vmem:[#allocation146_spill] sm:$0xff] %v19784_v33  ;;  %2105 = vperm.xlu1 %18039, %v19779_v4   ;;  %2100 = vperm.xlu0 %18038, %v15113_v2   ;;  %v19800_v23 = vld [vmem:[%s19039_s0 + $0x150] sm:$0xff]  ;;  %v19803_v33 = vld [vmem:[%s19039_s0 + $0x148] sm:$0xff] }
 0x227   : > { %v19793_v26 = vpop.permute.xlu1 %1588  ;;  %v19795_v31 = vpop.permute.xlu0 %1583 }
 0x228   : > { %24629 = vst [vmem:[#allocation147_spill] sm:$0xff] %v19793_v26  ;;  %24630 = vst [vmem:[#allocation148_spill] sm:$0xff] %v19795_v31  ;;  %2115 = vperm.xlu1 %18039, %v19788_v32   ;;  %2110 = vperm.xlu0 %18038, %v19791_v30   ;;  %v19812_v31 = vld [vmem:[%s19039_s0 + $0x160] sm:$0xff]  ;;  %v19815_v26 = vld [vmem:[%s19039_s0 + $0x158] sm:$0xff] }
 0x22b   : > { %v19805_v25 = vpop.permute.xlu1 %1598  ;;  %v19807_v2 = vpop.permute.xlu0 %1593 }
 0x22c   : > { %24631 = vst [vmem:[#allocation149_spill] sm:$0xff] %v19805_v25  ;;  %24632 = vst [vmem:[#allocation150_spill] sm:$0xff] %v19807_v2  ;;  %2125 = vperm.xlu1 %18039, %v19800_v23   ;;  %2120 = vperm.xlu0 %18038, %v19803_v33   ;;  %v19824_v2 = vld [vmem:[%s19039_s0 + $0x170] sm:$0xff]  ;;  %v19827_v25 = vld [vmem:[%s19039_s0 + $0x168] sm:$0xff] }
 0x22f   : > { %v19817_v21 = vpop.permute.xlu1 %1608  ;;  %v19819_v36 = vpop.permute.xlu0 %1603 }
 0x230   : > { %24633 = vst [vmem:[#allocation151_spill] sm:$0xff] %v19817_v21  ;;  %24634 = vst [vmem:[#allocation152_spill] sm:$0xff] %v19819_v36  ;;  %2135 = vperm.xlu1 %18039, %v19812_v31   ;;  %2130 = vperm.xlu0 %18038, %v19815_v26   ;;  %v19836_v21 = vld [vmem:[%s19039_s0 + $0x180] sm:$0xff]  ;;  %v19839_v36 = vld [vmem:[%s19039_s0 + $0x178] sm:$0xff] }
 0x233   : > { %v19829_v34 = vpop.permute.xlu1 %1618  ;;  %v19831_v27 = vpop.permute.xlu0 %1613 }
 0x234   : > { %24635 = vst [vmem:[#allocation153_spill] sm:$0xff] %v19829_v34  ;;  %24636 = vst [vmem:[#allocation154_spill] sm:$0xff] %v19831_v27  ;;  %2145 = vperm.xlu1 %18039, %v19824_v2   ;;  %2140 = vperm.xlu0 %18038, %v19827_v25   ;;  %v19848_v34 = vld [vmem:[%s19039_s0 + $0x190] sm:$0xff] }
 0x237   : > { %v19841_v24 = vpop.permute.xlu1 %1628  ;;  %v19843_v19 = vpop.permute.xlu0 %1623 }
 0x238   : > { %24637 = vst [vmem:[#allocation155_spill] sm:$0xff] %v19841_v24  ;;  %24638 = vst [vmem:[#allocation156_spill] sm:$0xff] %v19843_v19  ;;  %2155 = vperm.xlu1 %18039, %v19836_v21   ;;  %2150 = vperm.xlu0 %18038, %v19839_v36  }
 0x23b   : > { %v19853_v27 = vpop.permute.xlu1 %1638  ;;  %v19855_v20 = vpop.permute.xlu0 %1633 }
 0x23c   : > { %24639 = vst [vmem:[#allocation157_spill] sm:$0xff] %v19853_v27  ;;  %24640 = vst [vmem:[#allocation158_spill] sm:$0xff] %v19855_v20  ;;  %2165 = vperm.xlu1 %18039, %v19848_v34   ;;  %2160 = vperm.xlu0 %18038, %v19851_v22  }
 0x23f   : > { %v19862_v24 = vpop.permute.xlu1 %1648  ;;  %v19864_v19 = vpop.permute.xlu0 %1643 }
 0x240   : > { %24641 = vst [vmem:[#allocation159_spill] sm:$0xff] %v19862_v24  ;;  %24642 = vst [vmem:[#allocation160_spill] sm:$0xff] %v19864_v19  ;;  %2175 = vperm.xlu1 %18039, %v19530_v29   ;;  %2170 = vperm.xlu0 %18038, %v19860_v35  }
 0x243   : > { %v19868_v16 = vpop.permute.xlu1 %1658  ;;  %v19870_v14 = vpop.permute.xlu0 %1653 }
 0x244   : > { %24643 = vst [vmem:[#allocation161_spill] sm:$0xff] %v19868_v16  ;;  %24644 = vst [vmem:[#allocation162_spill] sm:$0xff] %v19870_v14  ;;  %2185 = vperm.xlu1 %18039, %v19698_v3   ;;  %2180 = vperm.xlu0 %18038, %v19686_v55  }
 0x247   : > { %v19874_v20 = vpop.permute.xlu1 %1668  ;;  %v19876_v27 = vpop.permute.xlu0 %1663 }
 0x248   : > { %24645 = vst [vmem:[#allocation163_spill] sm:$0xff] %v19874_v20  ;;  %24646 = vst [vmem:[#allocation164_spill] sm:$0xff] %v19876_v27  ;;  %2195 = vperm.xlu1 %18039, %v19710_v60   ;;  %2190 = vperm.xlu0 %18038, %v19695_v54  }
 0x24b   : > { %v19880_v19 = vpop.permute.xlu1 %1678  ;;  %v19882_v29 = vpop.permute.xlu0 %1673 }
 0x24c   : > { %24647 = vst [vmem:[#allocation165_spill] sm:$0xff] %v19880_v19  ;;  %24648 = vst [vmem:[#allocation166_spill] sm:$0xff] %v19882_v29  ;;  %2205 = vperm.xlu1 %18039, %v19722_v58   ;;  %2200 = vperm.xlu0 %18038, %v19707_v51  }
 0x24f   : > { %v19886_v14 = vpop.permute.xlu1 %1688  ;;  %v19888_v55 = vpop.permute.xlu0 %1683 }
 0x250   : > { %24649 = vst [vmem:[#allocation167_spill] sm:$0xff] %v19886_v14  ;;  %24650 = vst [vmem:[#allocation168_spill] sm:$0xff] %v19888_v55  ;;  %2215 = vperm.xlu1 %18039, %v19734_v0   ;;  %2210 = vperm.xlu0 %18038, %v19719_v17  }
 0x253   : > { %v19892_v27 = vpop.permute.xlu1 %1698  ;;  %v19894_v20 = vpop.permute.xlu0 %1693 }
 0x254   : > { %24651 = vst [vmem:[#allocation169_spill] sm:$0xff] %v19892_v27  ;;  %24652 = vst [vmem:[#allocation170_spill] sm:$0xff] %v19894_v20  ;;  %2225 = vperm.xlu1 %18039, %v19746_v57   ;;  %2220 = vperm.xlu0 %18038, %v19731_v56   ;;  %v19911_v20 = vld [vmem:[%s19039_s0 + $0x230] sm:$0xff] }
 0x255   : > { %24657 = vst [vmem:[#allocation175_spill] sm:$0xff] %v19911_v20 }
 0x257   : > { %v19898_v29 = vpop.permute.xlu1 %1708  ;;  %v19900_v19 = vpop.permute.xlu0 %1703 }
 0x258   : > { %24653 = vst [vmem:[#allocation171_spill] sm:$0xff] %v19898_v29  ;;  %24654 = vst [vmem:[#allocation172_spill] sm:$0xff] %v19900_v19  ;;  %2235 = vperm.xlu1 %18039, %v19758_v63   ;;  %2230 = vperm.xlu0 %18038, %v19743_v59  }
 0x25b   : > { %v19904_v55 = vpop.permute.xlu1 %1718  ;;  %v19906_v14 = vpop.permute.xlu0 %1713 }
 0x25c   : > { %24655 = vst [vmem:[#allocation173_spill] sm:$0xff] %v19904_v55  ;;  %24656 = vst [vmem:[#allocation174_spill] sm:$0xff] %v19906_v14  ;;  %2245 = vperm.xlu1 %18039, %v19770_v61   ;;  %2240 = vperm.xlu0 %18038, %v19755_v62  }
 0x25f   : > { %v19913_v27 = vpop.permute.xlu1 %1728  ;;  %v19915_v16 = vpop.permute.xlu0 %1723 }
 0x260   : > { %2255 = vperm.xlu1 %18039, %v19911_v20   ;;  %2250 = vperm.xlu0 %18038, %v19767_v1  }
 0x263   : > { %v19919_v19 = vpop.permute.xlu1 %1842  ;;  %v19921_v29 = vpop.permute.xlu0 %1837 }
 0x264   : > { %24658 = vst [vmem:[#allocation176_spill] sm:$0xff] %v19921_v29  ;;  %2368 = vperm.xlu1 %18039, %v19791_v30   ;;  %2363 = vperm.xlu0 %18038, %v19779_v4  }
 0x267   : > { %v19925_v14 = vpop.permute.xlu1 %1852  ;;  %v19927_v55 = vpop.permute.xlu0 %1847 }
 0x268   : > { %2378 = vperm.xlu1 %18039, %v19803_v33   ;;  %2373 = vperm.xlu0 %18038, %v19788_v32  }
 0x26b   : > { %v19931_v24 = vpop.permute.xlu1 %1862  ;;  %v19933_v20 = vpop.permute.xlu0 %1857 }
 0x26c   : > { %24659 = vst [vmem:[#allocation177_spill] sm:$0xff] %v19931_v24  ;;  %24660 = vst [vmem:[#allocation178_spill] sm:$0xff] %v19933_v20  ;;  %2388 = vperm.xlu1 %18039, %v19815_v26   ;;  %2383 = vperm.xlu0 %18038, %v19800_v23   ;;  %v19952_v26 = vld [vmem:[%s24665_s20] ss:$0 sm:$0xff]  ;;  %v24676_v24 = vld [vmem:[#allocation30_spill] sm:$0xff] }
 0x26f   : > { %v19937_v29 = vpop.permute.xlu1 %1872  ;;  %v19939_v30 = vpop.permute.xlu0 %1867 }
 0x270   : > { %24661 = vst [vmem:[#allocation179_spill] sm:$0xff] %v19937_v29  ;;  %24662 = vst [vmem:[#allocation180_spill] sm:$0xff] %v19939_v30  ;;  %2398 = vperm.xlu1 %18039, %v19827_v25   ;;  %2393 = vperm.xlu0 %18038, %v19812_v31   ;;  %v421_v31 = vmul.f32 %v19952_v26, %v19197_v37  ;;  %v19967_v25 = vld [vmem:[%s24665_s20 + $0x1] ss:$0 sm:$0xff]  ;;  %v423_v37 = vmul.f32 %v19952_v26, %v19211_v42  ;;  %v24674_v30 = vld [vmem:[#allocation28_spill] sm:$0xff] }
 0x271   : > { %v683_v42 = vmul.f32 %v19967_v25, %v19295_v7  ;;  %v684_v7 = vmul.f32 %v19967_v25, %v19303_v10  ;;  %v449_v10 = vmul.f32 %v19952_v26, %v19291_v6  ;;  %v24675_v29 = vld [vmem:[#allocation29_spill] sm:$0xff]  ;;  %v692_v6 = vmul.f32 %v19967_v25, %v24676_v24 }
 0x273   : > { %v19943_v4 = vpop.permute.xlu1 %1882  ;;  %v19945_v33 = vpop.permute.xlu0 %1877 }
 0x274   : > { %24663 = vst [vmem:[#allocation181_spill] sm:$0xff] %v19943_v4  ;;  %24664 = vst [vmem:[#allocation182_spill] sm:$0xff] %v19945_v33  ;;  %2408 = vperm.xlu1 %18039, %v19839_v36   ;;  %2403 = vperm.xlu0 %18038, %v19824_v2   ;;  %v419_v36 = vmul.f32 %v19952_v26, %v19199_v38  ;;  %v422_v2 = vmul.f32 %v19952_v26, %v19203_v39  ;;  %v24673_v4 = vld [vmem:[#allocation27_spill] sm:$0xff] }
 0x275   : > { %v425_v33 = vmul.f32 %v19952_v26, %v19217_v44  ;;  %v428_v39 = vmul.f32 %v19952_v26, %v19221_v45  ;;  %v15162_v44 = vld [vmem:[%s19039_s0 + $0x1a0] sm:$0xff]  ;;  %v429_v45 = vmul.f32 %v19952_v26, %v19229_v48  ;;  %v686_v48 = vmul.f32 %v19967_v25, %v19309_v12 }
 0x277   : > { %v19954_v23 = vpop.permute.xlu1 %1892  ;;  %v19956_v32 = vpop.permute.xlu0 %1887  ;;  %v718_v20 = vadd.f32 %v686_v48, %v423_v37 }
 0x278   : > { %24666 = vst [vmem:[#allocation183_spill] sm:$0xff] %v19954_v23  ;;  %24667 = vst [vmem:[#allocation184_spill] sm:$0xff] %v19956_v32  ;;  %2418 = vperm.xlu1 %18039, %v19851_v22   ;;  %2413 = vperm.xlu0 %18038, %v19836_v21   ;;  %v420_v22 = vmul.f32 %v19952_v26, %v19205_v40  ;;  %v424_v21 = vmul.f32 %v19952_v26, %v19209_v41 }
 0x279   : > { %v426_v23 = vmul.f32 %v19952_v26, %v19215_v43  ;;  %v427_v40 = vmul.f32 %v19952_v26, %v19223_v46  ;;  %v430_v41 = vmul.f32 %v19952_v26, %v19227_v47  ;;  %v682_v43 = vmul.f32 %v19967_v25, %v19297_v8 }
 0x27a   : > { %v685_v46 = vmul.f32 %v19967_v25, %v19301_v9  ;;  %v434_v47 = vmul.f32 %v19952_v26, %v19240_v52  ;;  %v687_v8 = vmul.f32 %v19967_v25, %v19307_v11  ;;  %v450_v9 = vmul.f32 %v19952_v26, %v19289_v5 }
 0x27b   : > { %v19977_v32 = vpop.permute.xlu1 %1902  ;;  %v19979_v38 = vpop.permute.xlu0 %1897  ;;  %v689_v52 = vmul.f32 %v19967_v25, %v19313_v13  ;;  %v715_v11 = vadd.f32 %v683_v42, %v420_v22  ;;  %v714_v12 = vadd.f32 %v682_v43, %v419_v36  ;;  %v690_v5 = vmul.f32 %v19967_v25, %v24674_v30  ;;  %v24678_v42 = vld [vmem:[#allocation32_spill] sm:$0xff]  ;;  %v24681_v43 = vld [vmem:[#allocation49_spill] sm:$0xff] }
 0x27c   : > { %24668 = vst [vmem:[#allocation185_spill] sm:$0xff] %v19977_v32  ;;  %24669 = vst [vmem:[#allocation186_spill] sm:$0xff] %v19979_v38  ;;  %2428 = vperm.xlu1 %18039, %v19860_v35   ;;  %2423 = vperm.xlu0 %18038, %v19848_v34   ;;  %v432_v35 = vmul.f32 %v19952_v26, %v19233_v49  ;;  %v431_v34 = vmul.f32 %v19952_v26, %v19235_v50 }
 0x27d   : > { %v433_v50 = vmul.f32 %v19952_v26, %v19242_v53  ;;  %v717_v32 = vadd.f32 %v685_v46, %v422_v2  ;;  %v691_v53 = vmul.f32 %v19967_v25, %v24673_v4  ;;  %v693_v13 = vmul.f32 %v19967_v25, %v24675_v29  ;;  %v20048_v29 = vld [vmem:[%s24665_s20 + $0x2] ss:$0 sm:$0xff] }
 0x27e   : > { %v721_v2 = vadd.f32 %v689_v52, %v426_v23  ;;  %v694_v30 = vmul.f32 %v19967_v25, %v24678_v42  ;;  %v24680_v23 = vld [vmem:[#allocation34_spill] sm:$0xff]  ;;  %v713_v46 = vmul.f32 %v19967_v25, %v24681_v43  ;;  %v724_v42 = vadd.f32 %v692_v6, %v429_v45 }
 0x27f   : > { %v20014_v38 = vpop.permute.xlu1 %1912  ;;  %v20016_v49 = vpop.permute.xlu0 %1907  ;;  %v696_v37 = vmul.f32 %v19967_v25, %v24680_v23  ;;  %v725_v48 = vadd.f32 %v693_v13, %v430_v41  ;;  %v24682_v52 = vld [vmem:[#allocation50_spill] sm:$0xff]  ;;  %v24684_v41 = vld [vmem:[#allocation52_spill] sm:$0xff]  ;;  %v24685_v13 = vld [vmem:[#allocation53_spill] sm:$0xff] }
 0x280   : > { %24670 = vst [vmem:[#allocation187_spill] sm:$0xff] %v20014_v38  ;;  %24671 = vst [vmem:[#allocation188_spill] sm:$0xff] %v20016_v49  ;;  %2438 = vperm.xlu1 %18039, %v19629_v28   ;;  %2433 = vperm.xlu0 %18038, %v15162_v44   ;;  %v24672_v38 = vld [vmem:[#allocation26_spill] sm:$0xff]  ;;  %v716_v28 = vadd.f32 %v684_v7, %v421_v31  ;;  %v719_v44 = vadd.f32 %v687_v8, %v424_v21  ;;  %v24679_v31 = vld [vmem:[#allocation33_spill] sm:$0xff] }
 0x281   : > { %v688_v49 = vmul.f32 %v19967_v25, %v24672_v38  ;;  %v24677_v38 = vld [vmem:[#allocation31_spill] sm:$0xff]  ;;  %v697_v21 = vmul.f32 %v19967_v25, %v24679_v31  ;;  %v723_v7 = vadd.f32 %v691_v53, %v428_v39  ;;  %v722_v8 = vadd.f32 %v690_v5, %v427_v40  ;;  %v24686_v43 = vld [vmem:[#allocation54_spill] sm:$0xff] }
 0x282   : > { %v695_v4 = vmul.f32 %v19967_v25, %v24677_v38  ;;  %v712_v38 = vmul.f32 %v19967_v25, %v24682_v52  ;;  %v726_v40 = vadd.f32 %v694_v30, %v431_v34  ;;  %v947_v53 = vmul.f32 %v20048_v29, %v24684_v41  ;;  %v24688_v34 = vld [vmem:[#allocation56_spill] sm:$0xff] }
 0x283   : > { %v20037_v36 = vpop.permute.xlu1 %1922  ;;  %v20039_v22 = vpop.permute.xlu0 %1917  ;;  %v720_v24 = vadd.f32 %v688_v49, %v425_v33  ;;  %v948_v49 = vmul.f32 %v20048_v29, %v19445_v18  ;;  %v728_v45 = vadd.f32 %v696_v37, %v433_v50  ;;  %v745_v5 = vadd.f32 %v713_v46, %v450_v9  ;;  %v24691_v46 = vld [vmem:[#allocation59_spill] sm:$0xff] }
 0x284   : > { %2448 = vperm.xlu1 %18039, %v19695_v54   ;;  %2443 = vperm.xlu0 %18038, %v19698_v3   ;;  %v946_v54 = vmul.f32 %v20048_v29, %v19439_v15  ;;  %v24683_v3 = vld [vmem:[#allocation51_spill] sm:$0xff]  ;;  %v727_v39 = vadd.f32 %v695_v4, %v432_v35  ;;  %v729_v15 = vadd.f32 %v697_v21, %v434_v47  ;;  %v24690_v21 = vld [vmem:[#allocation58_spill] sm:$0xff] }
 0x285   : > { %v945_v33 = vmul.f32 %v20048_v29, %v24683_v3  ;;  %v950_v6 = vmul.f32 %v20048_v29, %v24685_v13  ;;  %v744_v18 = vadd.f32 %v712_v38, %v449_v10  ;;  %v949_v52 = vmul.f32 %v20048_v29, %v24686_v43  ;;  %v24687_v3 = vld [vmem:[#allocation55_spill] sm:$0xff] }
 0x286   : > { %v952_v35 = vmul.f32 %v20048_v29, %v24687_v3  ;;  %v951_v4 = vmul.f32 %v20048_v29, %v24688_v34  ;;  %v978_v30 = vadd.f32 %v946_v54, %v715_v11  ;;  %v980_v41 = vadd.f32 %v948_v49, %v717_v32  ;;  %v24692_v32 = vld [vmem:[#allocation60_spill] sm:$0xff]  ;;  %v24693_v54 = vld [vmem:[#allocation61_spill] sm:$0xff]  ;;  %v24694_v49 = vld [vmem:[#allocation62_spill] sm:$0xff] }
 0x287   : > { %v20066_v31 = vpop.permute.xlu1 %1932  ;;  %v20068_v23 = vpop.permute.xlu0 %1927  ;;  %v979_v10 = vadd.f32 %v947_v53, %v716_v28  ;;  %v953_v37 = vmul.f32 %v20048_v29, %v24690_v21  ;;  %v956_v38 = vmul.f32 %v20048_v29, %v24691_v46  ;;  %v982_v11 = vadd.f32 %v950_v6, %v719_v44  ;;  %v20103_v53 = vld [vmem:[%s24665_s20 + $0x3] ss:$0 sm:$0xff]  ;;  %v24695_v3 = vld [vmem:[#allocation63_spill] sm:$0xff] }
 0x288   : > { %2458 = vperm.xlu1 %18039, %v19707_v51   ;;  %2453 = vperm.xlu0 %18038, %v19710_v60   ;;  %v977_v51 = vadd.f32 %v945_v33, %v714_v12  ;;  %v24689_v60 = vld [vmem:[#allocation57_spill] sm:$0xff]  ;;  %v955_v12 = vmul.f32 %v20048_v29, %v24692_v32  ;;  %v958_v33 = vmul.f32 %v20048_v29, %v24693_v54  ;;  %v24696_v6 = vld [vmem:[#allocation64_spill] sm:$0xff] }
 0x289   : > { %v954_v47 = vmul.f32 %v20048_v29, %v24689_v60  ;;  %v957_v28 = vmul.f32 %v20048_v29, %v24694_v49  ;;  %v981_v13 = vadd.f32 %v949_v52, %v718_v20  ;;  %v984_v43 = vadd.f32 %v952_v35, %v721_v2  ;;  %v24697_v60 = vld [vmem:[#allocation79_spill] sm:$0xff]  ;;  %v24698_v46 = vld [vmem:[#allocation80_spill] sm:$0xff] }
 0x28a   : > { %v959_v34 = vmul.f32 %v20048_v29, %v24696_v6  ;;  %v976_v21 = vmul.f32 %v20048_v29, %v24697_v60  ;;  %v975_v32 = vmul.f32 %v20048_v29, %v24698_v46  ;;  %v985_v20 = vadd.f32 %v953_v37, %v722_v8  ;;  %v24701_v60 = vld [vmem:[#allocation83_spill] sm:$0xff]  ;;  %v24702_v8 = vld [vmem:[#allocation84_spill] sm:$0xff]  ;;  %v24703_v37 = vld [vmem:[#allocation85_spill] sm:$0xff] }
 0x28b   : > { %v20084_v50 = vpop.permute.xlu1 %1942  ;;  %v20086_v9 = vpop.permute.xlu0 %1937  ;;  %v986_v44 = vadd.f32 %v954_v47, %v723_v7  ;;  %v988_v2 = vadd.f32 %v956_v38, %v725_v48  ;;  %v987_v7 = vadd.f32 %v955_v12, %v724_v42  ;;  %v990_v35 = vadd.f32 %v958_v33, %v727_v39  ;;  %v24700_v47 = vld [vmem:[#allocation82_spill] sm:$0xff] }
 0x28c   : > { %2468 = vperm.xlu1 %18039, %v19719_v17   ;;  %2463 = vperm.xlu0 %18038, %v19722_v58   ;;  %v983_v17 = vadd.f32 %v951_v4, %v720_v24  ;;  %v960_v58 = vmul.f32 %v20048_v29, %v24695_v3  ;;  %v24699_v24 = vld [vmem:[#allocation81_spill] sm:$0xff]  ;;  %v989_v4 = vadd.f32 %v957_v28, %v726_v40  ;;  %v24704_v39 = vld [vmem:[#allocation86_spill] sm:$0xff]  ;;  %v24705_v28 = vld [vmem:[#allocation87_spill] sm:$0xff] }
 0x28d   : > { %v1210_v52 = vmul.f32 %v20103_v53, %v24699_v24  ;;  %v1209_v3 = vmul.f32 %v20103_v53, %v24700_v47  ;;  %v1212_v46 = vmul.f32 %v20103_v53, %v24701_v60  ;;  %v1211_v48 = vmul.f32 %v20103_v53, %v24702_v8  ;;  %v24706_v24 = vld [vmem:[#allocation88_spill] sm:$0xff] }
 0x28e   : > { %v20123_v6 = vadd.f32 %v960_v58, %v729_v15  ;;  %v1214_v38 = vmul.f32 %v20103_v53, %v24703_v37  ;;  %v1007_v42 = vadd.f32 %v975_v32, %v744_v18  ;;  %v1213_v40 = vmul.f32 %v20103_v53, %v24704_v39  ;;  %v24709_v32 = vld [vmem:[#allocation91_spill] sm:$0xff]  ;;  %v24710_v37 = vld [vmem:[#allocation92_spill] sm:$0xff]  ;;  %v24712_v39 = vld [vmem:[#allocation94_spill] sm:$0xff] }
 0x28f   : > { %v20113_v54 = vpop.permute.xlu1 %1952  ;;  %v20115_v49 = vpop.permute.xlu0 %1947  ;;  %v1242_v33 = vadd.f32 %v1210_v52, %v978_v30  ;;  %v1216_v58 = vmul.f32 %v20103_v53, %v24705_v28  ;;  %v1215_v47 = vmul.f32 %v20103_v53, %v24706_v24  ;;  %v1220_v30 = vmul.f32 %v20103_v53, %v24709_v32  ;;  %v24713_v24 = vld [vmem:[#allocation111_spill] sm:$0xff] }
 0x290   : > { %2478 = vperm.xlu1 %18039, %v19731_v56   ;;  %2473 = vperm.xlu0 %18038, %v19734_v0   ;;  %v20131_v56 = vadd.f32 %v959_v34, %v728_v45  ;;  %v1008_v0 = vadd.f32 %v976_v21, %v745_v5  ;;  %v1241_v45 = vadd.f32 %v1209_v3, %v977_v51  ;;  %v24707_v5 = vld [vmem:[#allocation89_spill] sm:$0xff]  ;;  %v24708_v34 = vld [vmem:[#allocation90_spill] sm:$0xff] }
 0x291   : > { %v1218_v18 = vmul.f32 %v20103_v53, %v24707_v5  ;;  %v1217_v21 = vmul.f32 %v20103_v53, %v24708_v34  ;;  %v20151_v52 = vadd.f32 %v1212_v46, %v980_v41  ;;  %v20153_v60 = vadd.f32 %v1211_v48, %v979_v10  ;;  %v24711_v51 = vld [vmem:[#allocation93_spill] sm:$0xff]  ;;  %v20170_v41 = vld [vmem:[%s24665_s20 + $0x4] ss:$0 sm:$0xff] }
 0x292   : > { %v20155_v8 = vadd.f32 %v1214_v38, %v982_v11  ;;  %v1222_v3 = vmul.f32 %v20103_v53, %v24711_v51  ;;  %v1221_v28 = vmul.f32 %v20103_v53, %v24712_v39  ;;  %v1240_v5 = vmul.f32 %v20103_v53, %v24713_v24  ;;  %v24714_v48 = vld [vmem:[#allocation112_spill] sm:$0xff] }
 0x293   : > { %v20135_v12 = vpop.permute.xlu1 %1962  ;;  %v20137_v15 = vpop.permute.xlu0 %1957  ;;  %v20178_v46 = vadd.f32 %v1215_v47, %v983_v17  ;;  %v1239_v38 = vmul.f32 %v20103_v53, %v24714_v48  ;;  %v20186_v34 = vadd.f32 %v1217_v21, %v985_v20  ;;  %v20188_v32 = vadd.f32 %v1220_v30, %v988_v2  ;;  %v24716_v17 = vld [vmem:[#allocation113_spill] sm:$0xff]  ;;  %v24717_v47 = vld [vmem:[#allocation114_spill] sm:$0xff] }
 0x294   : > { %2488 = vperm.xlu1 %18039, %v19743_v59   ;;  %2483 = vperm.xlu0 %18038, %v19746_v57   ;;  %v1219_v59 = vmul.f32 %v20103_v53, %v24710_v37  ;;  %v20159_v57 = vadd.f32 %v1213_v40, %v981_v13  ;;  %v20176_v13 = vadd.f32 %v1216_v58, %v984_v43  ;;  %v24715_v37 = vld [vmem:[#allocation143_spill] sm:$0xff] }
 0x295   : > { %v20184_v40 = vadd.f32 %v1218_v18, %v986_v44  ;;  %v1503_v51 = vmul.f32 %v20170_v41, %v24715_v37  ;;  %v1473_v58 = vmul.f32 %v20170_v41, %v24716_v17  ;;  %v1472_v39 = vmul.f32 %v20170_v41, %v24717_v47  ;;  %v20203_v44 = vld [vmem:[%s24665_s20 + $0x5] ss:$0 sm:$0xff]  ;;  %v24725_v47 = vld [vmem:[#allocation115_spill] sm:$0xff] }
 0x296   : > { %v20192_v43 = vadd.f32 %v1219_v59, %v987_v7  ;;  %v20205_v20 = vadd.f32 %v1222_v3, %v990_v35  ;;  %v20207_v2 = vadd.f32 %v1221_v28, %v989_v4  ;;  %v1272_v7 = vadd.f32 %v1240_v5, %v1008_v0  ;;  %v24721_v59 = vld [vmem:[#allocation95_spill] sm:$0xff]  ;;  %v20224_v4 = vld [vmem:[%s24665_s20 + $0x6] ss:$0 sm:$0xff]  ;;  %v24723_v28 = vld [vmem:[#allocation145_spill] sm:$0xff] }
 0x297   : > { %v20172_v10 = vpop.permute.xlu1 %1972  ;;  %v20174_v11 = vpop.permute.xlu0 %1967  ;;  %v1766_v18 = vmul.f32 %v20203_v44, %v19913_v27  ;;  %v20217_v24 = vmul.f32 %v20103_v53, %v24721_v59  ;;  %v1271_v48 = vadd.f32 %v1239_v38, %v1007_v42  ;;  %v1765_v35 = vmul.f32 %v20203_v44, %v19915_v16  ;;  %v24722_v27 = vld [vmem:[#allocation96_spill] sm:$0xff]  ;;  %v24724_v5 = vld [vmem:[#allocation146_spill] sm:$0xff] }
 0x298   : > { %2498 = vperm.xlu1 %18039, %v19755_v62   ;;  %2493 = vperm.xlu0 %18038, %v19758_v63   ;;  %v24718_v62 = vld [vmem:[#allocation144_spill] sm:$0xff]  ;;  %v20230_v0 = vmul.f32 %v20103_v53, %v24722_v27  ;;  %v1535_v3 = vadd.f32 %v1503_v51, %v1272_v7  ;;  %v1736_v42 = vmul.f32 %v20203_v44, %v24723_v28  ;;  %v15179_v38 = vld [vmem:[%s19039_s0 + $0x238] sm:$0xff] }
 0x299   : > { %v1502_v63 = vmul.f32 %v20170_v41, %v24718_v62  ;;  %v1735_v16 = vmul.f32 %v20203_v44, %v24724_v5  ;;  %v1505_v37 = vadd.f32 %v1473_v58, %v1242_v33  ;;  %v1504_v17 = vadd.f32 %v1472_v39, %v1241_v45  ;;  %v24726_v59 = vld [vmem:[#allocation116_spill] sm:$0xff]  ;;  %v24728_v58 = vld [vmem:[#allocation175_spill] sm:$0xff]  ;;  %v24729_v39 = vld [vmem:[#allocation117_spill] sm:$0xff] }
 0x29a   : > { %v1475_v62 = vmul.f32 %v20170_v41, %v24725_v47  ;;  %v2000_v51 = vmul.f32 %v20224_v4, %v19919_v19  ;;  %v24727_v7 = vld [vmem:[#allocation176_spill] sm:$0xff] }
 0x29b   : > { %v20211_v21 = vpop.permute.xlu1 %1982  ;;  %v20213_v30 = vpop.permute.xlu0 %1977  ;;  %v1999_v27 = vmul.f32 %v20224_v4, %v24727_v7  ;;  %v1768_v19 = vadd.f32 %v1736_v42, %v1505_v37  ;;  %v20255_v47 = vld [vmem:[%s24665_s20 + $0x7] ss:$0 sm:$0xff] }
 0x29c   : > { %24719 = vst [vmem:[#allocation26_spill] sm:$0xff] %v20211_v21  ;;  %24720 = vst [vmem:[#allocation27_spill] sm:$0xff] %v20213_v30  ;;  %2508 = vperm.xlu1 %18039, %v19767_v1   ;;  %2503 = vperm.xlu0 %18038, %v19770_v61   ;;  %v1534_v1 = vadd.f32 %v1502_v63, %v1271_v48  ;;  %v1474_v61 = vmul.f32 %v20170_v41, %v24726_v59 }
 0x29d   : > { %v1798_v30 = vadd.f32 %v1766_v18, %v1535_v3  ;;  %v1477_v63 = vmul.f32 %v20170_v41, %v24729_v39  ;;  %v24730_v18 = vld [vmem:[#allocation118_spill] sm:$0xff]  ;;  %v1767_v3 = vadd.f32 %v1735_v16, %v1504_v17  ;;  %v2032_v16 = vadd.f32 %v2000_v51, %v1768_v19 }
 0x29e   : > { %v1797_v5 = vadd.f32 %v1765_v35, %v1534_v1  ;;  %v1476_v48 = vmul.f32 %v20170_v41, %v24730_v18  ;;  %v24731_v35 = vld [vmem:[#allocation147_spill] sm:$0xff]  ;;  %v1506_v42 = vadd.f32 %v1474_v61, %v20153_v60  ;;  %v2002_v39 = vmul.f32 %v20224_v4, %v19925_v14  ;;  %v24736_v61 = vld [vmem:[#allocation150_spill] sm:$0xff] }
 0x29f   : > { %v1993_v28 = vpop.permute.xlu1 %1992  ;;  %v1988_v21 = vpop.permute.xlu0 %1987  ;;  %v1738_v1 = vmul.f32 %v20203_v44, %v24731_v35  ;;  %v2031_v37 = vadd.f32 %v1999_v27, %v1767_v3  ;;  %v2001_v18 = vmul.f32 %v20224_v4, %v19927_v55  ;;  %v1739_v51 = vmul.f32 %v20203_v44, %v24736_v61  ;;  %v24739_v55 = vld [vmem:[#allocation119_spill] sm:$0xff]  ;;  %v24740_v3 = vld [vmem:[#allocation120_spill] sm:$0xff] }
 0x2a0   : > { %v2030_v33 = vmul.f32 %v20224_v4, %v1993_v28  ;;  %v2029_v45 = vmul.f32 %v20224_v4, %v1988_v21  ;;  %2518 = vperm.xlu1 %18039, %v15179_v38   ;;  %2513 = vperm.xlu0 %18038, %v24728_v58   ;;  %v24732_v21 = vld [vmem:[#allocation148_spill] sm:$0xff]  ;;  %v1507_v28 = vadd.f32 %v1475_v62, %v20151_v52  ;;  %v24735_v62 = vld [vmem:[#allocation149_spill] sm:$0xff] }
 0x2a1   : > { %v1737_v38 = vmul.f32 %v20203_v44, %v24732_v21  ;;  %v1508_v52 = vadd.f32 %v1476_v48, %v20159_v57  ;;  %v1740_v60 = vmul.f32 %v20203_v44, %v24735_v62  ;;  %v1479_v19 = vmul.f32 %v20170_v41, %v24739_v55  ;;  %v24742_v48 = vld [vmem:[#allocation178_spill] sm:$0xff]  ;;  %v24745_v55 = vld [vmem:[#allocation151_spill] sm:$0xff] }
 0x2a2   : > { %v20261_v59 = vadd.f32 %v2030_v33, %v1798_v30  ;;  %v20263_v7 = vadd.f32 %v2029_v45, %v1797_v5  ;;  %v1509_v5 = vadd.f32 %v1477_v63, %v20155_v8  ;;  %v1770_v27 = vadd.f32 %v1738_v1, %v1507_v28  ;;  %v24741_v63 = vld [vmem:[#allocation177_spill] sm:$0xff] }
 0x2a3   : > { %v2106_v17 = vpop.permute.xlu1 %2105  ;;  %v2101_v58 = vpop.permute.xlu0 %2100  ;;  %v1769_v33 = vadd.f32 %v1737_v38, %v1506_v42  ;;  %v1478_v8 = vmul.f32 %v20170_v41, %v24740_v3  ;;  %v2004_v57 = vmul.f32 %v20224_v4, %v24741_v63  ;;  %v2003_v21 = vmul.f32 %v20224_v4, %v24742_v48  ;;  %v24746_v63 = vld [vmem:[#allocation152_spill] sm:$0xff] }
 0x2a4   : > { %24733 = vst [vmem:[#allocation28_spill] sm:$0xff] %v20261_v59  ;;  %24734 = vst [vmem:[#allocation29_spill] sm:$0xff] %v20263_v7  ;;  %v2263_v35 = vmul.f32 %v20255_v47, %v2106_v17  ;;  %v2262_v30 = vmul.f32 %v20255_v47, %v2101_v58  ;;  %v2034_v1 = vadd.f32 %v2002_v39, %v1770_v27 }
 0x2a5   : > { %v2033_v38 = vadd.f32 %v2001_v18, %v1769_v33  ;;  %v1772_v62 = vadd.f32 %v1740_v60, %v1509_v5  ;;  %v1771_v61 = vadd.f32 %v1739_v51, %v1508_v52  ;;  %v1742_v3 = vmul.f32 %v20203_v44, %v24745_v55  ;;  %v24749_v5 = vld [vmem:[#allocation179_spill] sm:$0xff]  ;;  %v24750_v60 = vld [vmem:[#allocation180_spill] sm:$0xff] }
 0x2a6   : > { %v20279_v14 = vadd.f32 %v2263_v35, %v2032_v16  ;;  %v20281_v45 = vadd.f32 %v2262_v30, %v2031_v37  ;;  %v24743_v16 = vld [vmem:[#allocation121_spill] sm:$0xff]  ;;  %v24744_v35 = vld [vmem:[#allocation122_spill] sm:$0xff]  ;;  %v1741_v48 = vmul.f32 %v20203_v44, %v24746_v63  ;;  %v1511_v27 = vadd.f32 %v1479_v19, %v20176_v13 }
 0x2a7   : > { %v2116_v17 = vpop.permute.xlu1 %2115  ;;  %v2111_v58 = vpop.permute.xlu0 %2110  ;;  %v1481_v37 = vmul.f32 %v20170_v41, %v24743_v16  ;;  %v1480_v30 = vmul.f32 %v20170_v41, %v24744_v35  ;;  %v1510_v33 = vadd.f32 %v1478_v8, %v20178_v46  ;;  %v2006_v52 = vmul.f32 %v20224_v4, %v24749_v5  ;;  %v24751_v19 = vld [vmem:[#allocation153_spill] sm:$0xff]  ;;  %v24752_v8 = vld [vmem:[#allocation154_spill] sm:$0xff] }
 0x2a8   : > { %24737 = vst [vmem:[#allocation30_spill] sm:$0xff] %v20279_v14  ;;  %24738 = vst [vmem:[#allocation31_spill] sm:$0xff] %v20281_v45  ;;  %v2265_v28 = vmul.f32 %v20255_v47, %v2116_v17  ;;  %v2264_v42 = vmul.f32 %v20255_v47, %v2111_v58  ;;  %v2036_v17 = vadd.f32 %v2004_v57, %v1772_v62  ;;  %v24815_v14 = vld [vmem:[#allocation46_spill] sm:$0xff] }
 0x2a9   : > { %v2035_v58 = vadd.f32 %v2003_v21, %v1771_v61  ;;  %v2005_v51 = vmul.f32 %v20224_v4, %v24750_v60  ;;  %v1512_v13 = vadd.f32 %v1480_v30, %v20186_v34  ;;  %v1744_v46 = vmul.f32 %v20203_v44, %v24751_v19  ;;  %v24755_v61 = vld [vmem:[#allocation123_spill] sm:$0xff]  ;;  %v24758_v30 = vld [vmem:[#allocation182_spill] sm:$0xff] }
 0x2aa   : > { %v20301_v39 = vadd.f32 %v2265_v28, %v2034_v1  ;;  %v20303_v18 = vadd.f32 %v2264_v42, %v2033_v38  ;;  %v1513_v38 = vadd.f32 %v1481_v37, %v20184_v40  ;;  %v1743_v57 = vmul.f32 %v20203_v44, %v24752_v8  ;;  %v24757_v37 = vld [vmem:[#allocation181_spill] sm:$0xff] }
 0x2ab   : > { %v2126_v16 = vpop.permute.xlu1 %2125  ;;  %v2121_v35 = vpop.permute.xlu0 %2120  ;;  %v1774_v21 = vadd.f32 %v1742_v3, %v1511_v27  ;;  %v1773_v28 = vadd.f32 %v1741_v48, %v1510_v33  ;;  %v1483_v63 = vmul.f32 %v20170_v41, %v24755_v61  ;;  %v2008_v34 = vmul.f32 %v20224_v4, %v24757_v37  ;;  %v24761_v61 = vld [vmem:[#allocation155_spill] sm:$0xff]  ;;  %v24762_v37 = vld [vmem:[#allocation156_spill] sm:$0xff] }
 0x2ac   : > { %24747 = vst [vmem:[#allocation32_spill] sm:$0xff] %v20301_v39  ;;  %24748 = vst [vmem:[#allocation33_spill] sm:$0xff] %v20303_v18  ;;  %v2267_v55 = vmul.f32 %v20255_v47, %v2126_v16  ;;  %v2266_v1 = vmul.f32 %v20255_v47, %v2121_v35  ;;  %v24756_v16 = vld [vmem:[#allocation124_spill] sm:$0xff]  ;;  %v2007_v35 = vmul.f32 %v20224_v4, %v24758_v30 }
 0x2ad   : > { %v1482_v40 = vmul.f32 %v20170_v41, %v24756_v16  ;;  %v2038_v3 = vadd.f32 %v2006_v52, %v1774_v21  ;;  %v2037_v48 = vadd.f32 %v2005_v51, %v1773_v28  ;;  %v1776_v19 = vadd.f32 %v1744_v46, %v1513_v38  ;;  %v24765_v38 = vld [vmem:[#allocation183_spill] sm:$0xff]  ;;  %v24766_v46 = vld [vmem:[#allocation184_spill] sm:$0xff] }
 0x2ae   : > { %v20319_v42 = vadd.f32 %v2267_v55, %v2036_v17  ;;  %v20321_v62 = vadd.f32 %v2266_v1, %v2035_v58  ;;  %v24759_v17 = vld [vmem:[#allocation125_spill] sm:$0xff]  ;;  %v24760_v55 = vld [vmem:[#allocation126_spill] sm:$0xff]  ;;  %v1775_v8 = vadd.f32 %v1743_v57, %v1512_v13  ;;  %v1746_v16 = vmul.f32 %v20203_v44, %v24761_v61 }
 0x2af   : > { %v2136_v5 = vpop.permute.xlu1 %2135  ;;  %v2131_v60 = vpop.permute.xlu0 %2130  ;;  %v1485_v58 = vmul.f32 %v20170_v41, %v24759_v17  ;;  %v1484_v1 = vmul.f32 %v20170_v41, %v24760_v55  ;;  %v1745_v30 = vmul.f32 %v20203_v44, %v24762_v37  ;;  %v1515_v21 = vadd.f32 %v1483_v63, %v20188_v32  ;;  %v24767_v63 = vld [vmem:[#allocation157_spill] sm:$0xff] }
 0x2b0   : > { %24753 = vst [vmem:[#allocation34_spill] sm:$0xff] %v20319_v42  ;;  %24754 = vst [vmem:[#allocation49_spill] sm:$0xff] %v20321_v62  ;;  %v2269_v27 = vmul.f32 %v20255_v47, %v2136_v5  ;;  %v2268_v33 = vmul.f32 %v20255_v47, %v2131_v60  ;;  %v1514_v28 = vadd.f32 %v1482_v40, %v20192_v43  ;;  %v24768_v40 = vld [vmem:[#allocation158_spill] sm:$0xff] }
 0x2b1   : > { %v2040_v5 = vadd.f32 %v2008_v34, %v1776_v19  ;;  %v2039_v60 = vadd.f32 %v2007_v35, %v1775_v8  ;;  %v2010_v13 = vmul.f32 %v20224_v4, %v24765_v38  ;;  %v2009_v57 = vmul.f32 %v20224_v4, %v24766_v46  ;;  %v24771_v8 = vld [vmem:[#allocation127_spill] sm:$0xff] }
 0x2b2   : > { %v20341_v52 = vadd.f32 %v2269_v27, %v2038_v3  ;;  %v20343_v51 = vadd.f32 %v2268_v33, %v2037_v48  ;;  %v1517_v48 = vadd.f32 %v1485_v58, %v20205_v20  ;;  %v1516_v32 = vadd.f32 %v1484_v1, %v20207_v2  ;;  %v24773_v58 = vld [vmem:[#allocation185_spill] sm:$0xff]  ;;  %v24774_v1 = vld [vmem:[#allocation186_spill] sm:$0xff] }
 0x2b3   : > { %v2146_v17 = vpop.permute.xlu1 %2145  ;;  %v2141_v55 = vpop.permute.xlu0 %2140  ;;  %v1748_v43 = vmul.f32 %v20203_v44, %v24767_v63  ;;  %v1747_v34 = vmul.f32 %v20203_v44, %v24768_v40  ;;  %v1778_v35 = vadd.f32 %v1746_v16, %v1515_v21  ;;  %v1777_v27 = vadd.f32 %v1745_v30, %v1514_v28  ;;  %v24775_v63 = vld [vmem:[#allocation159_spill] sm:$0xff] }
 0x2b4   : > { %24763 = vst [vmem:[#allocation50_spill] sm:$0xff] %v20341_v52  ;;  %24764 = vst [vmem:[#allocation51_spill] sm:$0xff] %v20343_v51  ;;  %v2271_v61 = vmul.f32 %v20255_v47, %v2146_v17  ;;  %v2270_v3 = vmul.f32 %v20255_v47, %v2141_v55  ;;  %v1487_v37 = vmul.f32 %v20170_v41, %v24771_v8  ;;  %v24772_v17 = vld [vmem:[#allocation128_spill] sm:$0xff] }
 0x2b5   : > { %v1486_v20 = vmul.f32 %v20170_v41, %v24772_v17  ;;  %v2012_v2 = vmul.f32 %v20224_v4, %v24773_v58  ;;  %v2011_v55 = vmul.f32 %v20224_v4, %v24774_v1  ;;  %v2042_v16 = vadd.f32 %v2010_v13, %v1778_v35  ;;  %v24776_v8 = vld [vmem:[#allocation160_spill] sm:$0xff] }
 0x2b6   : > { %v20359_v33 = vadd.f32 %v2271_v61, %v2040_v5  ;;  %v20361_v19 = vadd.f32 %v2270_v3, %v2039_v60  ;;  %v2041_v30 = vadd.f32 %v2009_v57, %v1777_v27  ;;  %v1256_v5 = vadd.f32 %v20217_v24, %v20123_v6 }
 0x2b7   : > { %v2156_v38 = vpop.permute.xlu1 %2155  ;;  %v2151_v46 = vpop.permute.xlu0 %2150  ;;  %v1255_v60 = vadd.f32 %v20230_v0, %v20131_v56  ;;  %v1780_v61 = vadd.f32 %v1748_v43, %v1517_v48  ;;  %v1779_v3 = vadd.f32 %v1747_v34, %v1516_v32  ;;  %v1750_v40 = vmul.f32 %v20203_v44, %v24775_v63  ;;  %v24780_v0 = vld [vmem:[#allocation188_spill] sm:$0xff] }
 0x2b8   : > { %24769 = vst [vmem:[#allocation52_spill] sm:$0xff] %v20359_v33  ;;  %24770 = vst [vmem:[#allocation53_spill] sm:$0xff] %v20361_v19  ;;  %v2273_v21 = vmul.f32 %v20255_v47, %v2156_v38  ;;  %v2272_v28 = vmul.f32 %v20255_v47, %v2151_v46  ;;  %v1749_v17 = vmul.f32 %v20203_v44, %v24776_v8  ;;  %v24779_v38 = vld [vmem:[#allocation187_spill] sm:$0xff]  ;;  %v24786_v8 = vld [vmem:[#allocation12_spill] sm:$0xff] }
 0x2b9   : > { %v1519_v35 = vadd.f32 %v1487_v37, %v1256_v5  ;;  %v1518_v27 = vadd.f32 %v1486_v20, %v1255_v60  ;;  %v2044_v58 = vadd.f32 %v2012_v2, %v1780_v61  ;;  %v2043_v1 = vadd.f32 %v2011_v55, %v1779_v3  ;;  %v24807_v19 = vld [vmem:[#allocation42_spill] sm:$0xff]  ;;  %v24808_v33 = vld [vmem:[#allocation43_spill] sm:$0xff] }
 0x2ba   : > { %v20381_v13 = vadd.f32 %v2273_v21, %v2042_v16  ;;  %v20383_v57 = vadd.f32 %v2272_v28, %v2041_v30  ;;  %v2014_v56 = vmul.f32 %v20224_v4, %v24779_v38  ;;  %v2013_v48 = vmul.f32 %v20224_v4, %v24780_v0  ;;  %v24790_v38 = vld [vmem:[#allocation16_spill] sm:$0xff] }
 0x2bb   : > { %v2166_v6 = vpop.permute.xlu1 %2165  ;;  %v2161_v24 = vpop.permute.xlu0 %2160  ;;  %v1782_v34 = vadd.f32 %v1750_v40, %v1519_v35  ;;  %v1781_v46 = vadd.f32 %v1749_v17, %v1518_v27  ;;  %v436_v17 = vmul.f32 %v19952_v26, %v24786_v8  ;;  %v24787_v35 = vld [vmem:[#allocation13_spill] sm:$0xff]  ;;  %v24798_v8 = vld [vmem:[#allocation36_spill] sm:$0xff] }
 0x2bc   : > { %24777 = vst [vmem:[#allocation54_spill] sm:$0xff] %v20381_v13  ;;  %24778 = vst [vmem:[#allocation55_spill] sm:$0xff] %v20383_v57  ;;  %v2275_v32 = vmul.f32 %v20255_v47, %v2166_v6  ;;  %v2274_v43 = vmul.f32 %v20255_v47, %v2161_v24  ;;  %v435_v27 = vmul.f32 %v19952_v26, %v24787_v35  ;;  %v24789_v6 = vld [vmem:[#allocation15_spill] sm:$0xff]  ;;  %v24806_v13 = vld [vmem:[#allocation41_spill] sm:$0xff] }
 0x2bd   : > { %v2046_v55 = vadd.f32 %v2014_v56, %v1782_v34  ;;  %v2045_v30 = vadd.f32 %v2013_v48, %v1781_v46  ;;  %v437_v24 = vmul.f32 %v19952_v26, %v24789_v6  ;;  %v440_v56 = vmul.f32 %v19952_v26, %v24790_v38  ;;  %v24794_v34 = vld [vmem:[#allocation18_spill] sm:$0xff]  ;;  %v24805_v57 = vld [vmem:[#allocation23_spill] sm:$0xff] }
 0x2be   : > { %v20391_v16 = vadd.f32 %v2275_v32, %v2044_v58  ;;  %v20393_v37 = vadd.f32 %v2274_v43, %v2043_v1  ;;  %v24788_v58 = vld [vmem:[#allocation14_spill] sm:$0xff]  ;;  %v24793_v32 = vld [vmem:[#allocation17_spill] sm:$0xff]  ;;  %v442_v46 = vmul.f32 %v19952_v26, %v24794_v34  ;;  %v698_v35 = vmul.f32 %v19967_v25, %v24798_v8 }
 0x2bf   : > { %v2176_v20 = vpop.permute.xlu1 %2175  ;;  %v2171_v2 = vpop.permute.xlu0 %2170  ;;  %v438_v1 = vmul.f32 %v19952_v26, %v24788_v58  ;;  %v439_v43 = vmul.f32 %v19952_v26, %v24793_v32  ;;  %v24799_v58 = vld [vmem:[#allocation37_spill] sm:$0xff]  ;;  %v24800_v38 = vld [vmem:[#allocation38_spill] sm:$0xff]  ;;  %v445_v8 = vmul.f32 %v19952_v26, %v24805_v57  ;;  %v24813_v57 = vld [vmem:[#allocation44_spill] sm:$0xff] }
 0x2c0   : > { %24781 = vst [vmem:[#allocation56_spill] sm:$0xff] %v20391_v16  ;;  %24782 = vst [vmem:[#allocation57_spill] sm:$0xff] %v20393_v37  ;;  %v2277_v21 = vmul.f32 %v20255_v47, %v2176_v20  ;;  %v2276_v28 = vmul.f32 %v20255_v47, %v2171_v2  ;;  %v24795_v20 = vld [vmem:[#allocation19_spill] sm:$0xff]  ;;  %v701_v6 = vmul.f32 %v19967_v25, %v24799_v58  ;;  %v24804_v16 = vld [vmem:[#allocation40_spill] sm:$0xff] }
 0x2c1   : > { %v441_v2 = vmul.f32 %v19952_v26, %v24795_v20  ;;  %v700_v32 = vmul.f32 %v19967_v25, %v24800_v38  ;;  %v24803_v37 = vld [vmem:[#allocation39_spill] sm:$0xff]  ;;  %v705_v58 = vmul.f32 %v19967_v25, %v24806_v13  ;;  %v704_v38 = vmul.f32 %v19967_v25, %v24807_v19  ;;  %v24814_v13 = vld [vmem:[#allocation45_spill] sm:$0xff] }
 0x2c2   : > { %v20397_v5 = vadd.f32 %v2277_v21, %v2046_v55  ;;  %v20399_v60 = vadd.f32 %v2276_v28, %v2045_v30  ;;  %v24796_v55 = vld [vmem:[#allocation20_spill] sm:$0xff]  ;;  %v24797_v21 = vld [vmem:[#allocation35_spill] sm:$0xff]  ;;  %v706_v52 = vmul.f32 %v19967_v25, %v24813_v57  ;;  %v709_v62 = vmul.f32 %v19967_v25, %v24814_v13 }
 0x2c3   : > { %v20401_v61 = vpop.permute.xlu1 %2185  ;;  %v20403_v3 = vpop.permute.xlu0 %2180  ;;  %v444_v30 = vmul.f32 %v19952_v26, %v24796_v55  ;;  %v699_v28 = vmul.f32 %v19967_v25, %v24797_v21  ;;  %v703_v55 = vmul.f32 %v19967_v25, %v24803_v37  ;;  %v702_v21 = vmul.f32 %v19967_v25, %v24804_v16  ;;  %v24811_v37 = vld [vmem:[#allocation24_spill] sm:$0xff]  ;;  %v24812_v16 = vld [vmem:[#allocation25_spill] sm:$0xff]  ;;  %v24829_v13 = vld [vmem:[#allocation75_spill] sm:$0xff] }
 0x2c4   : > { %24783 = vst [vmem:[#allocation58_spill] sm:$0xff] %v20397_v5  ;;  %24784 = vst [vmem:[#allocation59_spill] sm:$0xff] %v20399_v60  ;;  %v24801_v60 = vld [vmem:[#allocation21_spill] sm:$0xff]  ;;  %v24802_v5 = vld [vmem:[#allocation22_spill] sm:$0xff]  ;;  %v448_v7 = vmul.f32 %v19952_v26, %v24811_v37  ;;  %v447_v59 = vmul.f32 %v19952_v26, %v24812_v16  ;;  %v730_v42 = vadd.f32 %v698_v35, %v435_v27 }
 0x2c5   : > { %v443_v34 = vmul.f32 %v19952_v26, %v24801_v60  ;;  %v446_v20 = vmul.f32 %v19952_v26, %v24802_v5  ;;  %v707_v60 = vmul.f32 %v19967_v25, %v24808_v33  ;;  %v731_v19 = vadd.f32 %v699_v28, %v436_v17  ;;  %v24821_v28 = vld [vmem:[#allocation67_spill] sm:$0xff] }
 0x2c6   : > { %v733_v18 = vadd.f32 %v701_v6, %v438_v1  ;;  %v732_v33 = vadd.f32 %v700_v32, %v437_v24  ;;  %v735_v39 = vadd.f32 %v703_v55, %v440_v56  ;;  %v734_v45 = vadd.f32 %v702_v21, %v439_v43  ;;  %v24819_v24 = vld [vmem:[#allocation65_spill] sm:$0xff]  ;;  %v24820_v43 = vld [vmem:[#allocation66_spill] sm:$0xff]  ;;  %v24825_v6 = vld [vmem:[#allocation71_spill] sm:$0xff] }
 0x2c7   : > { %v20405_v63 = vpop.permute.xlu1 %2195  ;;  %v20407_v40 = vpop.permute.xlu0 %2190  ;;  %v736_v26 = vadd.f32 %v704_v38, %v441_v2  ;;  %v739_v16 = vadd.f32 %v707_v60, %v444_v30  ;;  %v738_v27 = vadd.f32 %v706_v52, %v443_v34  ;;  %v741_v1 = vadd.f32 %v709_v62, %v446_v20  ;;  %v24823_v30 = vld [vmem:[#allocation69_spill] sm:$0xff]  ;;  %v24826_v34 = vld [vmem:[#allocation72_spill] sm:$0xff]  ;;  %v24828_v38 = vld [vmem:[#allocation74_spill] sm:$0xff] }
 0x2c8   : > { %24785 = vst [vmem:[#allocation60_spill] sm:$0xff] %v20407_v40  ;;  %v962_v56 = vmul.f32 %v20048_v29, %v24819_v24  ;;  %v968_v32 = vmul.f32 %v20048_v29, %v24825_v6  ;;  %v967_v20 = vmul.f32 %v20048_v29, %v24826_v34  ;;  %v24827_v21 = vld [vmem:[#allocation73_spill] sm:$0xff]  ;;  %v969_v60 = vmul.f32 %v20048_v29, %v24828_v38  ;;  %v24834_v38 = vld [vmem:[#allocation78_spill] sm:$0xff] }
 0x2c9   : > { %v972_v24 = vmul.f32 %v20048_v29, %v24829_v13  ;;  %v973_v13 = vmul.f32 %v20048_v29, %v24834_v38 }
 0x2cb   : > { %v20419_v0 = vpop.permute.xlu1 %2205  ;;  %v20421_v48 = vpop.permute.xlu0 %2200 }
 0x2cc   : > { %24791 = vst [vmem:[#allocation61_spill] sm:$0xff] %v20419_v0  ;;  %24792 = vst [vmem:[#allocation62_spill] sm:$0xff] %v20421_v48  ;;  %v737_v48 = vadd.f32 %v705_v58, %v442_v46  ;;  %v24817_v0 = vld [vmem:[#allocation48_spill] sm:$0xff]  ;;  %v970_v58 = vmul.f32 %v20048_v29, %v24827_v21  ;;  %v999_v21 = vadd.f32 %v967_v20, %v736_v26  ;;  %v24845_v20 = vld [vmem:[#allocation105_spill] sm:$0xff] }
 0x2cd   : > { %v710_v57 = vmul.f32 %v19967_v25, %v24817_v0  ;;  %v24822_v46 = vld [vmem:[#allocation68_spill] sm:$0xff]  ;;  %v24824_v0 = vld [vmem:[#allocation70_spill] sm:$0xff] }
 0x2ce   : > { %v963_v2 = vmul.f32 %v20048_v29, %v24822_v46  ;;  %v965_v35 = vmul.f32 %v20048_v29, %v24824_v0  ;;  %v24833_v46 = vld [vmem:[#allocation77_spill] sm:$0xff]  ;;  %v1000_v34 = vadd.f32 %v968_v32, %v737_v48  ;;  %v24839_v48 = vld [vmem:[#allocation99_spill] sm:$0xff]  ;;  %v24840_v26 = vld [vmem:[#allocation100_spill] sm:$0xff] }
 0x2cf   : > { %v20455_v51 = vpop.permute.xlu1 %2215  ;;  %v20457_v5 = vpop.permute.xlu0 %2210  ;;  %v742_v55 = vadd.f32 %v710_v57, %v447_v59  ;;  %v974_v59 = vmul.f32 %v20048_v29, %v24833_v46 }
 0x2d0   : > { %24809 = vst [vmem:[#allocation63_spill] sm:$0xff] %v20455_v51  ;;  %24810 = vst [vmem:[#allocation64_spill] sm:$0xff] %v20457_v5  ;;  %v708_v5 = vmul.f32 %v19967_v25, %v24815_v14  ;;  %v24816_v51 = vld [vmem:[#allocation47_spill] sm:$0xff]  ;;  %v961_v14 = vmul.f32 %v20048_v29, %v24820_v43  ;;  %v997_v6 = vadd.f32 %v965_v35, %v734_v45  ;;  %v24844_v35 = vld [vmem:[#allocation104_spill] sm:$0xff] }
 0x2d1   : > { %v711_v37 = vmul.f32 %v19967_v25, %v24816_v51  ;;  %v964_v51 = vmul.f32 %v20048_v29, %v24821_v28  ;;  %v966_v25 = vmul.f32 %v20048_v29, %v24823_v30  ;;  %v995_v30 = vadd.f32 %v963_v2, %v732_v33  ;;  %v24843_v2 = vld [vmem:[#allocation103_spill] sm:$0xff] }
 0x2d2   : > { %v740_v52 = vadd.f32 %v708_v5, %v445_v8  ;;  %v993_v5 = vadd.f32 %v961_v14, %v730_v42  ;;  %v1001_v42 = vadd.f32 %v969_v60, %v738_v27  ;;  %v24836_v14 = vld [vmem:[#allocation98_spill] sm:$0xff]  ;;  %v1228_v33 = vmul.f32 %v20103_v53, %v24839_v48 }
 0x2d3   : > { %v20473_v40 = vpop.permute.xlu1 %2225  ;;  %v20475_v17 = vpop.permute.xlu0 %2220  ;;  %v743_v62 = vadd.f32 %v711_v37, %v448_v7  ;;  %v994_v7 = vadd.f32 %v962_v56, %v731_v19  ;;  %v24832_v37 = vld [vmem:[#allocation76_spill] sm:$0xff]  ;;  %v996_v57 = vadd.f32 %v964_v51, %v733_v18  ;;  %v998_v0 = vadd.f32 %v966_v25, %v735_v39  ;;  %v24841_v51 = vld [vmem:[#allocation101_spill] sm:$0xff]  ;;  %v24842_v27 = vld [vmem:[#allocation102_spill] sm:$0xff] }
 0x2d4   : > { %24818 = vst [vmem:[#allocation79_spill] sm:$0xff] %v20475_v17  ;;  %v971_v28 = vmul.f32 %v20048_v29, %v24832_v37  ;;  %v1002_v19 = vadd.f32 %v970_v58, %v739_v16  ;;  %v1004_v56 = vadd.f32 %v972_v24, %v741_v1  ;;  %v1225_v37 = vmul.f32 %v20103_v53, %v24836_v14  ;;  %v24846_v60 = vld [vmem:[#allocation106_spill] sm:$0xff]  ;;  %v24849_v14 = vld [vmem:[#allocation109_spill] sm:$0xff] }
 0x2d5   : > { %v1006_v45 = vadd.f32 %v974_v59, %v743_v62  ;;  %v1227_v29 = vmul.f32 %v20103_v53, %v24840_v26  ;;  %v1230_v16 = vmul.f32 %v20103_v53, %v24841_v51  ;;  %v1229_v1 = vmul.f32 %v20103_v53, %v24842_v27  ;;  %v24848_v59 = vld [vmem:[#allocation108_spill] sm:$0xff]  ;;  %v24853_v27 = vld [vmem:[#allocation129_spill] sm:$0xff] }
 0x2d6   : > { %v1003_v39 = vadd.f32 %v971_v28, %v740_v52  ;;  %v1232_v25 = vmul.f32 %v20103_v53, %v24843_v2  ;;  %v1231_v32 = vmul.f32 %v20103_v53, %v24844_v35  ;;  %v1005_v52 = vadd.f32 %v973_v13, %v742_v55  ;;  %v24847_v28 = vld [vmem:[#allocation107_spill] sm:$0xff]  ;;  %v24852_v13 = vld [vmem:[#allocation110_spill] sm:$0xff] }
 0x2d7   : > { %v20499_v43 = vpop.permute.xlu1 %2235  ;;  %v20501_v8 = vpop.permute.xlu0 %2230  ;;  %v1234_v58 = vmul.f32 %v20103_v53, %v24845_v20  ;;  %v1233_v24 = vmul.f32 %v20103_v53, %v24846_v60  ;;  %v1236_v46 = vmul.f32 %v20103_v53, %v24847_v28  ;;  %v1235_v38 = vmul.f32 %v20103_v53, %v24848_v59  ;;  %v24854_v59 = vld [vmem:[#allocation130_spill] sm:$0xff] }
 0x2d8   : > { %24830 = vst [vmem:[#allocation80_spill] sm:$0xff] %v20499_v43  ;;  %24831 = vst [vmem:[#allocation81_spill] sm:$0xff] %v20501_v8  ;;  %v24835_v43 = vld [vmem:[#allocation97_spill] sm:$0xff]  ;;  %v1238_v48 = vmul.f32 %v20103_v53, %v24849_v14  ;;  %v1237_v51 = vmul.f32 %v20103_v53, %v24852_v13  ;;  %v1261_v2 = vadd.f32 %v1229_v1, %v997_v6  ;;  %v24859_v1 = vld [vmem:[#allocation135_spill] sm:$0xff] }
 0x2d9   : > { %v1226_v8 = vmul.f32 %v20103_v53, %v24835_v43  ;;  %v1257_v43 = vadd.f32 %v1225_v37, %v993_v5  ;;  %v1489_v5 = vmul.f32 %v20170_v41, %v24853_v27  ;;  %v1262_v37 = vadd.f32 %v1230_v16, %v998_v0  ;;  %v24865_v27 = vld [vmem:[#allocation141_spill] sm:$0xff] }
 0x2da   : > { %v1264_v35 = vadd.f32 %v1232_v25, %v1000_v34  ;;  %v1263_v20 = vadd.f32 %v1231_v32, %v999_v21  ;;  %v1266_v60 = vadd.f32 %v1234_v58, %v1002_v19  ;;  %v1265_v28 = vadd.f32 %v1233_v24, %v1001_v42  ;;  %v24857_v21 = vld [vmem:[#allocation133_spill] sm:$0xff]  ;;  %v24858_v42 = vld [vmem:[#allocation134_spill] sm:$0xff] }
 0x2db   : > { %v20513_v17 = vpop.permute.xlu1 %2245  ;;  %v20515_v18 = vpop.permute.xlu0 %2240  ;;  %v1258_v62 = vadd.f32 %v1226_v8, %v994_v7  ;;  %v1260_v8 = vadd.f32 %v1228_v33, %v996_v57  ;;  %v1259_v7 = vadd.f32 %v1227_v29, %v995_v30  ;;  %v1488_v14 = vmul.f32 %v20170_v41, %v24854_v59  ;;  %v24856_v29 = vld [vmem:[#allocation132_spill] sm:$0xff]  ;;  %v24861_v25 = vld [vmem:[#allocation137_spill] sm:$0xff]  ;;  %v24862_v58 = vld [vmem:[#allocation138_spill] sm:$0xff] }
 0x2dc   : > { %24837 = vst [vmem:[#allocation82_spill] sm:$0xff] %v20513_v17  ;;  %24838 = vst [vmem:[#allocation83_spill] sm:$0xff] %v20515_v18  ;;  %v1268_v57 = vadd.f32 %v1236_v46, %v1004_v56  ;;  %v1267_v30 = vadd.f32 %v1235_v38, %v1003_v39  ;;  %v1270_v33 = vadd.f32 %v1238_v48, %v1006_v45  ;;  %v24860_v39 = vld [vmem:[#allocation136_spill] sm:$0xff]  ;;  %v24863_v46 = vld [vmem:[#allocation139_spill] sm:$0xff] }
 0x2dd   : > { %v1490_v53 = vmul.f32 %v20170_v41, %v24856_v29  ;;  %v1269_v6 = vadd.f32 %v1237_v51, %v1005_v52  ;;  %v1521_v34 = vadd.f32 %v1489_v5, %v1258_v62  ;;  %v1493_v19 = vmul.f32 %v20170_v41, %v24857_v21  ;;  %v24864_v48 = vld [vmem:[#allocation140_spill] sm:$0xff]  ;;  %v24866_v59 = vld [vmem:[#allocation142_spill] sm:$0xff]  ;;  %v24867_v21 = vld [vmem:[#allocation161_spill] sm:$0xff] }
 0x2de   : > { %v1492_v16 = vmul.f32 %v20170_v41, %v24858_v42  ;;  %v1495_v56 = vmul.f32 %v20170_v41, %v24859_v1  ;;  %v1494_v45 = vmul.f32 %v20170_v41, %v24860_v39  ;;  %v1497_v32 = vmul.f32 %v20170_v41, %v24861_v25  ;;  %v24870_v25 = vld [vmem:[#allocation163_spill] sm:$0xff]  ;;  %v24872_v18 = vld [vmem:[#allocation165_spill] sm:$0xff] }
 0x2df   : > { %v20539_v26 = vpop.permute.xlu1 %2255  ;;  %v20541_v55 = vpop.permute.xlu0 %2250  ;;  %v1496_v24 = vmul.f32 %v20170_v41, %v24862_v58  ;;  %v1520_v52 = vadd.f32 %v1488_v14, %v1257_v43  ;;  %v1499_v38 = vmul.f32 %v20170_v41, %v24863_v46  ;;  %v1522_v51 = vadd.f32 %v1490_v53, %v1259_v7  ;;  %v24869_v14 = vld [vmem:[#allocation162_spill] sm:$0xff] }
 0x2e0   : > { %24850 = vst [vmem:[#allocation84_spill] sm:$0xff] %v20539_v26  ;;  %24851 = vst [vmem:[#allocation85_spill] sm:$0xff] %v20541_v55  ;;  %v24855_v26 = vld [vmem:[#allocation131_spill] sm:$0xff]  ;;  %v1501_v5 = vmul.f32 %v20170_v41, %v24865_v27  ;;  %v1500_v29 = vmul.f32 %v20170_v41, %v24866_v59  ;;  %v1752_v42 = vmul.f32 %v20203_v44, %v24867_v21  ;;  %v24871_v59 = vld [vmem:[#allocation164_spill] sm:$0xff] }
 0x2e1   : > { %v1491_v55 = vmul.f32 %v20170_v41, %v24855_v26  ;;  %v1498_v26 = vmul.f32 %v20170_v41, %v24864_v48  ;;  %v1751_v39 = vmul.f32 %v20203_v44, %v24869_v14  ;;  %v1754_v7 = vmul.f32 %v20203_v44, %v24870_v25 }
 0x2e2   : > { %v1527_v53 = vadd.f32 %v1495_v56, %v1264_v35  ;;  %v1526_v58 = vadd.f32 %v1494_v45, %v1263_v20  ;;  %v1529_v46 = vadd.f32 %v1497_v32, %v1266_v60  ;;  %v1528_v48 = vadd.f32 %v1496_v24, %v1265_v28  ;;  %v24874_v28 = vld [vmem:[#allocation167_spill] sm:$0xff]  ;;  %v24876_v45 = vld [vmem:[#allocation169_spill] sm:$0xff]  ;;  %v24879_v24 = vld [vmem:[#allocation172_spill] sm:$0xff] }
 0x2e3   : > { %v20553_v13 = vpop.permute.xlu1 %2368  ;;  %v20555_v0 = vpop.permute.xlu0 %2363  ;;  %v1523_v62 = vadd.f32 %v1491_v55, %v1260_v8  ;;  %v1525_v55 = vadd.f32 %v1493_v19, %v1262_v37  ;;  %v1524_v8 = vadd.f32 %v1492_v16, %v1261_v2  ;;  %v1531_v41 = vadd.f32 %v1499_v38, %v1268_v57  ;;  %v24873_v16 = vld [vmem:[#allocation166_spill] sm:$0xff] }
 0x2e4   : > { %v1530_v27 = vadd.f32 %v1498_v26, %v1267_v30  ;;  %v1753_v21 = vmul.f32 %v20203_v44, %v24871_v59  ;;  %v1756_v17 = vmul.f32 %v20203_v44, %v24872_v18  ;;  %v1533_v37 = vadd.f32 %v1501_v5, %v1270_v33  ;;  %v24875_v30 = vld [vmem:[#allocation168_spill] sm:$0xff]  ;;  %v24877_v33 = vld [vmem:[#allocation170_spill] sm:$0xff]  ;;  %v24880_v26 = vld [vmem:[#allocation173_spill] sm:$0xff] }
 0x2e5   : > { %v1532_v2 = vadd.f32 %v1500_v29, %v1269_v6  ;;  %v1784_v19 = vadd.f32 %v1752_v42, %v1521_v34  ;;  %v1755_v14 = vmul.f32 %v20203_v44, %v24873_v16  ;;  %v1783_v20 = vadd.f32 %v1751_v39, %v1520_v52  ;;  %v24878_v34 = vld [vmem:[#allocation171_spill] sm:$0xff]  ;;  %v24881_v29 = vld [vmem:[#allocation174_spill] sm:$0xff] }
 0x2e6   : > { %v1786_v60 = vadd.f32 %v1754_v7, %v1523_v62  ;;  %v1758_v57 = vmul.f32 %v20203_v44, %v24874_v28  ;;  %v1757_v56 = vmul.f32 %v20203_v44, %v24875_v30  ;;  %v1760_v18 = vmul.f32 %v20203_v44, %v24876_v45 }
 0x2e7   : > { %v20579_v1 = vpop.permute.xlu1 %2378  ;;  %v20581_v43 = vpop.permute.xlu0 %2373  ;;  %v1759_v6 = vmul.f32 %v20203_v44, %v24877_v33  ;;  %v1762_v32 = vmul.f32 %v20203_v44, %v24878_v34  ;;  %v1761_v38 = vmul.f32 %v20203_v44, %v24879_v24  ;;  %v1785_v52 = vadd.f32 %v1753_v21, %v1522_v51  ;;  %v24884_v33 = vld [vmem:[#allocation60_spill] sm:$0xff] }
 0x2e8   : > { %24868 = vst [vmem:[#allocation86_spill] sm:$0xff] %v20581_v43  ;;  %v1788_v62 = vadd.f32 %v1756_v17, %v1525_v55  ;;  %v1764_v5 = vmul.f32 %v20203_v44, %v24880_v26  ;;  %v1763_v42 = vmul.f32 %v20203_v44, %v24881_v29  ;;  %v1787_v39 = vadd.f32 %v1755_v14, %v1524_v8 }
 0x2e9   : > { %v2016_v25 = vmul.f32 %v20224_v4, %v20037_v36  ;;  %v2015_v7 = vmul.f32 %v20224_v4, %v20039_v22  ;;  %v2018_v59 = vmul.f32 %v20224_v4, %v20066_v31  ;;  %v1790_v17 = vadd.f32 %v1758_v57, %v1527_v53 }
 0x2ea   : > { %v1789_v55 = vadd.f32 %v1757_v56, %v1526_v58  ;;  %v2017_v21 = vmul.f32 %v20224_v4, %v20068_v23  ;;  %v2020_v44 = vmul.f32 %v20224_v4, %v20084_v50  ;;  %v1792_v8 = vadd.f32 %v1760_v18, %v1529_v46 }
 0x2eb   : > { %v20593_v43 = vpop.permute.xlu1 %2388  ;;  %v20595_v35 = vpop.permute.xlu0 %2383  ;;  %v1791_v36 = vadd.f32 %v1759_v6, %v1528_v48  ;;  %v1794_v14 = vadd.f32 %v1762_v32, %v1531_v41  ;;  %v1793_v28 = vadd.f32 %v1761_v38, %v1530_v27  ;;  %v1796_v22 = vadd.f32 %v1764_v5, %v1533_v37  ;;  %v24882_v37 = vld [vmem:[#allocation26_spill] sm:$0xff]  ;;  %v24885_v6 = vld [vmem:[#allocation61_spill] sm:$0xff] }
 0x2ec   : > { %v1795_v30 = vadd.f32 %v1763_v42, %v1532_v2  ;;  %v2019_v31 = vmul.f32 %v20224_v4, %v20086_v9  ;;  %v2022_v45 = vmul.f32 %v20224_v4, %v20113_v54  ;;  %v2048_v53 = vadd.f32 %v2016_v25, %v1784_v19  ;;  %v24883_v2 = vld [vmem:[#allocation27_spill] sm:$0xff]  ;;  %v24886_v38 = vld [vmem:[#allocation62_spill] sm:$0xff] }
 0x2ed   : > { %v2047_v58 = vadd.f32 %v2015_v7, %v1783_v20  ;;  %v2050_v57 = vadd.f32 %v2018_v59, %v1786_v60  ;;  %v2021_v23 = vmul.f32 %v20224_v4, %v20115_v49  ;;  %v2049_v46 = vadd.f32 %v2017_v21, %v1785_v52  ;;  %v24887_v52 = vld [vmem:[#allocation63_spill] sm:$0xff] }
 0x2ee   : > { %v2052_v48 = vadd.f32 %v2020_v44, %v1788_v62  ;;  %v2024_v41 = vmul.f32 %v20224_v4, %v20135_v12  ;;  %v2023_v9 = vmul.f32 %v20224_v4, %v20137_v15  ;;  %v2026_v54 = vmul.f32 %v20224_v4, %v20172_v10  ;;  %v24888_v44 = vld [vmem:[#allocation64_spill] sm:$0xff] }
 0x2ef   : > { %v20619_v16 = vpop.permute.xlu1 %2398  ;;  %v20621_v51 = vpop.permute.xlu0 %2393  ;;  %v2025_v27 = vmul.f32 %v20224_v4, %v20174_v11  ;;  %v2028_v49 = vmul.f32 %v20224_v4, %v24882_v37  ;;  %v2027_v19 = vmul.f32 %v20224_v4, %v24883_v2  ;;  %v2051_v20 = vadd.f32 %v2019_v31, %v1787_v39  ;;  %v20662_v4 = vld [vmem:[%s24665_s20 + $0x8] ss:$0 sm:$0xff]  ;;  %v24896_v2 = vld [vmem:[#allocation83_spill] sm:$0xff] }
 0x2f0   : > { %v2054_v60 = vadd.f32 %v2022_v45, %v1790_v17  ;;  %v2279_v12 = vmul.f32 %v20255_v47, %v20401_v61  ;;  %v2278_v15 = vmul.f32 %v20255_v47, %v20403_v3  ;;  %v2053_v18 = vadd.f32 %v2021_v23, %v1789_v55  ;;  %v24890_v31 = vld [vmem:[#allocation80_spill] sm:$0xff] }
 0x2f1   : > { %v2281_v10 = vmul.f32 %v20255_v47, %v20405_v63  ;;  %v2280_v11 = vmul.f32 %v20255_v47, %v24884_v33  ;;  %v2283_v34 = vmul.f32 %v20255_v47, %v24885_v6  ;;  %v2056_v3 = vadd.f32 %v2024_v41, %v1792_v8  ;;  %v24893_v41 = vld [vmem:[#allocation82_spill] sm:$0xff] }
 0x2f2   : > { %v2055_v24 = vadd.f32 %v2023_v9, %v1791_v36  ;;  %v2282_v63 = vmul.f32 %v20255_v47, %v24886_v38  ;;  %v2285_v62 = vmul.f32 %v20255_v47, %v24887_v52  ;;  %v2058_v26 = vadd.f32 %v2026_v54, %v1794_v14  ;;  %v24894_v9 = vld [vmem:[#allocation30_spill] sm:$0xff] }
 0x2f3   : > { %v20633_v56 = vpop.permute.xlu1 %2408  ;;  %v20635_v50 = vpop.permute.xlu0 %2403  ;;  %v2057_v5 = vadd.f32 %v2025_v27, %v1793_v28  ;;  %v2060_v29 = vadd.f32 %v2028_v49, %v1796_v22  ;;  %v2059_v42 = vadd.f32 %v2027_v19, %v1795_v30  ;;  %v2311_v39 = vadd.f32 %v2279_v12, %v2048_v53  ;;  %v24895_v27 = vld [vmem:[#allocation31_spill] sm:$0xff]  ;;  %v24902_v52 = vld [vmem:[#allocation34_spill] sm:$0xff] }
 0x2f4   : > { %v2310_v25 = vadd.f32 %v2278_v15, %v2047_v58  ;;  %v2526_v7 = vmul.f32 %v20662_v4, %v20553_v13  ;;  %v2525_v59 = vmul.f32 %v20662_v4, %v20555_v0  ;;  %v20676_v17 = vadd.f32 %v2281_v10, %v2050_v57  ;;  %v24889_v0 = vld [vmem:[#allocation79_spill] sm:$0xff]  ;;  %v24891_v58 = vld [vmem:[#allocation86_spill] sm:$0xff]  ;;  %v24898_v10 = vld [vmem:[#allocation84_spill] sm:$0xff] }
 0x2f5   : > { %v20678_v55 = vadd.f32 %v2280_v11, %v2049_v46  ;;  %v20680_v21 = vadd.f32 %v2283_v34, %v2052_v48  ;;  %v2284_v8 = vmul.f32 %v20255_v47, %v24888_v44  ;;  %v20688_v28 = vadd.f32 %v2282_v63, %v2051_v20  ;;  %v24892_v46 = vld [vmem:[#allocation81_spill] sm:$0xff]  ;;  %v20717_v19 = vld [vmem:[%s24897_s14] ss:$0 sm:$0xff] }
 0x2f6   : > { %v20690_v22 = vadd.f32 %v2285_v62, %v2054_v60  ;;  %v2287_v13 = vmul.f32 %v20255_v47, %v20473_v40  ;;  %v2286_v30 = vmul.f32 %v20255_v47, %v24889_v0  ;;  %v2289_v45 = vmul.f32 %v20255_v47, %v24890_v31  ;;  %v24899_v11 = vld [vmem:[#allocation85_spill] sm:$0xff] }
 0x2f7   : > { %v20664_v32 = vpop.permute.xlu1 %2418  ;;  %v20666_v61 = vpop.permute.xlu0 %2413  ;;  %v2528_v53 = vmul.f32 %v20662_v4, %v20579_v1  ;;  %v2527_v57 = vmul.f32 %v20662_v4, %v24891_v58  ;;  %v2530_v23 = vmul.f32 %v20662_v4, %v20593_v43  ;;  %v2288_v48 = vmul.f32 %v20255_v47, %v24892_v46  ;;  %v24901_v63 = vld [vmem:[#allocation33_spill] sm:$0xff] }
 0x2f8   : > { %v2291_v40 = vmul.f32 %v20255_v47, %v24893_v41  ;;  %v2558_v54 = vadd.f32 %v2526_v7, %v24894_v9  ;;  %v2557_v37 = vadd.f32 %v2525_v59, %v24895_v27  ;;  %v20710_v49 = vadd.f32 %v2284_v8, %v2053_v18  ;;  %v24903_v8 = vld [vmem:[#allocation49_spill] sm:$0xff] }
 0x2f9   : > { %v2290_v1 = vmul.f32 %v20255_v47, %v24896_v2  ;;  %v2529_v43 = vmul.f32 %v20662_v4, %v20595_v35  ;;  %v2532_v20 = vmul.f32 %v20662_v4, %v20619_v16  ;;  %v20727_v15 = vadd.f32 %v2287_v13, %v2056_v3  ;;  %v24900_v35 = vld [vmem:[#allocation32_spill] sm:$0xff] }
 0x2fa   : > { %v20729_v18 = vadd.f32 %v2286_v30, %v2055_v24  ;;  %v2293_v33 = vmul.f32 %v20255_v47, %v24898_v10  ;;  %v2292_v6 = vmul.f32 %v20255_v47, %v24899_v11  ;;  %v20735_v34 = vadd.f32 %v2289_v45, %v2058_v26  ;;  %v24904_v26 = vld [vmem:[#allocation50_spill] sm:$0xff]  ;;  %v24905_v45 = vld [vmem:[#allocation28_spill] sm:$0xff] }
 0x2fb   : > { %v20684_v36 = vpop.permute.xlu1 %2428  ;;  %v20686_v14 = vpop.permute.xlu0 %2423  ;;  %v2560_v38 = vadd.f32 %v2528_v53, %v24900_v35  ;;  %v2559_v16 = vadd.f32 %v2527_v57, %v24901_v63  ;;  %v2562_v62 = vadd.f32 %v2530_v23, %v24902_v52  ;;  %v20740_v7 = vadd.f32 %v2288_v48, %v2057_v5  ;;  %v24908_v35 = vld [vmem:[#allocation52_spill] sm:$0xff] }
 0x2fc   : > { %v20742_v3 = vadd.f32 %v2291_v40, %v2060_v29  ;;  %v2597_v24 = vadd.f32 %v20717_v19, %v2558_v54  ;;  %v2596_v59 = vadd.f32 %v20717_v19, %v2557_v37  ;;  %v20746_v44 = vadd.f32 %v2290_v1, %v2059_v42  ;;  %v24906_v29 = vld [vmem:[#allocation29_spill] sm:$0xff]  ;;  %v24907_v37 = vld [vmem:[#allocation51_spill] sm:$0xff] }
 0x2fd   : > { %v2561_v47 = vadd.f32 %v2529_v43, %v24903_v8  ;;  %v2564_v13 = vadd.f32 %v2532_v20, %v24904_v26  ;;  %v2531_v0 = vmul.f32 %v20662_v4, %v20621_v51  ;;  %v20753_v5 = vadd.f32 %v2293_v33, %v24905_v45  ;;  %v24909_v8 = vld [vmem:[#allocation53_spill] sm:$0xff] }
 0x2fe   : > { %v20756_v53 = vadd.f32 %v2292_v6, %v24906_v29  ;;  %v2599_v57 = vadd.f32 %v20717_v19, %v2560_v38  ;;  %v2598_v23 = vadd.f32 %v20717_v19, %v2559_v16  ;;  %v20763_v46 = vadd.f32 %v20717_v19, %v2562_v62 }
 0x2ff   : > { %v20723_v60 = vpop.permute.xlu1 %2438  ;;  %v20725_v12 = vpop.permute.xlu0 %2433  ;;  %v2534_v51 = vmul.f32 %v20662_v4, %v20633_v56  ;;  %v2629_v48 = vmax.f32 %v2597_v24, 0.0  ;;  %v2628_v41 = vmax.f32 %v2596_v59, 0.0  ;;  %v20768_v54 = vadd.f32 %v20717_v19, %v2561_v47 }
 0x300   : > { %v20771_v27 = vadd.f32 %v20717_v19, %v2564_v13  ;;  %v2563_v2 = vadd.f32 %v2531_v0, %v24907_v37  ;;  %v2533_v1 = vmul.f32 %v20662_v4, %v20635_v50  ;;  %v2631_v33 = vmax.f32 %v2599_v57, 0.0 }
 0x301   : > { %v2630_v11 = vmax.f32 %v2598_v23, 0.0  ;;  %v2633_v6 = vmax.f32 %v20763_v46, 0.0  ;;  %v2566_v38 = vadd.f32 %v2534_v51, %v24908_v35  ;;  %v2632_v62 = vmax.f32 %v20768_v54, 0.0 }
 0x302   : > { %v2635_v24 = vmax.f32 %v20771_v27, 0.0  ;;  %v20788_v59 = vadd.f32 %v20717_v19, %v2563_v2  ;;  %v2565_v47 = vadd.f32 %v2533_v1, %v24909_v8  ;;  %v24910_v1 = vld [vmem:[#allocation54_spill] sm:$0xff] }
 0x303   : > { %v2449_v30 = vpop.permute.xlu1 %2448  ;;  %v2444_v31 = vpop.permute.xlu0 %2443 }
 0x304   : > { %v2542_v58 = vmul.f32 %v20662_v4, %v2449_v30  ;;  %v2541_v42 = vmul.f32 %v20662_v4, %v2444_v31  ;;  %v2634_v51 = vmax.f32 %v20788_v59, 0.0 }
 0x306   : > { %v2574_v40 = vadd.f32 %v2542_v58, %v2311_v39  ;;  %v2573_v9 = vadd.f32 %v2541_v42, %v2310_v25  ;;  %v2535_v42 = vmul.f32 %v20662_v4, %v20666_v61 }
 0x307   : > { %v2459_v43 = vpop.permute.xlu1 %2458  ;;  %v2454_v20 = vpop.permute.xlu0 %2453 }
 0x308   : > { %v2613_v56 = vadd.f32 %v20717_v19, %v2574_v40  ;;  %v2612_v10 = vadd.f32 %v20717_v19, %v2573_v9  ;;  %v2544_v39 = vmul.f32 %v20662_v4, %v2459_v43  ;;  %v2543_v25 = vmul.f32 %v20662_v4, %v2454_v20  ;;  %v24911_v20 = vld [vmem:[#allocation55_spill] sm:$0xff] }
 0x30a   : > { %v2645_v63 = vmax.f32 %v2613_v56, 0.0  ;;  %v2644_v16 = vmax.f32 %v2612_v10, 0.0  ;;  %v2576_v50 = vadd.f32 %v2544_v39, %v20676_v17  ;;  %v2575_v52 = vadd.f32 %v2543_v25, %v20678_v55 }
 0x30b   : > { %v2469_v26 = vpop.permute.xlu1 %2468  ;;  %v2464_v13 = vpop.permute.xlu0 %2463  ;;  %v20794_v17 = vadd.f32 %v20717_v19, %v2566_v38  ;;  %v2536_v55 = vmul.f32 %v20662_v4, %v20664_v32  ;;  %v2567_v56 = vadd.f32 %v2535_v42, %v24911_v20  ;;  %v24915_v20 = vld [vmem:[#allocation59_spill] sm:$0xff] }
 0x30c   : > { %v2661_v0 = vmax.f32 %v2629_v48, %v2645_v63  ;;  %v2660_v30 = vmax.f32 %v2628_v41, %v2644_v16  ;;  %v2615_v31 = vadd.f32 %v20717_v19, %v2576_v50  ;;  %v2614_v45 = vadd.f32 %v20717_v19, %v2575_v52 }
 0x30d   : > { %v2546_v29 = vmul.f32 %v20662_v4, %v2469_v26  ;;  %v2545_v58 = vmul.f32 %v20662_v4, %v2464_v13  ;;  %v20804_v48 = vadd.f32 %v20717_v19, %v2565_v47  ;;  %v2637_v2 = vmax.f32 %v20794_v17, 0.0  ;;  %v24913_v17 = vld [vmem:[#allocation57_spill] sm:$0xff] }
 0x30e   : > { %v2676_v57 = vmax.f32 %v2660_v30, %v2661_v0  ;;  %v2647_v23 = vmax.f32 %v2615_v31, 0.0  ;;  %v2646_v46 = vmax.f32 %v2614_v45, 0.0  ;;  %v2606_v30 = vadd.f32 %v20717_v19, %v2567_v56  ;;  %v24912_v31 = vld [vmem:[#allocation56_spill] sm:$0xff] }
 0x30f   : > { %v2578_v41 = vadd.f32 %v2546_v29, %v20680_v21  ;;  %v2577_v40 = vadd.f32 %v2545_v58, %v20688_v28  ;;  %v2479_v32 = vpop.permute.xlu1 %2478  ;;  %v2474_v9 = vpop.permute.xlu0 %2473  ;;  %v2568_v21 = vadd.f32 %v2536_v55, %v24910_v1  ;;  %v2636_v59 = vmax.f32 %v20804_v48, 0.0 }
 0x310   : > { %15182 = vst.msk [vmem:[%s20808_s24 + $0x58] sm:$0xff] %vm76_vm0, %v2676_v57  ;;  %v2663_v61 = vmax.f32 %v2631_v33, %v2647_v23  ;;  %v2662_v54 = vmax.f32 %v2630_v11, %v2646_v46  ;;  %v2548_v27 = vmul.f32 %v20662_v4, %v2479_v32  ;;  %v2547_v37 = vmul.f32 %v20662_v4, %v2474_v9 }
 0x311   : > { %v2617_v28 = vadd.f32 %v20717_v19, %v2578_v41  ;;  %v2616_v43 = vadd.f32 %v20717_v19, %v2577_v40  ;;  %v2538_v33 = vmul.f32 %v20662_v4, %v20684_v36  ;;  %v2537_v11 = vmul.f32 %v20662_v4, %v20686_v14 }
 0x312   : > { %v2682_v10 = vmax.f32 %v2662_v54, %v2663_v61  ;;  %v2580_v39 = vadd.f32 %v2548_v27, %v20690_v22  ;;  %v2579_v25 = vadd.f32 %v2547_v37, %v20710_v49  ;;  %v2607_v36 = vadd.f32 %v20717_v19, %v2568_v21 }
 0x313   : > { %v2649_v35 = vmax.f32 %v2617_v28, 0.0  ;;  %v2648_v38 = vmax.f32 %v2616_v43, 0.0  ;;  %v2489_v63 = vpop.permute.xlu1 %2488  ;;  %v2484_v16 = vpop.permute.xlu0 %2483  ;;  %v2570_v45 = vadd.f32 %v2538_v33, %v24912_v31  ;;  %v2569_v55 = vadd.f32 %v2537_v11, %v24913_v17  ;;  %v24914_v28 = vld [vmem:[#allocation58_spill] sm:$0xff] }
 0x314   : > { %15183 = vst.msk [vmem:[%s20808_s24 + $0x60] sm:$0xff] %vm76_vm0, %v2682_v10  ;;  %v2619_v50 = vadd.f32 %v20717_v19, %v2580_v39  ;;  %v2618_v52 = vadd.f32 %v20717_v19, %v2579_v25  ;;  %v2550_v22 = vmul.f32 %v20662_v4, %v2489_v63  ;;  %v2549_v49 = vmul.f32 %v20662_v4, %v2484_v16 }
 0x315   : > { %v2665_v8 = vmax.f32 %v2633_v6, %v2649_v35  ;;  %v2664_v14 = vmax.f32 %v2632_v62, %v2648_v38  ;;  %v2639_v41 = vmax.f32 %v2607_v36, 0.0  ;;  %v2609_v32 = vadd.f32 %v20717_v19, %v2570_v45 }
 0x316   : > { %v2651_v47 = vmax.f32 %v2619_v50, 0.0  ;;  %v2650_v26 = vmax.f32 %v2618_v52, 0.0  ;;  %v2582_v13 = vadd.f32 %v2550_v22, %v20727_v15  ;;  %v2581_v0 = vadd.f32 %v2549_v49, %v20729_v18 }
 0x317   : > { %v2686_v29 = vmax.f32 %v2664_v14, %v2665_v8  ;;  %v2499_v58 = vpop.permute.xlu1 %2498  ;;  %v2494_v42 = vpop.permute.xlu0 %2493  ;;  %v2540_v15 = vmul.f32 %v20662_v4, %v20723_v60  ;;  %v2539_v18 = vmul.f32 %v20662_v4, %v20725_v12  ;;  %v2608_v9 = vadd.f32 %v20717_v19, %v2569_v55 }
 0x318   : > { %v2667_v57 = vmax.f32 %v2635_v24, %v2651_v47  ;;  %v2666_v23 = vmax.f32 %v2634_v51, %v2650_v26  ;;  %v2621_v6 = vadd.f32 %v20717_v19, %v2582_v13  ;;  %v2620_v62 = vadd.f32 %v20717_v19, %v2581_v0 }
 0x319   : > { %15184 = vst.msk [vmem:[%s20808_s24 + $0x68] sm:$0xff] %vm76_vm0, %v2686_v29  ;;  %v2552_v46 = vmul.f32 %v20662_v4, %v2499_v58  ;;  %v2551_v48 = vmul.f32 %v20662_v4, %v2494_v42  ;;  %v2572_v43 = vadd.f32 %v2540_v15, %v24914_v28  ;;  %v2571_v56 = vadd.f32 %v2539_v18, %v24915_v20 }
 0x31a   : > { %v2690_v24 = vmax.f32 %v2666_v23, %v2667_v57  ;;  %v2653_v51 = vmax.f32 %v2621_v6, 0.0  ;;  %v2652_v40 = vmax.f32 %v2620_v62, 0.0  ;;  %v2641_v33 = vmax.f32 %v2609_v32, 0.0 }
 0x31b   : > { %v2584_v61 = vadd.f32 %v2552_v46, %v20735_v34  ;;  %v2583_v60 = vadd.f32 %v2551_v48, %v20740_v7  ;;  %v2509_v54 = vpop.permute.xlu1 %2508  ;;  %v2504_v12 = vpop.permute.xlu0 %2503  ;;  %v2638_v7 = vmax.f32 %v2606_v30, 0.0  ;;  %v2640_v11 = vmax.f32 %v2608_v9, 0.0 }
 0x31c   : > { %15185 = vst.msk [vmem:[%s20808_s24 + $0x70] sm:$0xff] %vm76_vm0, %v2690_v24  ;;  %v2669_v27 = vmax.f32 %v2637_v2, %v2653_v51  ;;  %v2668_v37 = vmax.f32 %v2636_v59, %v2652_v40  ;;  %v2554_v1 = vmul.f32 %v20662_v4, %v2509_v54  ;;  %v2553_v21 = vmul.f32 %v20662_v4, %v2504_v12 }
 0x31d   : > { %v2623_v10 = vadd.f32 %v20717_v19, %v2584_v61  ;;  %v2622_v34 = vadd.f32 %v20717_v19, %v2583_v60 }
 0x31e   : > { %v2694_v39 = vmax.f32 %v2668_v37, %v2669_v27  ;;  %v2586_v25 = vadd.f32 %v2554_v1, %v20742_v3  ;;  %v2585_v2 = vadd.f32 %v2553_v21, %v20746_v44  ;;  %v2611_v3 = vadd.f32 %v20717_v19, %v2572_v43 }
 0x31f   : > { %v2655_v35 = vmax.f32 %v2623_v10, 0.0  ;;  %v2654_v38 = vmax.f32 %v2622_v34, 0.0  ;;  %v2519_v63 = vpop.permute.xlu1 %2518  ;;  %v2514_v16 = vpop.permute.xlu0 %2513  ;;  %v2610_v44 = vadd.f32 %v20717_v19, %v2571_v56 }
 0x320   : > { %15186 = vst.msk [vmem:[%s20808_s24 + $0x78] sm:$0xff] %vm76_vm0, %v2694_v39  ;;  %v2625_v50 = vadd.f32 %v20717_v19, %v2586_v25  ;;  %v2624_v52 = vadd.f32 %v20717_v19, %v2585_v2  ;;  %v2556_v22 = vmul.f32 %v20662_v4, %v2519_v63  ;;  %v2555_v49 = vmul.f32 %v20662_v4, %v2514_v16 }
 0x321   : > { %v2671_v59 = vmax.f32 %v2639_v41, %v2655_v35  ;;  %v2670_v36 = vmax.f32 %v2638_v7, %v2654_v38  ;;  %v2643_v45 = vmax.f32 %v2611_v3, 0.0  ;;  %v2642_v17 = vmax.f32 %v2610_v44, 0.0 }
 0x322   : > { %v2657_v8 = vmax.f32 %v2625_v50, 0.0  ;;  %v2656_v14 = vmax.f32 %v2624_v52, 0.0  ;;  %v2588_v47 = vadd.f32 %v2556_v22, %v20753_v5  ;;  %v2587_v26 = vadd.f32 %v2555_v49, %v20756_v53 }
 0x323   : > { %v2698_v13 = vmax.f32 %v2670_v36, %v2671_v59 }
 0x324   : > { %v2673_v0 = vmax.f32 %v2641_v33, %v2657_v8  ;;  %v2672_v30 = vmax.f32 %v2640_v11, %v2656_v14  ;;  %v2627_v31 = vadd.f32 %v20717_v19, %v2588_v47  ;;  %v2626_v4 = vadd.f32 %v20717_v19, %v2587_v26 }
 0x325   : > { %15187 = vst.msk [vmem:[%s20808_s24 + $0x80] sm:$0xff] %vm76_vm0, %v2698_v13 }
 0x326   : > { %v2702_v55 = vmax.f32 %v2672_v30, %v2673_v0  ;;  %v2659_v29 = vmax.f32 %v2627_v31, 0.0  ;;  %v2658_v58 = vmax.f32 %v2626_v4, 0.0  ;;  %217 = sbr.rel (!%p215_p8) target bundleno = 92 (0x5c), region = 168 }
 0x328   : > { %15188 = vst.msk [vmem:[%s20808_s24 + $0x88] sm:$0xff] %vm76_vm0, %v2702_v55  ;;  %v2675_v5 = vmax.f32 %v2643_v45, %v2659_v29  ;;  %v2674_v42 = vmax.f32 %v2642_v17, %v2658_v58 }
 0x32a   : > { %v2706_v53 = vmax.f32 %v2674_v42, %v2675_v5 }
 0x32c   : > { %15189 = vst.msk [vmem:[%s20808_s24 + $0x90] sm:$0xff] %vm76_vm0, %v2706_v53 }
 0x32d LB: > { %v18040_v19 = vld [vmem:[%s24472_s3 + $0x20] sm:$0xff]   ;;  %v18042_v23 = vld [vmem:[%s24472_s3 + $0x28] sm:$0xff]   ;;  %s15191_s20 = smul.u32 160, %s18675_s25  ;;  %v18044_v62 = vld [vmem:[%s24472_s3 + $0x30] sm:$0xff]   ;;  %s18675_s25 = sphi %s20883_s25, %s2715_s25  }
 0x32e   : > { %v20894_v57 = vld [vmem:[%s24472_s3 + $0x80] sm:$0xff]   ;;  %17139 = vmatprep.subr.bf16.mxu1 %v18040_v19  ;;  %v20904_v6 = vld [vmem:[%s24472_s3 + $0x88] sm:$0xff]   ;;  %v20914_v15 = vld [vmem:[%s24472_s3 + $0x90] sm:$0xff]   ;;  %s14880_s23 = smul.u32 48, %s18675_s25  ;;  %s2715_s25 = sadd.s32 1, %s18675_s25  }
 0x32f   : > { %17235 = vmatprep.subr.bf16.mxu0 %v20894_v57  ;;  %17140 = vmatpush3.bf16.msra.mxu1 %v18040_v19  ;;  %v18046_v18 = vld [vmem:[%s24472_s3 + $0x38] sm:$0xff]   ;;  %s20920_s24 = scalar_lea.vmem [#allocation2], %s15191_s20  ;;  %v18048_v60 = vld [vmem:[%s24472_s3] sm:$0xff]   ;;  %v18050_v56 = vld [vmem:[%s24472_s3 + $0xa8] sm:$0xff]   ;;  %p2712_p9 = scmp.ge.s32.totalorder %s2715_s25, 4  }
 0x330   : > { %17236 = vmatpush3.bf16.msra.mxu0 %v20894_v57  ;;  %17141 = vmatprep.subr.bf16.mxu1 %v18042_v23  ;;  %v20935_v24 = vld [vmem:[%s24472_s3 + $0x98] sm:$0xff]   ;;  %v18049_v27 = vld [vmem:[%s24472_s3 + $0xa0] sm:$0xff]   ;;  %v18051_v25 = vld [vmem:[%s24472_s3 + $0x8] sm:$0xff]   ;;  %s14881_s26 = scalar_lea.vmem [#allocation3], %s14880_s23  ;;  %vm14008_vm1 = vcmask (%p2712_p9), 7168   ;;  %vm14771_vm2 = vcmask (%p2712_p9), 73728  }
 0x331   : > { %17237 = vmatprep.subr.bf16.mxu0 %v20904_v6  ;;  %v18054_v11 = vld [vmem:[%s24472_s3 + $0x10] sm:$0xff]   ;;  %v18053_v50 = vld [vmem:[%s24472_s3 + $0xb8] sm:$0xff]   ;;  %v18055_v22 = vld [vmem:[%s24472_s3 + $0xc0] sm:$0xff]  }
 0x332   : > { %v18052_v35 = vld [vmem:[%s24472_s3 + $0xb0] sm:$0xff]   ;;  %v18056_v52 = vld [vmem:[%s24472_s3 + $0x18] sm:$0xff]   ;;  %v18058_v49 = vld [vmem:[%s24472_s3 + $0x40] sm:$0xff]  }
 0x333   : > { %17142 = vmatpush3.bf16.msra.mxu1 %v18042_v23  ;;  %v20923_v46 = vld [vmem:[%s20920_s24 + $0x8] sm:$0xff]  ;;  %v20926_v48 = vld [vmem:[%s20920_s24 + $0x10] sm:$0xff]  ;;  %v20929_v41 = vld [vmem:[%s20920_s24 + $0x58] sm:$0xff] }
 0x334   : > { %17238 = vmatpush3.bf16.msra.mxu0 %v20904_v6  ;;  %17143 = vmatprep.subr.bf16.mxu1 %v18044_v62  ;;  %v2769_v51 = vpack.c.bf16 %v20926_v48, %v20923_v46  ;;  %v15317_v40 = vld [vmem:[%s20920_s24 + $0x60] sm:$0xff]  ;;  %v20941_v32 = vld [vmem:[%s20920_s24 + $0x18] sm:$0xff]  ;;  %v15318_v54 = vld [vmem:[%s20920_s24 + $0x68] sm:$0xff] }
 0x335   : > { %17239 = vmatprep.subr.bf16.mxu0 %v20914_v15  ;;  %v3487_v9 = vpack.c.bf16 %v15317_v40, %v20929_v41  ;;  %v20945_v61 = vld [vmem:[%s20920_s24 + $0x20] sm:$0xff]  ;;  %v15319_v12 = vld [vmem:[%s20920_s24 + $0x70] sm:$0xff]  ;;  %v20960_v37 = vld [vmem:[%s20920_s24 + $0x28] sm:$0xff]  ;;  %v20998_v16 = vpack.c.bf16 %v15318_v54, %v15317_v40  ;;  %v2736_v42 = vpack.c.bf16 %v20941_v32, %v20926_v48 }
 0x336   : > { %17147 = vmatprep.mubr.msk.bf16.mxu1 %vm76_vm0, %v2769_v51  ;;  %v2770_v1 = vpack.c.bf16 %v20945_v61, %v20941_v32  ;;  %v20965_v21 = vld [vmem:[%s20920_s24 + $0x30] sm:$0xff]  ;;  %v15320_v28 = vld [vmem:[%s20920_s24 + $0x78] sm:$0xff]  ;;  %v15321_v43 = vld [vmem:[%s20920_s24 + $0x80] sm:$0xff]  ;;  %v3488_v20 = vpack.c.bf16 %v15319_v12, %v15318_v54  ;;  %v21085_v19 = vpack.c.bf16 %v20960_v37, %v20945_v61 }
 0x337   : > { %17144 = vmatpush3.bf16.msra.mxu1 %v18044_v62  ;;  %17243 = vmatprep.mubr.msk.bf16.mxu0 %vm76_vm0, %v3487_v9  ;;  %v2771_v10 = vpack.c.bf16 %v20965_v21, %v20960_v37  ;;  %v3489_v34 = vpack.c.bf16 %v15321_v43, %v15320_v28  ;;  %v20976_v7 = vld [vmem:[%s20920_s24 + $0x38] sm:$0xff]  ;;  %v20979_v39 = vld [vmem:[%s20920_s24 + $0x40] sm:$0xff]  ;;  %v15322_v2 = vld [vmem:[%s20920_s24 + $0x88] sm:$0xff]  ;;  %v21017_v3 = vpack.c.bf16 %v15320_v28, %v15319_v12 }
 0x338   : > { %17240 = vmatpush3.bf16.msra.mxu0 %v20914_v15  ;;  %17145 = vmatprep.subr.bf16.mxu1 %v18046_v18  ;;  %v15323_v33 = vld [vmem:[%s20920_s24 + $0x90] sm:$0xff]  ;;  %v2772_v38 = vpack.c.bf16 %v20979_v39, %v20976_v7  ;;  %v21019_v44 = vpack.c.bf16 %v15322_v2, %v15321_v43  ;;  %v18057_v59 = vld [vmem:[%s24472_s3 + $0xc8] sm:$0xff]   ;;  %v15361_v36 = vld [vmem:[%s20920_s24 + $0x98] sm:$0xff] }
 0x339   : > { %17241 = vmatprep.subr.bf16.mxu0 %v20935_v24  ;;  %v3490_v63 = vpack.c.bf16 %v15323_v33, %v15322_v2  ;;  %v2719_v8 = vld [vmem:[%s20920_s24] sm:$0xff]  ;;  %v21033_v14 = vld [vmem:[%s20920_s24 + $0xb0] sm:$0xff]  ;;  %v21036_v47 = vld [vmem:[%s20920_s24 + $0xb8] sm:$0xff]  ;;  %v21041_v13 = vpack.c.bf16 %v15361_v36, %v15323_v33 }
 0x33a   : > { %v18059_v26 = vld [vmem:[%s24472_s3 + $0xd0] sm:$0xff]   ;;  %v2735_v0 = vpack.c.bf16 %v20923_v46, %v2719_v8  ;;  %v21045_v30 = vld [vmem:[%s20920_s24 + $0x48] sm:$0xff]  ;;  %v21049_v31 = vpack.c.bf16 %v21036_v47, %v21033_v14  ;;  %v18061_v45 = vld [vmem:[%s24472_s3 + $0xd8] sm:$0xff]  }
 0x33b   : > { %17146 = vmatpush3.bf16.msra.mxu1 %v18046_v18  ;;  %v3097_v4 = vpack.c.bf16 %v21045_v30, %v20979_v39  ;;  %v21058_v17 = vld [vmem:[%s20920_s24 + $0xc0] sm:$0xff]  ;;  %v21061_v55 = vld [vmem:[%s20920_s24 + $0xc8] sm:$0xff]  ;;  %v21067_v29 = vld [vmem:[%s20920_s24 + $0xd0] sm:$0xff] }
 0x33c   : > { %17242 = vmatpush3.bf16.msra.mxu0 %v20935_v24  ;;  %17163 = vmatprep.subr.bf16.mxu1 %v18048_v60  ;;  %v21072_v58 = vld [vmem:[%s20920_s24 + $0xd8] sm:$0xff]  ;;  %v18063_v5 = vld [vmem:[%s24472_s3 + $0xe0] sm:$0xff]   ;;  %v21081_v53 = vpack.c.bf16 %v21061_v55, %v21058_v17  ;;  %v18060_v62 = vld [vmem:[%s24472_s3 + $0x48] sm:$0xff]  }
 0x33d   : > { %17259 = vmatprep.subr.bf16.mxu0 %v18049_v27  ;;  %v21089_v23 = vpack.c.bf16 %v21072_v58, %v21067_v29  ;;  %v21098_v18 = vld [vmem:[%s20920_s24 + $0xe0] sm:$0xff]  ;;  %v15369_v46 = vld [vmem:[%s20920_s24 + $0xe8] sm:$0xff]  ;;  %v2727_v48 = vld [vmem:[%s20920_s24 + $0x50] sm:$0xff] }
 0x33e   : > { %17148 = vmatmul.mubr.msk.bf16.vlgmr.msra.gmra.mrb[0].mxu1 %vm76_vm0, %v2770_v1  ;;  %v18062_v51 = vld [vmem:[%s24472_s3 + $0x50] sm:$0xff]   ;;  %v15392_v40 = vld [vmem:[%s20920_s24 + $0xa0] sm:$0xff]  ;;  %v15393_v32 = vld [vmem:[%s20920_s24 + $0xa8] sm:$0xff]  ;;  %v21114_v61 = vpack.c.bf16 %v15369_v46, %v21098_v18  ;;  %v4079_v36 = vpack.c.bf16 %v21098_v18, %v21072_v58 }
 0x33f   : > { %17244 = vmatmul.mubr.msk.bf16.vlgmr.msra.gmra.mrb[0].mxu0 %vm76_vm0, %v3488_v20  ;;  %17164 = vmatpush3.bf16.msra.mxu1 %v18048_v60  ;;  %v21117_v60 = vpack.c.bf16 %v20929_v41, %v2727_v48  ;;  %v21119_v54 = vpack.c.bf16 %v15393_v32, %v15392_v40  ;;  %v18064_v12 = vld [vmem:[%s24472_s3 + $0x58] sm:$0xff]   ;;  %v18066_v41 = vld [vmem:[%s24472_s3 + $0x60] sm:$0xff]   ;;  %v15400_v37 = vld [vmem:[%s20920_s24 + $0xf0] sm:$0xff] }
 0x340   : > { %17260 = vmatpush3.bf16.msra.mxu0 %v18049_v27  ;;  %17151 = vmatprep.mubr.msk.bf16.mxu1 %vm76_vm0, %v2771_v10  ;;  %v18065_v27 = vld [vmem:[%s24472_s3 + $0xe8] sm:$0xff]   ;;  %v21147_v1 = vld [vmem:[%s20920_s24 + $0xf8] sm:$0xff]  ;;  %v15404_v10 = vld [vmem:[%s20920_s24 + $0x110] sm:$0xff] }
 0x341   : > { %17261 = vmatprep.subr.bf16.mxu0 %v18050_v56  ;;  %17247 = vmatprep.mubr.msk.bf16.mxu0 %vm76_vm0, %v3489_v34  ;;  %v3884_v28 = vpack.c.bf16 %v21147_v1, %v15400_v37  ;;  %v18069_v43 = vld [vmem:[%s24472_s3 + $0xf8] sm:$0xff]   ;;  %v18068_v33 = vld [vmem:[%s24472_s3 + $0x68] sm:$0xff]  }
 0x342   : > { %17165 = vmatprep.subr.bf16.mxu1 %v18051_v25  ;;  %v18073_v39 = vld [vmem:[%s24472_s3 + $0x108] sm:$0xff]  }
 0x343   : > { %17166 = vmatpush3.bf16.msra.mxu1 %v18051_v25 }
 0x344   : > { %17262 = vmatpush3.bf16.msra.mxu0 %v18050_v56  ;;  %17167 = vmatprep.subr.bf16.mxu1 %v18054_v11  ;;  %v15403_v56 = vld [vmem:[%s20920_s24 + $0x108] sm:$0xff] }
 0x345   : > { %17263 = vmatprep.subr.bf16.mxu0 %v18052_v35 }
 0x346   : > { %17152 = vmatmul.mubr.msk.bf16.gmra.mrb[4].mxu1 %vm76_vm0, %v2772_v38  ;;  %v18070_v38 = vld [vmem:[%s24472_s3 + $0x70] sm:$0xff]  }
 0x347   : > { %17248 = vmatmul.mubr.msk.bf16.gmra.mrb[4].mxu0 %vm76_vm0, %v3490_v63  ;;  %17155 = vmatprep.mubr.msk.bf16.mxu1 %vm76_vm0, %v3487_v9  ;;  %v2738_v9 = vpack.c.bf16 %v20976_v7, %v20965_v21  ;;  %v18067_v21 = vld [vmem:[%s24472_s3 + $0xf0] sm:$0xff]   ;;  %v18071_v7 = vld [vmem:[%s24472_s3 + $0x100] sm:$0xff]  }
 0x348   : > { %17264 = vmatpush3.bf16.msra.mxu0 %v18052_v35  ;;  %17267 = vmatprep.mubr.msk.bf16.mxu0 %vm76_vm0, %v20998_v16  ;;  %v15407_v35 = vld [vmem:[%s20920_s24 + $0x128] sm:$0xff] }
 0x349   : > { %17265 = vmatprep.subr.bf16.mxu0 %v18053_v50  ;;  %17168 = vmatpush3.bf16.msra.mxu1 %v18054_v11  ;;  %v15406_v11 = vld [vmem:[%s20920_s24 + $0x120] sm:$0xff] }
 0x34a   : > { %17169 = vmatprep.subr.bf16.mxu1 %v18056_v52 }
 0x34c   : > { %17266 = vmatpush3.bf16.msra.mxu0 %v18053_v50  ;;  %v4076_v50 = vpack.c.bf16 %v21033_v14, %v15393_v32  ;;  %v18075_v14 = vld [vmem:[%s24472_s3 + $0x118] sm:$0xff]   ;;  %v15504_v32 = vld [vmem:[%s24473_s4] ss:$0 sm:$0xff] }
 0x34d   : > { %17283 = vmatprep.subr.bf16.mxu0 %v18055_v22  ;;  %17170 = vmatpush3.bf16.msra.mxu1 %v18056_v52  ;;  %v18072_v52 = vld [vmem:[%s24472_s3 + $0x78] sm:$0xff]  }
 0x34e   : > { %17156 = vmatmul.mubr.msk.bf16.gmra.mrb[8].mxu1 %vm76_vm0, %v3488_v20  ;;  %17187 = vmatprep.subr.bf16.mxu1 %v18058_v49  ;;  %v15402_v20 = vld [vmem:[%s20920_s24 + $0x100] sm:$0xff] }
 0x34f   : > { %17268 = vmatmul.mubr.msk.bf16.vlgmr.msra.gmra.mrb[0].mxu0 %vm76_vm0, %v21017_v3  ;;  %17159 = vmatprep.mubr.msk.bf16.mxu1 %vm76_vm0, %v3489_v34  ;;  %v15405_v34 = vld [vmem:[%s20920_s24 + $0x118] sm:$0xff]  ;;  %v21169_v25 = vpack.c.bf16 %v15403_v56, %v15402_v20  ;;  %v4080_v8 = vpack.c.bf16 %v15402_v20, %v21147_v1 }
 0x350   : > { %17284 = vmatpush3.bf16.msra.mxu0 %v18055_v22  ;;  %17271 = vmatprep.mubr.msk.bf16.mxu0 %vm76_vm0, %v21019_v44  ;;  %v21171_v2 = vpack.c.bf16 %v15405_v34, %v15404_v10  ;;  %v4077_v22 = vpack.c.bf16 %v21058_v17, %v21036_v47  ;;  %v4081_v47 = vpack.c.bf16 %v15404_v10, %v15403_v56 }
 0x351   : > { %17285 = vmatprep.subr.bf16.mxu0 %v18057_v59 }
 0x354   : > { %17286 = vmatpush3.bf16.msra.mxu0 %v18057_v59  ;;  %v18074_v59 = vld [vmem:[%s24472_s3 + $0x110] sm:$0xff]  }
 0x355   : > { %17287 = vmatprep.subr.bf16.mxu0 %v18059_v26 }
 0x356   : > { %17160 = vmatmul.mubr.msk.bf16.gmra.mrb[12].mxu1 %vm76_vm0, %v3490_v63  ;;  %v21188_v63 = vpack.c.bf16 %v15407_v35, %v15406_v11 }
 0x357   : > { %17272 = vmatmul.mubr.msk.bf16.gmra.mrb[4].mxu0 %vm76_vm0, %v21041_v13  ;;  %17171 = vmatprep.mubr.msk.bf16.mxu1 %vm76_vm0, %v2735_v0 }
 0x358   : > { %17275 = vmatprep.mubr.msk.bf16.mxu0 %vm76_vm0, %v21049_v31  ;;  %17288 = vmatpush3.bf16.msra.mxu0 %v18059_v26  ;;  %v4082_v26 = vpack.c.bf16 %v15406_v11, %v15405_v34 }
 0x359   : > { %17289 = vmatprep.subr.bf16.mxu0 %v18061_v45 }
 0x35c   : > { %17290 = vmatpush3.bf16.msra.mxu0 %v18061_v45 }
 0x35d   : > { %17307 = vmatprep.subr.bf16.mxu0 %v18063_v5 }
 0x35e   : > { %17172 = vmatmul.mubr.msk.bf16.vlgmr.msra.gmra.mrb[0].mxu1 %vm76_vm0, %v2736_v42 }
 0x35f   : > { %17276 = vmatmul.mubr.msk.bf16.gmra.mrb[8].mxu0 %vm76_vm0, %v21081_v53  ;;  %17188 = vmatpush3.bf16.msra.mxu1 %v18058_v49  ;;  %v4078_v49 = vpack.c.bf16 %v21067_v29, %v21061_v55 }
 0x360   : > { %17175 = vmatprep.mubr.msk.bf16.mxu1 %vm76_vm0, %v21085_v19  ;;  %17279 = vmatprep.mubr.msk.bf16.mxu0 %vm76_vm0, %v21089_v23 }
 0x361   : > { %17189 = vmatprep.subr.bf16.mxu1 %v18060_v62 }
 0x363   : > { %17190 = vmatpush3.bf16.msra.mxu1 %v18060_v62 }
 0x364   : > { %17191 = vmatprep.subr.bf16.mxu1 %v18062_v51 }
 0x366   : > { %17176 = vmatmul.mubr.msk.bf16.gmra.mrb[4].mxu1 %vm76_vm0, %v2738_v9 }
 0x367   : > { %17280 = vmatmul.mubr.msk.bf16.gmra.mrb[12].mxu0 %vm76_vm0, %v21114_v61  ;;  %17179 = vmatprep.mubr.msk.bf16.mxu1 %vm76_vm0, %v21117_v60 }
 0x368   : > { %17291 = vmatprep.mubr.msk.bf16.mxu0 %vm76_vm0, %v21119_v54  ;;  %17192 = vmatpush3.bf16.msra.mxu1 %v18062_v51 }
 0x369   : > { %17193 = vmatprep.subr.bf16.mxu1 %v18064_v12 }
 0x36c   : > { %17194 = vmatpush3.bf16.msra.mxu1 %v18064_v12 }
 0x36d   : > { %17211 = vmatprep.subr.bf16.mxu1 %v18066_v41 }
 0x36e   : > { %17180 = vmatmul.mubr.msk.bf16.gmra.mrb[8].mxu1 %vm76_vm0, %v20998_v16 }
 0x36f   : > { %17292 = vmatmul.mubr.msk.bf16.vlgmr.msra.gmra.mrb[0].mxu0 %vm76_vm0, %v21049_v31  ;;  %17183 = vmatprep.mubr.msk.bf16.mxu1 %vm76_vm0, %v21017_v3 }
 0x370   : > { %17308 = vmatpush3.bf16.msra.mxu0 %v18063_v5  ;;  %17295 = vmatprep.mubr.msk.bf16.mxu0 %vm76_vm0, %v21081_v53 }
 0x371   : > { %17309 = vmatprep.subr.bf16.mxu0 %v18065_v27 }
 0x374   : > { %17310 = vmatpush3.bf16.msra.mxu0 %v18065_v27 }
 0x375   : > { %17311 = vmatprep.subr.bf16.mxu0 %v18067_v21 }
 0x376   : > { %17184 = vmatmul.mubr.msk.bf16.gmra.mrb[12].mxu1 %vm76_vm0, %v21019_v44 }
 0x377   : > { %17296 = vmatmul.mubr.msk.bf16.gmra.mrb[4].mxu0 %vm76_vm0, %v21089_v23  ;;  %17195 = vmatprep.mubr.msk.bf16.mxu1 %vm76_vm0, %v2736_v42 }
 0x378   : > { %17299 = vmatprep.mubr.msk.bf16.mxu0 %vm76_vm0, %v3884_v28  ;;  %17312 = vmatpush3.bf16.msra.mxu0 %v18067_v21 }
 0x379   : > { %17313 = vmatprep.subr.bf16.mxu0 %v18069_v43 }
 0x37c   : > { %17314 = vmatpush3.bf16.msra.mxu0 %v18069_v43 }
 0x37d   : > { %17331 = vmatprep.subr.bf16.mxu0 %v18071_v7 }
 0x37e   : > { %17196 = vmatmul.mubr.msk.bf16.vlgmr.msra.gmra.mrb[0].mxu1 %vm76_vm0, %v21085_v19 }
 0x37f   : > { %17300 = vmatmul.mubr.msk.bf16.gmra.mrb[8].mxu0 %vm76_vm0, %v21169_v25  ;;  %17212 = vmatpush3.bf16.msra.mxu1 %v18066_v41 }
 0x380   : > { %17199 = vmatprep.mubr.msk.bf16.mxu1 %vm76_vm0, %v2738_v9  ;;  %17303 = vmatprep.mubr.msk.bf16.mxu0 %vm76_vm0, %v21171_v2 }
 0x381   : > { %17213 = vmatprep.subr.bf16.mxu1 %v18068_v33 }
 0x383   : > { %17214 = vmatpush3.bf16.msra.mxu1 %v18068_v33 }
 0x384   : > { %17215 = vmatprep.subr.bf16.mxu1 %v18070_v38 }
 0x386   : > { %17200 = vmatmul.mubr.msk.bf16.gmra.mrb[4].mxu1 %vm76_vm0, %v3097_v4 }
 0x387   : > { %17304 = vmatmul.mubr.msk.bf16.gmra.mrb[12].mxu0 %vm76_vm0, %v21188_v63  ;;  %17203 = vmatprep.mubr.msk.bf16.mxu1 %vm76_vm0, %v20998_v16 }
 0x388   : > { %17315 = vmatprep.mubr.msk.bf16.mxu0 %vm76_vm0, %v4076_v50  ;;  %17216 = vmatpush3.bf16.msra.mxu1 %v18070_v38 }
 0x389   : > { %17217 = vmatprep.subr.bf16.mxu1 %v18072_v52 }
 0x38c   : > { %17218 = vmatpush3.bf16.msra.mxu1 %v18072_v52 }
 0x38d   : > { %17643 = vmatprep.subr.bf16.mxu1 %v20894_v57 }
 0x38e   : > { %17204 = vmatmul.mubr.msk.bf16.gmra.mrb[8].mxu1 %vm76_vm0, %v21017_v3 }
 0x38f   : > { %17316 = vmatmul.mubr.msk.bf16.vlgmr.msra.gmra.mrb[0].mxu0 %vm76_vm0, %v4077_v22  ;;  %17207 = vmatprep.mubr.msk.bf16.mxu1 %vm76_vm0, %v21019_v44 }
 0x390   : > { %17332 = vmatpush3.bf16.msra.mxu0 %v18071_v7  ;;  %17319 = vmatprep.mubr.msk.bf16.mxu0 %vm76_vm0, %v4078_v49 }
 0x391   : > { %17333 = vmatprep.subr.bf16.mxu0 %v18073_v39 }
 0x394   : > { %17334 = vmatpush3.bf16.msra.mxu0 %v18073_v39 }
 0x395   : > { %17335 = vmatprep.subr.bf16.mxu0 %v18074_v59 }
 0x396   : > { %17208 = vmatmul.mubr.msk.bf16.gmra.mrb[12].mxu1 %vm76_vm0, %v21041_v13  ;;  %v15445_v13 = vld [vmem:[%s20920_s24 + $0x130] sm:$0xff] }
 0x397   : > { %17320 = vmatmul.mubr.msk.bf16.gmra.mrb[4].mxu0 %vm76_vm0, %v4079_v36  ;;  %17219 = vmatprep.mubr.msk.bf16.mxu1 %vm76_vm0, %v21117_v60  ;;  %v4083_v0 = vpack.c.bf16 %v15445_v13, %v15407_v35 }
 0x398   : > { %17323 = vmatprep.mubr.msk.bf16.mxu0 %vm76_vm0, %v4080_v8  ;;  %17336 = vmatpush3.bf16.msra.mxu0 %v18074_v59 }
 0x399   : > { %17337 = vmatprep.subr.bf16.mxu0 %v18075_v14 }
 0x39c   : > { %17338 = vmatpush3.bf16.msra.mxu0 %v18075_v14 }
 0x39e   : > { %17220 = vmatmul.mubr.msk.bf16.vlgmr.msra.gmra.mrb[0].mxu1 %vm76_vm0, %v20998_v16 }
 0x39f   : > { %17324 = vmatmul.mubr.msk.bf16.gmra.mrb[8].mxu0 %vm76_vm0, %v4081_v47  ;;  %17647 = vmatpush3.bf16.msra.mxu1 %v20894_v57  ;;  %v15483_v57 = vld [vmem:[%s20920_s24 + $0x138] sm:$0xff] }
 0x3a0   : > { %17223 = vmatprep.mubr.msk.bf16.mxu1 %vm76_vm0, %v21017_v3  ;;  %17327 = vmatprep.mubr.msk.bf16.mxu0 %vm76_vm0, %v4082_v26 }
 0x3a1   : > { %17644 = vmatprep.subr.bf16.mxu1 %v20904_v6 }
 0x3a3   : > { %17648 = vmatpush3.bf16.msra.mxu1 %v20904_v6  ;;  %v4279_v6 = vpack.c.bf16 %v15483_v57, %v15445_v13 }
 0x3a4   : > { %17645 = vmatprep.subr.bf16.mxu1 %v20914_v15 }
 0x3a6   : > { %17224 = vmatmul.mubr.msk.bf16.gmra.mrb[4].mxu1 %vm76_vm0, %v21019_v44 }
 0x3a7   : > { %17328 = vmatmul.mubr.msk.bf16.gmra.mrb[12].mxu0 %vm76_vm0, %v4083_v0  ;;  %17227 = vmatprep.mubr.msk.bf16.mxu1 %vm76_vm0, %v21119_v54 }
 0x3a8   : > { %17339 = vmatprep.mubr.msk.bf16.mxu0 %vm76_vm0, %v21049_v31  ;;  %17649 = vmatpush3.bf16.msra.mxu1 %v20914_v15 }
 0x3a9   : > { %17646 = vmatprep.subr.bf16.mxu1 %v20935_v24 }
 0x3ac   : > { %17650 = vmatpush3.bf16.msra.mxu1 %v20935_v24 }
 0x3ae   : > { %17228 = vmatmul.mubr.msk.bf16.gmra.mrb[8].mxu1 %vm76_vm0, %v21049_v31 }
 0x3af   : > { %17340 = vmatmul.mubr.msk.bf16.vlgmr.msra.gmra.mrb[0].mxu0 %vm76_vm0, %v21081_v53  ;;  %17231 = vmatprep.mubr.msk.bf16.mxu1 %vm76_vm0, %v21081_v53 }
 0x3b0   : > { %17343 = vmatprep.mubr.msk.bf16.mxu0 %vm76_vm0, %v21089_v23 }
 0x3b6   : > { %17232 = vmatmul.mubr.msk.bf16.gmra.mrb[12].mxu1 %vm76_vm0, %v21089_v23 }
 0x3b7   : > { %17344 = vmatmul.mubr.msk.bf16.gmra.mrb[4].mxu0 %vm76_vm0, %v21114_v61  ;;  %17251 = vmatprep.mubr.msk.bf16.mxu1 %vm76_vm0, %v4076_v50 }
 0x3b8   : > { %17347 = vmatprep.mubr.msk.bf16.mxu0 %vm76_vm0, %v21169_v25 }
 0x3be   : > { %17252 = vmatmul.mubr.msk.bf16.vlgmr.msra.gmra.mrb[8].mxu1 %vm76_vm0, %v4077_v22 }
 0x3bf   : > { %17348 = vmatmul.mubr.msk.bf16.gmra.mrb[8].mxu0 %vm76_vm0, %v21171_v2  ;;  %17255 = vmatprep.mubr.msk.bf16.mxu1 %vm76_vm0, %v4078_v49 }
 0x3c0   : > { %17351 = vmatprep.mubr.msk.bf16.mxu0 %vm76_vm0, %v21188_v63 }
 0x3c6   : > { %17256 = vmatmul.mubr.msk.bf16.gmra.mrb[12].mxu1 %vm76_vm0, %v4079_v36 }
 0x3c7   : > { %17352 = vmatmul.mubr.msk.bf16.gmra.mrb[12].mxu0 %vm76_vm0, %v4279_v6 }
 0x471   : > { %v17221_v15 = vpop.f32.mrb[0].mxu1 }
 0x472   : > { %v3390_v24 = vpop.f32.mrb[1].mxu1 }
 0x473   : > { %v17222_v16 = vpop.f32.mrb[2].mxu1 }
 0x474   : > { %v3393_v3 = vpop.f32.mrb[3].mxu1 }
 0x479   : > { %v17225_v44 = vpop.f32.mrb[4].mxu1 }
 0x47a   : > { %v3406_v30 = vpop.f32.mrb[5].mxu1 }
 0x47b   : > { %v17226_v31 = vpop.f32.mrb[6].mxu1 }
 0x47c   : > { %v3409_v4 = vpop.f32.mrb[7].mxu1 }
 0x482   : > { %v17341_v45 = vpop.f32.mrb[0].mxu0 }
 0x483   : > { %v17651_v17 = vadd.f32 %v17341_v45, %v17221_v15  ;;  %v4371_v55 = vpop.f32.mrb[1].mxu0 }
 0x484   : > { %v17652_v29 = vadd.f32 %v4371_v55, %v3390_v24  ;;  %v17342_v58 = vpop.f32.mrb[2].mxu0 }
 0x485   : > { %v17653_v5 = vadd.f32 %v17342_v58, %v17222_v16  ;;  %v4374_v42 = vpop.f32.mrb[3].mxu0  ;;  %v4459_v54 = vadd.f32 %v17651_v17, %v15504_v32 }
 0x486   : > { %v17654_v53 = vadd.f32 %v4374_v42, %v3393_v3  ;;  %v4457_v37 = vadd.f32 %v17652_v29, %v15504_v32 }
 0x487   : > { %v4460_v43 = vadd.f32 %v17653_v5, %v15504_v32  ;;  %v4475_v2 = vmax.f32 %v4459_v54, 0.0 }
 0x488   : > { %v4458_v34 = vadd.f32 %v17654_v53, %v15504_v32  ;;  %v4473_v35 = vmax.f32 %v4457_v37, 0.0  ;;  %v18080_v37 = vld [vmem:[%s24474_s5 + $0x58] sm:$0xff] (%p2712_p9)  }
 0x489   : > { %v4476_v50 = vmax.f32 %v4460_v43, 0.0  ;;  %v18081_v43 = vld [vmem:[%s24474_s5 + $0x60] sm:$0xff] (%p2712_p9)  }
 0x48a   : > { %v17345_v19 = vpop.f32.mrb[4].mxu0  ;;  %v4474_v39 = vmax.f32 %v4458_v34, 0.0 }
 0x48b   : > { %v17655_v23 = vadd.f32 %v17345_v19, %v17225_v44  ;;  %v4387_v62 = vpop.f32.mrb[5].mxu0 }
 0x48c   : > { %v17656_v18 = vadd.f32 %v4387_v62, %v3406_v30  ;;  %v17346_v46 = vpop.f32.mrb[6].mxu0 }
 0x48d   : > { %v17657_v48 = vadd.f32 %v17346_v46, %v17226_v31  ;;  %v4390_v51 = vpop.f32.mrb[7].mxu0  ;;  %v4463_v47 = vadd.f32 %v17655_v23, %v15504_v32 }
 0x48e   : > { %v17658_v40 = vadd.f32 %v4390_v51, %v3409_v4  ;;  %v4461_v6 = vadd.f32 %v17656_v18, %v15504_v32 }
 0x48f   : > { %v4464_v44 = vadd.f32 %v17657_v48, %v15504_v32  ;;  %v4479_v5 = vmax.f32 %v4463_v47, 0.0  ;;  %v18089_v47 = vld [vmem:[%s24474_s5 + $0x20] sm:$0xff] (%p2712_p9)  }
 0x490   : > { %v4462_v17 = vadd.f32 %v17658_v40, %v15504_v32  ;;  %v4477_v19 = vmax.f32 %v4461_v6, 0.0  ;;  %v18090_v6 = vld [vmem:[%s24474_s5 + $0x28] sm:$0xff] (%p2712_p9)  }
 0x491   : > { %v17253_v9 = vpop.f32.mrb[8].mxu1  ;;  %v4480_v18 = vmax.f32 %v4464_v44, 0.0 }
 0x492   : > { %v17349_v61 = vpop.f32.mrb[8].mxu0  ;;  %v3618_v60 = vpop.f32.mrb[9].mxu1  ;;  %v4478_v51 = vmax.f32 %v4462_v17, 0.0 }
 0x493   : > { %v17659_v12 = vadd.f32 %v17349_v61, %v17253_v9  ;;  %v4403_v41 = vpop.f32.mrb[9].mxu0  ;;  %v17254_v27 = vpop.f32.mrb[10].mxu1 }
 0x494   : > { %v17660_v1 = vadd.f32 %v4403_v41, %v3618_v60  ;;  %v17350_v21 = vpop.f32.mrb[10].mxu0  ;;  %v3621_v28 = vpop.f32.mrb[11].mxu1  ;;  %v18078_v41 = vld [vmem:[%s24474_s5 + $0x48] sm:$0xff] (%p2712_p9)  }
 0x495   : > { %v4467_v20 = vadd.f32 %v17659_v12, %v15504_v32  ;;  %v17661_v56 = vadd.f32 %v17350_v21, %v17254_v27  ;;  %v4406_v10 = vpop.f32.mrb[11].mxu0  ;;  %v18079_v27 = vld [vmem:[%s24474_s5 + $0x50] sm:$0xff] (%p2712_p9)  }
 0x496   : > { %v4465_v7 = vadd.f32 %v17660_v1, %v15504_v32  ;;  %v17662_v25 = vadd.f32 %v4406_v10, %v3621_v28  ;;  %v18084_v10 = vld [vmem:[%s24474_s5 + $0x78] sm:$0xff] (%p2712_p9)  }
 0x497   : > { %v4483_v33 = vmax.f32 %v4467_v20, 0.0  ;;  %v4468_v11 = vadd.f32 %v17661_v56, %v15504_v32  ;;  %v18082_v20 = vld [vmem:[%s24474_s5 + $0x68] sm:$0xff] (%p2712_p9)   ;;  %v18083_v56 = vld [vmem:[%s24474_s5 + $0x70] sm:$0xff] (%p2712_p9)  }
 0x498   : > { %v4481_v38 = vmax.f32 %v4465_v7, 0.0  ;;  %v4466_v63 = vadd.f32 %v17662_v25, %v15504_v32  ;;  %v18085_v25 = vld [vmem:[%s24474_s5] sm:$0xff] (%p2712_p9)  }
 0x499   : > { %v4491_v52 = vmax.f32 %v4475_v2, %v4483_v33  ;;  %v4484_v22 = vmax.f32 %v4468_v11, 0.0  ;;  %v17257_v49 = vpop.f32.mrb[12].mxu1 }
 0x49a   : > { %v4489_v59 = vmax.f32 %v4473_v35, %v4481_v38  ;;  %v4482_v36 = vmax.f32 %v4466_v63, 0.0  ;;  %v17353_v8 = vpop.f32.mrb[12].mxu0  ;;  %v3634_v14 = vpop.f32.mrb[13].mxu1  ;;  %v18086_v38 = vld [vmem:[%s24474_s5 + $0x8] sm:$0xff] (%p2712_p9)  }
 0x49b   : > { %v4492_v26 = vmax.f32 %v4476_v50, %v4484_v22  ;;  %v17663_v13 = vadd.f32 %v17353_v8, %v17257_v49  ;;  %v4419_v0 = vpop.f32.mrb[13].mxu0  ;;  %v17258_v57 = vpop.f32.mrb[14].mxu1 }
 0x49c   : > { %v4490_v15 = vmax.f32 %v4474_v39, %v4482_v36  ;;  %v17664_v24 = vadd.f32 %v4419_v0, %v3634_v14  ;;  %v17354_v16 = vpop.f32.mrb[14].mxu0  ;;  %v3637_v3 = vpop.f32.mrb[15].mxu1  ;;  %v18088_v36 = vld [vmem:[%s24474_s5 + $0x18] sm:$0xff] (%p2712_p9)  }
 0x49d   : > { %v4503_v30 = vmax.f32 %v4491_v52, %v4492_v26  ;;  %v4471_v31 = vadd.f32 %v17663_v13, %v15504_v32  ;;  %v17665_v4 = vadd.f32 %v17354_v16, %v17258_v57  ;;  %v4422_v45 = vpop.f32.mrb[15].mxu0  ;;  %v18087_v52 = vld [vmem:[%s24474_s5 + $0x10] sm:$0xff] (%p2712_p9)  }
 0x49e   : > { %v4497_v55 = vmax.f32 %v4489_v59, %v4490_v15  ;;  %v4469_v29 = vadd.f32 %v17664_v24, %v15504_v32  ;;  %v17666_v58 = vadd.f32 %v4422_v45, %v3637_v3  ;;  %v18091_v16 = vld [vmem:[%s24474_s5 + $0x30] sm:$0xff] (%p2712_p9)  }
 0x49f   : > { %15506 = vst [vmem:[%s14881_s26 + $0x40] sm:$0xff] %v4503_v30  ;;  %v4487_v42 = vmax.f32 %v4471_v31, 0.0  ;;  %v4472_v53 = vadd.f32 %v17665_v4, %v15504_v32  ;;  %v18092_v31 = vld [vmem:[%s24474_s5 + $0x38] sm:$0xff] (%p2712_p9)   ;;  %v18093_v4 = vld [vmem:[%s24474_s5 + $0x80] sm:$0xff] (%p2712_p9)  }
 0x4a0   : > { %15505 = vst [vmem:[%s14881_s26 + $0x38] sm:$0xff] %v4497_v55  ;;  %v4485_v23 = vmax.f32 %v4469_v29, 0.0  ;;  %v4470_v62 = vadd.f32 %v17666_v58, %v15504_v32  ;;  %v18077_v32 = vld [vmem:[%s24474_s5 + $0x40] sm:$0xff] (%p2712_p9)   ;;  %v18094_v29 = vld [vmem:[%s24474_s5 + $0x88] sm:$0xff] (%p2712_p9)   ;;  %v18095_v58 = vld [vmem:[%s24474_s5 + $0x90] sm:$0xff] (%p2712_p9)  }
 0x4a1   : > { %v4495_v46 = vmax.f32 %v4479_v5, %v4487_v42  ;;  %v4488_v48 = vmax.f32 %v4472_v53, 0.0  ;;  %17355 = vmatprep.subr.bf16.mxu0 (%p2712_p9), %v18077_v32 }
 0x4a2   : > { %v4493_v9 = vmax.f32 %v4477_v19, %v4485_v23  ;;  %v4486_v61 = vmax.f32 %v4470_v62, 0.0  ;;  %2714 = sbr.rel (!%p2712_p9) target bundleno = 813 (0x32d), region = 179  ;;  %17356 = vmatpush3.bf16.msra.mxu0 (%p2712_p9), %v18077_v32  ;;  %v18096_v19 = vld [vmem:[%s24474_s5 + $0x98] sm:$0xff] (%p2712_p9)   ;;  %v18097_v23 = vld [vmem:[%s24474_s5 + $0xa0] sm:$0xff] (%p2712_p9)  }
 0x4a3   : > { %v4496_v40 = vmax.f32 %v4480_v18, %v4488_v48  ;;  %17357 = vmatprep.subr.bf16.mxu0 (%p2712_p9), %v18078_v41  ;;  %v18098_v48 = vld [vmem:[%s24474_s5 + $0xa8] sm:$0xff] (%p2712_p9)  }
 0x4a4   : > { %v4494_v60 = vmax.f32 %v4478_v51, %v4486_v61  ;;  %v18099_v51 = vld [vmem:[%s24474_s5 + $0xb0] sm:$0xff] (%p2712_p9)   ;;  %v18100_v61 = vld [vmem:[%s24474_s5 + $0xb8] sm:$0xff] (%p2712_p9)  }
 0x4a5   : > { %v4511_v54 = vmax.f32 %v4495_v46, %v4496_v40 }
 0x4a6   : > { %v4507_v12 = vmax.f32 %v4493_v9, %v4494_v60  ;;  %17358 = vmatpush3.bf16.msra.mxu0 (%p2712_p9), %v18078_v41  ;;  %v18101_v60 = vld [vmem:[%s24474_s5 + $0xc0] sm:$0xff] (%p2712_p9)   ;;  %v18103_v41 = vld [vmem:[%s24474_s5 + $0xd0] sm:$0xff] (%p2712_p9)  }
 0x4a7   : > { %15508 = vst [vmem:[%s14881_s26 + $0x50] sm:$0xff] %v4511_v54  ;;  %17359 = vmatprep.subr.bf16.mxu0 (%p2712_p9), %v18079_v27 }
 0x4a8   : > { %15507 = vst [vmem:[%s14881_s26 + $0x48] sm:$0xff] %v4507_v12  ;;  %v18102_v12 = vld [vmem:[%s24474_s5 + $0xc8] sm:$0xff] (%p2712_p9)  }
 0x4aa   :  { %17360 = vmatpush3.bf16.msra.mxu0 %v18079_v27 }
 0x4ab   :  { %17361 = vmatprep.subr.bf16.mxu0 %v18080_v37 }
 0x4ae   :  { %17362 = vmatpush3.bf16.msra.mxu0 %v18080_v37  ;;  %v18104_v37 = vld [vmem:[%s24474_s5 + $0xd8] sm:$0xff]  }
 0x4af   :  { %v21298_v1 = vld [vmem:[#allocation3 + $0x8] sm:$0xff]  ;;  %v21300_v21 = vld [vmem:[#allocation3 + $0x10] sm:$0xff]  ;;  %17363 = vmatprep.subr.bf16.mxu0 %v18081_v43  ;;  %v4558_v34 = vld [vmem:[#allocation3 + $0x18] sm:$0xff] }
 0x4b0   :  { %v4572_v28 = vpack.c.bf16 %v21300_v21, %v21298_v1  ;;  %v21316_v7 = vld [vmem:[#allocation3 + $0x20] sm:$0xff]  ;;  %v4560_v2 = vld [vmem:[#allocation3 + $0x38] sm:$0xff]  ;;  %v4562_v63 = vld [vmem:[#allocation3 + $0x48] sm:$0xff]  ;;  %v4532_v17 = vpack.c.bf16 %v4558_v34, %v21300_v21 }
 0x4b1   :  { %v21321_v33 = vld [vmem:[#allocation3 + $0x40] sm:$0xff]  ;;  %v4573_v11 = vpack.c.bf16 %v21316_v7, %v4558_v34  ;;  %v21330_v50 = vld [vmem:[#allocation3 + $0x50] sm:$0xff]  ;;  %v4564_v22 = vld [vmem:[#allocation3 + $0x68] sm:$0xff] }
 0x4b2   :  { %17371 = vmatprep.mubr.bf16.mxu0 %v4572_v28  ;;  %17364 = vmatpush3.bf16.msra.mxu0 %v18081_v43  ;;  %v21325_v35 = vpack.c.bf16 %v21321_v33, %v4560_v2  ;;  %v4565_v49 = vld [vmem:[#allocation3 + $0x70] sm:$0xff]  ;;  %v21337_v39 = vpack.c.bf16 %v21330_v50, %v4562_v63  ;;  %v4566_v8 = vld [vmem:[#allocation3 + $0x78] sm:$0xff]  ;;  %v21344_v14 = vld [vmem:[#allocation3 + $0x80] sm:$0xff]  ;;  %v21388_v42 = vpack.c.bf16 %v4562_v63, %v21321_v33 }
 0x4b3   :  { %17365 = vmatprep.subr.bf16.mxu0 %v18082_v20  ;;  %v21339_v59 = vpack.c.bf16 %v4565_v49, %v4564_v22  ;;  %v4568_v26 = vld [vmem:[#allocation3 + $0x98] sm:$0xff]  ;;  %v4569_v13 = vld [vmem:[#allocation3 + $0xa0] sm:$0xff]  ;;  %v21352_v0 = vpack.c.bf16 %v21344_v14, %v4566_v8  ;;  %v4570_v15 = vld [vmem:[#allocation3 + $0xa8] sm:$0xff]  ;;  %v21400_v18 = vpack.c.bf16 %v4566_v8, %v4565_v49 }
 0x4b4   :  { %v21354_v57 = vpack.c.bf16 %v4569_v13, %v4568_v26  ;;  %v21360_v24 = vld [vmem:[#allocation3 + $0xb0] sm:$0xff]  ;;  %v4515_v3 = vld [vmem:[#allocation3] sm:$0xff]  ;;  %v21412_v9 = vpack.c.bf16 %v4570_v15, %v4569_v13  ;;  %v4891_v40 = vld [vmem:[#allocation3 + $0x28] sm:$0xff] }
 0x4b5   :  { %v21367_v44 = vpack.c.bf16 %v21360_v24, %v4570_v15  ;;  %v4531_v30 = vpack.c.bf16 %v21298_v1, %v4515_v3  ;;  %v4519_v45 = vld [vmem:[#allocation3 + $0x30] sm:$0xff]  ;;  %v4523_v5 = vld [vmem:[#allocation3 + $0x60] sm:$0xff]  ;;  %v4905_v54 = vpack.c.bf16 %v4891_v40, %v21316_v7  ;;  %v4895_v32 = vld [vmem:[#allocation3 + $0x58] sm:$0xff] }
 0x4b6   :  { %17366 = vmatpush3.bf16.msra.mxu0 %v18082_v20  ;;  %v21378_v55 = vpack.c.bf16 %v4560_v2, %v4519_v45  ;;  %v21390_v53 = vpack.c.bf16 %v4564_v22, %v4523_v5  ;;  %v4527_v62 = vld [vmem:[#allocation3 + $0x90] sm:$0xff]  ;;  %v21430_v27 = vpack.c.bf16 %v4895_v32, %v21330_v50  ;;  %v4899_v1 = vld [vmem:[#allocation3 + $0x88] sm:$0xff]  ;;  %v18105_v21 = vld [vmem:[%s24474_s5 + $0xe0] sm:$0xff]  }
 0x4b7   :  { %17367 = vmatprep.subr.bf16.mxu0 %v18083_v56  ;;  %v21402_v46 = vpack.c.bf16 %v4568_v26, %v4527_v62  ;;  %v21441_v28 = vpack.c.bf16 %v4899_v1, %v21344_v14  ;;  %v18106_v43 = vld [vmem:[%s24474_s5 + $0xe8] sm:$0xff]   ;;  %v4903_v20 = vld [vmem:[#allocation3 + $0xb8] sm:$0xff]  ;;  %v18109_v7 = vld [vmem:[%s24474_s5 + $0x100] sm:$0xff]  }
 0x4b8   :  { %v18108_v34 = vld [vmem:[%s24474_s5 + $0xf8] sm:$0xff]   ;;  %v18111_v2 = vld [vmem:[%s24474_s5 + $0x110] sm:$0xff]   ;;  %v5104_v63 = vld [vmem:[#allocation3 + $0xc8] sm:$0xff] }
 0x4b9   :  { %v18112_v33 = vld [vmem:[%s24474_s5 + $0x118] sm:$0xff]   ;;  %v5105_v22 = vld [vmem:[#allocation3 + $0xd0] sm:$0xff]  ;;  %v18118_v26 = vld [vmem:[%s24474_s5 + $0x148] sm:$0xff]  }
 0x4ba   :  { %17368 = vmatpush3.bf16.msra.mxu0 %v18083_v56  ;;  %v18107_v56 = vld [vmem:[%s24474_s5 + $0xf0] sm:$0xff]   ;;  %v5106_v49 = vld [vmem:[#allocation3 + $0xd8] sm:$0xff]  ;;  %v21517_v15 = vpack.c.bf16 %v5105_v22, %v5104_v63  ;;  %v18126_v62 = vld [vmem:[%s24474_s5 + $0x188] sm:$0xff]  }
 0x4bb   :  { %17369 = vmatprep.subr.bf16.mxu0 %v18084_v10  ;;  %v21488_v8 = vpack.c.bf16 %v5106_v49, %v5105_v22  ;;  %v18116_v14 = vld [vmem:[%s24474_s5 + $0x138] sm:$0xff]   ;;  %v6407_v32 = vld [vmem:[%s24476_s7 + $0x120] sm:$0xff] }
 0x4bc   :  { %v18120_v13 = vld [vmem:[%s24474_s5 + $0x158] sm:$0xff]   ;;  %v6411_v1 = vld [vmem:[%s24476_s7 + $0x140] sm:$0xff] }
 0x4be   :  { %17370 = vmatpush3.bf16.msra.mxu0 %v18084_v10  ;;  %v21452_v10 = vpack.c.bf16 %v4903_v20, %v21360_v24  ;;  %v21519_v24 = vld [vmem:[#allocation3 + $0xe0] sm:$0xff] }
 0x4bf   :  { %17387 = vmatprep.subr.bf16.mxu0 %v18085_v25  ;;  %v21527_v3 = vpack.c.bf16 %v21519_v24, %v5106_v49  ;;  %v18129_v20 = vld [vmem:[%s24474_s5 + $0x1a0] sm:$0xff]  }
 0x4c0   :  { %v6435_v49 = vld [vmem:[%s24476_s7 + $0x200] sm:$0xff] }
 0x4c1   :  { %17372 = vmatmul.mubr.bf16.vlgmr.msra.gmra.mrb[0].mxu0 %v4573_v11  ;;  %v18113_v11 = vld [vmem:[%s24474_s5 + $0x120] sm:$0xff]  }
 0x4c2   :  { %17388 = vmatpush3.bf16.msra.mxu0 %v18085_v25  ;;  %17375 = vmatprep.mubr.bf16.mxu0 %v21325_v35  ;;  %v18110_v25 = vld [vmem:[%s24474_s5 + $0x108] sm:$0xff]  }
 0x4c3   :  { %17389 = vmatprep.subr.bf16.mxu0 %v18086_v38 }
 0x4c6   :  { %17390 = vmatpush3.bf16.msra.mxu0 %v18086_v38  ;;  %v5103_v38 = vld [vmem:[#allocation3 + $0xc0] sm:$0xff] }
 0x4c7   :  { %17391 = vmatprep.subr.bf16.mxu0 %v18087_v52  ;;  %v21478_v50 = vpack.c.bf16 %v5104_v63, %v5103_v38  ;;  %v5512_v38 = vld [vmem:[#allocation3 + $0xe8] sm:$0xff]  ;;  %v18131_v63 = vld [vmem:[%s24474_s5 + $0x1b0] sm:$0xff]  }
 0x4c9   :  { %17376 = vmatmul.mubr.bf16.gmra.mrb[4].mxu0 %v21337_v39 }
 0x4ca   :  { %17392 = vmatpush3.bf16.msra.mxu0 %v18087_v52  ;;  %17379 = vmatprep.mubr.bf16.mxu0 %v21339_v59  ;;  %v18114_v52 = vld [vmem:[%s24474_s5 + $0x128] sm:$0xff]  }
 0x4cb   :  { %17393 = vmatprep.subr.bf16.mxu0 %v18088_v36 }
 0x4ce   :  { %17394 = vmatpush3.bf16.msra.mxu0 %v18088_v36  ;;  %v18115_v36 = vld [vmem:[%s24474_s5 + $0x130] sm:$0xff]  }
 0x4cf   :  { %17395 = vmatprep.subr.bf16.mxu0 %v18089_v47 }
 0x4d1   :  { %17380 = vmatmul.mubr.bf16.gmra.mrb[8].mxu0 %v21352_v0 }
 0x4d2   :  { %17396 = vmatpush3.bf16.msra.mxu0 %v18089_v47  ;;  %17383 = vmatprep.mubr.bf16.mxu0 %v21354_v57  ;;  %v18117_v47 = vld [vmem:[%s24474_s5 + $0x140] sm:$0xff]  }
 0x4d3   :  { %17397 = vmatprep.subr.bf16.mxu0 %v18090_v6 }
 0x4d6   :  { %17398 = vmatpush3.bf16.msra.mxu0 %v18090_v6  ;;  %v18122_v6 = vld [vmem:[%s24474_s5 + $0x168] sm:$0xff]  }
 0x4d7   :  { %17399 = vmatprep.subr.bf16.mxu0 %v18091_v16 }
 0x4d9   :  { %17384 = vmatmul.mubr.bf16.gmra.mrb[12].mxu0 %v21367_v44 }
 0x4da   :  { %17400 = vmatpush3.bf16.msra.mxu0 %v18091_v16  ;;  %17403 = vmatprep.mubr.bf16.mxu0 %v4531_v30  ;;  %v18123_v16 = vld [vmem:[%s24474_s5 + $0x170] sm:$0xff]   ;;  %v18124_v30 = vld [vmem:[%s24474_s5 + $0x178] sm:$0xff]  }
 0x4db   :  { %17401 = vmatprep.subr.bf16.mxu0 %v18092_v31 }
 0x4de   :  { %17402 = vmatpush3.bf16.msra.mxu0 %v18092_v31  ;;  %v6371_v31 = vld [vmem:[%s24476_s7] sm:$0xff] }
 0x4df   :  { %17419 = vmatprep.subr.bf16.mxu0 %v18093_v4 }
 0x4e1   :  { %17404 = vmatmul.mubr.bf16.vlgmr.msra.gmra.mrb[0].mxu0 %v4532_v17 }
 0x4e2   :  { %17420 = vmatpush3.bf16.msra.mxu0 %v18093_v4  ;;  %17407 = vmatprep.mubr.bf16.mxu0 %v21378_v55  ;;  %v6375_v4 = vld [vmem:[%s24476_s7 + $0x20] sm:$0xff] }
 0x4e3   :  { %17421 = vmatprep.subr.bf16.mxu0 %v18094_v29  ;;  %v15711_v45 = vcombine.high %v6371_v31, %v6375_v4 }
 0x4e5   :  { %7949 = vmatprep.subr.bf16.mxu1 %v15711_v45  ;;  %v21649_v45 = vld [vmem:[%s24476_s7 + $0x2e0] sm:$0xff] }
 0x4e6   :  { %17422 = vmatpush3.bf16.msra.mxu0 %v18094_v29  ;;  %v6383_v29 = vld [vmem:[%s24476_s7 + $0x60] sm:$0xff] }
 0x4e7   :  { %17423 = vmatprep.subr.bf16.mxu0 %v18095_v58 }
 0x4e9   :  { %17408 = vmatmul.mubr.bf16.gmra.mrb[4].mxu0 %v21388_v42 }
 0x4ea   :  { %17424 = vmatpush3.bf16.msra.mxu0 %v18095_v58  ;;  %17411 = vmatprep.mubr.bf16.mxu0 %v21390_v53  ;;  %v18125_v58 = vld [vmem:[%s24474_s5 + $0x180] sm:$0xff]  }
 0x4eb   :  { %17425 = vmatprep.subr.bf16.mxu0 %v18096_v19 }
 0x4ee   :  { %17426 = vmatpush3.bf16.msra.mxu0 %v18096_v19  ;;  %v6391_v19 = vld [vmem:[%s24476_s7 + $0xa0] sm:$0xff] }
 0x4ef   :  { %17427 = vmatprep.subr.bf16.mxu0 %v18097_v23 }
 0x4f1   :  { %17412 = vmatmul.mubr.bf16.gmra.mrb[8].mxu0 %v21400_v18 }
 0x4f2   :  { %17428 = vmatpush3.bf16.msra.mxu0 %v18097_v23  ;;  %17415 = vmatprep.mubr.bf16.mxu0 %v21402_v46 }
 0x4f3   :  { %17429 = vmatprep.subr.bf16.mxu0 %v18098_v48 }
 0x4f6   :  { %17430 = vmatpush3.bf16.msra.mxu0 %v18098_v48 }
 0x4f7   :  { %17431 = vmatprep.subr.bf16.mxu0 %v18099_v51 }
 0x4f9   :  { %17416 = vmatmul.mubr.bf16.gmra.mrb[12].mxu0 %v21412_v9 }
 0x4fa   :  { %17432 = vmatpush3.bf16.msra.mxu0 %v18099_v51  ;;  %17435 = vmatprep.mubr.bf16.mxu0 %v4532_v17  ;;  %v15710_v17 = vcombine.low %v6371_v31, %v6375_v4  ;;  %v6395_v51 = vld [vmem:[%s24476_s7 + $0xc0] sm:$0xff]  ;;  %v18134_v31 = vld [vmem:[%s24474_s5 + $0x1c8] sm:$0xff]  }
 0x4fb   :  { %17433 = vmatprep.subr.bf16.mxu0 %v18100_v61 }
 0x4fc   :  { %7950 = vmatpush1.bf16.msra.mxu1 %v15710_v17 }
 0x4fe   :  { %17434 = vmatpush3.bf16.msra.mxu0 %v18100_v61  ;;  %v6399_v61 = vld [vmem:[%s24476_s7 + $0xe0] sm:$0xff] }
 0x4ff   :  { %17451 = vmatprep.subr.bf16.mxu0 %v18101_v60 }
 0x501   :  { %17436 = vmatmul.mubr.bf16.vlgmr.msra.gmra.mrb[0].mxu0 %v4905_v54  ;;  %v18127_v54 = vld [vmem:[%s24474_s5 + $0x190] sm:$0xff]  }
 0x502   :  { %17452 = vmatpush3.bf16.msra.mxu0 %v18101_v60  ;;  %17439 = vmatprep.mubr.bf16.mxu0 %v21388_v42  ;;  %v15735_v60 = vcombine.high %v6395_v51, %v6399_v61 }
 0x503   :  { %17453 = vmatprep.subr.bf16.mxu0 %v18102_v12 }
 0x506   :  { %17454 = vmatpush3.bf16.msra.mxu0 %v18102_v12  ;;  %v6403_v12 = vld [vmem:[%s24476_s7 + $0x100] sm:$0xff] }
 0x507   :  { %17455 = vmatprep.subr.bf16.mxu0 %v18103_v41 }
 0x509   :  { %17440 = vmatmul.mubr.bf16.gmra.mrb[4].mxu0 %v21430_v27 }
 0x50a   :  { %17456 = vmatpush3.bf16.msra.mxu0 %v18103_v41  ;;  %17443 = vmatprep.mubr.bf16.mxu0 %v21400_v18  ;;  %v15734_v41 = vcombine.low %v6395_v51, %v6399_v61  ;;  %v18140_v51 = vld [vmem:[%s24474_s5 + $0x1f8] sm:$0xff]   ;;  %v18141_v61 = vld [vmem:[%s24474_s5 + $0x200] sm:$0xff]  }
 0x50b   :  { %17457 = vmatprep.subr.bf16.mxu0 %v18104_v37 }
 0x50e   :  { %17458 = vmatpush3.bf16.msra.mxu0 %v18104_v37  ;;  %v15743_v37 = vcombine.high %v6403_v12, %v6407_v32 }
 0x50f   :  { %17459 = vmatprep.subr.bf16.mxu0 %v18105_v21 }
 0x511   :  { %17444 = vmatmul.mubr.bf16.gmra.mrb[8].mxu0 %v21441_v28 }
 0x512   :  { %17460 = vmatpush3.bf16.msra.mxu0 %v18105_v21  ;;  %17447 = vmatprep.mubr.bf16.mxu0 %v21412_v9  ;;  %v6415_v21 = vld [vmem:[%s24476_s7 + $0x160] sm:$0xff] }
 0x513   :  { %17461 = vmatprep.subr.bf16.mxu0 %v18106_v43 }
 0x516   :  { %17462 = vmatpush3.bf16.msra.mxu0 %v18106_v43  ;;  %v15742_v43 = vcombine.low %v6403_v12, %v6407_v32  ;;  %v6106_v12 = vld [vmem:[#allocation3 + $0x70] sm:$0xff]  ;;  %v6107_v32 = vld [vmem:[#allocation3 + $0x78] sm:$0xff] }
 0x517   :  { %17463 = vmatprep.subr.bf16.mxu0 %v18107_v56 }
 0x519   :  { %17448 = vmatmul.mubr.bf16.gmra.mrb[12].mxu0 %v21452_v10 }
 0x51a   :  { %17464 = vmatpush3.bf16.msra.mxu0 %v18107_v56  ;;  %17467 = vmatprep.mubr.bf16.mxu0 %v21378_v55  ;;  %v6379_v55 = vld [vmem:[%s24476_s7 + $0x40] sm:$0xff]  ;;  %v15751_v56 = vcombine.high %v6411_v1, %v6415_v21 }
 0x51b   :  { %17465 = vmatprep.subr.bf16.mxu0 %v18108_v34  ;;  %v15719_v5 = vcombine.high %v6379_v55, %v6383_v29  ;;  %v15718_v23 = vcombine.low %v6379_v55, %v6383_v29  ;;  %v18135_v55 = vld [vmem:[%s24474_s5 + $0x1d0] sm:$0xff]  }
 0x51d   :  { %7951 = vmatprep.subr.bf16.mxu1 %v15719_v5  ;;  %v5712_v5 = vld [vmem:[#allocation3 + $0xf0] sm:$0xff] }
 0x51e   :  { %17466 = vmatpush3.bf16.msra.mxu0 %v18108_v34  ;;  %7952 = vmatpush1.bf16.msra.mxu1 %v15718_v23  ;;  %v6419_v34 = vld [vmem:[%s24476_s7 + $0x180] sm:$0xff]  ;;  %v18138_v23 = vld [vmem:[%s24474_s5 + $0x1e8] sm:$0xff]  }
 0x51f   :  { %17483 = vmatprep.subr.bf16.mxu0 %v18109_v7 }
 0x521   :  { %17468 = vmatmul.mubr.bf16.vlgmr.msra.gmra.mrb[0].mxu0 %v21388_v42 }
 0x522   :  { %17484 = vmatpush3.bf16.msra.mxu0 %v18109_v7  ;;  %17471 = vmatprep.mubr.bf16.mxu0 %v21390_v53  ;;  %v18130_v7 = vld [vmem:[%s24474_s5 + $0x1a8] sm:$0xff]  }
 0x523   :  { %17485 = vmatprep.subr.bf16.mxu0 %v18110_v25 }
 0x526   :  { %17486 = vmatpush3.bf16.msra.mxu0 %v18110_v25  ;;  %v15750_v25 = vcombine.low %v6411_v1, %v6415_v21  ;;  %v6378_v1 = vld [vmem:[%s24476_s7 + $0x38] sm:$0xff]  ;;  %v6108_v21 = vld [vmem:[#allocation3 + $0x80] sm:$0xff] }
 0x527   :  { %17487 = vmatprep.subr.bf16.mxu0 %v18111_v2 }
 0x529   :  { %17472 = vmatmul.mubr.bf16.gmra.mrb[4].mxu0 %v21400_v18 }
 0x52a   :  { %17488 = vmatpush3.bf16.msra.mxu0 %v18111_v2  ;;  %17475 = vmatprep.mubr.bf16.mxu0 %v21402_v46  ;;  %v6427_v2 = vld [vmem:[%s24476_s7 + $0x1c0] sm:$0xff] }
 0x52b   :  { %17489 = vmatprep.subr.bf16.mxu0 %v18112_v33 }
 0x52e   :  { %17490 = vmatpush3.bf16.msra.mxu0 %v18112_v33  ;;  %v6431_v33 = vld [vmem:[%s24476_s7 + $0x1e0] sm:$0xff] }
 0x52f   :  { %17491 = vmatprep.subr.bf16.mxu0 %v18113_v11  ;;  %v15767_v22 = vcombine.high %v6427_v2, %v6431_v33 }
 0x531   :  { %17476 = vmatmul.mubr.bf16.gmra.mrb[8].mxu0 %v21412_v9 }
 0x532   :  { %17492 = vmatpush3.bf16.msra.mxu0 %v18113_v11  ;;  %17479 = vmatprep.mubr.bf16.mxu0 %v21478_v50 }
 0x533   :  { %17493 = vmatprep.subr.bf16.mxu0 %v18114_v52 }
 0x536   :  { %17494 = vmatpush3.bf16.msra.mxu0 %v18114_v52 }
 0x537   :  { %17495 = vmatprep.subr.bf16.mxu0 %v18115_v36 }
 0x539   :  { %17480 = vmatmul.mubr.bf16.gmra.mrb[12].mxu0 %v21488_v8 }
 0x53a   :  { %17496 = vmatpush3.bf16.msra.mxu0 %v18115_v36  ;;  %17499 = vmatprep.mubr.bf16.mxu0 %v21325_v35  ;;  %v18119_v35 = vld [vmem:[%s24474_s5 + $0x150] sm:$0xff]   ;;  %v6439_v36 = vld [vmem:[%s24476_s7 + $0x220] sm:$0xff] }
 0x53b   :  { %17497 = vmatprep.subr.bf16.mxu0 %v18116_v14 }
 0x53e   :  { %17498 = vmatpush3.bf16.msra.mxu0 %v18116_v14  ;;  %v18132_v14 = vld [vmem:[%s24474_s5 + $0x1b8] sm:$0xff]  }
 0x53f   :  { %17515 = vmatprep.subr.bf16.mxu0 %v18117_v47 }
 0x541   :  { %17500 = vmatmul.mubr.bf16.vlgmr.msra.gmra.mrb[0].mxu0 %v21337_v39  ;;  %v18121_v39 = vld [vmem:[%s24474_s5 + $0x160] sm:$0xff]  }
 0x542   :  { %17516 = vmatpush3.bf16.msra.mxu0 %v18117_v47  ;;  %17503 = vmatprep.mubr.bf16.mxu0 %v21339_v59  ;;  %v15766_v47 = vcombine.low %v6427_v2, %v6431_v33 }
 0x543   :  { %17517 = vmatprep.subr.bf16.mxu0 %v18118_v26 }
 0x546   :  { %17518 = vmatpush3.bf16.msra.mxu0 %v18118_v26  ;;  %v6443_v26 = vld [vmem:[%s24476_s7 + $0x240] sm:$0xff] }
 0x547   :  { %17519 = vmatprep.subr.bf16.mxu0 %v18119_v35 }
 0x549   :  { %17504 = vmatmul.mubr.bf16.gmra.mrb[4].mxu0 %v21352_v0 }
 0x54a   :  { %17520 = vmatpush3.bf16.msra.mxu0 %v18119_v35  ;;  %17507 = vmatprep.mubr.bf16.mxu0 %v21354_v57  ;;  %v6447_v35 = vld [vmem:[%s24476_s7 + $0x260] sm:$0xff] }
 0x54b   :  { %17521 = vmatprep.subr.bf16.mxu0 %v18120_v13  ;;  %v15782_v4 = vcombine.low %v6443_v26, %v6447_v35 }
 0x54e   :  { %17522 = vmatpush3.bf16.msra.mxu0 %v18120_v13  ;;  %v15775_v13 = vcombine.high %v6435_v49, %v6439_v36 }
 0x54f   :  { %17523 = vmatprep.subr.bf16.mxu0 %v18121_v39 }
 0x551   :  { %17508 = vmatmul.mubr.bf16.gmra.mrb[8].mxu0 %v21367_v44 }
 0x552   :  { %17524 = vmatpush3.bf16.msra.mxu0 %v18121_v39  ;;  %17511 = vmatprep.mubr.bf16.mxu0 %v21517_v15  ;;  %v18133_v39 = vld [vmem:[%s24474_s5 + $0x1c0] sm:$0xff]  }
 0x553   :  { %17525 = vmatprep.subr.bf16.mxu0 %v18122_v6 }
 0x556   :  { %17526 = vmatpush3.bf16.msra.mxu0 %v18122_v6  ;;  %v15774_v6 = vcombine.low %v6435_v49, %v6439_v36  ;;  %v6398_v36 = vld [vmem:[%s24476_s7 + $0xd8] sm:$0xff] }
 0x557   :  { %17527 = vmatprep.subr.bf16.mxu0 %v18123_v16 }
 0x559   :  { %17512 = vmatmul.mubr.bf16.gmra.mrb[12].mxu0 %v21527_v3 }
 0x55a   :  { %17528 = vmatpush3.bf16.msra.mxu0 %v18123_v16  ;;  %17531 = vmatprep.mubr.bf16.mxu0 %v21388_v42  ;;  %v6387_v42 = vld [vmem:[%s24476_s7 + $0x80] sm:$0xff] }
 0x55b   :  { %17529 = vmatprep.subr.bf16.mxu0 %v18124_v30  ;;  %v15727_v48 = vcombine.high %v6387_v42, %v6391_v19  ;;  %v15726_v40 = vcombine.low %v6387_v42, %v6391_v19  ;;  %v6451_v16 = vld [vmem:[%s24476_s7 + $0x280] sm:$0xff]  ;;  %v5713_v42 = vld [vmem:[#allocation3 + $0xf8] sm:$0xff] }
 0x55c   :  { %v5722_v19 = vpack.c.bf16 %v5713_v42, %v5712_v5  ;;  %v6434_v5 = vld [vmem:[%s24476_s7 + $0x1f8] sm:$0xff] }
 0x55d   :  { %7953 = vmatprep.subr.bf16.mxu1 %v15727_v48 }
 0x55e   :  { %17530 = vmatpush3.bf16.msra.mxu0 %v18124_v30  ;;  %7954 = vmatpush1.bf16.msra.mxu1 %v15726_v40  ;;  %v6455_v30 = vld [vmem:[%s24476_s7 + $0x2a0] sm:$0xff]  ;;  %v18142_v40 = vld [vmem:[%s24474_s5 + $0x208] sm:$0xff]  }
 0x55f   :  { %17547 = vmatprep.subr.bf16.mxu0 %v18125_v58  ;;  %7955 = vmatprep.subr.bf16.mxu1 %v15735_v60  ;;  %v15791_v17 = vcombine.high %v6451_v16, %v6455_v30  ;;  %v15790_v29 = vcombine.low %v6451_v16, %v6455_v30  ;;  %v18144_v60 = vld [vmem:[%s24474_s5 + $0x218] sm:$0xff]  }
 0x560   :  { %v6414_v30 = vld [vmem:[%s24476_s7 + $0x158] sm:$0xff] }
 0x561   :  { %17532 = vmatmul.mubr.bf16.vlgmr.msra.gmra.mrb[0].mxu0 %v21430_v27  ;;  %v18128_v27 = vld [vmem:[%s24474_s5 + $0x198] sm:$0xff]  }
 0x562   :  { %17548 = vmatpush3.bf16.msra.mxu0 %v18125_v58  ;;  %17535 = vmatprep.mubr.bf16.mxu0 %v21400_v18 }
 0x563   :  { %17549 = vmatprep.subr.bf16.mxu0 %v18126_v62  ;;  %7956 = vmatpush1.bf16.msra.mxu1 %v15734_v41 }
 0x564   :  { %7957 = vmatprep.subr.bf16.mxu1 %v15743_v37  ;;  %v6374_v37 = vld [vmem:[%s24476_s7 + $0x18] sm:$0xff] }
 0x565   :  { %v15716_v33 = vcombine.low %v6374_v37, %v6378_v1 }
 0x566   :  { %17550 = vmatpush3.bf16.msra.mxu0 %v18126_v62  ;;  %v18139_v62 = vld [vmem:[%s24474_s5 + $0x1f0] sm:$0xff]  }
 0x567   :  { %17551 = vmatprep.subr.bf16.mxu0 %v18127_v54  ;;  %7958 = vmatpush1.bf16.msra.mxu1 %v15742_v43  ;;  %v6110_v43 = vld [vmem:[#allocation3 + $0xa0] sm:$0xff] }
 0x568   :  { %7959 = vmatprep.subr.bf16.mxu1 %v15751_v56  ;;  %v15717_v56 = vcombine.high %v6374_v37, %v6378_v1  ;;  %v6470_v1 = vld [vmem:[%s24476_s7 + $0x318] sm:$0xff] }
 0x569   :  { %17536 = vmatmul.mubr.bf16.gmra.mrb[4].mxu0 %v21441_v28  ;;  %v6423_v28 = vld [vmem:[%s24476_s7 + $0x1a0] sm:$0xff] }
 0x56a   :  { %17552 = vmatpush3.bf16.msra.mxu0 %v18127_v54  ;;  %17539 = vmatprep.mubr.bf16.mxu0 %v21412_v9  ;;  %v15759_v11 = vcombine.high %v6419_v34, %v6423_v28  ;;  %v15758_v52 = vcombine.low %v6419_v34, %v6423_v28  ;;  %v18146_v54 = vld [vmem:[%s24474_s5 + $0x228] sm:$0xff]   ;;  %v6382_v34 = vld [vmem:[%s24476_s7 + $0x58] sm:$0xff] }
 0x56b   :  { %17553 = vmatprep.subr.bf16.mxu0 %v18128_v27  ;;  %7960 = vmatpush1.bf16.msra.mxu1 %v15750_v25  ;;  %v6386_v28 = vld [vmem:[%s24476_s7 + $0x78] sm:$0xff] }
 0x56c   :  { %7961 = vmatprep.subr.bf16.mxu1 %v15759_v11  ;;  %v15725_v11 = vcombine.high %v6382_v34, %v6386_v28 }
 0x56e   :  { %17554 = vmatpush3.bf16.msra.mxu0 %v18128_v27  ;;  %v6122_v27 = vpack.c.bf16 %v6107_v32, %v6106_v12 }
 0x56f   :  { %17555 = vmatprep.subr.bf16.mxu0 %v18129_v20  ;;  %7962 = vmatpush1.bf16.msra.mxu1 %v15758_v52  ;;  %v6112_v52 = vld [vmem:[#allocation3 + $0xb0] sm:$0xff] }
 0x570   :  { %7963 = vmatprep.subr.bf16.mxu1 %v15767_v22  ;;  %v15724_v22 = vcombine.low %v6382_v34, %v6386_v28  ;;  %v6478_v34 = vld [vmem:[%s24476_s7 + $0x358] sm:$0xff] }
 0x571   :  { %17540 = vmatmul.mubr.bf16.gmra.mrb[8].mxu0 %v21452_v10  ;;  %v21616_v10 = vpack.c.bf16 %v5512_v38, %v21519_v24  ;;  %v15783_v24 = vcombine.high %v6443_v26, %v6447_v35  ;;  %v6390_v38 = vld [vmem:[%s24476_s7 + $0x98] sm:$0xff] }
 0x572   :  { %17556 = vmatpush3.bf16.msra.mxu0 %v18129_v20  ;;  %17543 = vmatprep.mubr.bf16.mxu0 %v21488_v8  ;;  %v6111_v20 = vld [vmem:[#allocation3 + $0xa8] sm:$0xff] }
 0x573   :  { %17557 = vmatprep.subr.bf16.mxu0 %v18130_v7  ;;  %7964 = vmatpush1.bf16.msra.mxu1 %v15766_v47  ;;  %v6124_v2 = vpack.c.bf16 %v6111_v20, %v6110_v43  ;;  %v18610_v47 = vld [vmem:[#allocation3 + $0xb8] sm:$0xff]  ;;  %v6475_v20 = vld [vmem:[%s24476_s7 + $0x340] sm:$0xff] }
 0x574   :  { %7965 = vmatprep.subr.bf16.mxu1 %v15775_v13  ;;  %v6125_v26 = vpack.c.bf16 %v18610_v47, %v6112_v52  ;;  %v6491_v47 = vld [vmem:[%s24476_s7 + $0x3c0] sm:$0xff] }
 0x576   :  { %17558 = vmatpush3.bf16.msra.mxu0 %v18130_v7  ;;  %v18609_v7 = vld [vmem:[#allocation3 + $0x88] sm:$0xff] }
 0x577   :  { %17559 = vmatprep.subr.bf16.mxu0 %v18131_v63  ;;  %7966 = vmatpush1.bf16.msra.mxu1 %v15774_v6  ;;  %v6123_v25 = vpack.c.bf16 %v18609_v7, %v6108_v21  ;;  %v6410_v6 = vld [vmem:[%s24476_s7 + $0x138] sm:$0xff] }
 0x578   :  { %7967 = vmatprep.subr.bf16.mxu1 %v15783_v24  ;;  %v6474_v21 = vld [vmem:[%s24476_s7 + $0x338] sm:$0xff] }
 0x579   :  { %17544 = vmatmul.mubr.bf16.gmra.mrb[12].mxu0 %v21616_v10  ;;  %v15812_v43 = vcombine.low %v6470_v1, %v6474_v21  ;;  %v6482_v7 = vld [vmem:[%s24476_s7 + $0x378] sm:$0xff] }
 0x57a   :  { %17560 = vmatpush3.bf16.msra.mxu0 %v18131_v63  ;;  %17563 = vmatprep.mubr.bf16.mxu0 %v21390_v53  ;;  %v21644_v53 = vld [vmem:[%s24476_s7 + $0x2c0] sm:$0xff]  ;;  %v6394_v63 = vld [vmem:[%s24476_s7 + $0xb8] sm:$0xff] }
 0x57b   :  { %17561 = vmatprep.subr.bf16.mxu0 %v18132_v14  ;;  %7968 = vmatpush1.bf16.msra.mxu1 %v15782_v4  ;;  %v15799_v58 = vcombine.high %v21644_v53, %v21649_v45  ;;  %v15733_v49 = vcombine.high %v6390_v38, %v6394_v63  ;;  %v15732_v35 = vcombine.low %v6390_v38, %v6394_v63  ;;  %v6487_v38 = vld [vmem:[%s24476_s7 + $0x3a0] sm:$0xff]  ;;  %v6486_v63 = vld [vmem:[%s24476_s7 + $0x398] sm:$0xff] }
 0x57c   :  { %7969 = vmatprep.subr.bf16.mxu1 %v15791_v17 }
 0x57e   :  { %17562 = vmatpush3.bf16.msra.mxu0 %v18132_v14  ;;  %v6402_v14 = vld [vmem:[%s24476_s7 + $0xf8] sm:$0xff] }
 0x57f   :  { %17579 = vmatprep.subr.bf16.mxu0 %v18133_v39  ;;  %7970 = vmatpush1.bf16.msra.mxu1 %v15790_v29  ;;  %v15741_v13 = vcombine.high %v6398_v36, %v6402_v14  ;;  %v15740_v24 = vcombine.low %v6398_v36, %v6402_v14  ;;  %v6121_v29 = vld [vmem:[#allocation3 + $0x118] sm:$0xff] }
 0x580   :  { %7971 = vmatprep.subr.bf16.mxu1 %v15799_v58 }
 0x581   :  { %17564 = vmatmul.mubr.bf16.vlgmr.msra.gmra.mrb[0].mxu0 %v21400_v18  ;;  %v18136_v18 = vld [vmem:[%s24474_s5 + $0x1d8] sm:$0xff]  }
 0x582   :  { %17580 = vmatpush3.bf16.msra.mxu0 %v18133_v39  ;;  %17567 = vmatprep.mubr.bf16.mxu0 %v21402_v46  ;;  %v18137_v46 = vld [vmem:[%s24474_s5 + $0x1e0] sm:$0xff]   ;;  %v6406_v39 = vld [vmem:[%s24476_s7 + $0x118] sm:$0xff] }
 0x583   :  { %17581 = vmatprep.subr.bf16.mxu0 %v18134_v31  ;;  %v15749_v16 = vcombine.high %v6406_v39, %v6410_v6  ;;  %v15748_v4 = vcombine.low %v6406_v39, %v6410_v6  ;;  %v6498_v39 = vld [vmem:[%s24476_s7 + $0x3f8] sm:$0xff] }
 0x586   :  { %17582 = vmatpush3.bf16.msra.mxu0 %v18134_v31  ;;  %v6418_v31 = vld [vmem:[%s24476_s7 + $0x178] sm:$0xff] }
 0x587   :  { %17583 = vmatprep.subr.bf16.mxu0 %v18135_v55  ;;  %v15757_v17 = vcombine.high %v6414_v30, %v6418_v31  ;;  %v15756_v58 = vcombine.low %v6414_v30, %v6418_v31  ;;  %v21841_v30 = vld [vmem:[%s24476_s7 + $0x400] sm:$0xff] }
 0x588   :  { %v21846_v31 = vld [vmem:[%s24476_s7 + $0x420] sm:$0xff] }
 0x589   :  { %17568 = vmatmul.mubr.bf16.gmra.mrb[4].mxu0 %v21412_v9  ;;  %v5714_v9 = vld [vmem:[#allocation3 + $0x100] sm:$0xff] }
 0x58a   :  { %17584 = vmatpush3.bf16.msra.mxu0 %v18135_v55  ;;  %17571 = vmatprep.mubr.bf16.mxu0 %v21478_v50  ;;  %v5715_v50 = vld [vmem:[#allocation3 + $0x108] sm:$0xff]  ;;  %v6426_v55 = vld [vmem:[%s24476_s7 + $0x1b8] sm:$0xff] }
 0x58b   :  { %17585 = vmatprep.subr.bf16.mxu0 %v18136_v18  ;;  %v21673_v48 = vpack.c.bf16 %v5715_v50, %v5714_v9 }
 0x58e   :  { %17586 = vmatpush3.bf16.msra.mxu0 %v18136_v18 }
 0x58f   :  { %17587 = vmatprep.subr.bf16.mxu0 %v18137_v46 }
 0x591   :  { %17572 = vmatmul.mubr.bf16.gmra.mrb[8].mxu0 %v21488_v8 }
 0x592   :  { %17588 = vmatpush3.bf16.msra.mxu0 %v18137_v46  ;;  %17575 = vmatprep.mubr.bf16.mxu0 %v5722_v19  ;;  %v6430_v46 = vld [vmem:[%s24476_s7 + $0x1d8] sm:$0xff] }
 0x593   :  { %17589 = vmatprep.subr.bf16.mxu0 %v18138_v23 }
 0x596   :  { %17590 = vmatpush3.bf16.msra.mxu0 %v18138_v23  ;;  %v6438_v23 = vld [vmem:[%s24476_s7 + $0x218] sm:$0xff] }
 0x597   :  { %17591 = vmatprep.subr.bf16.mxu0 %v18139_v62 }
 0x599   :  { %17576 = vmatmul.mubr.bf16.gmra.mrb[12].mxu0 %v21673_v48 }
 0x59a   :  { %17592 = vmatpush3.bf16.msra.mxu0 %v18139_v62  ;;  %17595 = vmatprep.mubr.bf16.mxu0 %v21339_v59  ;;  %v18143_v59 = vld [vmem:[%s24474_s5 + $0x210] sm:$0xff]  }
 0x59b   :  { %17593 = vmatprep.subr.bf16.mxu0 %v18140_v51 }
 0x59e   :  { %17594 = vmatpush3.bf16.msra.mxu0 %v18140_v51  ;;  %v6450_v51 = vld [vmem:[%s24476_s7 + $0x278] sm:$0xff] }
 0x59f   :  { %17611 = vmatprep.subr.bf16.mxu0 %v18141_v61 }
 0x5a1   :  { %17596 = vmatmul.mubr.bf16.vlgmr.msra.gmra.mrb[0].mxu0 %v21352_v0  ;;  %v18145_v0 = vld [vmem:[%s24474_s5 + $0x220] sm:$0xff]  }
 0x5a2   :  { %17612 = vmatpush3.bf16.msra.mxu0 %v18141_v61  ;;  %17599 = vmatprep.mubr.bf16.mxu0 %v21354_v57  ;;  %v5925_v57 = vpack.c.bf16 %v5714_v9, %v5713_v42  ;;  %v6442_v9 = vld [vmem:[%s24476_s7 + $0x238] sm:$0xff] }
 0x5a3   :  { %17613 = vmatprep.subr.bf16.mxu0 %v18142_v40  ;;  %v15781_v62 = vcombine.high %v6438_v23, %v6442_v9  ;;  %v15780_v61 = vcombine.low %v6438_v23, %v6442_v9 }
 0x5a6   :  { %17614 = vmatpush3.bf16.msra.mxu0 %v18142_v40 }
 0x5a7   :  { %17615 = vmatprep.subr.bf16.mxu0 %v18143_v59 }
 0x5a9   :  { %17600 = vmatmul.mubr.bf16.gmra.mrb[4].mxu0 %v21367_v44  ;;  %v21703_v44 = vld [vmem:[#allocation3 + $0x110] sm:$0xff] }
 0x5aa   :  { %17616 = vmatpush3.bf16.msra.mxu0 %v18143_v59  ;;  %17603 = vmatprep.mubr.bf16.mxu0 %v21517_v15  ;;  %v18147_v15 = vld [vmem:[%s24474_s5 + $0x230] sm:$0xff]   ;;  %v5926_v41 = vpack.c.bf16 %v21703_v44, %v5715_v50  ;;  %v6129_v42 = vpack.c.bf16 %v6121_v29, %v21703_v44  ;;  %v15772_v50 = vcombine.low %v6430_v46, %v6434_v5  ;;  %v6454_v59 = vld [vmem:[%s24476_s7 + $0x298] sm:$0xff] }
 0x5ab   :  { %17617 = vmatprep.subr.bf16.mxu0 %v18144_v60  ;;  %v6466_v44 = vld [vmem:[%s24476_s7 + $0x2f8] sm:$0xff] }
 0x5ae   :  { %17618 = vmatpush3.bf16.msra.mxu0 %v18144_v60  ;;  %v6458_v60 = vld [vmem:[%s24476_s7 + $0x2b8] sm:$0xff] }
 0x5af   :  { %17619 = vmatprep.subr.bf16.mxu0 %v18145_v0 }
 0x5b1   :  { %17604 = vmatmul.mubr.bf16.gmra.mrb[8].mxu0 %v21527_v3  ;;  %v18148_v3 = vld [vmem:[%s24474_s5 + $0x238] sm:$0xff]  }
 0x5b2   :  { %17620 = vmatpush3.bf16.msra.mxu0 %v18145_v0  ;;  %17607 = vmatprep.mubr.bf16.mxu0 %v5925_v57  ;;  %v15797_v57 = vcombine.high %v6454_v59, %v6458_v60 }
 0x5b3   :  { %17621 = vmatprep.subr.bf16.mxu0 %v18146_v54 }
 0x5b6   :  { %17622 = vmatpush3.bf16.msra.mxu0 %v18146_v54  ;;  %v6462_v54 = vld [vmem:[%s24476_s7 + $0x2d8] sm:$0xff] }
 0x5b7   :  { %17623 = vmatprep.subr.bf16.mxu0 %v18147_v15  ;;  %v15805_v12 = vcombine.high %v6462_v54, %v6466_v44  ;;  %v15804_v32 = vcombine.low %v6462_v54, %v6466_v44 }
 0x5b9   :  { %17608 = vmatmul.mubr.bf16.gmra.mrb[12].mxu0 %v5926_v41  ;;  %v15798_v41 = vcombine.low %v21644_v53, %v21649_v45  ;;  %v15813_v53 = vcombine.high %v6470_v1, %v6474_v21 }
 0x5ba   :  { %17624 = vmatpush3.bf16.msra.mxu0 %v18147_v15  ;;  %17627 = vmatprep.mubr.bf16.mxu0 %v6122_v27  ;;  %v15796_v15 = vcombine.low %v6454_v59, %v6458_v60  ;;  %v6467_v27 = vld [vmem:[%s24476_s7 + $0x300] sm:$0xff] }
 0x5bb   :  { %17625 = vmatprep.subr.bf16.mxu0 %v18148_v3  ;;  %7972 = vmatpush1.bf16.msra.mxu1 %v15798_v41 }
 0x5be   :  { %17626 = vmatpush3.bf16.msra.mxu0 %v18148_v3  ;;  %v6471_v3 = vld [vmem:[%s24476_s7 + $0x320] sm:$0xff] }
 0x5bf   :  { %8195 = vmatprep.subr.bf16.mxu0 %v15717_v56  ;;  %v15807_v37 = vcombine.high %v6467_v27, %v6471_v3  ;;  %v15806_v45 = vcombine.low %v6467_v27, %v6471_v3  ;;  %v6479_v56 = vld [vmem:[%s24476_s7 + $0x360] sm:$0xff] }
 0x5c0   :  { %v15815_v28 = vcombine.high %v6475_v20, %v6479_v56 }
 0x5c1   :  { %17628 = vmatmul.mubr.bf16.vlgmr.msra.gmra.mrb[0].mxu0 %v6123_v25  ;;  %7973 = vmatprep.subr.bf16.mxu1 %v15807_v37  ;;  %v15820_v25 = vcombine.low %v6478_v34, %v6482_v7 }
 0x5c2   :  { %17631 = vmatprep.mubr.bf16.mxu0 %v6124_v2  ;;  %8196 = vmatpush1.bf16.msra.mxu0 %v15716_v33  ;;  %v15821_v2 = vcombine.high %v6478_v34, %v6482_v7  ;;  %v15814_v33 = vcombine.low %v6475_v20, %v6479_v56  ;;  %v6510_v20 = vld [vmem:[%s24476_s7 + $0x458] sm:$0xff] }
 0x5c3   :  { %8197 = vmatprep.subr.bf16.mxu0 %v15725_v11  ;;  %7974 = vmatpush1.bf16.msra.mxu1 %v15806_v45  ;;  %v6483_v11 = vld [vmem:[%s24476_s7 + $0x380] sm:$0xff]  ;;  %v6514_v56 = vld [vmem:[%s24476_s7 + $0x478] sm:$0xff] }
 0x5c4   :  { %7975 = vmatprep.subr.bf16.mxu1 %v15815_v28  ;;  %v15823_v52 = vcombine.high %v6483_v11, %v6487_v38  ;;  %v15822_v14 = vcombine.low %v6483_v11, %v6487_v38  ;;  %v6511_v45 = vld [vmem:[%s24476_s7 + $0x460] sm:$0xff] }
 0x5c6   :  { %8198 = vmatpush1.bf16.msra.mxu0 %v15724_v22  ;;  %v6490_v22 = vld [vmem:[%s24476_s7 + $0x3b8] sm:$0xff] }
 0x5c7   :  { %8199 = vmatprep.subr.bf16.mxu0 %v15733_v49  ;;  %7976 = vmatpush1.bf16.msra.mxu1 %v15814_v33  ;;  %v15828_v49 = vcombine.low %v6486_v63, %v6490_v22  ;;  %v15829_v36 = vcombine.high %v6486_v63, %v6490_v22  ;;  %v6515_v22 = vld [vmem:[%s24476_s7 + $0x480] sm:$0xff] }
 0x5c8   :  { %7977 = vmatprep.subr.bf16.mxu1 %v15823_v52  ;;  %v15853_v52 = vcombine.high %v6510_v20, %v6514_v56 }
 0x5c9   :  { %17632 = vmatmul.mubr.bf16.gmra.mrb[4].mxu0 %v6125_v26  ;;  %v6495_v26 = vld [vmem:[%s24476_s7 + $0x3e0] sm:$0xff] }
 0x5ca   :  { %17635 = vmatprep.mubr.bf16.mxu0 %v21488_v8  ;;  %8200 = vmatpush1.bf16.msra.mxu0 %v15732_v35  ;;  %v6422_v8 = vld [vmem:[%s24476_s7 + $0x198] sm:$0xff] }
 0x5cb   :  { %8201 = vmatprep.subr.bf16.mxu0 %v15741_v13  ;;  %v15765_v18 = vcombine.high %v6422_v8, %v6426_v55  ;;  %v15764_v19 = vcombine.low %v6422_v8, %v6426_v55  ;;  %7978 = vmatpush1.bf16.msra.mxu1 %v15822_v14  ;;  %v6494_v35 = vld [vmem:[%s24476_s7 + $0x3d8] sm:$0xff]  ;;  %v15831_v13 = vcombine.high %v6491_v47, %v6495_v26  ;;  %v6519_v14 = vld [vmem:[%s24476_s7 + $0x4a0] sm:$0xff] }
 0x5cc   :  { %v15836_v6 = vcombine.low %v6494_v35, %v6498_v39  ;;  %v21858_v8 = vld [vmem:[%s24476_s7 + $0x438] sm:$0xff]  ;;  %v15838_v55 = vcombine.low %v21841_v30, %v21846_v31 }
 0x5cd   :  { %7979 = vmatprep.subr.bf16.mxu1 %v15831_v13 }
 0x5ce   :  { %8202 = vmatpush1.bf16.msra.mxu0 %v15740_v24  ;;  %v15837_v24 = vcombine.high %v6494_v35, %v6498_v39 }
 0x5cf   :  { %8203 = vmatprep.subr.bf16.mxu0 %v15749_v16  ;;  %v15830_v16 = vcombine.low %v6491_v47, %v6495_v26  ;;  %v6518_v47 = vld [vmem:[%s24476_s7 + $0x498] sm:$0xff] }
 0x5d0   :  { %v6522_v26 = vld [vmem:[%s24476_s7 + $0x4b8] sm:$0xff] }
 0x5d1   :  { %17636 = vmatmul.mubr.bf16.gmra.mrb[8].mxu0 %v21616_v10  ;;  %v15773_v10 = vcombine.high %v6430_v46, %v6434_v5  ;;  %7980 = vmatpush1.bf16.msra.mxu1 %v15830_v16 }
 0x5d2   :  { %17639 = vmatprep.mubr.bf16.mxu0 %v21673_v48  ;;  %8204 = vmatpush1.bf16.msra.mxu0 %v15748_v4  ;;  %v6446_v48 = vld [vmem:[%s24476_s7 + $0x258] sm:$0xff] }
 0x5d3   :  { %8205 = vmatprep.subr.bf16.mxu0 %v15757_v17  ;;  %v15789_v40 = vcombine.high %v6446_v48, %v6450_v51  ;;  %v15788_v0 = vcombine.low %v6446_v48, %v6450_v51  ;;  %v21851_v4 = vld [vmem:[%s24476_s7 + $0x418] sm:$0xff]  ;;  %v15839_v17 = vcombine.high %v21841_v30, %v21846_v31  ;;  %v15855_v31 = vcombine.high %v6515_v22, %v6519_v14 }
 0x5d4   :  { %v15844_v29 = vcombine.low %v21851_v4, %v21858_v8 }
 0x5d5   :  { %7990 = vmatprep.subr.bf16.mxu1 %v15839_v17  ;;  %v6523_v17 = vld [vmem:[%s24476_s7 + $0x4c0] sm:$0xff] }
 0x5d6   :  { %8206 = vmatpush1.bf16.msra.mxu0 %v15756_v58  ;;  %v15845_v58 = vcombine.high %v21851_v4, %v21858_v8  ;;  %v15861_v4 = vcombine.high %v6518_v47, %v6522_v26 }
 0x5d7   :  { %8207 = vmatprep.subr.bf16.mxu0 %v15765_v18  ;;  %v21869_v18 = vld [vmem:[%s24475_s6] ss:$0 sm:$0xff] }
 0x5d9   :  { %17640 = vmatmul.mubr.bf16.gmra.mrb[12].mxu0 %v6129_v42 }
 0x5da   :  { %8208 = vmatpush1.bf16.msra.mxu0 %v15764_v19 }
 0x5db   :  { %8209 = vmatprep.subr.bf16.mxu0 %v15773_v10 }
 0x5de   :  { %8210 = vmatpush1.bf16.msra.mxu0 %v15772_v50 }
 0x5df   :  { %8211 = vmatprep.subr.bf16.mxu0 %v15781_v62 }
 0x5e2   :  { %8212 = vmatpush1.bf16.msra.mxu0 %v15780_v61 }
 0x5e3   :  { %8213 = vmatprep.subr.bf16.mxu0 %v15789_v40 }
 0x5e6   :  { %8214 = vmatpush1.bf16.msra.mxu0 %v15788_v0 }
 0x5e7   :  { %8215 = vmatprep.subr.bf16.mxu0 %v15797_v57 }
 0x5ea   :  { %8216 = vmatpush1.bf16.msra.mxu0 %v15796_v15 }
 0x5eb   :  { %8217 = vmatprep.subr.bf16.mxu0 %v15805_v12 }
 0x5ee   :  { %8218 = vmatpush1.bf16.msra.mxu0 %v15804_v32 }
 0x5ef   :  { %8219 = vmatprep.subr.bf16.mxu0 %v15813_v53 }
 0x5f2   :  { %8220 = vmatpush1.bf16.msra.mxu0 %v15812_v43  ;;  %v6507_v43 = vld [vmem:[%s24476_s7 + $0x440] sm:$0xff] }
 0x5f3   :  { %8221 = vmatprep.subr.bf16.mxu0 %v15821_v2  ;;  %v15847_v63 = vcombine.high %v6507_v43, %v6511_v45 }
 0x5f6   :  { %8222 = vmatpush1.bf16.msra.mxu0 %v15820_v25 }
 0x5f7   :  { %8223 = vmatprep.subr.bf16.mxu0 %v15829_v36 }
 0x5fa   :  { %8224 = vmatpush1.bf16.msra.mxu0 %v15828_v49 }
 0x5fb   :  { %8225 = vmatprep.subr.bf16.mxu0 %v15837_v24  ;;  %v15852_v24 = vcombine.low %v6510_v20, %v6514_v56 }
 0x5fe   :  { %8226 = vmatpush1.bf16.msra.mxu0 %v15836_v6  ;;  %v15846_v6 = vcombine.low %v6507_v43, %v6511_v45  ;;  %v6546_v45 = vld [vmem:[%s24476_s7 + $0x578] sm:$0xff] }
 0x5ff   :  { %8236 = vmatprep.subr.bf16.mxu0 %v15845_v58  ;;  %v6527_v58 = vld [vmem:[%s24476_s7 + $0x4e0] sm:$0xff] }
 0x694   :  { %v17629_v46 = vpop.f32.mrb[0].mxu0 }
 0x695   :  { %v6317_v5 = vadd.f32 %v17629_v46, %v21869_v18  ;;  %v6229_v42 = vpop.f32.mrb[1].mxu0 }
 0x696   :  { %v6315_v19 = vadd.f32 %v21869_v18, %v6229_v42  ;;  %v17630_v10 = vpop.f32.mrb[2].mxu0 }
 0x697   :  { %v6318_v23 = vadd.f32 %v17630_v10, %v21869_v18  ;;  %v6232_v9 = vpop.f32.mrb[3].mxu0  ;;  %v6333_v62 = vmax.f32 %v6317_v5, 0.0  ;;  %v15854_v10 = vcombine.low %v6515_v22, %v6519_v14 }
 0x698   :  { %v6316_v50 = vadd.f32 %v21869_v18, %v6232_v9  ;;  %v6331_v51 = vmax.f32 %v6315_v19, 0.0 }
 0x699   :  { %v6334_v48 = vmax.f32 %v6318_v23, 0.0  ;;  %v15860_v23 = vcombine.low %v6518_v47, %v6522_v26  ;;  %v6555_v47 = vld [vmem:[%s24476_s7 + $0x5c0] sm:$0xff] }
 0x69a   :  { %v6332_v61 = vmax.f32 %v6316_v50, 0.0  ;;  %v6559_v26 = vld [vmem:[%s24476_s7 + $0x5e0] sm:$0xff] }
 0x69b   :  { %v6351_v40 = vmax.f32 %v6333_v62, %v6334_v48  ;;  %v15863_v62 = vcombine.high %v6523_v17, %v6527_v58 }
 0x69c   :  { %v6347_v59 = vmax.f32 %v6331_v51, %v6332_v61  ;;  %v17633_v60 = vpop.f32.mrb[4].mxu0  ;;  %v6531_v51 = vld [vmem:[%s24476_s7 + $0x500] sm:$0xff] }
 0x69d   :  { %v6321_v0 = vadd.f32 %v17633_v60, %v21869_v18  ;;  %v6245_v57 = vpop.f32.mrb[5].mxu0  ;;  %v6535_v60 = vld [vmem:[%s24476_s7 + $0x520] sm:$0xff] }
 0x69e   :  { %v6319_v54 = vadd.f32 %v21869_v18, %v6245_v57  ;;  %v17634_v44 = vpop.f32.mrb[6].mxu0  ;;  %v6538_v57 = vld [vmem:[%s24476_s7 + $0x538] sm:$0xff] }
 0x69f   :  { %v6337_v15 = vmax.f32 %v6321_v0, 0.0  ;;  %v6322_v12 = vadd.f32 %v17634_v44, %v21869_v18  ;;  %v6248_v32 = vpop.f32.mrb[7].mxu0  ;;  %v6534_v0 = vld [vmem:[%s24476_s7 + $0x518] sm:$0xff] }
 0x6a0   :  { %v6335_v41 = vmax.f32 %v6319_v54, 0.0  ;;  %v6320_v27 = vadd.f32 %v21869_v18, %v6248_v32  ;;  %v15862_v32 = vcombine.low %v6523_v17, %v6527_v58  ;;  %v6570_v17 = vld [vmem:[%s24476_s7 + $0x638] sm:$0xff] }
 0x6a1   :  { %v6352_v3 = vmax.f32 %v6351_v40, %v6337_v15  ;;  %v6338_v37 = vmax.f32 %v6322_v12, 0.0 }
 0x6a2   :  { %v6348_v1 = vmax.f32 %v6347_v59, %v6335_v41  ;;  %v6336_v21 = vmax.f32 %v6320_v27, 0.0 }
 0x6a3   :  { %v6353_v53 = vmax.f32 %v6352_v3, %v6338_v37  ;;  %v15871_v37 = vcombine.high %v6531_v51, %v6535_v60 }
 0x6a4   :  { %v6349_v34 = vmax.f32 %v6348_v1, %v6336_v21  ;;  %v17637_v28 = vpop.f32.mrb[8].mxu0  ;;  %v15877_v1 = vcombine.high %v6534_v0, %v6538_v57  ;;  %v6539_v21 = vld [vmem:[%s24476_s7 + $0x540] sm:$0xff] }
 0x6a5   :  { %v21891_v7 = vpack.c.bf16 %v6353_v53, %v6353_v53  ;;  %v6325_v25 = vadd.f32 %v17637_v28, %v21869_v18  ;;  %v6261_v2 = vpop.f32.mrb[9].mxu0  ;;  %v6542_v53 = vld [vmem:[%s24476_s7 + $0x558] sm:$0xff]  ;;  %v15876_v28 = vcombine.low %v6534_v0, %v6538_v57  ;;  %v6587_v57 = vld [vmem:[%s24476_s7 + $0x6c0] sm:$0xff] }
 0x6a6   :  { %v21894_v33 = vpack.c.bf16 %v6349_v34, %v6349_v34  ;;  %v6323_v11 = vadd.f32 %v21869_v18, %v6261_v2  ;;  %v17638_v38 = vpop.f32.mrb[10].mxu0  ;;  %v15870_v34 = vcombine.low %v6531_v51, %v6535_v60  ;;  %v15885_v2 = vcombine.high %v6542_v53, %v6546_v45  ;;  %v6582_v51 = vld [vmem:[%s24476_s7 + $0x698] sm:$0xff] }
 0x6a7   :  { %v6326_v49 = vadd.f32 %v17638_v38, %v21869_v18  ;;  %v6264_v36 = vpop.f32.mrb[11].mxu0  ;;  %7981 = vmatprep.mubr.bf16.mxu1 %v21891_v7  ;;  %8227 = vmatprep.mubr.bf16.mxu0 %v21891_v7  ;;  %v6341_v13 = vmax.f32 %v6325_v25, 0.0  ;;  %v6551_v38 = vld [vmem:[%s24476_s7 + $0x5a0] sm:$0xff] }
 0x6a8   :  { %v6324_v35 = vadd.f32 %v21869_v18, %v6264_v36  ;;  %7982 = vmatmul.mubr.bf16.vlgmr.msra.gmra.mrb[0].mxu1 %v21894_v33  ;;  %8228 = vmatmul.mubr.bf16.vlgmr.msra.gmra.mrb[16].mxu0 %v21894_v33  ;;  %v6339_v16 = vmax.f32 %v6323_v11, 0.0  ;;  %v6547_v11 = vld [vmem:[%s24476_s7 + $0x580] sm:$0xff] }
 0x6a9   :  { %v6342_v39 = vmax.f32 %v6326_v49, 0.0  ;;  %7991 = vmatpush1.bf16.msra.mxu1 %v15838_v55  ;;  %8237 = vmatpush1.bf16.msra.mxu0 %v15844_v29  ;;  %v6526_v55 = vld [vmem:[%s24476_s7 + $0x4d8] sm:$0xff]  ;;  %v15884_v49 = vcombine.low %v6542_v53, %v6546_v45  ;;  %v15887_v36 = vcombine.high %v6547_v11, %v6551_v38 }
 0x6aa   :  { %v6340_v30 = vmax.f32 %v6324_v35, 0.0  ;;  %7992 = vmatprep.subr.bf16.mxu1 %v15847_v63  ;;  %8238 = vmatprep.subr.bf16.mxu0 %v15853_v52  ;;  %v6530_v29 = vld [vmem:[%s24476_s7 + $0x4f8] sm:$0xff] }
 0x6ab   :  { %v6359_v8 = vmax.f32 %v6341_v13, %v6342_v39  ;;  %v15869_v48 = vcombine.high %v6526_v55, %v6530_v29  ;;  %v15868_v41 = vcombine.low %v6526_v55, %v6530_v29  ;;  %v6550_v63 = vld [vmem:[%s24476_s7 + $0x598] sm:$0xff]  ;;  %v15886_v39 = vcombine.low %v6547_v11, %v6551_v38 }
 0x6ac   :  { %v6355_v46 = vmax.f32 %v6339_v16, %v6340_v30  ;;  %v17641_v5 = vpop.f32.mrb[12].mxu0  ;;  %v6554_v52 = vld [vmem:[%s24476_s7 + $0x5b8] sm:$0xff]  ;;  %v6563_v30 = vld [vmem:[%s24476_s7 + $0x600] sm:$0xff] }
 0x6ad   :  { %v6329_v42 = vadd.f32 %v17641_v5, %v21869_v18  ;;  %7993 = vmatpush1.bf16.msra.mxu1 %v15846_v6  ;;  %8239 = vmatpush1.bf16.msra.mxu0 %v15852_v24  ;;  %v6277_v19 = vpop.f32.mrb[13].mxu0  ;;  %v15893_v14 = vcombine.high %v6550_v63, %v6554_v52  ;;  %v6558_v35 = vld [vmem:[%s24476_s7 + $0x5d8] sm:$0xff]  ;;  %v15892_v6 = vcombine.low %v6550_v63, %v6554_v52  ;;  %v6575_v5 = vld [vmem:[%s24476_s7 + $0x660] sm:$0xff] }
 0x6ae   :  { %v6327_v9 = vadd.f32 %v21869_v18, %v6277_v19  ;;  %v17642_v50 = vpop.f32.mrb[14].mxu0  ;;  %7994 = vmatprep.subr.bf16.mxu1 %v15855_v31  ;;  %8240 = vmatprep.subr.bf16.mxu0 %v15861_v4  ;;  %v6562_v13 = vld [vmem:[%s24476_s7 + $0x5f8] sm:$0xff]  ;;  %v15895_v24 = vcombine.high %v6555_v47, %v6559_v26  ;;  %v6567_v31 = vld [vmem:[%s24476_s7 + $0x620] sm:$0xff] }
 0x6af   :  { %v6345_v61 = vmax.f32 %v6329_v42, 0.0  ;;  %v6330_v40 = vadd.f32 %v17642_v50, %v21869_v18  ;;  %v6280_v59 = vpop.f32.mrb[15].mxu0  ;;  %v15901_v16 = vcombine.high %v6558_v35, %v6562_v13  ;;  %v6566_v4 = vld [vmem:[%s24476_s7 + $0x618] sm:$0xff]  ;;  %v15900_v58 = vcombine.low %v6558_v35, %v6562_v13 }
 0x6b0   :  { %v6343_v54 = vmax.f32 %v6327_v9, 0.0  ;;  %v6328_v44 = vadd.f32 %v21869_v18, %v6280_v59  ;;  %v6543_v18 = vld [vmem:[%s24476_s7 + $0x560] sm:$0xff]  ;;  %v15903_v55 = vcombine.high %v6563_v30, %v6567_v31  ;;  %v15909_v29 = vcombine.high %v6566_v4, %v6570_v17  ;;  %v6574_v42 = vld [vmem:[%s24476_s7 + $0x658] sm:$0xff] }
 0x6b1   :  { %v6360_v15 = vmax.f32 %v6359_v8, %v6345_v61  ;;  %v6346_v12 = vmax.f32 %v6330_v40, 0.0  ;;  %7995 = vmatpush1.bf16.msra.mxu1 %v15854_v10  ;;  %8241 = vmatpush1.bf16.msra.mxu0 %v15860_v23  ;;  %v15879_v25 = vcombine.high %v6539_v21, %v6543_v18  ;;  %v15878_v22 = vcombine.low %v6539_v21, %v6543_v18  ;;  %v6578_v19 = vld [vmem:[%s24476_s7 + $0x678] sm:$0xff] }
 0x6b2   :  { %v6356_v27 = vmax.f32 %v6355_v46, %v6343_v54  ;;  %v6344_v3 = vmax.f32 %v6328_v44, 0.0  ;;  %7996 = vmatprep.subr.bf16.mxu1 %v15863_v62  ;;  %8242 = vmatprep.subr.bf16.mxu0 %v15869_v48  ;;  %v15894_v8 = vcombine.low %v6555_v47, %v6559_v26  ;;  %v6571_v46 = vld [vmem:[%s24476_s7 + $0x640] sm:$0xff]  ;;  %v15902_v10 = vcombine.low %v6563_v30, %v6567_v31  ;;  %v6586_v61 = vld [vmem:[%s24476_s7 + $0x6b8] sm:$0xff] }
 0x6b3   :  { %v6361_v43 = vmax.f32 %v6360_v15, %v6346_v12  ;;  %v15908_v23 = vcombine.low %v6566_v4, %v6570_v17  ;;  %v15911_v9 = vcombine.high %v6571_v46, %v6575_v5  ;;  %v15917_v50 = vcombine.high %v6574_v42, %v6578_v19  ;;  %v6579_v62 = vld [vmem:[%s24476_s7 + $0x680] sm:$0xff]  ;;  %v6590_v44 = vld [vmem:[%s24476_s7 + $0x6d8] sm:$0xff] }
 0x6b4   :  { %v21955_v20 = vmax.f32 %v6356_v27, %v6344_v3  ;;  %v6583_v48 = vld [vmem:[%s24476_s7 + $0x6a0] sm:$0xff]  ;;  %v15910_v40 = vcombine.low %v6571_v46, %v6575_v5  ;;  %v15916_v59 = vcombine.low %v6574_v42, %v6578_v19  ;;  %v15925_v0 = vcombine.high %v6582_v51, %v6586_v61  ;;  %v6594_v15 = vld [vmem:[%s24476_s7 + $0x6f8] sm:$0xff]  ;;  %v6380_v5 = vld [vmem:[%s24476_s7 + $0x48] sm:$0xff] }
 0x6b5   :  { %v21957_v56 = vpack.c.bf16 %v6361_v43, %v6361_v43  ;;  %7997 = vmatpush1.bf16.msra.mxu1 %v15862_v32  ;;  %8243 = vmatpush1.bf16.msra.mxu0 %v15868_v41  ;;  %v15919_v60 = vcombine.high %v6579_v62, %v6583_v48  ;;  %v6591_v54 = vld [vmem:[%s24476_s7 + $0x6e0] sm:$0xff]  ;;  %v15918_v12 = vcombine.low %v6579_v62, %v6583_v48  ;;  %v6602_v21 = vld [vmem:[%s24476_s7 + $0x738] sm:$0xff]  ;;  %v6384_v42 = vld [vmem:[%s24476_s7 + $0x68] sm:$0xff] }
 0x6b6   :  { %7998 = vmatprep.subr.bf16.mxu1 %v15871_v37  ;;  %8244 = vmatprep.subr.bf16.mxu0 %v15877_v1  ;;  %v15924_v32 = vcombine.low %v6582_v51, %v6586_v61  ;;  %v15927_v41 = vcombine.high %v6587_v57, %v6591_v54  ;;  %v15933_v27 = vcombine.high %v6590_v44, %v6594_v15  ;;  %v6595_v3 = vld [vmem:[%s24476_s7 + $0x700] sm:$0xff]  ;;  %v6598_v1 = vld [vmem:[%s24476_s7 + $0x718] sm:$0xff]  ;;  %v6396_v48 = vld [vmem:[%s24476_s7 + $0xc8] sm:$0xff] }
 0x6b7   :  { %8022 = vmatprep.mubr.bf16.mxu1 %v21957_v56  ;;  %8268 = vmatprep.mubr.bf16.mxu0 %v21957_v56  ;;  %v6599_v37 = vld [vmem:[%s24476_s7 + $0x720] sm:$0xff]  ;;  %v15926_v43 = vcombine.low %v6587_v57, %v6591_v54  ;;  %v15932_v18 = vcombine.low %v6590_v44, %v6594_v15  ;;  %v15941_v45 = vcombine.high %v6598_v1, %v6602_v21  ;;  %v6400_v51 = vld [vmem:[%s24476_s7 + $0xe8] sm:$0xff] }
 0x6b8   :  { %v15935_v53 = vcombine.high %v6595_v3, %v6599_v37  ;;  %v15934_v11 = vcombine.low %v6595_v3, %v6599_v37  ;;  %v15940_v38 = vcombine.low %v6598_v1, %v6602_v21  ;;  %v15720_v62 = vcombine.low %v6380_v5, %v6384_v42  ;;  %v6412_v54 = vld [vmem:[%s24476_s7 + $0x148] sm:$0xff] }
 0x6b9   :  { %7999 = vmatpush1.bf16.msra.mxu1 %v15870_v34  ;;  %8245 = vmatpush1.bf16.msra.mxu0 %v15876_v28  ;;  %v6603_v34 = vld [vmem:[%s24476_s7 + $0x740] sm:$0xff]  ;;  %v6416_v44 = vld [vmem:[%s24476_s7 + $0x168] sm:$0xff] }
 0x6ba   :  { %8000 = vmatprep.subr.bf16.mxu1 %v15879_v25  ;;  %8246 = vmatprep.subr.bf16.mxu0 %v15885_v2  ;;  %v6607_v28 = vld [vmem:[%s24476_s7 + $0x760] sm:$0xff]  ;;  %v6606_v25 = vld [vmem:[%s24476_s7 + $0x758] sm:$0xff]  ;;  %v6428_v37 = vld [vmem:[%s24476_s7 + $0x1c8] sm:$0xff] }
 0x6bb   :  { %v6610_v2 = vld [vmem:[%s24476_s7 + $0x778] sm:$0xff]  ;;  %v15943_v63 = vcombine.high %v6603_v34, %v6607_v28  ;;  %v15942_v47 = vcombine.low %v6603_v34, %v6607_v28  ;;  %v6432_v1 = vld [vmem:[%s24476_s7 + $0x1e8] sm:$0xff] }
 0x6bc   :  { %v15949_v52 = vcombine.high %v6606_v25, %v6610_v2  ;;  %v15948_v26 = vcombine.low %v6606_v25, %v6610_v2  ;;  %v8294_v34 = vld [vmem:[%s24478_s9 + $0x8] sm:$0xff] }
 0x6bd   :  { %8001 = vmatpush1.bf16.msra.mxu1 %v15878_v22  ;;  %8247 = vmatpush1.bf16.msra.mxu0 %v15884_v49  ;;  %v6611_v22 = vld [vmem:[%s24476_s7 + $0x780] sm:$0xff]  ;;  %v8298_v25 = vld [vmem:[%s24478_s9 + $0x28] sm:$0xff] }
 0x6be   :  { %8002 = vmatprep.subr.bf16.mxu1 %v15887_v36  ;;  %8248 = vmatprep.subr.bf16.mxu0 %v15893_v14  ;;  %v6615_v49 = vld [vmem:[%s24476_s7 + $0x7a0] sm:$0xff]  ;;  %v6614_v36 = vld [vmem:[%s24476_s7 + $0x798] sm:$0xff]  ;;  %v6444_v2 = vld [vmem:[%s24476_s7 + $0x248] sm:$0xff] }
 0x6bf   :  { %v6618_v14 = vld [vmem:[%s24476_s7 + $0x7b8] sm:$0xff]  ;;  %v15951_v35 = vcombine.high %v6611_v22, %v6615_v49  ;;  %v15950_v30 = vcombine.low %v6611_v22, %v6615_v49  ;;  %v8302_v22 = vld [vmem:[%s24478_s9 + $0x48] sm:$0xff] }
 0x6c0   :  { %v15957_v13 = vcombine.high %v6614_v36, %v6618_v14  ;;  %v15956_v31 = vcombine.low %v6614_v36, %v6618_v14  ;;  %v8306_v36 = vld [vmem:[%s24478_s9 + $0x68] sm:$0xff] }
 0x6c1   :  { %8003 = vmatpush1.bf16.msra.mxu1 %v15886_v39  ;;  %8249 = vmatpush1.bf16.msra.mxu0 %v15892_v6  ;;  %v6619_v39 = vld [vmem:[%s24476_s7 + $0x7c0] sm:$0xff]  ;;  %v6452_v14 = vld [vmem:[%s24476_s7 + $0x288] sm:$0xff] }
 0x6c2   :  { %8004 = vmatprep.subr.bf16.mxu1 %v15895_v24  ;;  %8250 = vmatprep.subr.bf16.mxu0 %v15901_v16  ;;  %v6623_v6 = vld [vmem:[%s24476_s7 + $0x7e0] sm:$0xff]  ;;  %v6622_v24 = vld [vmem:[%s24476_s7 + $0x7d8] sm:$0xff] }
 0x6c3   :  { %v6626_v16 = vld [vmem:[%s24476_s7 + $0x7f8] sm:$0xff]  ;;  %v15959_v4 = vcombine.high %v6619_v39, %v6623_v6 }
 0x6c4   :  { %v15965_v17 = vcombine.high %v6622_v24, %v6626_v16 }
 0x6c5   :  { %8005 = vmatpush1.bf16.msra.mxu1 %v15894_v8  ;;  %8251 = vmatpush1.bf16.msra.mxu0 %v15900_v58  ;;  %v6372_v8 = vld [vmem:[%s24476_s7 + $0x8] sm:$0xff] }
 0x6c6   :  { %8006 = vmatprep.subr.bf16.mxu1 %v15903_v55  ;;  %8252 = vmatprep.subr.bf16.mxu0 %v15909_v29  ;;  %v6376_v58 = vld [vmem:[%s24476_s7 + $0x28] sm:$0xff]  ;;  %v15958_v55 = vcombine.low %v6619_v39, %v6623_v6  ;;  %v15964_v29 = vcombine.low %v6622_v24, %v6626_v16 }
 0x6c7   :  { %v15713_v46 = vcombine.high %v6372_v8, %v6376_v58  ;;  %v15712_v19 = vcombine.low %v6372_v8, %v6376_v58  ;;  %v8310_v39 = vld [vmem:[%s24478_s9 + $0x88] sm:$0xff] }
 0x6c8   :  { %v8314_v24 = vld [vmem:[%s24478_s9 + $0xa8] sm:$0xff] }
 0x6c9   :  { %8007 = vmatpush1.bf16.msra.mxu1 %v15902_v10  ;;  %8253 = vmatpush1.bf16.msra.mxu0 %v15908_v23  ;;  %v22095_v10 = vpack.c.bf16 %v21955_v20, %v21955_v20  ;;  %v15721_v23 = vcombine.high %v6380_v5, %v6384_v42  ;;  %v6460_v16 = vld [vmem:[%s24476_s7 + $0x2c8] sm:$0xff] }
 0x6ca   :  { %8008 = vmatprep.subr.bf16.mxu1 %v15911_v9  ;;  %8254 = vmatprep.subr.bf16.mxu0 %v15917_v50  ;;  %v6388_v9 = vld [vmem:[%s24476_s7 + $0x88] sm:$0xff] }
 0x6cb   :  { %v6392_v50 = vld [vmem:[%s24476_s7 + $0xa8] sm:$0xff] }
 0x6cc   :  { %v15729_v20 = vcombine.high %v6388_v9, %v6392_v50  ;;  %v15728_v61 = vcombine.low %v6388_v9, %v6392_v50  ;;  %v8318_v8 = vld [vmem:[%s24478_s9 + $0xc8] sm:$0xff] }
 0x6cd   :  { %8009 = vmatpush1.bf16.msra.mxu1 %v15910_v40  ;;  %8255 = vmatpush1.bf16.msra.mxu0 %v15916_v59  ;;  %v15737_v40 = vcombine.high %v6396_v48, %v6400_v51  ;;  %v6404_v59 = vld [vmem:[%s24476_s7 + $0x108] sm:$0xff] }
 0x6ce   :  { %8010 = vmatprep.subr.bf16.mxu1 %v15919_v60  ;;  %8256 = vmatprep.subr.bf16.mxu0 %v15925_v0  ;;  %v6408_v60 = vld [vmem:[%s24476_s7 + $0x128] sm:$0xff]  ;;  %v15736_v0 = vcombine.low %v6396_v48, %v6400_v51 }
 0x6cf   :  { %v15745_v57 = vcombine.high %v6404_v59, %v6408_v60  ;;  %v15744_v15 = vcombine.low %v6404_v59, %v6408_v60  ;;  %v8330_v50 = vld [vmem:[%s24478_s9 + $0x128] sm:$0xff] }
 0x6d0   :  { %v8338_v60 = vld [vmem:[%s24478_s9 + $0x168] sm:$0xff] }
 0x6d1   :  { %8011 = vmatpush1.bf16.msra.mxu1 %v15918_v12  ;;  %8257 = vmatpush1.bf16.msra.mxu0 %v15924_v32  ;;  %v15753_v12 = vcombine.high %v6412_v54, %v6416_v44  ;;  %v6420_v32 = vld [vmem:[%s24476_s7 + $0x188] sm:$0xff] }
 0x6d2   :  { %8012 = vmatprep.subr.bf16.mxu1 %v15927_v41  ;;  %8258 = vmatprep.subr.bf16.mxu0 %v15933_v27  ;;  %v6424_v41 = vld [vmem:[%s24476_s7 + $0x1a8] sm:$0xff]  ;;  %v15752_v27 = vcombine.low %v6412_v54, %v6416_v44 }
 0x6d3   :  { %v15761_v3 = vcombine.high %v6420_v32, %v6424_v41  ;;  %v15760_v21 = vcombine.low %v6420_v32, %v6424_v41  ;;  %v8346_v41 = vld [vmem:[%s24478_s9 + $0x1a8] sm:$0xff] }
 0x6d5   :  { %8013 = vmatpush1.bf16.msra.mxu1 %v15926_v43  ;;  %8259 = vmatpush1.bf16.msra.mxu0 %v15932_v18  ;;  %v15769_v43 = vcombine.high %v6428_v37, %v6432_v1  ;;  %v6436_v18 = vld [vmem:[%s24476_s7 + $0x208] sm:$0xff] }
 0x6d6   :  { %8014 = vmatprep.subr.bf16.mxu1 %v15935_v53  ;;  %8260 = vmatprep.subr.bf16.mxu0 %v15941_v45  ;;  %v6440_v53 = vld [vmem:[%s24476_s7 + $0x228] sm:$0xff]  ;;  %v15768_v45 = vcombine.low %v6428_v37, %v6432_v1 }
 0x6d7   :  { %v15777_v28 = vcombine.high %v6436_v18, %v6440_v53 }
 0x6d9   :  { %8015 = vmatpush1.bf16.msra.mxu1 %v15934_v11  ;;  %8261 = vmatpush1.bf16.msra.mxu0 %v15940_v38  ;;  %v6448_v11 = vld [vmem:[%s24476_s7 + $0x268] sm:$0xff]  ;;  %v15968_v38 = vcombine.low %v8294_v34, %v8298_v25 }
 0x6da   :  { %8016 = vmatprep.subr.bf16.mxu1 %v15943_v63  ;;  %8262 = vmatprep.subr.bf16.mxu0 %v15949_v52  ;;  %v15969_v63 = vcombine.high %v8294_v34, %v8298_v25  ;;  %v15776_v52 = vcombine.low %v6436_v18, %v6440_v53  ;;  %v15785_v49 = vcombine.high %v6444_v2, %v6448_v11  ;;  %v8354_v53 = vld [vmem:[%s24478_s9 + $0x1e8] sm:$0xff] }
 0x6db   :  { %v6504_v34 = vld [vmem:[%s24476_s7 + $0x428] sm:$0xff] }
 0x6dd   :  { %8017 = vmatpush1.bf16.msra.mxu1 %v15942_v47  ;;  %8263 = vmatpush1.bf16.msra.mxu0 %v15948_v26  ;;  %v6456_v47 = vld [vmem:[%s24476_s7 + $0x2a8] sm:$0xff]  ;;  %v15976_v26 = vcombine.low %v8302_v22, %v8306_v36 }
 0x6de   :  { %8018 = vmatprep.subr.bf16.mxu1 %v15951_v35  ;;  %8264 = vmatprep.subr.bf16.mxu0 %v15957_v13  ;;  %v15977_v35 = vcombine.high %v8302_v22, %v8306_v36  ;;  %v15784_v13 = vcombine.low %v6444_v2, %v6448_v11  ;;  %v15793_v6 = vcombine.high %v6452_v14, %v6456_v47  ;;  %v8358_v11 = vld [vmem:[%s24478_s9 + $0x208] sm:$0xff] }
 0x6df   :  { %v6512_v22 = vld [vmem:[%s24476_s7 + $0x468] sm:$0xff] }
 0x6e1   :  { %8019 = vmatpush1.bf16.msra.mxu1 %v15950_v30  ;;  %8265 = vmatpush1.bf16.msra.mxu0 %v15956_v31  ;;  %v6464_v30 = vld [vmem:[%s24476_s7 + $0x2e8] sm:$0xff]  ;;  %v15984_v31 = vcombine.low %v8310_v39, %v8314_v24 }
 0x6e2   :  { %8020 = vmatprep.subr.bf16.mxu1 %v15959_v4  ;;  %8266 = vmatprep.subr.bf16.mxu0 %v15965_v17  ;;  %v15985_v4 = vcombine.high %v8310_v39, %v8314_v24  ;;  %v15792_v17 = vcombine.low %v6452_v14, %v6456_v47  ;;  %v15801_v58 = vcombine.high %v6460_v16, %v6464_v30  ;;  %v8366_v47 = vld [vmem:[%s24478_s9 + $0x248] sm:$0xff] }
 0x6e3   :  { %v6520_v39 = vld [vmem:[%s24476_s7 + $0x4a8] sm:$0xff] }
 0x6e5   :  { %8021 = vmatpush1.bf16.msra.mxu1 %v15958_v55  ;;  %8267 = vmatpush1.bf16.msra.mxu0 %v15964_v29  ;;  %v8322_v55 = vld [vmem:[%s24478_s9 + $0xe8] sm:$0xff] }
 0x6e6   :  { %8031 = vmatprep.subr.bf16.mxu1 %v15713_v46  ;;  %11571 = vmatprep.subr.bf16.mxu0 %v15969_v63  ;;  %v6468_v29 = vld [vmem:[%s24476_s7 + $0x308] sm:$0xff]  ;;  %v15992_v5 = vcombine.low %v8318_v8, %v8322_v55  ;;  %v15993_v42 = vcombine.high %v8318_v8, %v8322_v55 }
 0x6e7   :  { %v6472_v46 = vld [vmem:[%s24476_s7 + $0x328] sm:$0xff] }
 0x6e8   :  { %8023 = vmatmul.mubr.bf16.vlgmr.msra.gmra.mrb[0].mxu1 %v22095_v10  ;;  %8269 = vmatmul.mubr.bf16.vlgmr.msra.gmra.mrb[16].mxu0 %v22095_v10  ;;  %v15809_v9 = vcombine.high %v6468_v29, %v6472_v46  ;;  %v8362_v63 = vld [vmem:[%s24478_s9 + $0x228] sm:$0xff] }
 0x6e9   :  { %8032 = vmatpush1.bf16.msra.mxu1 %v15712_v19  ;;  %8063 = vmatprep.mubr.bf16.mxu1 %v21891_v7  ;;  %v15800_v19 = vcombine.low %v6460_v16, %v6464_v30  ;;  %v16033_v36 = vcombine.high %v8358_v11, %v8362_v63  ;;  %v8374_v30 = vld [vmem:[%s24478_s9 + $0x288] sm:$0xff] }
 0x6ea   :  { %8033 = vmatprep.subr.bf16.mxu1 %v15721_v23  ;;  %11572 = vmatpush1.bf16.msra.mxu0 %v15968_v38  ;;  %v8326_v23 = vld [vmem:[%s24478_s9 + $0x108] sm:$0xff] }
 0x6eb   :  { %11573 = vmatprep.subr.bf16.mxu0 %v15977_v35  ;;  %v16000_v48 = vcombine.low %v8326_v23, %v8330_v50  ;;  %v16001_v51 = vcombine.high %v8326_v23, %v8330_v50  ;;  %v8370_v35 = vld [vmem:[%s24478_s9 + $0x268] sm:$0xff] }
 0x6ec   :  { %v16041_v24 = vcombine.high %v8366_v47, %v8370_v35  ;;  %v6528_v8 = vld [vmem:[%s24476_s7 + $0x4e8] sm:$0xff] }
 0x6ed   :  { %8034 = vmatpush1.bf16.msra.mxu1 %v15720_v62  ;;  %v6476_v62 = vld [vmem:[%s24476_s7 + $0x348] sm:$0xff] }
 0x6ee   :  { %8035 = vmatprep.subr.bf16.mxu1 %v15729_v20  ;;  %11574 = vmatpush1.bf16.msra.mxu0 %v15976_v26  ;;  %v6480_v20 = vld [vmem:[%s24476_s7 + $0x368] sm:$0xff] }
 0x6ef   :  { %11575 = vmatprep.subr.bf16.mxu0 %v15985_v4  ;;  %v15817_v59 = vcombine.high %v6476_v62, %v6480_v20  ;;  %v8378_v4 = vld [vmem:[%s24478_s9 + $0x2a8] sm:$0xff] }
 0x6f0   :  { %v16049_v55 = vcombine.high %v8374_v30, %v8378_v4  ;;  %v6536_v23 = vld [vmem:[%s24476_s7 + $0x528] sm:$0xff] }
 0x6f1   :  { %8036 = vmatpush1.bf16.msra.mxu1 %v15728_v61  ;;  %v15808_v61 = vcombine.low %v6468_v29, %v6472_v46  ;;  %v8382_v46 = vld [vmem:[%s24478_s9 + $0x2c8] sm:$0xff] }
 0x6f2   :  { %8037 = vmatprep.subr.bf16.mxu1 %v15737_v40  ;;  %11576 = vmatpush1.bf16.msra.mxu0 %v15984_v31  ;;  %v8334_v40 = vld [vmem:[%s24478_s9 + $0x148] sm:$0xff] }
 0x6f3   :  { %11577 = vmatprep.subr.bf16.mxu0 %v15993_v42  ;;  %v16008_v54 = vcombine.low %v8334_v40, %v8338_v60  ;;  %v16009_v44 = vcombine.high %v8334_v40, %v8338_v60  ;;  %v8386_v42 = vld [vmem:[%s24478_s9 + $0x2e8] sm:$0xff] }
 0x6f4   :  { %v16057_v50 = vcombine.high %v8382_v46, %v8386_v42  ;;  %v6544_v40 = vld [vmem:[%s24476_s7 + $0x568] sm:$0xff] }
 0x6f5   :  { %8038 = vmatpush1.bf16.msra.mxu1 %v15736_v0  ;;  %v6484_v0 = vld [vmem:[%s24476_s7 + $0x388] sm:$0xff] }
 0x6f6   :  { %8039 = vmatprep.subr.bf16.mxu1 %v15745_v57  ;;  %11578 = vmatpush1.bf16.msra.mxu0 %v15992_v5  ;;  %v6488_v57 = vld [vmem:[%s24476_s7 + $0x3a8] sm:$0xff] }
 0x6f7   :  { %11579 = vmatprep.subr.bf16.mxu0 %v16001_v51  ;;  %v15825_v32 = vcombine.high %v6484_v0, %v6488_v57  ;;  %v8394_v51 = vld [vmem:[%s24478_s9 + $0x328] sm:$0xff] }
 0x6f9   :  { %8040 = vmatpush1.bf16.msra.mxu1 %v15744_v15  ;;  %v15816_v15 = vcombine.low %v6476_v62, %v6480_v20  ;;  %v8390_v20 = vld [vmem:[%s24478_s9 + $0x308] sm:$0xff] }
 0x6fa   :  { %8041 = vmatprep.subr.bf16.mxu1 %v15753_v12  ;;  %11580 = vmatpush1.bf16.msra.mxu0 %v16000_v48  ;;  %v8342_v12 = vld [vmem:[%s24478_s9 + $0x188] sm:$0xff]  ;;  %v16065_v60 = vcombine.high %v8390_v20, %v8394_v51 }
 0x6fb   :  { %11581 = vmatprep.subr.bf16.mxu0 %v16009_v44  ;;  %v16016_v37 = vcombine.low %v8342_v12, %v8346_v41  ;;  %v16017_v1 = vcombine.high %v8342_v12, %v8346_v41  ;;  %v8402_v44 = vld [vmem:[%s24478_s9 + $0x368] sm:$0xff] }
 0x6fc   :  { %v6552_v12 = vld [vmem:[%s24476_s7 + $0x5a8] sm:$0xff] }
 0x6fd   :  { %8042 = vmatpush1.bf16.msra.mxu1 %v15752_v27  ;;  %v6492_v27 = vld [vmem:[%s24476_s7 + $0x3c8] sm:$0xff] }
 0x6fe   :  { %8043 = vmatprep.subr.bf16.mxu1 %v15761_v3  ;;  %11582 = vmatpush1.bf16.msra.mxu0 %v16008_v54  ;;  %v6496_v3 = vld [vmem:[%s24476_s7 + $0x3e8] sm:$0xff] }
 0x6ff   :  { %11583 = vmatprep.subr.bf16.mxu0 %v16017_v1  ;;  %v15833_v18 = vcombine.high %v6492_v27, %v6496_v3  ;;  %v15832_v2 = vcombine.low %v6492_v27, %v6496_v3  ;;  %v8410_v1 = vld [vmem:[%s24478_s9 + $0x3a8] sm:$0xff] }
 0x701   :  { %8044 = vmatpush1.bf16.msra.mxu1 %v15760_v21  ;;  %v15824_v21 = vcombine.low %v6484_v0, %v6488_v57  ;;  %v8398_v57 = vld [vmem:[%s24478_s9 + $0x348] sm:$0xff] }
 0x702   :  { %8045 = vmatprep.subr.bf16.mxu1 %v15769_v43  ;;  %v8350_v43 = vld [vmem:[%s24478_s9 + $0x1c8] sm:$0xff]  ;;  %11584 = vmatpush1.bf16.msra.mxu0 %v16016_v37  ;;  %v16073_v41 = vcombine.high %v8398_v57, %v8402_v44 }
 0x703   :  { %v16025_v25 = vcombine.high %v8350_v43, %v8354_v53  ;;  %v8406_v37 = vld [vmem:[%s24478_s9 + $0x388] sm:$0xff] }
 0x705   :  { %8046 = vmatpush1.bf16.msra.mxu1 %v15768_v45  ;;  %v6500_v45 = vld [vmem:[%s24476_s7 + $0x408] sm:$0xff]  ;;  %11585 = vmatprep.subr.bf16.mxu0 %v16025_v25 }
 0x706   :  { %8047 = vmatprep.subr.bf16.mxu1 %v15777_v28  ;;  %v16024_v28 = vcombine.low %v8350_v43, %v8354_v53  ;;  %v15841_v38 = vcombine.high %v6500_v45, %v6504_v34  ;;  %v15840_v14 = vcombine.low %v6500_v45, %v6504_v34  ;;  %v6560_v43 = vld [vmem:[%s24476_s7 + $0x5e8] sm:$0xff]  ;;  %v16081_v53 = vcombine.high %v8406_v37, %v8410_v1 }
 0x707   :  { %v8414_v34 = vld [vmem:[%s24478_s9 + $0x3c8] sm:$0xff] }
 0x708   :  { %11586 = vmatpush1.bf16.msra.mxu0 %v16024_v28  ;;  %v8418_v25 = vld [vmem:[%s24478_s9 + $0x3e8] sm:$0xff] }
 0x709   :  { %8048 = vmatpush1.bf16.msra.mxu1 %v15776_v52  ;;  %v6508_v52 = vld [vmem:[%s24476_s7 + $0x448] sm:$0xff]  ;;  %11587 = vmatprep.subr.bf16.mxu0 %v16033_v36 }
 0x70a   :  { %8049 = vmatprep.subr.bf16.mxu1 %v15785_v49  ;;  %v16032_v49 = vcombine.low %v8358_v11, %v8362_v63  ;;  %v15849_v26 = vcombine.high %v6508_v52, %v6512_v22  ;;  %v15848_v16 = vcombine.low %v6508_v52, %v6512_v22  ;;  %v6568_v11 = vld [vmem:[%s24476_s7 + $0x628] sm:$0xff]  ;;  %v16089_v63 = vcombine.high %v8414_v34, %v8418_v25 }
 0x70b   :  { %v6576_v36 = vld [vmem:[%s24476_s7 + $0x668] sm:$0xff] }
 0x70c   :  { %11588 = vmatpush1.bf16.msra.mxu0 %v16032_v49  ;;  %v6572_v49 = vld [vmem:[%s24476_s7 + $0x648] sm:$0xff] }
 0x70d   :  { %8050 = vmatpush1.bf16.msra.mxu1 %v15784_v13  ;;  %v6516_v13 = vld [vmem:[%s24476_s7 + $0x488] sm:$0xff]  ;;  %11589 = vmatprep.subr.bf16.mxu0 %v16041_v24 }
 0x70e   :  { %8051 = vmatprep.subr.bf16.mxu1 %v15793_v6  ;;  %v16040_v6 = vcombine.low %v8366_v47, %v8370_v35  ;;  %v15857_v31 = vcombine.high %v6516_v13, %v6520_v39  ;;  %v15856_v29 = vcombine.low %v6516_v13, %v6520_v39  ;;  %v15913_v47 = vcombine.high %v6572_v49, %v6576_v36  ;;  %v6584_v35 = vld [vmem:[%s24476_s7 + $0x6a8] sm:$0xff] }
 0x70f   :  { %v15912_v13 = vcombine.low %v6572_v49, %v6576_v36  ;;  %v6592_v24 = vld [vmem:[%s24476_s7 + $0x6e8] sm:$0xff]  ;;  %v6441_v49 = vld [vmem:[%s24476_s7 + $0x230] sm:$0xff] }
 0x710   :  { %11590 = vmatpush1.bf16.msra.mxu0 %v16040_v6  ;;  %v6588_v6 = vld [vmem:[%s24476_s7 + $0x6c8] sm:$0xff] }
 0x711   :  { %8052 = vmatpush1.bf16.msra.mxu1 %v15792_v17  ;;  %v6524_v17 = vld [vmem:[%s24476_s7 + $0x4c8] sm:$0xff]  ;;  %11591 = vmatprep.subr.bf16.mxu0 %v16049_v55 }
 0x712   :  { %8053 = vmatprep.subr.bf16.mxu1 %v15801_v58  ;;  %v16048_v58 = vcombine.low %v8374_v30, %v8378_v4  ;;  %v15865_v5 = vcombine.high %v6524_v17, %v6528_v8  ;;  %v15864_v62 = vcombine.low %v6524_v17, %v6528_v8  ;;  %v15929_v30 = vcombine.high %v6588_v6, %v6592_v24  ;;  %v6600_v4 = vld [vmem:[%s24476_s7 + $0x728] sm:$0xff] }
 0x713   :  { %v15928_v17 = vcombine.low %v6588_v6, %v6592_v24  ;;  %v6608_v55 = vld [vmem:[%s24476_s7 + $0x768] sm:$0xff] }
 0x714   :  { %11592 = vmatpush1.bf16.msra.mxu0 %v16048_v58  ;;  %v6604_v58 = vld [vmem:[%s24476_s7 + $0x748] sm:$0xff] }
 0x715   :  { %8054 = vmatpush1.bf16.msra.mxu1 %v15800_v19  ;;  %v6532_v19 = vld [vmem:[%s24476_s7 + $0x508] sm:$0xff]  ;;  %11593 = vmatprep.subr.bf16.mxu0 %v16057_v50 }
 0x716   :  { %8055 = vmatprep.subr.bf16.mxu1 %v15809_v9  ;;  %v16056_v9 = vcombine.low %v8382_v46, %v8386_v42  ;;  %v15873_v48 = vcombine.high %v6532_v19, %v6536_v23  ;;  %v15872_v0 = vcombine.low %v6532_v19, %v6536_v23  ;;  %v15945_v46 = vcombine.high %v6604_v58, %v6608_v55  ;;  %v6616_v42 = vld [vmem:[%s24476_s7 + $0x7a8] sm:$0xff] }
 0x717   :  { %v15944_v19 = vcombine.low %v6604_v58, %v6608_v55  ;;  %v6624_v50 = vld [vmem:[%s24476_s7 + $0x7e8] sm:$0xff]  ;;  %v6465_v58 = vld [vmem:[%s24476_s7 + $0x2f0] sm:$0xff] }
 0x718   :  { %11594 = vmatpush1.bf16.msra.mxu0 %v16056_v9  ;;  %v6620_v9 = vld [vmem:[%s24476_s7 + $0x7c8] sm:$0xff] }
 0x719   :  { %8056 = vmatpush1.bf16.msra.mxu1 %v15808_v61  ;;  %v6540_v61 = vld [vmem:[%s24476_s7 + $0x548] sm:$0xff]  ;;  %11595 = vmatprep.subr.bf16.mxu0 %v16065_v60  ;;  %v6385_v60 = vld [vmem:[%s24476_s7 + $0x70] sm:$0xff] }
 0x71a   :  { %8057 = vmatprep.subr.bf16.mxu1 %v15817_v59  ;;  %v16064_v59 = vcombine.low %v8390_v20, %v8394_v51  ;;  %v15881_v54 = vcombine.high %v6540_v61, %v6544_v40  ;;  %v15880_v27 = vcombine.low %v6540_v61, %v6544_v40  ;;  %v15961_v20 = vcombine.high %v6620_v9, %v6624_v50  ;;  %v6377_v51 = vld [vmem:[%s24476_s7 + $0x30] sm:$0xff] }
 0x71b   :  { %v15960_v61 = vcombine.low %v6620_v9, %v6624_v50  ;;  %v6481_v9 = vld [vmem:[%s24476_s7 + $0x370] sm:$0xff] }
 0x71c   :  { %11596 = vmatpush1.bf16.msra.mxu0 %v16064_v59  ;;  %v6381_v59 = vld [vmem:[%s24476_s7 + $0x50] sm:$0xff] }
 0x71d   :  { %8058 = vmatpush1.bf16.msra.mxu1 %v15816_v15  ;;  %v6548_v15 = vld [vmem:[%s24476_s7 + $0x588] sm:$0xff]  ;;  %11597 = vmatprep.subr.bf16.mxu0 %v16073_v41  ;;  %v6401_v41 = vld [vmem:[%s24476_s7 + $0xf0] sm:$0xff] }
 0x71e   :  { %8059 = vmatprep.subr.bf16.mxu1 %v15825_v32  ;;  %v16072_v32 = vcombine.low %v8398_v57, %v8402_v44  ;;  %v15889_v3 = vcombine.high %v6548_v15, %v6552_v12  ;;  %v15888_v45 = vcombine.low %v6548_v15, %v6552_v12  ;;  %v15723_v57 = vcombine.high %v6381_v59, %v6385_v60  ;;  %v6393_v44 = vld [vmem:[%s24476_s7 + $0xb0] sm:$0xff] }
 0x71f   :  { %v15722_v15 = vcombine.low %v6381_v59, %v6385_v60  ;;  %v6497_v59 = vld [vmem:[%s24476_s7 + $0x3f0] sm:$0xff] }
 0x720   :  { %11598 = vmatpush1.bf16.msra.mxu0 %v16072_v32  ;;  %v6397_v32 = vld [vmem:[%s24476_s7 + $0xd0] sm:$0xff] }
 0x721   :  { %8060 = vmatpush1.bf16.msra.mxu1 %v15824_v21  ;;  %v6556_v21 = vld [vmem:[%s24476_s7 + $0x5c8] sm:$0xff]  ;;  %11599 = vmatprep.subr.bf16.mxu0 %v16081_v53 }
 0x722   :  { %8061 = vmatprep.subr.bf16.mxu1 %v15833_v18  ;;  %v16080_v18 = vcombine.low %v8406_v37, %v8410_v1  ;;  %v15897_v28 = vcombine.high %v6556_v21, %v6560_v43  ;;  %v15896_v52 = vcombine.low %v6556_v21, %v6560_v43  ;;  %v6405_v37 = vld [vmem:[%s24476_s7 + $0x110] sm:$0xff]  ;;  %v15738_v1 = vcombine.low %v6397_v32, %v6401_v41 }
 0x723   :  { %v6413_v43 = vld [vmem:[%s24476_s7 + $0x150] sm:$0xff] }
 0x724   :  { %11600 = vmatpush1.bf16.msra.mxu0 %v16080_v18  ;;  %v6417_v18 = vld [vmem:[%s24476_s7 + $0x170] sm:$0xff] }
 0x725   :  { %8062 = vmatpush1.bf16.msra.mxu1 %v15832_v2  ;;  %v6564_v2 = vld [vmem:[%s24476_s7 + $0x608] sm:$0xff]  ;;  %11601 = vmatprep.subr.bf16.mxu0 %v16089_v63 }
 0x726   :  { %8072 = vmatprep.subr.bf16.mxu1 %v15841_v38  ;;  %v16088_v38 = vcombine.low %v8414_v34, %v8418_v25  ;;  %v15905_v22 = vcombine.high %v6564_v2, %v6568_v11  ;;  %v6421_v34 = vld [vmem:[%s24476_s7 + $0x190] sm:$0xff]  ;;  %v15754_v25 = vcombine.low %v6413_v43, %v6417_v18 }
 0x728   :  { %8064 = vmatmul.mubr.bf16.vlgmr.msra.gmra.mrb[4].mxu1 %v21894_v33  ;;  %11602 = vmatpush1.bf16.msra.mxu0 %v16088_v38  ;;  %v6433_v38 = vld [vmem:[%s24476_s7 + $0x1f0] sm:$0xff] }
 0x729   :  { %8073 = vmatpush1.bf16.msra.mxu1 %v15840_v14  ;;  %8104 = vmatprep.mubr.bf16.mxu1 %v21957_v56  ;;  %v15904_v14 = vcombine.low %v6564_v2, %v6568_v11  ;;  %v6429_v11 = vld [vmem:[%s24476_s7 + $0x1d0] sm:$0xff] }
 0x72a   :  { %8074 = vmatprep.subr.bf16.mxu1 %v15849_v26  ;;  %v6580_v26 = vld [vmem:[%s24476_s7 + $0x688] sm:$0xff]  ;;  %v15770_v36 = vcombine.low %v6429_v11, %v6433_v38 }
 0x72b   :  { %v15921_v39 = vcombine.high %v6580_v26, %v6584_v35 }
 0x72d   :  { %8075 = vmatpush1.bf16.msra.mxu1 %v15848_v16  ;;  %v15920_v16 = vcombine.low %v6580_v26, %v6584_v35  ;;  %v22442_v26 = vld [vmem:[%s24478_s9 + $0x428] sm:$0xff]  ;;  %v6445_v35 = vld [vmem:[%s24476_s7 + $0x250] sm:$0xff] }
 0x72e   :  { %8076 = vmatprep.subr.bf16.mxu1 %v15857_v31  ;;  %v6596_v31 = vld [vmem:[%s24476_s7 + $0x708] sm:$0xff] }
 0x72f   :  { %v15937_v8 = vcombine.high %v6596_v31, %v6600_v4 }
 0x731   :  { %8077 = vmatpush1.bf16.msra.mxu1 %v15856_v29  ;;  %v15936_v29 = vcombine.low %v6596_v31, %v6600_v4  ;;  %v6457_v31 = vld [vmem:[%s24476_s7 + $0x2b0] sm:$0xff] }
 0x732   :  { %8078 = vmatprep.subr.bf16.mxu1 %v15865_v5  ;;  %v6612_v5 = vld [vmem:[%s24476_s7 + $0x788] sm:$0xff] }
 0x733   :  { %v15953_v23 = vcombine.high %v6612_v5, %v6616_v42 }
 0x735   :  { %8079 = vmatpush1.bf16.msra.mxu1 %v15864_v62  ;;  %v15952_v62 = vcombine.low %v6612_v5, %v6616_v42  ;;  %v6473_v5 = vld [vmem:[%s24476_s7 + $0x330] sm:$0xff] }
 0x736   :  { %8080 = vmatprep.subr.bf16.mxu1 %v15873_v48  ;;  %v6373_v48 = vld [vmem:[%s24476_s7 + $0x10] sm:$0xff] }
 0x737   :  { %v15715_v40 = vcombine.high %v6373_v48, %v6377_v51 }
 0x739   :  { %8081 = vmatpush1.bf16.msra.mxu1 %v15872_v0  ;;  %v15714_v0 = vcombine.low %v6373_v48, %v6377_v51  ;;  %v6489_v48 = vld [vmem:[%s24476_s7 + $0x3b0] sm:$0xff] }
 0x73a   :  { %8082 = vmatprep.subr.bf16.mxu1 %v15881_v54  ;;  %v6389_v54 = vld [vmem:[%s24476_s7 + $0x90] sm:$0xff] }
 0x73b   :  { %v15731_v12 = vcombine.high %v6389_v54, %v6393_v44 }
 0x73d   :  { %8083 = vmatpush1.bf16.msra.mxu1 %v15880_v27  ;;  %v15730_v27 = vcombine.low %v6389_v54, %v6393_v44  ;;  %v6505_v54 = vld [vmem:[%s24476_s7 + $0x430] sm:$0xff] }
 0x73e   :  { %8084 = vmatprep.subr.bf16.mxu1 %v15889_v3  ;;  %v15739_v3 = vcombine.high %v6397_v32, %v6401_v41  ;;  %v6513_v32 = vld [vmem:[%s24476_s7 + $0x470] sm:$0xff] }
 0x741   :  { %8085 = vmatpush1.bf16.msra.mxu1 %v15888_v45  ;;  %v15755_v45 = vcombine.high %v6413_v43, %v6417_v18  ;;  %v6529_v43 = vld [vmem:[%s24476_s7 + $0x4f0] sm:$0xff]  ;;  %v6629_v18 = vlaneseq }
 0x742   :  { %8086 = vmatprep.subr.bf16.mxu1 %v15897_v28  ;;  %v6425_v28 = vld [vmem:[%s24476_s7 + $0x1b0] sm:$0xff] }
 0x743   :  { %v15763_v2 = vcombine.high %v6421_v34, %v6425_v28  ;;  %v15762_v63 = vcombine.low %v6421_v34, %v6425_v28  ;;  %v22522_v34 = vshrl.u32 %v6629_v18, 7  ;;  %v6593_v18 = vld [vmem:[%s24476_s7 + $0x6f0] sm:$0xff] }
 0x745   :  { %8087 = vmatpush1.bf16.msra.mxu1 %v15896_v52  ;;  %v15771_v52 = vcombine.high %v6429_v11, %v6433_v38  ;;  %v6545_v11 = vld [vmem:[%s24476_s7 + $0x570] sm:$0xff]  ;;  %v22531_v38 = vsub.s32 0, %v22522_v34 }
 0x746   :  { %8088 = vmatprep.subr.bf16.mxu1 %v15905_v22  ;;  %v6437_v22 = vld [vmem:[%s24476_s7 + $0x210] sm:$0xff] }
 0x747   :  { %v15778_v24 = vcombine.low %v6437_v22, %v6441_v49 }
 0x749   :  { %8089 = vmatpush1.bf16.msra.mxu1 %v15904_v14  ;;  %v22437_v14 = vld [vmem:[%s24478_s9 + $0x408] sm:$0xff] }
 0x74a   :  { %8090 = vmatprep.subr.bf16.mxu1 %v15913_v47  ;;  %v15779_v47 = vcombine.high %v6437_v22, %v6441_v49  ;;  %v16097_v6 = vcombine.high %v22437_v14, %v22442_v26  ;;  %v22539_v22 = vsub.s32 1, %v22522_v34 }
 0x74c   :  { %11612 = vmatprep.subr.bf16.mxu0 %v16097_v6 }
 0x74d   :  { %8091 = vmatpush1.bf16.msra.mxu1 %v15912_v13  ;;  %v6449_v13 = vld [vmem:[%s24476_s7 + $0x270] sm:$0xff] }
 0x74e   :  { %8092 = vmatprep.subr.bf16.mxu1 %v15921_v39  ;;  %v16096_v39 = vcombine.low %v22437_v14, %v22442_v26  ;;  %v15786_v4 = vcombine.low %v6445_v35, %v6449_v13  ;;  %v8450_v14 = vld [vmem:[%s24478_s9 + $0x4e8] sm:$0xff] }
 0x751   :  { %8093 = vmatpush1.bf16.msra.mxu1 %v15920_v16  ;;  %v15787_v16 = vcombine.high %v6445_v35, %v6449_v13 }
 0x752   :  { %8094 = vmatprep.subr.bf16.mxu1 %v15929_v30  ;;  %v6453_v30 = vld [vmem:[%s24476_s7 + $0x290] sm:$0xff] }
 0x753   :  { %v15794_v55 = vcombine.low %v6453_v30, %v6457_v31 }
 0x755   :  { %8095 = vmatpush1.bf16.msra.mxu1 %v15928_v17  ;;  %v15795_v17 = vcombine.high %v6453_v30, %v6457_v31  ;;  %v6557_v31 = vld [vmem:[%s24476_s7 + $0x5d0] sm:$0xff] }
 0x756   :  { %8096 = vmatprep.subr.bf16.mxu1 %v15937_v8  ;;  %v6461_v8 = vld [vmem:[%s24476_s7 + $0x2d0] sm:$0xff] }
 0x757   :  { %v15802_v42 = vcombine.low %v6461_v8, %v6465_v58 }
 0x759   :  { %8097 = vmatpush1.bf16.msra.mxu1 %v15936_v29  ;;  %v15803_v29 = vcombine.high %v6461_v8, %v6465_v58 }
 0x75a   :  { %8098 = vmatprep.subr.bf16.mxu1 %v15945_v46  ;;  %v6469_v46 = vld [vmem:[%s24476_s7 + $0x310] sm:$0xff] }
 0x75b   :  { %v15810_v50 = vcombine.low %v6469_v46, %v6473_v5 }
 0x75d   :  { %8099 = vmatpush1.bf16.msra.mxu1 %v15944_v19  ;;  %v15811_v19 = vcombine.high %v6469_v46, %v6473_v5 }
 0x75e   :  { %8100 = vmatprep.subr.bf16.mxu1 %v15953_v23  ;;  %v6477_v23 = vld [vmem:[%s24476_s7 + $0x350] sm:$0xff] }
 0x75f   :  { %v15818_v51 = vcombine.low %v6477_v23, %v6481_v9 }
 0x761   :  { %8101 = vmatpush1.bf16.msra.mxu1 %v15952_v62  ;;  %v15819_v62 = vcombine.high %v6477_v23, %v6481_v9 }
 0x762   :  { %8102 = vmatprep.subr.bf16.mxu1 %v15961_v20  ;;  %v6485_v20 = vld [vmem:[%s24476_s7 + $0x390] sm:$0xff] }
 0x763   :  { %v15826_v60 = vcombine.low %v6485_v20, %v6489_v48 }
 0x765   :  { %8103 = vmatpush1.bf16.msra.mxu1 %v15960_v61  ;;  %v15827_v61 = vcombine.high %v6485_v20, %v6489_v48  ;;  %v6569_v20 = vld [vmem:[%s24476_s7 + $0x630] sm:$0xff]  ;;  %v8430_v48 = vld [vmem:[%s24478_s9 + $0x448] sm:$0xff] }
 0x766   :  { %8113 = vmatprep.subr.bf16.mxu1 %v15715_v40  ;;  %v6493_v40 = vld [vmem:[%s24476_s7 + $0x3d0] sm:$0xff] }
 0x767   :  { %v15834_v44 = vcombine.low %v6493_v40, %v6497_v59 }
 0x768   :  { %8105 = vmatmul.mubr.bf16.vlgmr.msra.gmra.mrb[4].mxu1 %v22095_v10 }
 0x769   :  { %8114 = vmatpush1.bf16.msra.mxu1 %v15714_v0  ;;  %8145 = vmatprep.mubr.bf16.mxu1 %v21891_v7  ;;  %v6409_v7 = vld [vmem:[%s24476_s7 + $0x130] sm:$0xff]  ;;  %v15835_v0 = vcombine.high %v6493_v40, %v6497_v59 }
 0x76a   :  { %8115 = vmatprep.subr.bf16.mxu1 %v15723_v57  ;;  %v15747_v21 = vcombine.high %v6405_v37, %v6409_v7  ;;  %v15746_v53 = vcombine.low %v6405_v37, %v6409_v7  ;;  %v6501_v57 = vld [vmem:[%s24476_s7 + $0x410] sm:$0xff] }
 0x76b   :  { %v15842_v41 = vcombine.low %v6501_v57, %v6505_v54  ;;  %v6521_v37 = vld [vmem:[%s24476_s7 + $0x4b0] sm:$0xff] }
 0x76d   :  { %8116 = vmatpush1.bf16.msra.mxu1 %v15722_v15  ;;  %v15843_v15 = vcombine.high %v6501_v57, %v6505_v54  ;;  %v6577_v54 = vld [vmem:[%s24476_s7 + $0x670] sm:$0xff] }
 0x76e   :  { %8117 = vmatprep.subr.bf16.mxu1 %v15731_v12  ;;  %v6509_v12 = vld [vmem:[%s24476_s7 + $0x450] sm:$0xff] }
 0x76f   :  { %v15850_v7 = vcombine.low %v6509_v12, %v6513_v32 }
 0x771   :  { %8118 = vmatpush1.bf16.msra.mxu1 %v15730_v27  ;;  %v15851_v27 = vcombine.high %v6509_v12, %v6513_v32 }
 0x772   :  { %8119 = vmatprep.subr.bf16.mxu1 %v15739_v3  ;;  %v6517_v3 = vld [vmem:[%s24476_s7 + $0x490] sm:$0xff] }
 0x775   :  { %8120 = vmatpush1.bf16.msra.mxu1 %v15738_v1  ;;  %v15859_v1 = vcombine.high %v6517_v3, %v6521_v37 }
 0x776   :  { %8121 = vmatprep.subr.bf16.mxu1 %v15747_v21  ;;  %v6525_v21 = vld [vmem:[%s24476_s7 + $0x4d0] sm:$0xff] }
 0x777   :  { %v15866_v28 = vcombine.low %v6525_v21, %v6529_v43 }
 0x779   :  { %8122 = vmatpush1.bf16.msra.mxu1 %v15746_v53  ;;  %v15858_v53 = vcombine.low %v6517_v3, %v6521_v37  ;;  %v6585_v37 = vld [vmem:[%s24476_s7 + $0x6b0] sm:$0xff] }
 0x77a   :  { %8123 = vmatprep.subr.bf16.mxu1 %v15755_v45  ;;  %v15867_v45 = vcombine.high %v6525_v21, %v6529_v43  ;;  %v6589_v21 = vld [vmem:[%s24476_s7 + $0x6d0] sm:$0xff] }
 0x77d   :  { %8124 = vmatpush1.bf16.msra.mxu1 %v15754_v25 }
 0x77e   :  { %8125 = vmatprep.subr.bf16.mxu1 %v15763_v2  ;;  %v6541_v2 = vld [vmem:[%s24476_s7 + $0x550] sm:$0xff] }
 0x77f   :  { %v15883_v49 = vcombine.high %v6541_v2, %v6545_v11  ;;  %v15882_v6 = vcombine.low %v6541_v2, %v6545_v11  ;;  %v6601_v11 = vld [vmem:[%s24476_s7 + $0x730] sm:$0xff] }
 0x781   :  { %8126 = vmatpush1.bf16.msra.mxu1 %v15762_v63 }
 0x782   :  { %8127 = vmatprep.subr.bf16.mxu1 %v15771_v52  ;;  %v22536_v52 = vld [vmem:[%s24477_s8] sm:$0xff] }
 0x783   :  { %v6632_v35 = vrot.slane %v22536_v52, %v22531_v38  ;;  %v6636_v13 = vrot.slane %v22536_v52, %v22539_v22 }
 0x785   :  { %8128 = vmatpush1.bf16.msra.mxu1 %v15770_v36  ;;  %v6549_v36 = vld [vmem:[%s24476_s7 + $0x590] sm:$0xff] }
 0x786   :  { %8129 = vmatprep.subr.bf16.mxu1 %v15779_v47  ;;  %v6553_v47 = vld [vmem:[%s24476_s7 + $0x5b0] sm:$0xff] }
 0x787   :  { %v15890_v5 = vcombine.low %v6549_v36, %v6553_v47 }
 0x789   :  { %8130 = vmatpush1.bf16.msra.mxu1 %v15778_v24  ;;  %v15891_v24 = vcombine.high %v6549_v36, %v6553_v47  ;;  %v15930_v36 = vcombine.low %v6589_v21, %v6593_v18 }
 0x78a   :  { %8131 = vmatprep.subr.bf16.mxu1 %v15787_v16 }
 0x78d   :  { %8132 = vmatpush1.bf16.msra.mxu1 %v15786_v4  ;;  %v6561_v4 = vld [vmem:[%s24476_s7 + $0x5f0] sm:$0xff] }
 0x78e   :  { %8133 = vmatprep.subr.bf16.mxu1 %v15795_v17  ;;  %v15899_v9 = vcombine.high %v6557_v31, %v6561_v4  ;;  %v15898_v40 = vcombine.low %v6557_v31, %v6561_v4  ;;  %v8474_v31 = vld [vmem:[%s24478_s9 + $0x5a8] sm:$0xff] }
 0x791   :  { %8134 = vmatpush1.bf16.msra.mxu1 %v15794_v55 }
 0x792   :  { %8135 = vmatprep.subr.bf16.mxu1 %v15803_v29 }
 0x795   :  { %8136 = vmatpush1.bf16.msra.mxu1 %v15802_v42 }
 0x796   :  { %8137 = vmatprep.subr.bf16.mxu1 %v15811_v19 }
 0x799   :  { %8138 = vmatpush1.bf16.msra.mxu1 %v15810_v50  ;;  %v6565_v50 = vld [vmem:[%s24476_s7 + $0x610] sm:$0xff] }
 0x79a   :  { %8139 = vmatprep.subr.bf16.mxu1 %v15819_v62  ;;  %v15906_v12 = vcombine.low %v6565_v50, %v6569_v20 }
 0x79d   :  { %8140 = vmatpush1.bf16.msra.mxu1 %v15818_v51  ;;  %v8434_v51 = vld [vmem:[%s24478_s9 + $0x468] sm:$0xff] }
 0x79e   :  { %8141 = vmatprep.subr.bf16.mxu1 %v15827_v61  ;;  %v16105_v57 = vcombine.high %v8430_v48, %v8434_v51  ;;  %v16104_v32 = vcombine.low %v8430_v48, %v8434_v51  ;;  %v8486_v48 = vld [vmem:[%s24478_s9 + $0x608] sm:$0xff] }
 0x79f   :  { %v8490_v51 = vld [vmem:[%s24478_s9 + $0x628] sm:$0xff] }
 0x7a1   :  { %8142 = vmatpush1.bf16.msra.mxu1 %v15826_v60  ;;  %v15907_v60 = vcombine.high %v6565_v50, %v6569_v20  ;;  %v6621_v50 = vld [vmem:[%s24476_s7 + $0x7d0] sm:$0xff] }
 0x7a2   :  { %8143 = vmatprep.subr.bf16.mxu1 %v15835_v0  ;;  %v6573_v0 = vld [vmem:[%s24476_s7 + $0x650] sm:$0xff] }
 0x7a3   :  { %v15914_v26 = vcombine.low %v6573_v0, %v6577_v54  ;;  %v6625_v20 = vld [vmem:[%s24476_s7 + $0x7f0] sm:$0xff] }
 0x7a5   :  { %8144 = vmatpush1.bf16.msra.mxu1 %v15834_v44  ;;  %v8438_v44 = vld [vmem:[%s24478_s9 + $0x488] sm:$0xff] }
 0x7a6   :  { %8154 = vmatprep.subr.bf16.mxu1 %v15843_v15  ;;  %v8442_v15 = vld [vmem:[%s24478_s9 + $0x4a8] sm:$0xff] }
 0x7a7   :  { %v16113_v3 = vcombine.high %v8438_v44, %v8442_v15 }
 0x7a8   :  { %8146 = vmatmul.mubr.bf16.vlgmr.msra.gmra.mrb[8].mxu1 %v21894_v33  ;;  %v6533_v33 = vld [vmem:[%s24476_s7 + $0x510] sm:$0xff] }
 0x7a9   :  { %8155 = vmatpush1.bf16.msra.mxu1 %v15842_v41  ;;  %8186 = vmatprep.mubr.bf16.mxu1 %v21957_v56  ;;  %v6537_v56 = vld [vmem:[%s24476_s7 + $0x530] sm:$0xff]  ;;  %v15915_v41 = vcombine.high %v6573_v0, %v6577_v54  ;;  %v15963_v0 = vcombine.high %v6621_v50, %v6625_v20  ;;  %v16161_v54 = vcombine.high %v8486_v48, %v8490_v51 }
 0x7aa   :  { %8156 = vmatprep.subr.bf16.mxu1 %v15851_v27  ;;  %v15875_v25 = vcombine.high %v6533_v33, %v6537_v56  ;;  %v15874_v63 = vcombine.low %v6533_v33, %v6537_v56  ;;  %v6581_v27 = vld [vmem:[%s24476_s7 + $0x690] sm:$0xff] }
 0x7ab   :  { %v15922_v33 = vcombine.low %v6581_v27, %v6585_v37 }
 0x7ad   :  { %8157 = vmatpush1.bf16.msra.mxu1 %v15850_v7  ;;  %v8446_v7 = vld [vmem:[%s24478_s9 + $0x4c8] sm:$0xff] }
 0x7ae   :  { %8158 = vmatprep.subr.bf16.mxu1 %v15859_v1  ;;  %v15923_v1 = vcombine.high %v6581_v27, %v6585_v37  ;;  %v16121_v43 = vcombine.high %v8446_v7, %v8450_v14  ;;  %v16120_v56 = vcombine.low %v8446_v7, %v8450_v14  ;;  %v8301_v37 = vld [vmem:[%s24478_s9 + $0x40] sm:$0xff]  ;;  %v8502_v14 = vld [vmem:[%s24478_s9 + $0x688] sm:$0xff] }
 0x7af   :  { %v8305_v7 = vld [vmem:[%s24478_s9 + $0x60] sm:$0xff] }
 0x7b1   :  { %8159 = vmatpush1.bf16.msra.mxu1 %v15858_v53  ;;  %v8454_v53 = vld [vmem:[%s24478_s9 + $0x508] sm:$0xff] }
 0x7b2   :  { %8160 = vmatprep.subr.bf16.mxu1 %v15867_v45  ;;  %v8458_v45 = vld [vmem:[%s24478_s9 + $0x528] sm:$0xff] }
 0x7b3   :  { %v16129_v2 = vcombine.high %v8454_v53, %v8458_v45  ;;  %v16128_v47 = vcombine.low %v8454_v53, %v8458_v45  ;;  %v8510_v45 = vld [vmem:[%s24478_s9 + $0x6c8] sm:$0xff] }
 0x7b5   :  { %8161 = vmatpush1.bf16.msra.mxu1 %v15866_v28  ;;  %v15931_v28 = vcombine.high %v6589_v21, %v6593_v18  ;;  %v8313_v18 = vld [vmem:[%s24478_s9 + $0xa0] sm:$0xff] }
 0x7b6   :  { %8162 = vmatprep.subr.bf16.mxu1 %v15875_v25  ;;  %v6597_v25 = vld [vmem:[%s24476_s7 + $0x710] sm:$0xff] }
 0x7b7   :  { %v15938_v4 = vcombine.low %v6597_v25, %v6601_v11 }
 0x7b9   :  { %8163 = vmatpush1.bf16.msra.mxu1 %v15874_v63  ;;  %v8462_v63 = vld [vmem:[%s24478_s9 + $0x548] sm:$0xff] }
 0x7ba   :  { %8164 = vmatprep.subr.bf16.mxu1 %v15883_v49  ;;  %v8466_v49 = vld [vmem:[%s24478_s9 + $0x568] sm:$0xff] }
 0x7bb   :  { %v8024_v16 = vpop.f32.mrb[0].mxu1  ;;  %v22551_v30 = vpop.f32.mrb[16].mxu0 }
 0x7bc   :  { %v17779_v17 = vadd.f32 %v8024_v16, %v6632_v35  ;;  %v8026_v8 = vpop.f32.mrb[1].mxu1  ;;  %v22559_v58 = vpop.f32.mrb[17].mxu0  ;;  %v15939_v35 = vcombine.high %v6597_v25, %v6601_v11  ;;  %v8470_v16 = vld [vmem:[%s24478_s9 + $0x588] sm:$0xff] }
 0x7bd   :  { %v17780_v55 = vadd.f32 %v8026_v8, %v6636_v13  ;;  %v8028_v29 = vpop.f32.mrb[2].mxu1  ;;  %8165 = vmatpush1.bf16.msra.mxu1 %v15882_v6  ;;  %v8274_v46 = vpop.f32.mrb[18].mxu0  ;;  %v6605_v13 = vld [vmem:[%s24476_s7 + $0x750] sm:$0xff]  ;;  %v16137_v6 = vcombine.high %v8462_v63, %v8466_v49 }
 0x7be   :  { %v8277_v42 = vmax.f32 %v17779_v17, 0.0  ;;  %v8029_v19 = vpop.f32.mrb[3].mxu1  ;;  %v8275_v23 = vpop.f32.mrb[19].mxu0  ;;  %8166 = vmatprep.subr.bf16.mxu1 %v15891_v24  ;;  %v6609_v24 = vld [vmem:[%s24476_s7 + $0x770] sm:$0xff]  ;;  %v16136_v17 = vcombine.low %v8462_v63, %v8466_v49  ;;  %v16145_v29 = vcombine.high %v8470_v16, %v8474_v31  ;;  %v8317_v63 = vld [vmem:[%s24478_s9 + $0xc0] sm:$0xff] }
 0x7bf   :  { %v8278_v62 = vmax.f32 %v17780_v55, 0.0  ;;  %v15947_v8 = vcombine.high %v6605_v13, %v6609_v24  ;;  %v6613_v55 = vld [vmem:[%s24476_s7 + $0x790] sm:$0xff]  ;;  %v15946_v19 = vcombine.low %v6605_v13, %v6609_v24  ;;  %v16144_v23 = vcombine.low %v8470_v16, %v8474_v31  ;;  %v8321_v49 = vld [vmem:[%s24478_s9 + $0xe0] sm:$0xff] }
 0x7c0   :  { %v22575_v59 = vpack.c.bf16 %v8277_v42, %v8277_v42  ;;  %v6617_v46 = vld [vmem:[%s24476_s7 + $0x7b0] sm:$0xff]  ;;  %v8482_v42 = vld [vmem:[%s24478_s9 + $0x5e8] sm:$0xff]  ;;  %v8325_v16 = vld [vmem:[%s24478_s9 + $0x100] sm:$0xff] }
 0x7c1   :  { %v22573_v61 = vpack.c.bf16 %v8278_v62, %v8278_v62  ;;  %8167 = vmatpush1.bf16.msra.mxu1 %v15890_v5  ;;  %v8478_v5 = vld [vmem:[%s24478_s9 + $0x5c8] sm:$0xff]  ;;  %v8329_v31 = vld [vmem:[%s24478_s9 + $0x120] sm:$0xff] }
 0x7c2   :  { %8168 = vmatprep.subr.bf16.mxu1 %v15899_v9  ;;  %v15955_v9 = vcombine.high %v6613_v55, %v6617_v46  ;;  %v16153_v62 = vcombine.high %v8478_v5, %v8482_v42 }
 0x7c3   :  { %11603 = vmatprep.mubr.bf16.mxu0 %v22573_v61 }
 0x7c4   :  { %11604 = vmatmul.mubr.bf16.vlgmr.msra.gmra.mrb[20].mxu0 %v22575_v59 }
 0x7c5   :  { %8169 = vmatpush1.bf16.msra.mxu1 %v15898_v40  ;;  %11613 = vmatpush1.bf16.msra.mxu0 %v16096_v39  ;;  %v16112_v39 = vcombine.low %v8438_v44, %v8442_v15  ;;  %v15954_v40 = vcombine.low %v6613_v55, %v6617_v46  ;;  %v8297_v44 = vld [vmem:[%s24478_s9 + $0x20] sm:$0xff]  ;;  %v8494_v15 = vld [vmem:[%s24478_s9 + $0x648] sm:$0xff]  ;;  %v15990_v55 = vcombine.low %v8317_v63, %v8321_v49 }
 0x7c6   :  { %8170 = vmatprep.subr.bf16.mxu1 %v15907_v60  ;;  %11614 = vmatprep.subr.bf16.mxu0 %v16105_v57  ;;  %v16152_v60 = vcombine.low %v8478_v5, %v8482_v42  ;;  %v8293_v57 = vld [vmem:[%s24478_s9] sm:$0xff] }
 0x7c7   :  { %v15967_v27 = vcombine.high %v8293_v57, %v8297_v44  ;;  %v8333_v5 = vld [vmem:[%s24478_s9 + $0x140] sm:$0xff] }
 0x7c8   :  { %v8337_v42 = vld [vmem:[%s24478_s9 + $0x160] sm:$0xff] }
 0x7c9   :  { %8171 = vmatpush1.bf16.msra.mxu1 %v15906_v12  ;;  %11615 = vmatpush1.bf16.msra.mxu0 %v16104_v32  ;;  %v8498_v12 = vld [vmem:[%s24478_s9 + $0x668] sm:$0xff]  ;;  %v15962_v32 = vcombine.low %v6621_v50, %v6625_v20  ;;  %v15998_v50 = vcombine.low %v8325_v16, %v8329_v31 }
 0x7ca   :  { %8172 = vmatprep.subr.bf16.mxu1 %v15915_v41  ;;  %11616 = vmatprep.subr.bf16.mxu0 %v16113_v3  ;;  %v16160_v41 = vcombine.low %v8486_v48, %v8490_v51  ;;  %v16169_v3 = vcombine.high %v8494_v15, %v8498_v12  ;;  %v16168_v21 = vcombine.low %v8494_v15, %v8498_v12  ;;  %v8341_v48 = vld [vmem:[%s24478_s9 + $0x180] sm:$0xff] }
 0x7cb   :  { %v8345_v51 = vld [vmem:[%s24478_s9 + $0x1a0] sm:$0xff] }
 0x7cc   :  { %v8349_v15 = vld [vmem:[%s24478_s9 + $0x1c0] sm:$0xff] }
 0x7cd   :  { %8173 = vmatpush1.bf16.msra.mxu1 %v15914_v26  ;;  %11617 = vmatpush1.bf16.msra.mxu0 %v16112_v39  ;;  %v8506_v26 = vld [vmem:[%s24478_s9 + $0x6a8] sm:$0xff]  ;;  %v15966_v39 = vcombine.low %v8293_v57, %v8297_v44  ;;  %v16006_v57 = vcombine.low %v8333_v5, %v8337_v42  ;;  %v8353_v12 = vld [vmem:[%s24478_s9 + $0x1e0] sm:$0xff] }
 0x7ce   :  { %8174 = vmatprep.subr.bf16.mxu1 %v15923_v1  ;;  %11618 = vmatprep.subr.bf16.mxu0 %v16121_v43  ;;  %v15975_v1 = vcombine.high %v8301_v37, %v8305_v7  ;;  %v8309_v43 = vld [vmem:[%s24478_s9 + $0x80] sm:$0xff]  ;;  %v16177_v53 = vcombine.high %v8502_v14, %v8506_v26 }
 0x7cf   :  { %v15983_v25 = vcombine.high %v8309_v43, %v8313_v18  ;;  %v15982_v13 = vcombine.low %v8309_v43, %v8313_v18 }
 0x7d1   :  { %8175 = vmatpush1.bf16.msra.mxu1 %v15922_v33  ;;  %11619 = vmatpush1.bf16.msra.mxu0 %v16120_v56  ;;  %v8514_v33 = vld [vmem:[%s24478_s9 + $0x6e8] sm:$0xff] }
 0x7d2   :  { %8176 = vmatprep.subr.bf16.mxu1 %v15931_v28  ;;  %11620 = vmatprep.subr.bf16.mxu0 %v16129_v2  ;;  %v22706_v56 = vld [vmem:[%s24478_s9 + $0x808] sm:$0xff]  ;;  %v15974_v28 = vcombine.low %v8301_v37, %v8305_v7  ;;  %v16176_v2 = vcombine.low %v8502_v14, %v8506_v26  ;;  %v16184_v24 = vcombine.low %v8510_v45, %v8514_v33  ;;  %v8357_v37 = vld [vmem:[%s24478_s9 + $0x200] sm:$0xff] }
 0x7d3   :  { %v8361_v7 = vld [vmem:[%s24478_s9 + $0x220] sm:$0xff]  ;;  %v16022_v26 = vcombine.low %v8349_v15, %v8353_v12 }
 0x7d4   :  { %v16030_v43 = vcombine.low %v8357_v37, %v8361_v7 }
 0x7d5   :  { %8177 = vmatpush1.bf16.msra.mxu1 %v15930_v36  ;;  %11621 = vmatpush1.bf16.msra.mxu0 %v16128_v47  ;;  %v16185_v36 = vcombine.high %v8510_v45, %v8514_v33  ;;  %v8518_v47 = vld [vmem:[%s24478_s9 + $0x708] sm:$0xff]  ;;  %v8377_v45 = vld [vmem:[%s24478_s9 + $0x2a0] sm:$0xff] }
 0x7d6   :  { %8178 = vmatprep.subr.bf16.mxu1 %v15939_v35  ;;  %11622 = vmatprep.subr.bf16.mxu0 %v16137_v6  ;;  %v8522_v35 = vld [vmem:[%s24478_s9 + $0x728] sm:$0xff]  ;;  %v15991_v6 = vcombine.high %v8317_v63, %v8321_v49 }
 0x7d7   :  { %v16192_v46 = vcombine.low %v8518_v47, %v8522_v35 }
 0x7d9   :  { %8179 = vmatpush1.bf16.msra.mxu1 %v15938_v4  ;;  %11623 = vmatpush1.bf16.msra.mxu0 %v16136_v17  ;;  %v16193_v4 = vcombine.high %v8518_v47, %v8522_v35  ;;  %v8526_v17 = vld [vmem:[%s24478_s9 + $0x748] sm:$0xff]  ;;  %v8393_v47 = vld [vmem:[%s24478_s9 + $0x320] sm:$0xff] }
 0x7da   :  { %8180 = vmatprep.subr.bf16.mxu1 %v15947_v8  ;;  %11624 = vmatprep.subr.bf16.mxu0 %v16145_v29  ;;  %v8530_v8 = vld [vmem:[%s24478_s9 + $0x768] sm:$0xff]  ;;  %v15999_v29 = vcombine.high %v8325_v16, %v8329_v31 }
 0x7db   :  { %v16200_v20 = vcombine.low %v8526_v17, %v8530_v8 }
 0x7dd   :  { %8181 = vmatpush1.bf16.msra.mxu1 %v15946_v19  ;;  %11625 = vmatpush1.bf16.msra.mxu0 %v16144_v23  ;;  %v16201_v19 = vcombine.high %v8526_v17, %v8530_v8  ;;  %v8534_v23 = vld [vmem:[%s24478_s9 + $0x788] sm:$0xff]  ;;  %v8409_v17 = vld [vmem:[%s24478_s9 + $0x3a0] sm:$0xff] }
 0x7de   :  { %8182 = vmatprep.subr.bf16.mxu1 %v15955_v9  ;;  %11626 = vmatprep.subr.bf16.mxu0 %v16153_v62  ;;  %v8538_v9 = vld [vmem:[%s24478_s9 + $0x7a8] sm:$0xff]  ;;  %v16007_v62 = vcombine.high %v8333_v5, %v8337_v42 }
 0x7df   :  { %v16208_v44 = vcombine.low %v8534_v23, %v8538_v9 }
 0x7e1   :  { %8183 = vmatpush1.bf16.msra.mxu1 %v15954_v40  ;;  %11627 = vmatpush1.bf16.msra.mxu0 %v16152_v60  ;;  %v16209_v40 = vcombine.high %v8534_v23, %v8538_v9  ;;  %v8542_v60 = vld [vmem:[%s24478_s9 + $0x7c8] sm:$0xff]  ;;  %v8425_v23 = vld [vmem:[%s24478_s9 + $0x420] sm:$0xff] }
 0x7e2   :  { %8184 = vmatprep.subr.bf16.mxu1 %v15963_v0  ;;  %11628 = vmatprep.subr.bf16.mxu0 %v16161_v54  ;;  %v8546_v0 = vld [vmem:[%s24478_s9 + $0x7e8] sm:$0xff]  ;;  %v16015_v54 = vcombine.high %v8341_v48, %v8345_v51 }
 0x7e5   :  { %8185 = vmatpush1.bf16.msra.mxu1 %v15962_v32  ;;  %11629 = vmatpush1.bf16.msra.mxu0 %v16160_v41  ;;  %v16217_v32 = vcombine.high %v8542_v60, %v8546_v0  ;;  %v16014_v41 = vcombine.low %v8341_v48, %v8345_v51 }
 0x7e6   :  { %11407 = vmatprep.subr.bf16.mxu1 %v15967_v27  ;;  %11630 = vmatprep.subr.bf16.mxu0 %v16169_v3  ;;  %v16023_v27 = vcombine.high %v8349_v15, %v8353_v12  ;;  %v16216_v3 = vcombine.low %v8542_v60, %v8546_v0  ;;  %v8441_v60 = vld [vmem:[%s24478_s9 + $0x4a0] sm:$0xff] }
 0x7e8   :  { %8187 = vmatmul.mubr.bf16.vlgmr.msra.gmra.mrb[8].mxu1 %v22095_v10  ;;  %v22712_v10 = vld [vmem:[%s24478_s9 + $0x828] sm:$0xff] }
 0x7e9   :  { %11408 = vmatpush1.bf16.msra.mxu1 %v15966_v39  ;;  %11439 = vmatprep.mubr.bf16.mxu1 %v22573_v61  ;;  %v16224_v11 = vcombine.low %v22706_v56, %v22712_v10  ;;  %v16225_v14 = vcombine.high %v22706_v56, %v22712_v10  ;;  %v16031_v39 = vcombine.high %v8357_v37, %v8361_v7  ;;  %v8461_v37 = vld [vmem:[%s24478_s9 + $0x540] sm:$0xff]  ;;  %v8578_v56 = vld [vmem:[%s24478_s9 + $0x8e8] sm:$0xff] }
 0x7ea   :  { %11409 = vmatprep.subr.bf16.mxu1 %v15975_v1  ;;  %11631 = vmatpush1.bf16.msra.mxu0 %v16168_v21  ;;  %v8365_v1 = vld [vmem:[%s24478_s9 + $0x240] sm:$0xff] }
 0x7eb   :  { %11632 = vmatprep.subr.bf16.mxu0 %v16177_v53  ;;  %v8369_v21 = vld [vmem:[%s24478_s9 + $0x260] sm:$0xff] }
 0x7ec   :  { %v16039_v18 = vcombine.high %v8365_v1, %v8369_v21  ;;  %v8373_v53 = vld [vmem:[%s24478_s9 + $0x280] sm:$0xff]  ;;  %v16038_v33 = vcombine.low %v8365_v1, %v8369_v21 }
 0x7ed   :  { %11410 = vmatpush1.bf16.msra.mxu1 %v15974_v28  ;;  %v16047_v28 = vcombine.high %v8373_v53, %v8377_v45  ;;  %v16046_v63 = vcombine.low %v8373_v53, %v8377_v45  ;;  %v8465_v7 = vld [vmem:[%s24478_s9 + $0x560] sm:$0xff] }
 0x7ee   :  { %11411 = vmatprep.subr.bf16.mxu1 %v15983_v25  ;;  %11633 = vmatpush1.bf16.msra.mxu0 %v16176_v2  ;;  %v8381_v25 = vld [vmem:[%s24478_s9 + $0x2c0] sm:$0xff]  ;;  %v16135_v1 = vcombine.high %v8461_v37, %v8465_v7  ;;  %v16134_v45 = vcombine.low %v8461_v37, %v8465_v7 }
 0x7ef   :  { %11634 = vmatprep.subr.bf16.mxu0 %v16185_v36  ;;  %v8385_v2 = vld [vmem:[%s24478_s9 + $0x2e0] sm:$0xff] }
 0x7f0   :  { %v16055_v49 = vcombine.high %v8381_v25, %v8385_v2  ;;  %v8389_v36 = vld [vmem:[%s24478_s9 + $0x300] sm:$0xff]  ;;  %v16054_v35 = vcombine.low %v8381_v25, %v8385_v2 }
 0x7f1   :  { %11412 = vmatpush1.bf16.msra.mxu1 %v15982_v13  ;;  %v16063_v13 = vcombine.high %v8389_v36, %v8393_v47  ;;  %v16062_v16 = vcombine.low %v8389_v36, %v8393_v47  ;;  %v8469_v21 = vld [vmem:[%s24478_s9 + $0x580] sm:$0xff] }
 0x7f2   :  { %11413 = vmatprep.subr.bf16.mxu1 %v15991_v6  ;;  %11635 = vmatpush1.bf16.msra.mxu0 %v16184_v24  ;;  %v8397_v6 = vld [vmem:[%s24478_s9 + $0x340] sm:$0xff] }
 0x7f3   :  { %11636 = vmatprep.subr.bf16.mxu0 %v16193_v4  ;;  %v8401_v24 = vld [vmem:[%s24478_s9 + $0x360] sm:$0xff] }
 0x7f4   :  { %v16071_v31 = vcombine.high %v8397_v6, %v8401_v24  ;;  %v8405_v4 = vld [vmem:[%s24478_s9 + $0x380] sm:$0xff]  ;;  %v16070_v8 = vcombine.low %v8397_v6, %v8401_v24 }
 0x7f5   :  { %11414 = vmatpush1.bf16.msra.mxu1 %v15990_v55  ;;  %v16079_v55 = vcombine.high %v8405_v4, %v8409_v17  ;;  %v16078_v5 = vcombine.low %v8405_v4, %v8409_v17  ;;  %v8477_v25 = vld [vmem:[%s24478_s9 + $0x5c0] sm:$0xff]  ;;  %v8558_v4 = vld [vmem:[%s24478_s9 + $0x848] sm:$0xff] }
 0x7f6   :  { %11415 = vmatprep.subr.bf16.mxu1 %v15999_v29  ;;  %11637 = vmatpush1.bf16.msra.mxu0 %v16192_v46  ;;  %v8413_v29 = vld [vmem:[%s24478_s9 + $0x3c0] sm:$0xff]  ;;  %v8562_v17 = vld [vmem:[%s24478_s9 + $0x868] sm:$0xff] }
 0x7f7   :  { %11638 = vmatprep.subr.bf16.mxu0 %v16201_v19  ;;  %v8417_v46 = vld [vmem:[%s24478_s9 + $0x3e0] sm:$0xff] }
 0x7f8   :  { %v16087_v42 = vcombine.high %v8413_v29, %v8417_v46  ;;  %v8421_v19 = vld [vmem:[%s24478_s9 + $0x400] sm:$0xff]  ;;  %v16086_v9 = vcombine.low %v8413_v29, %v8417_v46  ;;  %v22901_v46 = vld [vmem:[%s24478_s9 + $0xc28] sm:$0xff] }
 0x7f9   :  { %11416 = vmatpush1.bf16.msra.mxu1 %v15998_v50  ;;  %v16095_v50 = vcombine.high %v8421_v19, %v8425_v23  ;;  %v16094_v48 = vcombine.low %v8421_v19, %v8425_v23  ;;  %v8481_v2 = vld [vmem:[%s24478_s9 + $0x5e0] sm:$0xff]  ;;  %v16233_v23 = vcombine.high %v8558_v4, %v8562_v17 }
 0x7fa   :  { %11417 = vmatprep.subr.bf16.mxu1 %v16007_v62  ;;  %11639 = vmatpush1.bf16.msra.mxu0 %v16200_v20  ;;  %v8429_v62 = vld [vmem:[%s24478_s9 + $0x440] sm:$0xff]  ;;  %v16151_v6 = vcombine.high %v8477_v25, %v8481_v2  ;;  %v16150_v29 = vcombine.low %v8477_v25, %v8481_v2 }
 0x7fb   :  { %11640 = vmatprep.subr.bf16.mxu0 %v16209_v40  ;;  %v8433_v20 = vld [vmem:[%s24478_s9 + $0x460] sm:$0xff] }
 0x7fc   :  { %v16103_v51 = vcombine.high %v8429_v62, %v8433_v20  ;;  %v8437_v40 = vld [vmem:[%s24478_s9 + $0x480] sm:$0xff]  ;;  %v16102_v0 = vcombine.low %v8429_v62, %v8433_v20  ;;  %v8566_v62 = vld [vmem:[%s24478_s9 + $0x888] sm:$0xff] }
 0x7fd   :  { %11418 = vmatpush1.bf16.msra.mxu1 %v16006_v57  ;;  %v16111_v57 = vcombine.high %v8437_v40, %v8441_v60  ;;  %v16110_v15 = vcombine.low %v8437_v40, %v8441_v60  ;;  %v8485_v24 = vld [vmem:[%s24478_s9 + $0x600] sm:$0xff]  ;;  %v8570_v20 = vld [vmem:[%s24478_s9 + $0x8a8] sm:$0xff] }
 0x7fe   :  { %11419 = vmatprep.subr.bf16.mxu1 %v16015_v54  ;;  %11641 = vmatpush1.bf16.msra.mxu0 %v16208_v44  ;;  %v8445_v54 = vld [vmem:[%s24478_s9 + $0x4c0] sm:$0xff] }
 0x7ff   :  { %11642 = vmatprep.subr.bf16.mxu0 %v16217_v32  ;;  %v8449_v44 = vld [vmem:[%s24478_s9 + $0x4e0] sm:$0xff] }
 0x800   :  { %v16119_v12 = vcombine.high %v8445_v54, %v8449_v44  ;;  %v8453_v32 = vld [vmem:[%s24478_s9 + $0x500] sm:$0xff] }
 0x801   :  { %11420 = vmatpush1.bf16.msra.mxu1 %v16014_v41  ;;  %v8457_v41 = vld [vmem:[%s24478_s9 + $0x520] sm:$0xff] }
 0x802   :  { %11421 = vmatprep.subr.bf16.mxu1 %v16023_v27  ;;  %11643 = vmatpush1.bf16.msra.mxu0 %v16216_v3  ;;  %v16118_v27 = vcombine.low %v8445_v54, %v8449_v44  ;;  %v16127_v3 = vcombine.high %v8453_v32, %v8457_v41  ;;  %v8493_v19 = vld [vmem:[%s24478_s9 + $0x640] sm:$0xff]  ;;  %v8574_v54 = vld [vmem:[%s24478_s9 + $0x8c8] sm:$0xff] }
 0x803   :  { %11653 = vmatprep.subr.bf16.mxu0 %v16225_v14  ;;  %v22858_v14 = vsub.s32 2, %v22522_v34  ;;  %v8501_v60 = vld [vmem:[%s24478_s9 + $0x680] sm:$0xff]  ;;  %v16248_v37 = vcombine.low %v8574_v54, %v8578_v56 }
 0x804   :  { %v8529_v2 = vld [vmem:[%s24478_s9 + $0x760] sm:$0xff] }
 0x805   :  { %11422 = vmatpush1.bf16.msra.mxu1 %v16022_v26  ;;  %v16126_v26 = vcombine.low %v8453_v32, %v8457_v41  ;;  %v8513_v32 = vld [vmem:[%s24478_s9 + $0x6e0] sm:$0xff]  ;;  %v8582_v41 = vld [vmem:[%s24478_s9 + $0x908] sm:$0xff] }
 0x806   :  { %11423 = vmatprep.subr.bf16.mxu1 %v16031_v39  ;;  %v22861_v39 = vsub.s32 3, %v22522_v34 }
 0x808   :  { %v6644_v53 = vrot.slane %v22536_v52, %v22861_v39 }
 0x809   :  { %11424 = vmatpush1.bf16.msra.mxu1 %v16030_v43  ;;  %v8473_v43 = vld [vmem:[%s24478_s9 + $0x5a0] sm:$0xff] }
 0x80a   :  { %11425 = vmatprep.subr.bf16.mxu1 %v16039_v18  ;;  %v6640_v18 = vrot.slane %v22536_v52, %v22858_v14 }
 0x80d   :  { %11426 = vmatpush1.bf16.msra.mxu1 %v16038_v33  ;;  %v16143_v33 = vcombine.high %v8469_v21, %v8473_v43 }
 0x80e   :  { %11427 = vmatprep.subr.bf16.mxu1 %v16047_v28 }
 0x811   :  { %11428 = vmatpush1.bf16.msra.mxu1 %v16046_v63 }
 0x812   :  { %11429 = vmatprep.subr.bf16.mxu1 %v16055_v49 }
 0x815   :  { %11430 = vmatpush1.bf16.msra.mxu1 %v16054_v35  ;;  %v16142_v35 = vcombine.low %v8469_v21, %v8473_v43  ;;  %v8521_v21 = vld [vmem:[%s24478_s9 + $0x720] sm:$0xff]  ;;  %v8590_v43 = vld [vmem:[%s24478_s9 + $0x948] sm:$0xff] }
 0x816   :  { %11431 = vmatprep.subr.bf16.mxu1 %v16063_v13 }
 0x819   :  { %11432 = vmatpush1.bf16.msra.mxu1 %v16062_v16 }
 0x81a   :  { %11433 = vmatprep.subr.bf16.mxu1 %v16071_v31  ;;  %v8489_v31 = vld [vmem:[%s24478_s9 + $0x620] sm:$0xff] }
 0x81d   :  { %11434 = vmatpush1.bf16.msra.mxu1 %v16070_v8  ;;  %v22894_v8 = vld [vmem:[%s24478_s9 + $0xc08] sm:$0xff] }
 0x81e   :  { %11435 = vmatprep.subr.bf16.mxu1 %v16079_v55 }
 0x821   :  { %11436 = vmatpush1.bf16.msra.mxu1 %v16078_v5 }
 0x822   :  { %11437 = vmatprep.subr.bf16.mxu1 %v16087_v42  ;;  %v16159_v42 = vcombine.high %v8485_v24, %v8489_v31 }
 0x825   :  { %11438 = vmatpush1.bf16.msra.mxu1 %v16086_v9  ;;  %v16352_v9 = vcombine.low %v22894_v8, %v22901_v46 }
 0x826   :  { %11448 = vmatprep.subr.bf16.mxu1 %v16095_v50  ;;  %v8497_v50 = vld [vmem:[%s24478_s9 + $0x660] sm:$0xff] }
 0x827   :  { %v16167_v40 = vcombine.high %v8493_v19, %v8497_v50  ;;  %v16166_v10 = vcombine.low %v8493_v19, %v8497_v50  ;;  %v8545_v19 = vld [vmem:[%s24478_s9 + $0x7e0] sm:$0xff]  ;;  %v8618_v50 = vld [vmem:[%s24478_s9 + $0xa28] sm:$0xff] }
 0x828   :  { %11440 = vmatmul.mubr.bf16.vlgmr.msra.gmra.mrb[12].mxu1 %v22575_v59 }
 0x829   :  { %11449 = vmatpush1.bf16.msra.mxu1 %v16094_v48  ;;  %v16158_v48 = vcombine.low %v8485_v24, %v8489_v31  ;;  %v8606_v24 = vld [vmem:[%s24478_s9 + $0x9c8] sm:$0xff] }
 0x82a   :  { %11450 = vmatprep.subr.bf16.mxu1 %v16103_v51  ;;  %v16232_v51 = vcombine.low %v8558_v4, %v8562_v17 }
 0x82d   :  { %11451 = vmatpush1.bf16.msra.mxu1 %v16102_v0  ;;  %v16241_v0 = vcombine.high %v8566_v62, %v8570_v20 }
 0x82e   :  { %11452 = vmatprep.subr.bf16.mxu1 %v16111_v57  ;;  %v8505_v57 = vld [vmem:[%s24478_s9 + $0x6a0] sm:$0xff] }
 0x82f   :  { %v16175_v44 = vcombine.high %v8501_v60, %v8505_v57 }
 0x831   :  { %11453 = vmatpush1.bf16.msra.mxu1 %v16110_v15  ;;  %v8509_v15 = vld [vmem:[%s24478_s9 + $0x6c0] sm:$0xff] }
 0x832   :  { %11454 = vmatprep.subr.bf16.mxu1 %v16119_v12  ;;  %v16249_v12 = vcombine.high %v8574_v54, %v8578_v56  ;;  %v16183_v7 = vcombine.high %v8509_v15, %v8513_v32 }
 0x835   :  { %11455 = vmatpush1.bf16.msra.mxu1 %v16118_v27  ;;  %v8586_v27 = vld [vmem:[%s24478_s9 + $0x928] sm:$0xff] }
 0x836   :  { %11456 = vmatprep.subr.bf16.mxu1 %v16127_v3  ;;  %v16174_v3 = vcombine.low %v8501_v60, %v8505_v57  ;;  %v8553_v60 = vld [vmem:[%s24478_s9 + $0x820] sm:$0xff]  ;;  %v8626_v57 = vld [vmem:[%s24478_s9 + $0xa68] sm:$0xff] }
 0x839   :  { %11457 = vmatpush1.bf16.msra.mxu1 %v16126_v26  ;;  %v8517_v26 = vld [vmem:[%s24478_s9 + $0x700] sm:$0xff] }
 0x83a   :  { %11458 = vmatprep.subr.bf16.mxu1 %v16135_v1  ;;  %v16257_v1 = vcombine.high %v8582_v41, %v8586_v27 }
 0x83b   :  { %v8106_v28 = vpop.f32.mrb[4].mxu1 }
 0x83c   :  { %v17781_v63 = vadd.f32 %v8106_v28, %v6640_v18  ;;  %v8108_v49 = vpop.f32.mrb[5].mxu1  ;;  %v8594_v18 = vld [vmem:[%s24478_s9 + $0x968] sm:$0xff]  ;;  %v8525_v28 = vld [vmem:[%s24478_s9 + $0x740] sm:$0xff] }
 0x83d   :  { %v17782_v36 = vadd.f32 %v8108_v49, %v6644_v53  ;;  %v8110_v47 = vpop.f32.mrb[6].mxu1  ;;  %11459 = vmatpush1.bf16.msra.mxu1 %v16134_v45  ;;  %v16182_v53 = vcombine.low %v8509_v15, %v8513_v32  ;;  %v16256_v45 = vcombine.low %v8582_v41, %v8586_v27  ;;  %v16265_v25 = vcombine.high %v8590_v43, %v8594_v18  ;;  %v8602_v49 = vld [vmem:[%s24478_s9 + $0x9a8] sm:$0xff]  ;;  %v8561_v15 = vld [vmem:[%s24478_s9 + $0x860] sm:$0xff] }
 0x83e   :  { %v8279_v13 = vmax.f32 %v17781_v63, 0.0  ;;  %v8111_v52 = vpop.f32.mrb[7].mxu1  ;;  %11460 = vmatprep.subr.bf16.mxu1 %v16143_v33  ;;  %v16191_v33 = vcombine.high %v8517_v26, %v8521_v21  ;;  %v8598_v63 = vld [vmem:[%s24478_s9 + $0x988] sm:$0xff]  ;;  %v16264_v47 = vcombine.low %v8590_v43, %v8594_v18  ;;  %v16198_v31 = vcombine.low %v8525_v28, %v8529_v2 }
 0x83f   :  { %v8280_v16 = vmax.f32 %v17782_v36, 0.0  ;;  %v16190_v36 = vcombine.low %v8517_v26, %v8521_v21  ;;  %v16273_v52 = vcombine.high %v8598_v63, %v8602_v49  ;;  %v16272_v4 = vcombine.low %v8598_v63, %v8602_v49  ;;  %v8634_v32 = vld [vmem:[%s24478_s9 + $0xaa8] sm:$0xff]  ;;  %v8569_v26 = vld [vmem:[%s24478_s9 + $0x8a0] sm:$0xff] }
 0x840   :  { %v22903_v5 = vpack.c.bf16 %v8279_v13, %v8279_v13  ;;  %v8533_v13 = vld [vmem:[%s24478_s9 + $0x780] sm:$0xff]  ;;  %v8642_v21 = vld [vmem:[%s24478_s9 + $0xae8] sm:$0xff] }
 0x841   :  { %v22896_v55 = vpack.c.bf16 %v8280_v16, %v8280_v16  ;;  %11461 = vmatpush1.bf16.msra.mxu1 %v16142_v35  ;;  %v16199_v35 = vcombine.high %v8525_v28, %v8529_v2  ;;  %v8610_v16 = vld [vmem:[%s24478_s9 + $0x9e8] sm:$0xff]  ;;  %v8577_v28 = vld [vmem:[%s24478_s9 + $0x8e0] sm:$0xff] }
 0x842   :  { %11462 = vmatprep.subr.bf16.mxu1 %v16151_v6  ;;  %v8537_v6 = vld [vmem:[%s24478_s9 + $0x7a0] sm:$0xff]  ;;  %v8650_v2 = vld [vmem:[%s24478_s9 + $0xb28] sm:$0xff] }
 0x843   :  { %11480 = vmatprep.mubr.bf16.mxu1 %v22896_v55  ;;  %11644 = vmatprep.mubr.bf16.mxu0 %v22896_v55  ;;  %v16207_v17 = vcombine.high %v8533_v13, %v8537_v6 }
 0x844   :  { %11645 = vmatmul.mubr.bf16.vlgmr.msra.gmra.mrb[20].mxu0 %v22903_v5 }
 0x845   :  { %11463 = vmatpush1.bf16.msra.mxu1 %v16150_v29  ;;  %11654 = vmatpush1.bf16.msra.mxu0 %v16224_v11  ;;  %v16240_v11 = vcombine.low %v8566_v62, %v8570_v20  ;;  %v8541_v29 = vld [vmem:[%s24478_s9 + $0x7c0] sm:$0xff]  ;;  %v16206_v62 = vcombine.low %v8533_v13, %v8537_v6  ;;  %v16280_v20 = vcombine.low %v8606_v24, %v8610_v16  ;;  %v8658_v6 = vld [vmem:[%s24478_s9 + $0xb68] sm:$0xff] }
 0x846   :  { %11464 = vmatprep.subr.bf16.mxu1 %v16159_v42  ;;  %11655 = vmatprep.subr.bf16.mxu0 %v16233_v23  ;;  %v16281_v42 = vcombine.high %v8606_v24, %v8610_v16  ;;  %v8614_v23 = vld [vmem:[%s24478_s9 + $0xa08] sm:$0xff]  ;;  %v16214_v54 = vcombine.low %v8541_v29, %v8545_v19  ;;  %v8585_v13 = vld [vmem:[%s24478_s9 + $0x920] sm:$0xff] }
 0x847   :  { %v16288_v56 = vcombine.low %v8614_v23, %v8618_v50 }
 0x849   :  { %11465 = vmatpush1.bf16.msra.mxu1 %v16158_v48  ;;  %11656 = vmatpush1.bf16.msra.mxu0 %v16232_v51  ;;  %v16215_v48 = vcombine.high %v8541_v29, %v8545_v19  ;;  %v8549_v51 = vld [vmem:[%s24478_s9 + $0x800] sm:$0xff]  ;;  %v8666_v19 = vld [vmem:[%s24478_s9 + $0xba8] sm:$0xff] }
 0x84a   :  { %11466 = vmatprep.subr.bf16.mxu1 %v16167_v40  ;;  %11657 = vmatprep.subr.bf16.mxu0 %v16241_v0  ;;  %v16289_v40 = vcombine.high %v8614_v23, %v8618_v50  ;;  %v8622_v0 = vld [vmem:[%s24478_s9 + $0xa48] sm:$0xff]  ;;  %v16222_v41 = vcombine.low %v8549_v51, %v8553_v60  ;;  %v8593_v29 = vld [vmem:[%s24478_s9 + $0x960] sm:$0xff] }
 0x84b   :  { %v16296_v27 = vcombine.low %v8622_v0, %v8626_v57 }
 0x84d   :  { %11467 = vmatpush1.bf16.msra.mxu1 %v16166_v10  ;;  %11658 = vmatpush1.bf16.msra.mxu0 %v16240_v11  ;;  %v16223_v10 = vcombine.high %v8549_v51, %v8553_v60  ;;  %v8557_v11 = vld [vmem:[%s24478_s9 + $0x840] sm:$0xff]  ;;  %v8674_v60 = vld [vmem:[%s24478_s9 + $0xbe8] sm:$0xff] }
 0x84e   :  { %11468 = vmatprep.subr.bf16.mxu1 %v16175_v44  ;;  %11659 = vmatprep.subr.bf16.mxu0 %v16249_v12  ;;  %v16297_v44 = vcombine.high %v8622_v0, %v8626_v57  ;;  %v8630_v12 = vld [vmem:[%s24478_s9 + $0xa88] sm:$0xff]  ;;  %v16230_v43 = vcombine.low %v8557_v11, %v8561_v15  ;;  %v8601_v51 = vld [vmem:[%s24478_s9 + $0x9a0] sm:$0xff] }
 0x84f   :  { %v16304_v18 = vcombine.low %v8630_v12, %v8634_v32 }
 0x851   :  { %11469 = vmatpush1.bf16.msra.mxu1 %v16174_v3  ;;  %11660 = vmatpush1.bf16.msra.mxu0 %v16248_v37  ;;  %v16231_v3 = vcombine.high %v8557_v11, %v8561_v15  ;;  %v8565_v37 = vld [vmem:[%s24478_s9 + $0x880] sm:$0xff] }
 0x852   :  { %11470 = vmatprep.subr.bf16.mxu1 %v16183_v7  ;;  %11661 = vmatprep.subr.bf16.mxu0 %v16257_v1  ;;  %v16305_v7 = vcombine.high %v8630_v12, %v8634_v32  ;;  %v8638_v1 = vld [vmem:[%s24478_s9 + $0xac8] sm:$0xff]  ;;  %v16238_v63 = vcombine.low %v8565_v37, %v8569_v26  ;;  %v8609_v11 = vld [vmem:[%s24478_s9 + $0x9e0] sm:$0xff]  ;;  %v16353_v32 = vcombine.high %v22894_v8, %v22901_v46 }
 0x853   :  { %v16312_v49 = vcombine.low %v8638_v1, %v8642_v21  ;;  %v8702_v8 = vld [vmem:[%s24478_s9 + $0xcc8] sm:$0xff] }
 0x854   :  { %v8706_v46 = vld [vmem:[%s24478_s9 + $0xce8] sm:$0xff] }
 0x855   :  { %11471 = vmatpush1.bf16.msra.mxu1 %v16182_v53  ;;  %11662 = vmatpush1.bf16.msra.mxu0 %v16256_v45  ;;  %v16239_v53 = vcombine.high %v8565_v37, %v8569_v26  ;;  %v8573_v45 = vld [vmem:[%s24478_s9 + $0x8c0] sm:$0xff] }
 0x856   :  { %11472 = vmatprep.subr.bf16.mxu1 %v16191_v33  ;;  %11663 = vmatprep.subr.bf16.mxu0 %v16265_v25  ;;  %v16313_v33 = vcombine.high %v8638_v1, %v8642_v21  ;;  %v8646_v25 = vld [vmem:[%s24478_s9 + $0xb08] sm:$0xff]  ;;  %v16246_v24 = vcombine.low %v8573_v45, %v8577_v28  ;;  %v8625_v26 = vld [vmem:[%s24478_s9 + $0xa60] sm:$0xff] }
 0x857   :  { %v16320_v16 = vcombine.low %v8646_v25, %v8650_v2 }
 0x859   :  { %11473 = vmatpush1.bf16.msra.mxu1 %v16190_v36  ;;  %11664 = vmatpush1.bf16.msra.mxu0 %v16264_v47  ;;  %v16247_v36 = vcombine.high %v8573_v45, %v8577_v28  ;;  %v8581_v47 = vld [vmem:[%s24478_s9 + $0x900] sm:$0xff] }
 0x85a   :  { %11474 = vmatprep.subr.bf16.mxu1 %v16199_v35  ;;  %11665 = vmatprep.subr.bf16.mxu0 %v16273_v52  ;;  %v16321_v35 = vcombine.high %v8646_v25, %v8650_v2  ;;  %v8654_v52 = vld [vmem:[%s24478_s9 + $0xb48] sm:$0xff]  ;;  %v16254_v23 = vcombine.low %v8581_v47, %v8585_v13  ;;  %v8641_v28 = vld [vmem:[%s24478_s9 + $0xae0] sm:$0xff] }
 0x85b   :  { %v16328_v50 = vcombine.low %v8654_v52, %v8658_v6 }
 0x85d   :  { %11475 = vmatpush1.bf16.msra.mxu1 %v16198_v31  ;;  %11666 = vmatpush1.bf16.msra.mxu0 %v16272_v4  ;;  %v16255_v31 = vcombine.high %v8581_v47, %v8585_v13  ;;  %v8589_v4 = vld [vmem:[%s24478_s9 + $0x940] sm:$0xff] }
 0x85e   :  { %11476 = vmatprep.subr.bf16.mxu1 %v16207_v17  ;;  %11667 = vmatprep.subr.bf16.mxu0 %v16281_v42  ;;  %v16329_v17 = vcombine.high %v8654_v52, %v8658_v6  ;;  %v8662_v42 = vld [vmem:[%s24478_s9 + $0xb88] sm:$0xff]  ;;  %v16262_v0 = vcombine.low %v8589_v4, %v8593_v29  ;;  %v8657_v13 = vld [vmem:[%s24478_s9 + $0xb60] sm:$0xff] }
 0x85f   :  { %v16336_v57 = vcombine.low %v8662_v42, %v8666_v19 }
 0x861   :  { %11477 = vmatpush1.bf16.msra.mxu1 %v16206_v62  ;;  %11668 = vmatpush1.bf16.msra.mxu0 %v16280_v20  ;;  %v16263_v62 = vcombine.high %v8589_v4, %v8593_v29  ;;  %v8597_v20 = vld [vmem:[%s24478_s9 + $0x980] sm:$0xff] }
 0x862   :  { %11478 = vmatprep.subr.bf16.mxu1 %v16215_v48  ;;  %11669 = vmatprep.subr.bf16.mxu0 %v16289_v40  ;;  %v16337_v48 = vcombine.high %v8662_v42, %v8666_v19  ;;  %v8670_v40 = vld [vmem:[%s24478_s9 + $0xbc8] sm:$0xff]  ;;  %v8673_v29 = vld [vmem:[%s24478_s9 + $0xbe0] sm:$0xff] }
 0x863   :  { %v16344_v15 = vcombine.low %v8670_v40, %v8674_v60 }
 0x865   :  { %11479 = vmatpush1.bf16.msra.mxu1 %v16214_v54  ;;  %11670 = vmatpush1.bf16.msra.mxu0 %v16288_v56  ;;  %v16271_v54 = vcombine.high %v8597_v20, %v8601_v51  ;;  %v16345_v56 = vcombine.high %v8670_v40, %v8674_v60  ;;  %v6651_v40 = vsub.s32 5, %v22522_v34  ;;  %v23150_v60 = vld [vmem:[%s24477_s8] sm:$0xff] }
 0x866   :  { %11489 = vmatprep.subr.bf16.mxu1 %v16223_v10  ;;  %11671 = vmatprep.subr.bf16.mxu0 %v16297_v44  ;;  %v8605_v10 = vld [vmem:[%s24478_s9 + $0x9c0] sm:$0xff]  ;;  %v16270_v44 = vcombine.low %v8597_v20, %v8601_v51  ;;  %v6647_v51 = vsub.s32 4, %v22522_v34 }
 0x867   :  { %v16279_v12 = vcombine.high %v8605_v10, %v8609_v11 }
 0x868   :  { %11481 = vmatmul.mubr.bf16.vlgmr.msra.gmra.mrb[12].mxu1 %v22903_v5 }
 0x869   :  { %11490 = vmatpush1.bf16.msra.mxu1 %v16222_v41  ;;  %11672 = vmatpush1.bf16.msra.mxu0 %v16296_v27  ;;  %v8613_v41 = vld [vmem:[%s24478_s9 + $0xa00] sm:$0xff] }
 0x86a   :  { %11491 = vmatprep.subr.bf16.mxu1 %v16231_v3  ;;  %11673 = vmatprep.subr.bf16.mxu0 %v16305_v7  ;;  %v8617_v27 = vld [vmem:[%s24478_s9 + $0xa20] sm:$0xff]  ;;  %v16278_v3 = vcombine.low %v8605_v10, %v8609_v11 }
 0x86b   :  { %v16287_v37 = vcombine.high %v8613_v41, %v8617_v27  ;;  %v8621_v7 = vld [vmem:[%s24478_s9 + $0xa40] sm:$0xff]  ;;  %v16286_v1 = vcombine.low %v8613_v41, %v8617_v27 }
 0x86c   :  { %v16295_v21 = vcombine.high %v8621_v7, %v8625_v26 }
 0x86d   :  { %11492 = vmatpush1.bf16.msra.mxu1 %v16230_v43  ;;  %11674 = vmatpush1.bf16.msra.mxu0 %v16304_v18  ;;  %v8629_v43 = vld [vmem:[%s24478_s9 + $0xa80] sm:$0xff] }
 0x86e   :  { %11493 = vmatprep.subr.bf16.mxu1 %v16239_v53  ;;  %11675 = vmatprep.subr.bf16.mxu0 %v16313_v33  ;;  %v8633_v18 = vld [vmem:[%s24478_s9 + $0xaa0] sm:$0xff]  ;;  %v16294_v53 = vcombine.low %v8621_v7, %v8625_v26  ;;  %v8690_v26 = vld [vmem:[%s24478_s9 + $0xc68] sm:$0xff] }
 0x86f   :  { %v16303_v45 = vcombine.high %v8629_v43, %v8633_v18  ;;  %v8637_v33 = vld [vmem:[%s24478_s9 + $0xac0] sm:$0xff]  ;;  %v16302_v25 = vcombine.low %v8629_v43, %v8633_v18 }
 0x870   :  { %v16311_v2 = vcombine.high %v8637_v33, %v8641_v28  ;;  %v8689_v7 = vld [vmem:[%s24478_s9 + $0xc60] sm:$0xff] }
 0x871   :  { %11494 = vmatpush1.bf16.msra.mxu1 %v16238_v63  ;;  %11676 = vmatpush1.bf16.msra.mxu0 %v16312_v49  ;;  %v8645_v63 = vld [vmem:[%s24478_s9 + $0xb00] sm:$0xff] }
 0x872   :  { %11495 = vmatprep.subr.bf16.mxu1 %v16247_v36  ;;  %11677 = vmatprep.subr.bf16.mxu0 %v16321_v35  ;;  %v8649_v49 = vld [vmem:[%s24478_s9 + $0xb20] sm:$0xff]  ;;  %v16310_v36 = vcombine.low %v8637_v33, %v8641_v28  ;;  %v8694_v28 = vld [vmem:[%s24478_s9 + $0xc88] sm:$0xff] }
 0x873   :  { %v16319_v47 = vcombine.high %v8645_v63, %v8649_v49  ;;  %v8653_v35 = vld [vmem:[%s24478_s9 + $0xb40] sm:$0xff]  ;;  %v16318_v52 = vcombine.low %v8645_v63, %v8649_v49 }
 0x874   :  { %v16327_v6 = vcombine.high %v8653_v35, %v8657_v13  ;;  %v8693_v18 = vld [vmem:[%s24478_s9 + $0xc80] sm:$0xff] }
 0x875   :  { %11496 = vmatpush1.bf16.msra.mxu1 %v16246_v24  ;;  %11678 = vmatpush1.bf16.msra.mxu0 %v16320_v16  ;;  %v8661_v24 = vld [vmem:[%s24478_s9 + $0xb80] sm:$0xff] }
 0x876   :  { %11497 = vmatprep.subr.bf16.mxu1 %v16255_v31  ;;  %11679 = vmatprep.subr.bf16.mxu0 %v16329_v17  ;;  %v8665_v16 = vld [vmem:[%s24478_s9 + $0xba0] sm:$0xff]  ;;  %v16326_v31 = vcombine.low %v8653_v35, %v8657_v13 }
 0x877   :  { %v16335_v4 = vcombine.high %v8661_v24, %v8665_v16  ;;  %v8669_v17 = vld [vmem:[%s24478_s9 + $0xbc0] sm:$0xff]  ;;  %v16334_v42 = vcombine.low %v8661_v24, %v8665_v16  ;;  %v16377_v24 = vcombine.high %v8702_v8, %v8706_v46 }
 0x878   :  { %v16343_v19 = vcombine.high %v8669_v17, %v8673_v29  ;;  %v8697_v33 = vld [vmem:[%s24478_s9 + $0xca0] sm:$0xff] }
 0x879   :  { %11498 = vmatpush1.bf16.msra.mxu1 %v16254_v23  ;;  %11680 = vmatpush1.bf16.msra.mxu0 %v16328_v50  ;;  %v8677_v23 = vld [vmem:[%s24478_s9 + $0xc00] sm:$0xff] }
 0x87a   :  { %11499 = vmatprep.subr.bf16.mxu1 %v16263_v62  ;;  %11681 = vmatprep.subr.bf16.mxu0 %v16337_v48  ;;  %v8681_v50 = vld [vmem:[%s24478_s9 + $0xc20] sm:$0xff]  ;;  %v16342_v62 = vcombine.low %v8669_v17, %v8673_v29  ;;  %v6659_v48 = vsub.s32 7, %v22522_v34  ;;  %v8714_v17 = vld [vmem:[%s24478_s9 + $0xd28] sm:$0xff] }
 0x87b   :  { %v16351_v20 = vcombine.high %v8677_v23, %v8681_v50  ;;  %v8701_v35 = vld [vmem:[%s24478_s9 + $0xcc0] sm:$0xff] }
 0x87c   :  { %v8705_v13 = vld [vmem:[%s24478_s9 + $0xce0] sm:$0xff] }
 0x87d   :  { %11500 = vmatpush1.bf16.msra.mxu1 %v16262_v0  ;;  %11682 = vmatpush1.bf16.msra.mxu0 %v16336_v57  ;;  %v6660_v0 = vrot.slane %v23150_v60, %v6659_v48  ;;  %v6648_v57 = vrot.slane %v23150_v60, %v6647_v51  ;;  %v8709_v16 = vld [vmem:[%s24478_s9 + $0xd00] sm:$0xff]  ;;  %v16374_v29 = vcombine.low %v8701_v35, %v8705_v13 }
 0x87e   :  { %11501 = vmatprep.subr.bf16.mxu1 %v16271_v54  ;;  %11683 = vmatprep.subr.bf16.mxu0 %v16345_v56  ;;  %v6652_v54 = vrot.slane %v23150_v60, %v6651_v40 }
 0x87f   :  { %v17786_v10 = vadd.f32 %v22559_v58, %v6660_v0  ;;  %v8686_v58 = vld [vmem:[%s24478_s9 + $0xc48] sm:$0xff] }
 0x880   :  { %v16360_v49 = vcombine.low %v8686_v58, %v8690_v26  ;;  %v8722_v0 = vld [vmem:[%s24478_s9 + $0xd68] sm:$0xff] }
 0x881   :  { %11502 = vmatpush1.bf16.msra.mxu1 %v16270_v44  ;;  %11684 = vmatpush1.bf16.msra.mxu0 %v16344_v15 }
 0x882   :  { %11503 = vmatprep.subr.bf16.mxu1 %v16279_v12  ;;  %11694 = vmatprep.subr.bf16.mxu0 %v16353_v32 }
 0x885   :  { %11504 = vmatpush1.bf16.msra.mxu1 %v16278_v3  ;;  %v8685_v3 = vld [vmem:[%s24478_s9 + $0xc40] sm:$0xff] }
 0x886   :  { %11505 = vmatprep.subr.bf16.mxu1 %v16287_v37  ;;  %v8284_v37 = vmax.f32 %v17786_v10, 0.0  ;;  %v16358_v63 = vcombine.low %v8685_v3, %v8689_v7 }
 0x889   :  { %11506 = vmatpush1.bf16.msra.mxu1 %v16286_v1 }
 0x88a   :  { %11507 = vmatprep.subr.bf16.mxu1 %v16295_v21  ;;  %v16350_v21 = vcombine.low %v8677_v23, %v8681_v50  ;;  %v8717_v50 = vld [vmem:[%s24478_s9 + $0xd40] sm:$0xff] }
 0x88d   :  { %11508 = vmatpush1.bf16.msra.mxu1 %v16294_v53  ;;  %v16359_v53 = vcombine.high %v8685_v3, %v8689_v7  ;;  %v8737_v7 = vld [vmem:[%s24478_s9 + $0xde0] sm:$0xff] }
 0x88e   :  { %11509 = vmatprep.subr.bf16.mxu1 %v16303_v45  ;;  %v16361_v45 = vcombine.high %v8686_v58, %v8690_v26  ;;  %v8734_v58 = vld [vmem:[%s24478_s9 + $0xdc8] sm:$0xff] }
 0x88f   :  { %v8738_v26 = vld [vmem:[%s24478_s9 + $0xde8] sm:$0xff] }
 0x891   :  { %11510 = vmatpush1.bf16.msra.mxu1 %v16302_v25  ;;  %v8698_v25 = vld [vmem:[%s24478_s9 + $0xca8] sm:$0xff] }
 0x892   :  { %11511 = vmatprep.subr.bf16.mxu1 %v16311_v2  ;;  %v23192_v2 = vpack.c.bf16 %v8284_v37, %v8284_v37  ;;  %v8733_v37 = vld [vmem:[%s24478_s9 + $0xdc0] sm:$0xff] }
 0x895   :  { %11512 = vmatpush1.bf16.msra.mxu1 %v16310_v36  ;;  %v16367_v36 = vcombine.high %v8693_v18, %v8697_v33 }
 0x896   :  { %11513 = vmatprep.subr.bf16.mxu1 %v16319_v47  ;;  %v16369_v47 = vcombine.high %v8694_v28, %v8698_v25 }
 0x899   :  { %11514 = vmatpush1.bf16.msra.mxu1 %v16318_v52  ;;  %v16368_v52 = vcombine.low %v8694_v28, %v8698_v25  ;;  %v8745_v28 = vld [vmem:[%s24478_s9 + $0xe20] sm:$0xff]  ;;  %v8742_v25 = vld [vmem:[%s24478_s9 + $0xe08] sm:$0xff] }
 0x89a   :  { %11515 = vmatprep.subr.bf16.mxu1 %v16327_v6  ;;  %v16375_v6 = vcombine.high %v8701_v35, %v8705_v13  ;;  %v8749_v13 = vld [vmem:[%s24478_s9 + $0xe40] sm:$0xff] }
 0x89d   :  { %11516 = vmatpush1.bf16.msra.mxu1 %v16326_v31  ;;  %v8713_v31 = vld [vmem:[%s24478_s9 + $0xd20] sm:$0xff] }
 0x89e   :  { %11517 = vmatprep.subr.bf16.mxu1 %v16335_v4  ;;  %v8710_v4 = vld [vmem:[%s24478_s9 + $0xd08] sm:$0xff] }
 0x89f   :  { %v16385_v23 = vcombine.high %v8710_v4, %v8714_v17 }
 0x8a1   :  { %11518 = vmatpush1.bf16.msra.mxu1 %v16334_v42  ;;  %v16376_v42 = vcombine.low %v8702_v8, %v8706_v46  ;;  %v8753_v8 = vld [vmem:[%s24478_s9 + $0xe60] sm:$0xff]  ;;  %v8750_v46 = vld [vmem:[%s24478_s9 + $0xe48] sm:$0xff] }
 0x8a2   :  { %11519 = vmatprep.subr.bf16.mxu1 %v16343_v19  ;;  %v16383_v19 = vcombine.high %v8709_v16, %v8713_v31 }
 0x8a5   :  { %11520 = vmatpush1.bf16.msra.mxu1 %v16342_v62  ;;  %v8721_v62 = vld [vmem:[%s24478_s9 + $0xd60] sm:$0xff] }
 0x8a6   :  { %11530 = vmatprep.subr.bf16.mxu1 %v16351_v20  ;;  %v8718_v20 = vld [vmem:[%s24478_s9 + $0xd48] sm:$0xff] }
 0x8a7   :  { %v16393_v10 = vcombine.high %v8718_v20, %v8722_v0 }
 0x8bb   :  { %v8188_v56 = vpop.f32.mrb[8].mxu1 }
 0x8bc   :  { %v17783_v11 = vadd.f32 %v8188_v56, %v6648_v57  ;;  %v8190_v44 = vpop.f32.mrb[9].mxu1  ;;  %v16382_v57 = vcombine.low %v8709_v16, %v8713_v31  ;;  %v16391_v56 = vcombine.high %v8717_v50, %v8721_v62  ;;  %v8757_v31 = vld [vmem:[%s24478_s9 + $0xe80] sm:$0xff] }
 0x8bd   :  { %v17784_v15 = vadd.f32 %v8190_v44, %v6652_v54  ;;  %v8192_v12 = vpop.f32.mrb[10].mxu1  ;;  %v16384_v54 = vcombine.low %v8710_v4, %v8714_v17  ;;  %v8729_v44 = vld [vmem:[%s24478_s9 + $0xda0] sm:$0xff]  ;;  %v8758_v17 = vld [vmem:[%s24478_s9 + $0xe88] sm:$0xff] }
 0x8be   :  { %v8281_v32 = vmax.f32 %v17783_v11, 0.0  ;;  %v8193_v41 = vpop.f32.mrb[11].mxu1  ;;  %v8725_v11 = vld [vmem:[%s24478_s9 + $0xd80] sm:$0xff]  ;;  %v8730_v12 = vld [vmem:[%s24478_s9 + $0xda8] sm:$0xff] }
 0x8bf   :  { %v8282_v27 = vmax.f32 %v17784_v15, 0.0  ;;  %v8726_v15 = vld [vmem:[%s24478_s9 + $0xd88] sm:$0xff]  ;;  %v16392_v41 = vcombine.low %v8718_v20, %v8722_v0  ;;  %v8761_v4 = vld [vmem:[%s24478_s9 + $0xea0] sm:$0xff] }
 0x8c0   :  { %v23176_v43 = vpack.c.bf16 %v8281_v32, %v8281_v32  ;;  %v16390_v32 = vcombine.low %v8717_v50, %v8721_v62  ;;  %v16401_v3 = vcombine.high %v8726_v15, %v8730_v12  ;;  %v8765_v62 = vld [vmem:[%s24478_s9 + $0xec0] sm:$0xff]  ;;  %v8766_v0 = vld [vmem:[%s24478_s9 + $0xec8] sm:$0xff] }
 0x8c1   :  { %v23174_v1 = vpack.c.bf16 %v8282_v27, %v8282_v27  ;;  %v16399_v27 = vcombine.high %v8725_v11, %v8729_v44  ;;  %v8769_v20 = vld [vmem:[%s24478_s9 + $0xee0] sm:$0xff] }
 0x8c3   :  { %11521 = vmatprep.mubr.bf16.mxu1 %v23174_v1  ;;  %11685 = vmatprep.mubr.bf16.mxu0 %v23174_v1 }
 0x8c4   :  { %11522 = vmatmul.mubr.bf16.vlgmr.msra.gmra.mrb[12].mxu1 %v23176_v43  ;;  %11686 = vmatmul.mubr.bf16.vlgmr.msra.gmra.mrb[20].mxu0 %v23176_v43 }
 0x8c5   :  { %11531 = vmatpush1.bf16.msra.mxu1 %v16350_v21  ;;  %11695 = vmatpush1.bf16.msra.mxu0 %v16352_v9  ;;  %v16366_v9 = vcombine.low %v8693_v18, %v8697_v33  ;;  %v16398_v21 = vcombine.low %v8725_v11, %v8729_v44  ;;  %v16400_v18 = vcombine.low %v8726_v15, %v8730_v12  ;;  %v8741_v33 = vld [vmem:[%s24478_s9 + $0xe00] sm:$0xff]  ;;  %v8774_v12 = vld [vmem:[%s24478_s9 + $0xf08] sm:$0xff] }
 0x8c6   :  { %11562 = vmatprep.mubr.bf16.mxu1 %v23192_v2  ;;  %11726 = vmatprep.mubr.bf16.mxu0 %v23192_v2  ;;  %v8773_v44 = vld [vmem:[%s24478_s9 + $0xf00] sm:$0xff] }
 0x8c7   :  { %11532 = vmatprep.subr.bf16.mxu1 %v16359_v53  ;;  %11696 = vmatprep.subr.bf16.mxu0 %v16361_v45  ;;  %v16407_v53 = vcombine.high %v8733_v37, %v8737_v7  ;;  %v16409_v45 = vcombine.high %v8734_v58, %v8738_v26  ;;  %v8777_v15 = vld [vmem:[%s24478_s9 + $0xf20] sm:$0xff] }
 0x8c9   :  { %11533 = vmatpush1.bf16.msra.mxu1 %v16358_v63  ;;  %11697 = vmatpush1.bf16.msra.mxu0 %v16360_v49  ;;  %v8746_v63 = vld [vmem:[%s24478_s9 + $0xe28] sm:$0xff]  ;;  %v16406_v49 = vcombine.low %v8733_v37, %v8737_v7  ;;  %v8781_v7 = vld [vmem:[%s24478_s9 + $0xf40] sm:$0xff] }
 0x8ca   :  { %11534 = vmatprep.subr.bf16.mxu1 %v16367_v36  ;;  %11698 = vmatprep.subr.bf16.mxu0 %v16369_v47  ;;  %v16408_v36 = vcombine.low %v8734_v58, %v8738_v26  ;;  %v16415_v47 = vcombine.high %v8741_v33, %v8745_v28  ;;  %v16417_v35 = vcombine.high %v8742_v25, %v8746_v63  ;;  %v8785_v58 = vld [vmem:[%s24478_s9 + $0xf60] sm:$0xff]  ;;  %v8782_v26 = vld [vmem:[%s24478_s9 + $0xf48] sm:$0xff] }
 0x8cd   :  { %11535 = vmatpush1.bf16.msra.mxu1 %v16366_v9  ;;  %11699 = vmatpush1.bf16.msra.mxu0 %v16368_v52  ;;  %v8754_v9 = vld [vmem:[%s24478_s9 + $0xe68] sm:$0xff]  ;;  %v16414_v52 = vcombine.low %v8741_v33, %v8745_v28  ;;  %v16455_v33 = vcombine.high %v8781_v7, %v8785_v58 }
 0x8ce   :  { %11536 = vmatprep.subr.bf16.mxu1 %v16375_v6  ;;  %11700 = vmatprep.subr.bf16.mxu0 %v16377_v24  ;;  %v16416_v6 = vcombine.low %v8742_v25, %v8746_v63  ;;  %v16423_v24 = vcombine.high %v8749_v13, %v8753_v8  ;;  %v16425_v16 = vcombine.high %v8750_v46, %v8754_v9  ;;  %v8789_v25 = vld [vmem:[%s24478_s9 + $0xf80] sm:$0xff] }
 0x8cf   :  { %v8793_v63 = vld [vmem:[%s24478_s9 + $0xfa0] sm:$0xff] }
 0x8d1   :  { %11537 = vmatpush1.bf16.msra.mxu1 %v16374_v29  ;;  %11701 = vmatpush1.bf16.msra.mxu0 %v16376_v42  ;;  %v8762_v29 = vld [vmem:[%s24478_s9 + $0xea8] sm:$0xff]  ;;  %v16422_v42 = vcombine.low %v8749_v13, %v8753_v8  ;;  %v16463_v8 = vcombine.high %v8789_v25, %v8793_v63 }
 0x8d2   :  { %11538 = vmatprep.subr.bf16.mxu1 %v16383_v19  ;;  %11702 = vmatprep.subr.bf16.mxu0 %v16385_v23  ;;  %v16424_v19 = vcombine.low %v8750_v46, %v8754_v9  ;;  %v16431_v23 = vcombine.high %v8757_v31, %v8761_v4  ;;  %v16433_v50 = vcombine.high %v8758_v17, %v8762_v29  ;;  %v8797_v9 = vld [vmem:[%s24478_s9 + $0xfc0] sm:$0xff] }
 0x8d5   :  { %11539 = vmatpush1.bf16.msra.mxu1 %v16382_v57  ;;  %11703 = vmatpush1.bf16.msra.mxu0 %v16384_v54  ;;  %v8770_v57 = vld [vmem:[%s24478_s9 + $0xee8] sm:$0xff]  ;;  %v16430_v54 = vcombine.low %v8757_v31, %v8761_v4 }
 0x8d6   :  { %11540 = vmatprep.subr.bf16.mxu1 %v16391_v56  ;;  %11704 = vmatprep.subr.bf16.mxu0 %v16393_v10  ;;  %v16432_v56 = vcombine.low %v8758_v17, %v8762_v29  ;;  %v16439_v10 = vcombine.high %v8765_v62, %v8769_v20  ;;  %v16441_v11 = vcombine.high %v8766_v0, %v8770_v57  ;;  %v8295_v29 = vld [vmem:[%s24478_s9 + $0x10] sm:$0xff] }
 0x8d9   :  { %11541 = vmatpush1.bf16.msra.mxu1 %v16390_v32  ;;  %11705 = vmatpush1.bf16.msra.mxu0 %v16392_v41  ;;  %v8778_v32 = vld [vmem:[%s24478_s9 + $0xf28] sm:$0xff]  ;;  %v16438_v41 = vcombine.low %v8765_v62, %v8769_v20 }
 0x8da   :  { %11542 = vmatprep.subr.bf16.mxu1 %v16399_v27  ;;  %11706 = vmatprep.subr.bf16.mxu0 %v16401_v3  ;;  %v16440_v27 = vcombine.low %v8766_v0, %v8770_v57  ;;  %v16447_v3 = vcombine.high %v8773_v44, %v8777_v15  ;;  %v16449_v37 = vcombine.high %v8774_v12, %v8778_v32  ;;  %v8303_v57 = vld [vmem:[%s24478_s9 + $0x50] sm:$0xff] }
 0x8dd   :  { %11543 = vmatpush1.bf16.msra.mxu1 %v16398_v21  ;;  %11707 = vmatpush1.bf16.msra.mxu0 %v16400_v18  ;;  %v8786_v21 = vld [vmem:[%s24478_s9 + $0xf68] sm:$0xff]  ;;  %v16446_v18 = vcombine.low %v8773_v44, %v8777_v15 }
 0x8de   :  { %11544 = vmatprep.subr.bf16.mxu1 %v16407_v53  ;;  %11708 = vmatprep.subr.bf16.mxu0 %v16409_v45  ;;  %v16448_v53 = vcombine.low %v8774_v12, %v8778_v32  ;;  %v6655_v45 = vsub.s32 6, %v22522_v34  ;;  %v16457_v28 = vcombine.high %v8782_v26, %v8786_v21 }
 0x8e0   :  { %v6656_v13 = vrot.slane %v23150_v60, %v6655_v45  ;;  %v8802_v60 = vld [vmem:[%s24478_s9 + $0xfe8] sm:$0xff] }
 0x8e1   :  { %11545 = vmatpush1.bf16.msra.mxu1 %v16406_v49  ;;  %11709 = vmatpush1.bf16.msra.mxu0 %v16408_v36  ;;  %v8790_v49 = vld [vmem:[%s24478_s9 + $0xf88] sm:$0xff] }
 0x8e2   :  { %11546 = vmatprep.subr.bf16.mxu1 %v16415_v47  ;;  %11710 = vmatprep.subr.bf16.mxu0 %v16417_v35  ;;  %v8794_v36 = vld [vmem:[%s24478_s9 + $0xfa8] sm:$0xff]  ;;  %v16454_v47 = vcombine.low %v8781_v7, %v8785_v58  ;;  %v16456_v35 = vcombine.low %v8782_v26, %v8786_v21  ;;  %v17785_v31 = vadd.f32 %v22551_v30, %v6656_v13  ;;  %v8300_v30 = vld [vmem:[%s24478_s9 + $0x38] sm:$0xff] }
 0x8e3   :  { %v16465_v46 = vcombine.high %v8790_v49, %v8794_v36  ;;  %v8332_v13 = vld [vmem:[%s24478_s9 + $0x138] sm:$0xff] }
 0x8e4   :  { %v8283_v62 = vmax.f32 %v17785_v31, 0.0 }
 0x8e5   :  { %11547 = vmatpush1.bf16.msra.mxu1 %v16414_v52  ;;  %11711 = vmatpush1.bf16.msra.mxu0 %v16416_v6  ;;  %v8801_v52 = vld [vmem:[%s24478_s9 + $0xfe0] sm:$0xff]  ;;  %v8798_v6 = vld [vmem:[%s24478_s9 + $0xfc8] sm:$0xff] }
 0x8e6   :  { %11548 = vmatprep.subr.bf16.mxu1 %v16423_v24  ;;  %11712 = vmatprep.subr.bf16.mxu0 %v16425_v16  ;;  %v16462_v24 = vcombine.low %v8789_v25, %v8793_v63  ;;  %v16464_v16 = vcombine.low %v8790_v49, %v8794_v36  ;;  %v16471_v4 = vcombine.high %v8797_v9, %v8801_v52  ;;  %v8327_v36 = vld [vmem:[%s24478_s9 + $0x110] sm:$0xff] }
 0x8e7   :  { %v16473_v17 = vcombine.high %v8798_v6, %v8802_v60  ;;  %v23386_v44 = vpack.c.bf16 %v8283_v62, %v8283_v62 }
 0x8e9   :  { %11549 = vmatpush1.bf16.msra.mxu1 %v16422_v42  ;;  %11713 = vmatpush1.bf16.msra.mxu0 %v16424_v19  ;;  %v8299_v42 = vld [vmem:[%s24478_s9 + $0x30] sm:$0xff]  ;;  %v8296_v19 = vld [vmem:[%s24478_s9 + $0x18] sm:$0xff] }
 0x8ea   :  { %11550 = vmatprep.subr.bf16.mxu1 %v16431_v23  ;;  %11714 = vmatprep.subr.bf16.mxu0 %v16433_v50  ;;  %v16470_v23 = vcombine.low %v8797_v9, %v8801_v52  ;;  %v16472_v50 = vcombine.low %v8798_v6, %v8802_v60  ;;  %v15971_v20 = vcombine.high %v8295_v29, %v8299_v42  ;;  %v8335_v6 = vld [vmem:[%s24478_s9 + $0x150] sm:$0xff] }
 0x8eb   :  { %v15973_v0 = vcombine.high %v8296_v19, %v8300_v30  ;;  %v15972_v15 = vcombine.low %v8296_v19, %v8300_v30  ;;  %v8339_v60 = vld [vmem:[%s24478_s9 + $0x170] sm:$0xff]  ;;  %v8344_v30 = vld [vmem:[%s24478_s9 + $0x198] sm:$0xff] }
 0x8ec   :  { %v8347_v19 = vld [vmem:[%s24478_s9 + $0x1b0] sm:$0xff] }
 0x8ed   :  { %11551 = vmatpush1.bf16.msra.mxu1 %v16430_v54  ;;  %11715 = vmatpush1.bf16.msra.mxu0 %v16432_v56  ;;  %v8307_v54 = vld [vmem:[%s24478_s9 + $0x70] sm:$0xff]  ;;  %v8304_v56 = vld [vmem:[%s24478_s9 + $0x58] sm:$0xff] }
 0x8ee   :  { %11552 = vmatprep.subr.bf16.mxu1 %v16439_v10  ;;  %11716 = vmatprep.subr.bf16.mxu0 %v16441_v11  ;;  %v8308_v10 = vld [vmem:[%s24478_s9 + $0x78] sm:$0xff]  ;;  %v15970_v11 = vcombine.low %v8295_v29, %v8299_v42  ;;  %v15979_v12 = vcombine.high %v8303_v57, %v8307_v54  ;;  %v15978_v7 = vcombine.low %v8303_v57, %v8307_v54  ;;  %v8343_v42 = vld [vmem:[%s24478_s9 + $0x190] sm:$0xff] }
 0x8ef   :  { %v15981_v32 = vcombine.high %v8304_v56, %v8308_v10  ;;  %v15980_v58 = vcombine.low %v8304_v56, %v8308_v10  ;;  %v8351_v57 = vld [vmem:[%s24478_s9 + $0x1d0] sm:$0xff]  ;;  %v8352_v56 = vld [vmem:[%s24478_s9 + $0x1d8] sm:$0xff] }
 0x8f0   :  { %v8355_v54 = vld [vmem:[%s24478_s9 + $0x1f0] sm:$0xff]  ;;  %v8356_v10 = vld [vmem:[%s24478_s9 + $0x1f8] sm:$0xff] }
 0x8f1   :  { %11553 = vmatpush1.bf16.msra.mxu1 %v16438_v41  ;;  %11717 = vmatpush1.bf16.msra.mxu0 %v16440_v27  ;;  %v8311_v41 = vld [vmem:[%s24478_s9 + $0x90] sm:$0xff] }
 0x8f2   :  { %11554 = vmatprep.subr.bf16.mxu1 %v16447_v3  ;;  %11718 = vmatprep.subr.bf16.mxu0 %v16449_v37  ;;  %v8315_v27 = vld [vmem:[%s24478_s9 + $0xb0] sm:$0xff]  ;;  %v8312_v3 = vld [vmem:[%s24478_s9 + $0x98] sm:$0xff] }
 0x8f3   :  { %v8316_v37 = vld [vmem:[%s24478_s9 + $0xb8] sm:$0xff]  ;;  %v15987_v26 = vcombine.high %v8311_v41, %v8315_v27 }
 0x8f4   :  { %v15989_v21 = vcombine.high %v8312_v3, %v8316_v37  ;;  %v15988_v25 = vcombine.low %v8312_v3, %v8316_v37  ;;  %v8360_v3 = vld [vmem:[%s24478_s9 + $0x218] sm:$0xff] }
 0x8f5   :  { %11555 = vmatpush1.bf16.msra.mxu1 %v16446_v18  ;;  %11719 = vmatpush1.bf16.msra.mxu0 %v16448_v53  ;;  %v8319_v18 = vld [vmem:[%s24478_s9 + $0xd0] sm:$0xff]  ;;  %v8364_v37 = vld [vmem:[%s24478_s9 + $0x238] sm:$0xff] }
 0x8f6   :  { %11556 = vmatprep.subr.bf16.mxu1 %v16455_v33  ;;  %11720 = vmatprep.subr.bf16.mxu0 %v16457_v28  ;;  %v8323_v53 = vld [vmem:[%s24478_s9 + $0xf0] sm:$0xff]  ;;  %v8320_v33 = vld [vmem:[%s24478_s9 + $0xd8] sm:$0xff]  ;;  %v15986_v28 = vcombine.low %v8311_v41, %v8315_v27 }
 0x8f7   :  { %v15995_v63 = vcombine.high %v8319_v18, %v8323_v53  ;;  %v8359_v41 = vld [vmem:[%s24478_s9 + $0x210] sm:$0xff] }
 0x8f8   :  { %v8363_v27 = vld [vmem:[%s24478_s9 + $0x230] sm:$0xff] }
 0x8f9   :  { %11557 = vmatpush1.bf16.msra.mxu1 %v16454_v47  ;;  %11721 = vmatpush1.bf16.msra.mxu0 %v16456_v35  ;;  %v8331_v47 = vld [vmem:[%s24478_s9 + $0x130] sm:$0xff]  ;;  %v8328_v35 = vld [vmem:[%s24478_s9 + $0x118] sm:$0xff] }
 0x8fa   :  { %11558 = vmatprep.subr.bf16.mxu1 %v16463_v8  ;;  %11722 = vmatprep.subr.bf16.mxu0 %v16465_v46  ;;  %v15994_v8 = vcombine.low %v8319_v18, %v8323_v53  ;;  %v16003_v9 = vcombine.high %v8327_v36, %v8331_v47  ;;  %v16005_v52 = vcombine.high %v8328_v35, %v8332_v13  ;;  %v8367_v18 = vld [vmem:[%s24478_s9 + $0x250] sm:$0xff] }
 0x8fb   :  { %v16002_v31 = vcombine.low %v8327_v36, %v8331_v47  ;;  %v8371_v53 = vld [vmem:[%s24478_s9 + $0x270] sm:$0xff] }
 0x8fc   :  { %v8375_v36 = vld [vmem:[%s24478_s9 + $0x290] sm:$0xff] }
 0x8fd   :  { %11559 = vmatpush1.bf16.msra.mxu1 %v16462_v24  ;;  %11723 = vmatpush1.bf16.msra.mxu0 %v16464_v16  ;;  %v8336_v24 = vld [vmem:[%s24478_s9 + $0x158] sm:$0xff]  ;;  %v8379_v47 = vld [vmem:[%s24478_s9 + $0x2b0] sm:$0xff] }
 0x8fe   :  { %11560 = vmatprep.subr.bf16.mxu1 %v16471_v4  ;;  %11724 = vmatprep.subr.bf16.mxu0 %v16473_v17  ;;  %v8340_v16 = vld [vmem:[%s24478_s9 + $0x178] sm:$0xff]  ;;  %v16004_v4 = vcombine.low %v8328_v35, %v8332_v13  ;;  %v16011_v17 = vcombine.high %v8335_v6, %v8339_v60 }
 0x8ff   :  { %v16013_v29 = vcombine.high %v8336_v24, %v8340_v16  ;;  %v16012_v62 = vcombine.low %v8336_v24, %v8340_v16  ;;  %v8376_v35 = vld [vmem:[%s24478_s9 + $0x298] sm:$0xff] }
 0x900   :  { %v8380_v13 = vld [vmem:[%s24478_s9 + $0x2b8] sm:$0xff] }
 0x901   :  { %11561 = vmatpush1.bf16.msra.mxu1 %v16470_v23  ;;  %11725 = vmatpush1.bf16.msra.mxu0 %v16472_v50  ;;  %v8348_v23 = vld [vmem:[%s24478_s9 + $0x1b8] sm:$0xff]  ;;  %v16010_v50 = vcombine.low %v8335_v6, %v8339_v60  ;;  %v8383_v6 = vld [vmem:[%s24478_s9 + $0x2d0] sm:$0xff] }
 0x902   :  { %11735 = vmatprep.subr.bf16.mxu1 %v15971_v20  ;;  %11899 = vmatprep.subr.bf16.mxu0 %v15973_v0  ;;  %v16019_v20 = vcombine.high %v8343_v42, %v8347_v19  ;;  %v16021_v0 = vcombine.high %v8344_v30, %v8348_v23  ;;  %v8387_v60 = vld [vmem:[%s24478_s9 + $0x2f0] sm:$0xff]  ;;  %v8384_v24 = vld [vmem:[%s24478_s9 + $0x2d8] sm:$0xff] }
 0x903   :  { %v8388_v16 = vld [vmem:[%s24478_s9 + $0x2f8] sm:$0xff] }
 0x904   :  { %11563 = vmatmul.mubr.bf16.vlgmr.msra.gmra.mrb[12].mxu1 %v23386_v44  ;;  %11727 = vmatmul.mubr.bf16.vlgmr.msra.gmra.mrb[20].mxu0 %v23386_v44 }
 0x905   :  { %11736 = vmatpush1.bf16.msra.mxu1 %v15970_v11  ;;  %11767 = vmatprep.mubr.bf16.mxu1 %v22573_v61  ;;  %v16018_v11 = vcombine.low %v8343_v42, %v8347_v19  ;;  %v8391_v42 = vld [vmem:[%s24478_s9 + $0x310] sm:$0xff] }
 0x906   :  { %11900 = vmatpush1.bf16.msra.mxu0 %v15972_v15  ;;  %11931 = vmatprep.mubr.bf16.mxu0 %v22573_v61  ;;  %v8324_v61 = vld [vmem:[%s24478_s9 + $0xf8] sm:$0xff]  ;;  %v16020_v15 = vcombine.low %v8344_v30, %v8348_v23  ;;  %v8395_v19 = vld [vmem:[%s24478_s9 + $0x330] sm:$0xff] }
 0x907   :  { %11737 = vmatprep.subr.bf16.mxu1 %v15979_v12  ;;  %11901 = vmatprep.subr.bf16.mxu0 %v15981_v32  ;;  %v15997_v49 = vcombine.high %v8320_v33, %v8324_v61  ;;  %v15996_v46 = vcombine.low %v8320_v33, %v8324_v61  ;;  %v16027_v12 = vcombine.high %v8351_v57, %v8355_v54  ;;  %v8368_v33 = vld [vmem:[%s24478_s9 + $0x258] sm:$0xff] }
 0x908   :  { %v16029_v32 = vcombine.high %v8352_v56, %v8356_v10  ;;  %v8372_v61 = vld [vmem:[%s24478_s9 + $0x278] sm:$0xff] }
 0x909   :  { %11738 = vmatpush1.bf16.msra.mxu1 %v15978_v7  ;;  %v16026_v7 = vcombine.low %v8351_v57, %v8355_v54  ;;  %v8392_v30 = vld [vmem:[%s24478_s9 + $0x318] sm:$0xff]  ;;  %v8399_v57 = vld [vmem:[%s24478_s9 + $0x350] sm:$0xff] }
 0x90a   :  { %11902 = vmatpush1.bf16.msra.mxu0 %v15980_v58  ;;  %11739 = vmatprep.subr.bf16.mxu1 %v15987_v26  ;;  %v16028_v58 = vcombine.low %v8352_v56, %v8356_v10  ;;  %v16035_v26 = vcombine.high %v8359_v41, %v8363_v27  ;;  %v8396_v23 = vld [vmem:[%s24478_s9 + $0x338] sm:$0xff]  ;;  %v8403_v54 = vld [vmem:[%s24478_s9 + $0x370] sm:$0xff] }
 0x90b   :  { %11903 = vmatprep.subr.bf16.mxu0 %v15989_v21  ;;  %v16037_v21 = vcombine.high %v8360_v3, %v8364_v37  ;;  %v8400_v56 = vld [vmem:[%s24478_s9 + $0x358] sm:$0xff] }
 0x90c   :  { %v8404_v10 = vld [vmem:[%s24478_s9 + $0x378] sm:$0xff] }
 0x90d   :  { %11740 = vmatpush1.bf16.msra.mxu1 %v15986_v28  ;;  %v16034_v28 = vcombine.low %v8359_v41, %v8363_v27  ;;  %v8407_v41 = vld [vmem:[%s24478_s9 + $0x390] sm:$0xff] }
 0x90e   :  { %11904 = vmatpush1.bf16.msra.mxu0 %v15988_v25  ;;  %11741 = vmatprep.subr.bf16.mxu1 %v15995_v63  ;;  %v16036_v25 = vcombine.low %v8360_v3, %v8364_v37  ;;  %v16043_v63 = vcombine.high %v8367_v18, %v8371_v53  ;;  %v8411_v27 = vld [vmem:[%s24478_s9 + $0x3b0] sm:$0xff]  ;;  %v8408_v3 = vld [vmem:[%s24478_s9 + $0x398] sm:$0xff] }
 0x90f   :  { %11905 = vmatprep.subr.bf16.mxu0 %v15997_v49  ;;  %v16045_v49 = vcombine.high %v8368_v33, %v8372_v61  ;;  %v8412_v37 = vld [vmem:[%s24478_s9 + $0x3b8] sm:$0xff] }
 0x911   :  { %11742 = vmatpush1.bf16.msra.mxu1 %v15994_v8  ;;  %v16042_v8 = vcombine.low %v8367_v18, %v8371_v53  ;;  %v8415_v18 = vld [vmem:[%s24478_s9 + $0x3d0] sm:$0xff] }
 0x912   :  { %11906 = vmatpush1.bf16.msra.mxu0 %v15996_v46  ;;  %11743 = vmatprep.subr.bf16.mxu1 %v16003_v9  ;;  %v16044_v46 = vcombine.low %v8368_v33, %v8372_v61  ;;  %v16051_v9 = vcombine.high %v8375_v36, %v8379_v47  ;;  %v8419_v53 = vld [vmem:[%s24478_s9 + $0x3f0] sm:$0xff]  ;;  %v8416_v33 = vld [vmem:[%s24478_s9 + $0x3d8] sm:$0xff] }
 0x913   :  { %11907 = vmatprep.subr.bf16.mxu0 %v16005_v52  ;;  %v16053_v52 = vcombine.high %v8376_v35, %v8380_v13  ;;  %v8420_v61 = vld [vmem:[%s24478_s9 + $0x3f8] sm:$0xff] }
 0x915   :  { %11744 = vmatpush1.bf16.msra.mxu1 %v16002_v31  ;;  %v16050_v31 = vcombine.low %v8375_v36, %v8379_v47  ;;  %v8423_v36 = vld [vmem:[%s24478_s9 + $0x410] sm:$0xff] }
 0x916   :  { %11908 = vmatpush1.bf16.msra.mxu0 %v16004_v4  ;;  %11745 = vmatprep.subr.bf16.mxu1 %v16011_v17  ;;  %v16052_v4 = vcombine.low %v8376_v35, %v8380_v13  ;;  %v16059_v17 = vcombine.high %v8383_v6, %v8387_v60  ;;  %v8427_v47 = vld [vmem:[%s24478_s9 + $0x430] sm:$0xff]  ;;  %v8424_v35 = vld [vmem:[%s24478_s9 + $0x418] sm:$0xff] }
 0x917   :  { %11909 = vmatprep.subr.bf16.mxu0 %v16013_v29  ;;  %v16061_v29 = vcombine.high %v8384_v24, %v8388_v16  ;;  %v8428_v13 = vld [vmem:[%s24478_s9 + $0x438] sm:$0xff] }
 0x919   :  { %11746 = vmatpush1.bf16.msra.mxu1 %v16010_v50  ;;  %v16058_v50 = vcombine.low %v8383_v6, %v8387_v60  ;;  %v8431_v6 = vld [vmem:[%s24478_s9 + $0x450] sm:$0xff] }
 0x91a   :  { %11910 = vmatpush1.bf16.msra.mxu0 %v16012_v62  ;;  %11747 = vmatprep.subr.bf16.mxu1 %v16019_v20  ;;  %v16060_v62 = vcombine.low %v8384_v24, %v8388_v16  ;;  %v16067_v20 = vcombine.high %v8391_v42, %v8395_v19  ;;  %v8435_v60 = vld [vmem:[%s24478_s9 + $0x470] sm:$0xff]  ;;  %v16098_v24 = vcombine.low %v8423_v36, %v8427_v47  ;;  %v8432_v16 = vld [vmem:[%s24478_s9 + $0x458] sm:$0xff] }
 0x91b   :  { %11911 = vmatprep.subr.bf16.mxu0 %v16021_v0  ;;  %v16069_v0 = vcombine.high %v8392_v30, %v8396_v23 }
 0x91d   :  { %11748 = vmatpush1.bf16.msra.mxu1 %v16018_v11  ;;  %v16066_v11 = vcombine.low %v8391_v42, %v8395_v19  ;;  %v8443_v42 = vld [vmem:[%s24478_s9 + $0x4b0] sm:$0xff] }
 0x91e   :  { %11912 = vmatpush1.bf16.msra.mxu0 %v16020_v15  ;;  %11749 = vmatprep.subr.bf16.mxu1 %v16027_v12  ;;  %v16068_v15 = vcombine.low %v8392_v30, %v8396_v23  ;;  %v16075_v12 = vcombine.high %v8399_v57, %v8403_v54  ;;  %v8440_v30 = vld [vmem:[%s24478_s9 + $0x498] sm:$0xff] }
 0x91f   :  { %11913 = vmatprep.subr.bf16.mxu0 %v16029_v32  ;;  %v16077_v32 = vcombine.high %v8400_v56, %v8404_v10  ;;  %v8444_v23 = vld [vmem:[%s24478_s9 + $0x4b8] sm:$0xff] }
 0x921   :  { %11750 = vmatpush1.bf16.msra.mxu1 %v16026_v7  ;;  %v16074_v7 = vcombine.low %v8399_v57, %v8403_v54  ;;  %v8447_v57 = vld [vmem:[%s24478_s9 + $0x4d0] sm:$0xff] }
 0x922   :  { %11914 = vmatpush1.bf16.msra.mxu0 %v16028_v58  ;;  %11751 = vmatprep.subr.bf16.mxu1 %v16035_v26  ;;  %v16076_v58 = vcombine.low %v8400_v56, %v8404_v10  ;;  %v16083_v26 = vcombine.high %v8407_v41, %v8411_v27  ;;  %v8451_v54 = vld [vmem:[%s24478_s9 + $0x4f0] sm:$0xff]  ;;  %v8452_v56 = vld [vmem:[%s24478_s9 + $0x4f8] sm:$0xff]  ;;  %v16116_v10 = vcombine.low %v8440_v30, %v8444_v23 }
 0x923   :  { %11915 = vmatprep.subr.bf16.mxu0 %v16037_v21  ;;  %v16085_v21 = vcombine.high %v8408_v3, %v8412_v37 }
 0x925   :  { %11752 = vmatpush1.bf16.msra.mxu1 %v16034_v28  ;;  %v16082_v28 = vcombine.low %v8407_v41, %v8411_v27  ;;  %v8456_v41 = vld [vmem:[%s24478_s9 + $0x518] sm:$0xff] }
 0x926   :  { %11916 = vmatpush1.bf16.msra.mxu0 %v16036_v25  ;;  %11753 = vmatprep.subr.bf16.mxu1 %v16043_v63  ;;  %v16084_v25 = vcombine.low %v8408_v3, %v8412_v37  ;;  %v16091_v63 = vcombine.high %v8415_v18, %v8419_v53  ;;  %v8460_v27 = vld [vmem:[%s24478_s9 + $0x538] sm:$0xff]  ;;  %v16122_v3 = vcombine.low %v8447_v57, %v8451_v54 }
 0x927   :  { %11917 = vmatprep.subr.bf16.mxu0 %v16045_v49  ;;  %v16093_v49 = vcombine.high %v8416_v33, %v8420_v61 }
 0x929   :  { %11754 = vmatpush1.bf16.msra.mxu1 %v16042_v8  ;;  %v16090_v8 = vcombine.low %v8415_v18, %v8419_v53  ;;  %v8464_v18 = vld [vmem:[%s24478_s9 + $0x558] sm:$0xff] }
 0x92a   :  { %11918 = vmatpush1.bf16.msra.mxu0 %v16044_v46  ;;  %11755 = vmatprep.subr.bf16.mxu1 %v16051_v9  ;;  %v16092_v46 = vcombine.low %v8416_v33, %v8420_v61  ;;  %v16099_v9 = vcombine.high %v8423_v36, %v8427_v47  ;;  %v8468_v53 = vld [vmem:[%s24478_s9 + $0x578] sm:$0xff]  ;;  %v16132_v61 = vcombine.low %v8456_v41, %v8460_v27 }
 0x92b   :  { %11919 = vmatprep.subr.bf16.mxu0 %v16053_v52  ;;  %v16101_v52 = vcombine.high %v8424_v35, %v8428_v13  ;;  %v8472_v36 = vld [vmem:[%s24478_s9 + $0x598] sm:$0xff] }
 0x92c   :  { %v8476_v47 = vld [vmem:[%s24478_s9 + $0x5b8] sm:$0xff] }
 0x92d   :  { %11756 = vmatpush1.bf16.msra.mxu1 %v16050_v31  ;;  %v8436_v31 = vld [vmem:[%s24478_s9 + $0x478] sm:$0xff] }
 0x92e   :  { %11920 = vmatpush1.bf16.msra.mxu0 %v16052_v4  ;;  %11757 = vmatprep.subr.bf16.mxu1 %v16059_v17  ;;  %v16100_v4 = vcombine.low %v8424_v35, %v8428_v13  ;;  %v16107_v17 = vcombine.high %v8431_v6, %v8435_v60  ;;  %v16109_v19 = vcombine.high %v8432_v16, %v8436_v31 }
 0x92f   :  { %11921 = vmatprep.subr.bf16.mxu0 %v16061_v29  ;;  %v8439_v29 = vld [vmem:[%s24478_s9 + $0x490] sm:$0xff]  ;;  %v16140_v13 = vcombine.low %v8464_v18, %v8468_v53 }
 0x931   :  { %11758 = vmatpush1.bf16.msra.mxu1 %v16058_v50  ;;  %v16106_v50 = vcombine.low %v8431_v6, %v8435_v60  ;;  %v8480_v6 = vld [vmem:[%s24478_s9 + $0x5d8] sm:$0xff] }
 0x932   :  { %11922 = vmatpush1.bf16.msra.mxu0 %v16060_v62  ;;  %11759 = vmatprep.subr.bf16.mxu1 %v16067_v20  ;;  %v16108_v62 = vcombine.low %v8432_v16, %v8436_v31  ;;  %v16115_v20 = vcombine.high %v8439_v29, %v8443_v42  ;;  %v8484_v60 = vld [vmem:[%s24478_s9 + $0x5f8] sm:$0xff]  ;;  %v16148_v16 = vcombine.low %v8472_v36, %v8476_v47 }
 0x933   :  { %11923 = vmatprep.subr.bf16.mxu0 %v16069_v0  ;;  %v16117_v0 = vcombine.high %v8440_v30, %v8444_v23  ;;  %v16156_v23 = vcombine.low %v8480_v6, %v8484_v60 }
 0x935   :  { %11760 = vmatpush1.bf16.msra.mxu1 %v16066_v11  ;;  %v16123_v11 = vcombine.high %v8447_v57, %v8451_v54  ;;  %v8496_v57 = vld [vmem:[%s24478_s9 + $0x658] sm:$0xff] }
 0x936   :  { %11924 = vmatpush1.bf16.msra.mxu0 %v16068_v15  ;;  %11761 = vmatprep.subr.bf16.mxu1 %v16075_v12  ;;  %v8455_v12 = vld [vmem:[%s24478_s9 + $0x510] sm:$0xff]  ;;  %v8500_v54 = vld [vmem:[%s24478_s9 + $0x678] sm:$0xff] }
 0x937   :  { %11925 = vmatprep.subr.bf16.mxu0 %v16077_v32  ;;  %v8459_v32 = vld [vmem:[%s24478_s9 + $0x530] sm:$0xff] }
 0x938   :  { %v16130_v33 = vcombine.low %v8455_v12, %v8459_v32 }
 0x939   :  { %11762 = vmatpush1.bf16.msra.mxu1 %v16074_v7  ;;  %v16131_v7 = vcombine.high %v8455_v12, %v8459_v32  ;;  %v8504_v12 = vld [vmem:[%s24478_s9 + $0x698] sm:$0xff] }
 0x93a   :  { %11926 = vmatpush1.bf16.msra.mxu0 %v16076_v58  ;;  %11763 = vmatprep.subr.bf16.mxu1 %v16083_v26  ;;  %v16133_v58 = vcombine.high %v8456_v41, %v8460_v27  ;;  %v8463_v26 = vld [vmem:[%s24478_s9 + $0x550] sm:$0xff]  ;;  %v8508_v32 = vld [vmem:[%s24478_s9 + $0x6b8] sm:$0xff]  ;;  %v16172_v27 = vcombine.low %v8496_v57, %v8500_v54 }
 0x93b   :  { %11927 = vmatprep.subr.bf16.mxu0 %v16085_v21  ;;  %v8467_v21 = vld [vmem:[%s24478_s9 + $0x570] sm:$0xff] }
 0x93c   :  { %v16138_v35 = vcombine.low %v8463_v26, %v8467_v21 }
 0x93d   :  { %11764 = vmatpush1.bf16.msra.mxu1 %v16082_v28  ;;  %v16139_v28 = vcombine.high %v8463_v26, %v8467_v21  ;;  %v8512_v26 = vld [vmem:[%s24478_s9 + $0x6d8] sm:$0xff] }
 0x93e   :  { %11928 = vmatpush1.bf16.msra.mxu0 %v16084_v25  ;;  %11765 = vmatprep.subr.bf16.mxu1 %v16091_v63  ;;  %v16141_v25 = vcombine.high %v8464_v18, %v8468_v53  ;;  %v8471_v63 = vld [vmem:[%s24478_s9 + $0x590] sm:$0xff]  ;;  %v8516_v21 = vld [vmem:[%s24478_s9 + $0x6f8] sm:$0xff]  ;;  %v16180_v53 = vcombine.low %v8504_v12, %v8508_v32 }
 0x93f   :  { %11929 = vmatprep.subr.bf16.mxu0 %v16093_v49  ;;  %v8475_v49 = vld [vmem:[%s24478_s9 + $0x5b0] sm:$0xff] }
 0x941   :  { %11766 = vmatpush1.bf16.msra.mxu1 %v16090_v8  ;;  %v16147_v8 = vcombine.high %v8471_v63, %v8475_v49 }
 0x942   :  { %11930 = vmatpush1.bf16.msra.mxu0 %v16092_v46  ;;  %11776 = vmatprep.subr.bf16.mxu1 %v16099_v9  ;;  %v16149_v46 = vcombine.high %v8472_v36, %v8476_v47  ;;  %v8479_v9 = vld [vmem:[%s24478_s9 + $0x5d0] sm:$0xff]  ;;  %v16188_v47 = vcombine.low %v8512_v26, %v8516_v21 }
 0x943   :  { %11940 = vmatprep.subr.bf16.mxu0 %v16101_v52  ;;  %v8483_v52 = vld [vmem:[%s24478_s9 + $0x5f0] sm:$0xff] }
 0x944   :  { %11768 = vmatmul.mubr.bf16.vlgmr.msra.gmra.mrb[16].mxu1 %v22575_v59  ;;  %v16155_v31 = vcombine.high %v8479_v9, %v8483_v52  ;;  %v16154_v30 = vcombine.low %v8479_v9, %v8483_v52  ;;  %v8528_v9 = vld [vmem:[%s24478_s9 + $0x758] sm:$0xff] }
 0x945   :  { %11932 = vmatmul.mubr.bf16.vlgmr.msra.gmra.mrb[24].mxu0 %v22575_v59  ;;  %11777 = vmatpush1.bf16.msra.mxu1 %v16098_v24  ;;  %v8448_v59 = vld [vmem:[%s24478_s9 + $0x4d8] sm:$0xff]  ;;  %v16146_v24 = vcombine.low %v8471_v63, %v8475_v49 }
 0x946   :  { %11808 = vmatprep.mubr.bf16.mxu1 %v22896_v55  ;;  %11941 = vmatpush1.bf16.msra.mxu0 %v16100_v4  ;;  %v16125_v15 = vcombine.high %v8448_v59, %v8452_v56  ;;  %v16124_v37 = vcombine.low %v8448_v59, %v8452_v56  ;;  %v16157_v4 = vcombine.high %v8480_v6, %v8484_v60  ;;  %v8520_v63 = vld [vmem:[%s24478_s9 + $0x718] sm:$0xff] }
 0x947   :  { %11972 = vmatprep.mubr.bf16.mxu0 %v22896_v55  ;;  %11778 = vmatprep.subr.bf16.mxu1 %v16107_v17  ;;  %v16114_v55 = vcombine.low %v8439_v29, %v8443_v42  ;;  %v8487_v17 = vld [vmem:[%s24478_s9 + $0x610] sm:$0xff]  ;;  %v8488_v42 = vld [vmem:[%s24478_s9 + $0x618] sm:$0xff] }
 0x948   :  { %11942 = vmatprep.subr.bf16.mxu0 %v16109_v19  ;;  %v8491_v29 = vld [vmem:[%s24478_s9 + $0x630] sm:$0xff]  ;;  %v8492_v19 = vld [vmem:[%s24478_s9 + $0x638] sm:$0xff] }
 0x949   :  { %11779 = vmatpush1.bf16.msra.mxu1 %v16106_v50  ;;  %v16163_v50 = vcombine.high %v8487_v17, %v8491_v29  ;;  %v16162_v59 = vcombine.low %v8487_v17, %v8491_v29  ;;  %v16164_v56 = vcombine.low %v8488_v42, %v8492_v19  ;;  %v8524_v49 = vld [vmem:[%s24478_s9 + $0x738] sm:$0xff] }
 0x94a   :  { %11943 = vmatpush1.bf16.msra.mxu0 %v16108_v62  ;;  %11780 = vmatprep.subr.bf16.mxu1 %v16115_v20  ;;  %v16165_v62 = vcombine.high %v8488_v42, %v8492_v19  ;;  %v8495_v20 = vld [vmem:[%s24478_s9 + $0x650] sm:$0xff]  ;;  %v8532_v52 = vld [vmem:[%s24478_s9 + $0x778] sm:$0xff]  ;;  %v16196_v60 = vcombine.low %v8520_v63, %v8524_v49 }
 0x94b   :  { %11944 = vmatprep.subr.bf16.mxu0 %v16117_v0  ;;  %v8499_v0 = vld [vmem:[%s24478_s9 + $0x670] sm:$0xff]  ;;  %v8536_v17 = vld [vmem:[%s24478_s9 + $0x798] sm:$0xff]  ;;  %v16204_v19 = vcombine.low %v8528_v9, %v8532_v52 }
 0x94c   :  { %v16170_v41 = vcombine.low %v8495_v20, %v8499_v0  ;;  %v8540_v29 = vld [vmem:[%s24478_s9 + $0x7b8] sm:$0xff] }
 0x94d   :  { %11781 = vmatpush1.bf16.msra.mxu1 %v16114_v55  ;;  %v16171_v55 = vcombine.high %v8495_v20, %v8499_v0  ;;  %v8544_v20 = vld [vmem:[%s24478_s9 + $0x7d8] sm:$0xff] }
 0x94e   :  { %11945 = vmatpush1.bf16.msra.mxu0 %v16116_v10  ;;  %11782 = vmatprep.subr.bf16.mxu1 %v16123_v11  ;;  %v16173_v10 = vcombine.high %v8496_v57, %v8500_v54  ;;  %v8503_v11 = vld [vmem:[%s24478_s9 + $0x690] sm:$0xff]  ;;  %v8548_v0 = vld [vmem:[%s24478_s9 + $0x7f8] sm:$0xff]  ;;  %v16212_v54 = vcombine.low %v8536_v17, %v8540_v29 }
 0x94f   :  { %11946 = vmatprep.subr.bf16.mxu0 %v16125_v15  ;;  %v8507_v15 = vld [vmem:[%s24478_s9 + $0x6b0] sm:$0xff] }
 0x950   :  { %v16178_v18 = vcombine.low %v8503_v11, %v8507_v15 }
 0x951   :  { %11783 = vmatpush1.bf16.msra.mxu1 %v16122_v3  ;;  %v16179_v3 = vcombine.high %v8503_v11, %v8507_v15  ;;  %v8552_v11 = vld [vmem:[%s24478_s9 + $0x818] sm:$0xff] }
 0x952   :  { %11947 = vmatpush1.bf16.msra.mxu0 %v16124_v37  ;;  %11784 = vmatprep.subr.bf16.mxu1 %v16131_v7  ;;  %v16181_v37 = vcombine.high %v8504_v12, %v8508_v32  ;;  %v8511_v7 = vld [vmem:[%s24478_s9 + $0x6d0] sm:$0xff]  ;;  %v8556_v15 = vld [vmem:[%s24478_s9 + $0x838] sm:$0xff]  ;;  %v16220_v32 = vcombine.low %v8544_v20, %v8548_v0 }
 0x953   :  { %11948 = vmatprep.subr.bf16.mxu0 %v16133_v58  ;;  %v8515_v58 = vld [vmem:[%s24478_s9 + $0x6f0] sm:$0xff] }
 0x954   :  { %v16186_v36 = vcombine.low %v8511_v7, %v8515_v58 }
 0x955   :  { %11785 = vmatpush1.bf16.msra.mxu1 %v16130_v33  ;;  %v16187_v33 = vcombine.high %v8511_v7, %v8515_v58  ;;  %v8560_v58 = vld [vmem:[%s24478_s9 + $0x858] sm:$0xff] }
 0x956   :  { %11949 = vmatpush1.bf16.msra.mxu0 %v16132_v61  ;;  %11786 = vmatprep.subr.bf16.mxu1 %v16139_v28  ;;  %v16189_v61 = vcombine.high %v8512_v26, %v8516_v21  ;;  %v8519_v28 = vld [vmem:[%s24478_s9 + $0x710] sm:$0xff]  ;;  %v8564_v26 = vld [vmem:[%s24478_s9 + $0x878] sm:$0xff]  ;;  %v16228_v21 = vcombine.low %v8552_v11, %v8556_v15 }
 0x957   :  { %11950 = vmatprep.subr.bf16.mxu0 %v16141_v25  ;;  %v8523_v25 = vld [vmem:[%s24478_s9 + $0x730] sm:$0xff] }
 0x958   :  { %v16194_v6 = vcombine.low %v8519_v28, %v8523_v25 }
 0x959   :  { %11787 = vmatpush1.bf16.msra.mxu1 %v16138_v35  ;;  %v16195_v35 = vcombine.high %v8519_v28, %v8523_v25  ;;  %v8568_v28 = vld [vmem:[%s24478_s9 + $0x898] sm:$0xff] }
 0x95a   :  { %11951 = vmatpush1.bf16.msra.mxu0 %v16140_v13  ;;  %11788 = vmatprep.subr.bf16.mxu1 %v16147_v8  ;;  %v16197_v13 = vcombine.high %v8520_v63, %v8524_v49  ;;  %v8527_v8 = vld [vmem:[%s24478_s9 + $0x750] sm:$0xff]  ;;  %v8572_v25 = vld [vmem:[%s24478_s9 + $0x8b8] sm:$0xff]  ;;  %v16236_v49 = vcombine.low %v8560_v58, %v8564_v26 }
 0x95b   :  { %11952 = vmatprep.subr.bf16.mxu0 %v16149_v46  ;;  %v8531_v46 = vld [vmem:[%s24478_s9 + $0x770] sm:$0xff] }
 0x95c   :  { %v16202_v42 = vcombine.low %v8527_v8, %v8531_v46 }
 0x95d   :  { %11789 = vmatpush1.bf16.msra.mxu1 %v16146_v24  ;;  %v16203_v24 = vcombine.high %v8527_v8, %v8531_v46  ;;  %v8580_v8 = vld [vmem:[%s24478_s9 + $0x8f8] sm:$0xff]  ;;  %v16244_v46 = vcombine.low %v8568_v28, %v8572_v25 }
 0x95e   :  { %11953 = vmatpush1.bf16.msra.mxu0 %v16148_v16  ;;  %11790 = vmatprep.subr.bf16.mxu1 %v16155_v31  ;;  %v16205_v16 = vcombine.high %v8528_v9, %v8532_v52  ;;  %v8535_v31 = vld [vmem:[%s24478_s9 + $0x790] sm:$0xff] }
 0x95f   :  { %11954 = vmatprep.subr.bf16.mxu0 %v16157_v4  ;;  %v8539_v4 = vld [vmem:[%s24478_s9 + $0x7b0] sm:$0xff] }
 0x960   :  { %v16210_v57 = vcombine.low %v8535_v31, %v8539_v4 }
 0x961   :  { %11791 = vmatpush1.bf16.msra.mxu1 %v16154_v30  ;;  %v16211_v30 = vcombine.high %v8535_v31, %v8539_v4 }
 0x962   :  { %11955 = vmatpush1.bf16.msra.mxu0 %v16156_v23  ;;  %11792 = vmatprep.subr.bf16.mxu1 %v16163_v50  ;;  %v16213_v23 = vcombine.high %v8536_v17, %v8540_v29  ;;  %v8543_v50 = vld [vmem:[%s24478_s9 + $0x7d0] sm:$0xff] }
 0x963   :  { %11956 = vmatprep.subr.bf16.mxu0 %v16165_v62  ;;  %v8547_v62 = vld [vmem:[%s24478_s9 + $0x7f0] sm:$0xff] }
 0x964   :  { %v16218_v12 = vcombine.low %v8543_v50, %v8547_v62 }
 0x965   :  { %11793 = vmatpush1.bf16.msra.mxu1 %v16162_v59  ;;  %v16219_v59 = vcombine.high %v8543_v50, %v8547_v62 }
 0x966   :  { %11957 = vmatpush1.bf16.msra.mxu0 %v16164_v56  ;;  %11794 = vmatprep.subr.bf16.mxu1 %v16171_v55  ;;  %v16221_v56 = vcombine.high %v8544_v20, %v8548_v0  ;;  %v8551_v55 = vld [vmem:[%s24478_s9 + $0x810] sm:$0xff] }
 0x967   :  { %11958 = vmatprep.subr.bf16.mxu0 %v16173_v10  ;;  %v8555_v10 = vld [vmem:[%s24478_s9 + $0x830] sm:$0xff] }
 0x968   :  { %v16226_v7 = vcombine.low %v8551_v55, %v8555_v10 }
 0x969   :  { %11795 = vmatpush1.bf16.msra.mxu1 %v16170_v41  ;;  %v16227_v41 = vcombine.high %v8551_v55, %v8555_v10 }
 0x96a   :  { %11959 = vmatpush1.bf16.msra.mxu0 %v16172_v27  ;;  %11796 = vmatprep.subr.bf16.mxu1 %v16179_v3  ;;  %v16229_v27 = vcombine.high %v8552_v11, %v8556_v15  ;;  %v8559_v3 = vld [vmem:[%s24478_s9 + $0x850] sm:$0xff] }
 0x96b   :  { %11960 = vmatprep.subr.bf16.mxu0 %v16181_v37  ;;  %v8563_v37 = vld [vmem:[%s24478_s9 + $0x870] sm:$0xff] }
 0x96c   :  { %v16234_v63 = vcombine.low %v8559_v3, %v8563_v37 }
 0x96d   :  { %11797 = vmatpush1.bf16.msra.mxu1 %v16178_v18  ;;  %v16235_v18 = vcombine.high %v8559_v3, %v8563_v37 }
 0x96e   :  { %11961 = vmatpush1.bf16.msra.mxu0 %v16180_v53  ;;  %11798 = vmatprep.subr.bf16.mxu1 %v16187_v33  ;;  %v8567_v53 = vld [vmem:[%s24478_s9 + $0x890] sm:$0xff] }
 0x96f   :  { %11962 = vmatprep.subr.bf16.mxu0 %v16189_v61  ;;  %v8571_v33 = vld [vmem:[%s24478_s9 + $0x8b0] sm:$0xff]  ;;  %v16237_v61 = vcombine.high %v8560_v58, %v8564_v26 }
 0x970   :  { %v8615_v26 = vld [vmem:[%s24478_s9 + $0xa10] sm:$0xff] }
 0x971   :  { %11799 = vmatpush1.bf16.msra.mxu1 %v16186_v36  ;;  %v16243_v36 = vcombine.high %v8567_v53, %v8571_v33 }
 0x972   :  { %11963 = vmatpush1.bf16.msra.mxu0 %v16188_v47  ;;  %11800 = vmatprep.subr.bf16.mxu1 %v16195_v35  ;;  %v16245_v47 = vcombine.high %v8568_v28, %v8572_v25  ;;  %v8575_v35 = vld [vmem:[%s24478_s9 + $0x8d0] sm:$0xff] }
 0x973   :  { %11964 = vmatprep.subr.bf16.mxu0 %v16197_v13  ;;  %v8579_v13 = vld [vmem:[%s24478_s9 + $0x8f0] sm:$0xff] }
 0x974   :  { %v16251_v9 = vcombine.high %v8575_v35, %v8579_v13  ;;  %v16250_v31 = vcombine.low %v8575_v35, %v8579_v13 }
 0x975   :  { %11801 = vmatpush1.bf16.msra.mxu1 %v16194_v6  ;;  %v8583_v6 = vld [vmem:[%s24478_s9 + $0x910] sm:$0xff] }
 0x976   :  { %11965 = vmatpush1.bf16.msra.mxu0 %v16196_v60  ;;  %11802 = vmatprep.subr.bf16.mxu1 %v16203_v24  ;;  %v8587_v60 = vld [vmem:[%s24478_s9 + $0x930] sm:$0xff]  ;;  %v8584_v24 = vld [vmem:[%s24478_s9 + $0x918] sm:$0xff] }
 0x977   :  { %11966 = vmatprep.subr.bf16.mxu0 %v16205_v16  ;;  %v8588_v16 = vld [vmem:[%s24478_s9 + $0x938] sm:$0xff]  ;;  %v16259_v17 = vcombine.high %v8583_v6, %v8587_v60  ;;  %v16258_v50 = vcombine.low %v8583_v6, %v8587_v60 }
 0x978   :  { %v16261_v29 = vcombine.high %v8584_v24, %v8588_v16  ;;  %v16260_v62 = vcombine.low %v8584_v24, %v8588_v16 }
 0x979   :  { %11803 = vmatpush1.bf16.msra.mxu1 %v16202_v42  ;;  %v8591_v42 = vld [vmem:[%s24478_s9 + $0x950] sm:$0xff] }
 0x97a   :  { %11967 = vmatpush1.bf16.msra.mxu0 %v16204_v19  ;;  %11804 = vmatprep.subr.bf16.mxu1 %v16211_v30  ;;  %v8595_v19 = vld [vmem:[%s24478_s9 + $0x970] sm:$0xff]  ;;  %v8592_v30 = vld [vmem:[%s24478_s9 + $0x958] sm:$0xff] }
 0x97b   :  { %11968 = vmatprep.subr.bf16.mxu0 %v16213_v23  ;;  %v8596_v23 = vld [vmem:[%s24478_s9 + $0x978] sm:$0xff]  ;;  %v16267_v20 = vcombine.high %v8591_v42, %v8595_v19  ;;  %v16266_v55 = vcombine.low %v8591_v42, %v8595_v19 }
 0x97c   :  { %v16269_v0 = vcombine.high %v8592_v30, %v8596_v23  ;;  %v16268_v10 = vcombine.low %v8592_v30, %v8596_v23 }
 0x97d   :  { %11805 = vmatpush1.bf16.msra.mxu1 %v16210_v57  ;;  %v8599_v57 = vld [vmem:[%s24478_s9 + $0x990] sm:$0xff] }
 0x97e   :  { %11969 = vmatpush1.bf16.msra.mxu0 %v16212_v54  ;;  %11806 = vmatprep.subr.bf16.mxu1 %v16219_v59  ;;  %v8603_v54 = vld [vmem:[%s24478_s9 + $0x9b0] sm:$0xff]  ;;  %v8600_v59 = vld [vmem:[%s24478_s9 + $0x998] sm:$0xff] }
 0x97f   :  { %11970 = vmatprep.subr.bf16.mxu0 %v16221_v56  ;;  %v8604_v56 = vld [vmem:[%s24478_s9 + $0x9b8] sm:$0xff]  ;;  %v16275_v11 = vcombine.high %v8599_v57, %v8603_v54  ;;  %v16274_v3 = vcombine.low %v8599_v57, %v8603_v54 }
 0x980   :  { %v16277_v15 = vcombine.high %v8600_v59, %v8604_v56  ;;  %v16276_v37 = vcombine.low %v8600_v59, %v8604_v56 }
 0x981   :  { %11807 = vmatpush1.bf16.msra.mxu1 %v16218_v12  ;;  %v8607_v12 = vld [vmem:[%s24478_s9 + $0x9d0] sm:$0xff] }
 0x982   :  { %11971 = vmatpush1.bf16.msra.mxu0 %v16220_v32  ;;  %11817 = vmatprep.subr.bf16.mxu1 %v16227_v41  ;;  %v8611_v32 = vld [vmem:[%s24478_s9 + $0x9f0] sm:$0xff]  ;;  %v8608_v41 = vld [vmem:[%s24478_s9 + $0x9d8] sm:$0xff] }
 0x983   :  { %11981 = vmatprep.subr.bf16.mxu0 %v16229_v27  ;;  %v8612_v27 = vld [vmem:[%s24478_s9 + $0x9f8] sm:$0xff] }
 0x984   :  { %11809 = vmatmul.mubr.bf16.vlgmr.msra.gmra.mrb[16].mxu1 %v22903_v5  ;;  %v16285_v58 = vcombine.high %v8608_v41, %v8612_v27 }
 0x985   :  { %11973 = vmatmul.mubr.bf16.vlgmr.msra.gmra.mrb[24].mxu0 %v22903_v5  ;;  %11818 = vmatpush1.bf16.msra.mxu1 %v16226_v7  ;;  %v8576_v5 = vld [vmem:[%s24478_s9 + $0x8d8] sm:$0xff]  ;;  %v16283_v7 = vcombine.high %v8607_v12, %v8611_v32 }
 0x986   :  { %11849 = vmatprep.mubr.bf16.mxu1 %v23174_v1  ;;  %11982 = vmatpush1.bf16.msra.mxu0 %v16228_v21  ;;  %v16253_v52 = vcombine.high %v8576_v5, %v8580_v8  ;;  %v16252_v4 = vcombine.low %v8576_v5, %v8580_v8  ;;  %v8619_v21 = vld [vmem:[%s24478_s9 + $0xa30] sm:$0xff] }
 0x987   :  { %12013 = vmatprep.mubr.bf16.mxu0 %v23174_v1  ;;  %11819 = vmatprep.subr.bf16.mxu1 %v16235_v18  ;;  %v16242_v1 = vcombine.low %v8567_v53, %v8571_v33  ;;  %v8616_v18 = vld [vmem:[%s24478_s9 + $0xa18] sm:$0xff]  ;;  %v16282_v33 = vcombine.low %v8607_v12, %v8611_v32  ;;  %v16291_v28 = vcombine.high %v8615_v26, %v8619_v21 }
 0x988   :  { %11983 = vmatprep.subr.bf16.mxu0 %v16237_v61  ;;  %v8620_v53 = vld [vmem:[%s24478_s9 + $0xa38] sm:$0xff]  ;;  %v16284_v61 = vcombine.low %v8608_v41, %v8612_v27  ;;  %v16290_v35 = vcombine.low %v8615_v26, %v8619_v21 }
 0x989   :  { %11820 = vmatpush1.bf16.msra.mxu1 %v16234_v63  ;;  %v16293_v25 = vcombine.high %v8616_v18, %v8620_v53  ;;  %v8623_v63 = vld [vmem:[%s24478_s9 + $0xa50] sm:$0xff]  ;;  %v16292_v13 = vcombine.low %v8616_v18, %v8620_v53 }
 0x98a   :  { %11984 = vmatpush1.bf16.msra.mxu0 %v16236_v49  ;;  %11821 = vmatprep.subr.bf16.mxu1 %v16243_v36  ;;  %v8627_v49 = vld [vmem:[%s24478_s9 + $0xa70] sm:$0xff]  ;;  %v8624_v36 = vld [vmem:[%s24478_s9 + $0xa58] sm:$0xff] }
 0x98b   :  { %11985 = vmatprep.subr.bf16.mxu0 %v16245_v47  ;;  %v8628_v47 = vld [vmem:[%s24478_s9 + $0xa78] sm:$0xff]  ;;  %v16299_v5 = vcombine.high %v8623_v63, %v8627_v49  ;;  %v16298_v6 = vcombine.low %v8623_v63, %v8627_v49 }
 0x98c   :  { %v16301_v8 = vcombine.high %v8624_v36, %v8628_v47  ;;  %v16300_v60 = vcombine.low %v8624_v36, %v8628_v47 }
 0x98d   :  { %11822 = vmatpush1.bf16.msra.mxu1 %v16242_v1  ;;  %v8631_v1 = vld [vmem:[%s24478_s9 + $0xa90] sm:$0xff] }
 0x98e   :  { %11986 = vmatpush1.bf16.msra.mxu0 %v16244_v46  ;;  %11823 = vmatprep.subr.bf16.mxu1 %v16251_v9  ;;  %v8635_v46 = vld [vmem:[%s24478_s9 + $0xab0] sm:$0xff]  ;;  %v8632_v9 = vld [vmem:[%s24478_s9 + $0xa98] sm:$0xff] }
 0x98f   :  { %11987 = vmatprep.subr.bf16.mxu0 %v16253_v52  ;;  %v8636_v52 = vld [vmem:[%s24478_s9 + $0xab8] sm:$0xff]  ;;  %v16307_v24 = vcombine.high %v8631_v1, %v8635_v46  ;;  %v16306_v42 = vcombine.low %v8631_v1, %v8635_v46 }
 0x990   :  { %v16309_v16 = vcombine.high %v8632_v9, %v8636_v52  ;;  %v16308_v19 = vcombine.low %v8632_v9, %v8636_v52 }
 0x991   :  { %11824 = vmatpush1.bf16.msra.mxu1 %v16250_v31  ;;  %v8639_v31 = vld [vmem:[%s24478_s9 + $0xad0] sm:$0xff] }
 0x992   :  { %11988 = vmatpush1.bf16.msra.mxu0 %v16252_v4  ;;  %11825 = vmatprep.subr.bf16.mxu1 %v16259_v17  ;;  %v8643_v4 = vld [vmem:[%s24478_s9 + $0xaf0] sm:$0xff]  ;;  %v8640_v17 = vld [vmem:[%s24478_s9 + $0xad8] sm:$0xff] }
 0x993   :  { %11989 = vmatprep.subr.bf16.mxu0 %v16261_v29  ;;  %v8644_v29 = vld [vmem:[%s24478_s9 + $0xaf8] sm:$0xff]  ;;  %v16315_v30 = vcombine.high %v8639_v31, %v8643_v4  ;;  %v16314_v57 = vcombine.low %v8639_v31, %v8643_v4 }
 0x994   :  { %v16317_v23 = vcombine.high %v8640_v17, %v8644_v29  ;;  %v16316_v54 = vcombine.low %v8640_v17, %v8644_v29  ;;  %v8692_v31 = vld [vmem:[%s24478_s9 + $0xc78] sm:$0xff]  ;;  %v8695_v29 = vld [vmem:[%s24478_s9 + $0xc90] sm:$0xff] }
 0x995   :  { %11826 = vmatpush1.bf16.msra.mxu1 %v16258_v50  ;;  %v8647_v50 = vld [vmem:[%s24478_s9 + $0xb10] sm:$0xff] }
 0x996   :  { %11990 = vmatpush1.bf16.msra.mxu0 %v16260_v62  ;;  %11827 = vmatprep.subr.bf16.mxu1 %v16267_v20  ;;  %v8651_v62 = vld [vmem:[%s24478_s9 + $0xb30] sm:$0xff]  ;;  %v8648_v20 = vld [vmem:[%s24478_s9 + $0xb18] sm:$0xff] }
 0x997   :  { %11991 = vmatprep.subr.bf16.mxu0 %v16269_v0  ;;  %v8652_v0 = vld [vmem:[%s24478_s9 + $0xb38] sm:$0xff]  ;;  %v16323_v59 = vcombine.high %v8647_v50, %v8651_v62  ;;  %v16322_v12 = vcombine.low %v8647_v50, %v8651_v62 }
 0x998   :  { %v16325_v56 = vcombine.high %v8648_v20, %v8652_v0  ;;  %v16324_v32 = vcombine.low %v8648_v20, %v8652_v0 }
 0x999   :  { %11828 = vmatpush1.bf16.msra.mxu1 %v16266_v55  ;;  %v8655_v55 = vld [vmem:[%s24478_s9 + $0xb50] sm:$0xff] }
 0x99a   :  { %11992 = vmatpush1.bf16.msra.mxu0 %v16268_v10  ;;  %11829 = vmatprep.subr.bf16.mxu1 %v16275_v11  ;;  %v8659_v10 = vld [vmem:[%s24478_s9 + $0xb70] sm:$0xff]  ;;  %v8656_v11 = vld [vmem:[%s24478_s9 + $0xb58] sm:$0xff] }
 0x99b   :  { %11993 = vmatprep.subr.bf16.mxu0 %v16277_v15  ;;  %v8660_v15 = vld [vmem:[%s24478_s9 + $0xb78] sm:$0xff]  ;;  %v16331_v41 = vcombine.high %v8655_v55, %v8659_v10  ;;  %v16330_v26 = vcombine.low %v8655_v55, %v8659_v10 }
 0x99c   :  { %v16333_v27 = vcombine.high %v8656_v11, %v8660_v15  ;;  %v16332_v21 = vcombine.low %v8656_v11, %v8660_v15  ;;  %v8711_v11 = vld [vmem:[%s24478_s9 + $0xd10] sm:$0xff] }
 0x99d   :  { %11830 = vmatpush1.bf16.msra.mxu1 %v16274_v3  ;;  %v8663_v3 = vld [vmem:[%s24478_s9 + $0xb90] sm:$0xff] }
 0x99e   :  { %11994 = vmatpush1.bf16.msra.mxu0 %v16276_v37  ;;  %11831 = vmatprep.subr.bf16.mxu1 %v16283_v7  ;;  %v8667_v37 = vld [vmem:[%s24478_s9 + $0xbb0] sm:$0xff]  ;;  %v8664_v7 = vld [vmem:[%s24478_s9 + $0xb98] sm:$0xff] }
 0x99f   :  { %11995 = vmatprep.subr.bf16.mxu0 %v16285_v58  ;;  %v8668_v58 = vld [vmem:[%s24478_s9 + $0xbb8] sm:$0xff]  ;;  %v16339_v18 = vcombine.high %v8663_v3, %v8667_v37  ;;  %v16338_v63 = vcombine.low %v8663_v3, %v8667_v37  ;;  %v8715_v15 = vld [vmem:[%s24478_s9 + $0xd30] sm:$0xff] }
 0x9a0   :  { %v16341_v53 = vcombine.high %v8664_v7, %v8668_v58  ;;  %v16340_v49 = vcombine.low %v8664_v7, %v8668_v58  ;;  %v16387_v3 = vcombine.high %v8711_v11, %v8715_v15  ;;  %v8719_v7 = vld [vmem:[%s24478_s9 + $0xd50] sm:$0xff] }
 0x9a1   :  { %11832 = vmatpush1.bf16.msra.mxu1 %v16282_v33  ;;  %v8671_v33 = vld [vmem:[%s24478_s9 + $0xbd0] sm:$0xff] }
 0x9a2   :  { %11996 = vmatpush1.bf16.msra.mxu0 %v16284_v61  ;;  %11833 = vmatprep.subr.bf16.mxu1 %v16291_v28  ;;  %v8675_v61 = vld [vmem:[%s24478_s9 + $0xbf0] sm:$0xff]  ;;  %v8672_v28 = vld [vmem:[%s24478_s9 + $0xbd8] sm:$0xff] }
 0x9a3   :  { %11997 = vmatprep.subr.bf16.mxu0 %v16293_v25  ;;  %v8676_v25 = vld [vmem:[%s24478_s9 + $0xbf8] sm:$0xff]  ;;  %v16347_v36 = vcombine.high %v8671_v33, %v8675_v61  ;;  %v16346_v1 = vcombine.low %v8671_v33, %v8675_v61  ;;  %v8723_v58 = vld [vmem:[%s24478_s9 + $0xd70] sm:$0xff] }
 0x9a4   :  { %v16349_v47 = vcombine.high %v8672_v28, %v8676_v25  ;;  %v16348_v46 = vcombine.low %v8672_v28, %v8676_v25  ;;  %v16395_v33 = vcombine.high %v8719_v7, %v8723_v58  ;;  %v8727_v28 = vld [vmem:[%s24478_s9 + $0xd90] sm:$0xff] }
 0x9a5   :  { %11834 = vmatpush1.bf16.msra.mxu1 %v16290_v35  ;;  %v8679_v35 = vld [vmem:[%s24478_s9 + $0xc10] sm:$0xff] }
 0x9a6   :  { %11998 = vmatpush1.bf16.msra.mxu0 %v16292_v13  ;;  %11835 = vmatprep.subr.bf16.mxu1 %v16299_v5  ;;  %v8683_v13 = vld [vmem:[%s24478_s9 + $0xc30] sm:$0xff]  ;;  %v8680_v5 = vld [vmem:[%s24478_s9 + $0xc18] sm:$0xff] }
 0x9a7   :  { %11999 = vmatprep.subr.bf16.mxu0 %v16301_v8  ;;  %v8684_v8 = vld [vmem:[%s24478_s9 + $0xc38] sm:$0xff]  ;;  %v16355_v9 = vcombine.high %v8679_v35, %v8683_v13  ;;  %v8731_v25 = vld [vmem:[%s24478_s9 + $0xdb0] sm:$0xff] }
 0x9a8   :  { %v16357_v52 = vcombine.high %v8680_v5, %v8684_v8  ;;  %v16356_v4 = vcombine.low %v8680_v5, %v8684_v8 }
 0x9a9   :  { %11836 = vmatpush1.bf16.msra.mxu1 %v16298_v6  ;;  %v8687_v6 = vld [vmem:[%s24478_s9 + $0xc50] sm:$0xff] }
 0x9aa   :  { %12000 = vmatpush1.bf16.msra.mxu0 %v16300_v60  ;;  %11837 = vmatprep.subr.bf16.mxu1 %v16307_v24  ;;  %v8691_v60 = vld [vmem:[%s24478_s9 + $0xc70] sm:$0xff]  ;;  %v16354_v24 = vcombine.low %v8679_v35, %v8683_v13  ;;  %v16403_v35 = vcombine.high %v8727_v28, %v8731_v25 }
 0x9ab   :  { %12001 = vmatprep.subr.bf16.mxu0 %v16309_v16  ;;  %v8688_v16 = vld [vmem:[%s24478_s9 + $0xc58] sm:$0xff]  ;;  %v16363_v17 = vcombine.high %v8687_v6, %v8691_v60  ;;  %v16362_v50 = vcombine.low %v8687_v6, %v8691_v60 }
 0x9ac   :  { %v16364_v62 = vcombine.low %v8688_v16, %v8692_v31  ;;  %v8736_v6 = vld [vmem:[%s24478_s9 + $0xdd8] sm:$0xff] }
 0x9ad   :  { %11838 = vmatpush1.bf16.msra.mxu1 %v16306_v42  ;;  %v8699_v42 = vld [vmem:[%s24478_s9 + $0xcb0] sm:$0xff]  ;;  %v8740_v60 = vld [vmem:[%s24478_s9 + $0xdf8] sm:$0xff] }
 0x9ae   :  { %12002 = vmatpush1.bf16.msra.mxu0 %v16308_v19  ;;  %11839 = vmatprep.subr.bf16.mxu1 %v16315_v30  ;;  %v16365_v19 = vcombine.high %v8688_v16, %v8692_v31  ;;  %v8696_v30 = vld [vmem:[%s24478_s9 + $0xc98] sm:$0xff]  ;;  %v16371_v20 = vcombine.high %v8695_v29, %v8699_v42  ;;  %v16402_v31 = vcombine.low %v8727_v28, %v8731_v25 }
 0x9af   :  { %12003 = vmatprep.subr.bf16.mxu0 %v16317_v23  ;;  %v8700_v23 = vld [vmem:[%s24478_s9 + $0xcb8] sm:$0xff] }
 0x9b0   :  { %v16373_v0 = vcombine.high %v8696_v30, %v8700_v23 }
 0x9b1   :  { %11840 = vmatpush1.bf16.msra.mxu1 %v16314_v57  ;;  %v8703_v57 = vld [vmem:[%s24478_s9 + $0xcd0] sm:$0xff] }
 0x9b2   :  { %12004 = vmatpush1.bf16.msra.mxu0 %v16316_v54  ;;  %11841 = vmatprep.subr.bf16.mxu1 %v16323_v59  ;;  %v8707_v54 = vld [vmem:[%s24478_s9 + $0xcf0] sm:$0xff]  ;;  %v8708_v59 = vld [vmem:[%s24478_s9 + $0xcf8] sm:$0xff] }
 0x9b3   :  { %12005 = vmatprep.subr.bf16.mxu0 %v16325_v56  ;;  %v16372_v56 = vcombine.low %v8696_v30, %v8700_v23  ;;  %v16379_v55 = vcombine.high %v8703_v57, %v8707_v54  ;;  %v8743_v30 = vld [vmem:[%s24478_s9 + $0xe10] sm:$0xff] }
 0x9b4   :  { %v8747_v23 = vld [vmem:[%s24478_s9 + $0xe30] sm:$0xff] }
 0x9b5   :  { %11842 = vmatpush1.bf16.msra.mxu1 %v16322_v12  ;;  %v8712_v12 = vld [vmem:[%s24478_s9 + $0xd18] sm:$0xff] }
 0x9b6   :  { %12006 = vmatpush1.bf16.msra.mxu0 %v16324_v32  ;;  %11843 = vmatprep.subr.bf16.mxu1 %v16331_v41  ;;  %v8716_v32 = vld [vmem:[%s24478_s9 + $0xd38] sm:$0xff]  ;;  %v16378_v41 = vcombine.low %v8703_v57, %v8707_v54  ;;  %v16419_v57 = vcombine.high %v8743_v30, %v8747_v23 }
 0x9b7   :  { %12007 = vmatprep.subr.bf16.mxu0 %v16333_v27  ;;  %v16389_v37 = vcombine.high %v8712_v12, %v8716_v32 }
 0x9b9   :  { %11844 = vmatpush1.bf16.msra.mxu1 %v16330_v26  ;;  %v8720_v26 = vld [vmem:[%s24478_s9 + $0xd58] sm:$0xff] }
 0x9ba   :  { %12008 = vmatpush1.bf16.msra.mxu0 %v16332_v21  ;;  %11845 = vmatprep.subr.bf16.mxu1 %v16339_v18  ;;  %v8724_v21 = vld [vmem:[%s24478_s9 + $0xd78] sm:$0xff]  ;;  %v16386_v18 = vcombine.low %v8711_v11, %v8715_v15 }
 0x9bb   :  { %12009 = vmatprep.subr.bf16.mxu0 %v16341_v53  ;;  %v16388_v53 = vcombine.low %v8712_v12, %v8716_v32  ;;  %v16397_v61 = vcombine.high %v8720_v26, %v8724_v21  ;;  %v8759_v12 = vld [vmem:[%s24478_s9 + $0xe90] sm:$0xff] }
 0x9bc   :  { %v8763_v32 = vld [vmem:[%s24478_s9 + $0xeb0] sm:$0xff] }
 0x9bd   :  { %11846 = vmatpush1.bf16.msra.mxu1 %v16338_v63  ;;  %v8728_v63 = vld [vmem:[%s24478_s9 + $0xd98] sm:$0xff] }
 0x9be   :  { %12010 = vmatpush1.bf16.msra.mxu0 %v16340_v49  ;;  %11847 = vmatprep.subr.bf16.mxu1 %v16347_v36  ;;  %v8732_v49 = vld [vmem:[%s24478_s9 + $0xdb8] sm:$0xff]  ;;  %v16394_v36 = vcombine.low %v8719_v7, %v8723_v58  ;;  %v16435_v7 = vcombine.high %v8759_v12, %v8763_v32 }
 0x9bf   :  { %12011 = vmatprep.subr.bf16.mxu0 %v16349_v47  ;;  %v16396_v47 = vcombine.low %v8720_v26, %v8724_v21  ;;  %v16405_v8 = vcombine.high %v8728_v63, %v8732_v49  ;;  %v8767_v26 = vld [vmem:[%s24478_s9 + $0xed0] sm:$0xff] }
 0x9c0   :  { %v8771_v21 = vld [vmem:[%s24478_s9 + $0xef0] sm:$0xff] }
 0x9c1   :  { %11848 = vmatpush1.bf16.msra.mxu1 %v16346_v1  ;;  %v8735_v1 = vld [vmem:[%s24478_s9 + $0xdd0] sm:$0xff]  ;;  %v16443_v28 = vcombine.high %v8767_v26, %v8771_v21 }
 0x9c2   :  { %12012 = vmatpush1.bf16.msra.mxu0 %v16348_v46  ;;  %11858 = vmatprep.subr.bf16.mxu1 %v16355_v9  ;;  %v8739_v46 = vld [vmem:[%s24478_s9 + $0xdf0] sm:$0xff] }
 0x9c3   :  { %12022 = vmatprep.subr.bf16.mxu0 %v16357_v52 }
 0x9c4   :  { %11850 = vmatmul.mubr.bf16.vlgmr.msra.gmra.mrb[16].mxu1 %v23176_v43 }
 0x9c5   :  { %12014 = vmatmul.mubr.bf16.vlgmr.msra.gmra.mrb[24].mxu0 %v23176_v43  ;;  %11859 = vmatpush1.bf16.msra.mxu1 %v16354_v24  ;;  %v8704_v43 = vld [vmem:[%s24478_s9 + $0xcd8] sm:$0xff] }
 0x9c6   :  { %11890 = vmatprep.mubr.bf16.mxu1 %v23192_v2  ;;  %12023 = vmatpush1.bf16.msra.mxu0 %v16356_v4  ;;  %v16381_v10 = vcombine.high %v8704_v43, %v8708_v59  ;;  %v16380_v27 = vcombine.low %v8704_v43, %v8708_v59  ;;  %v8751_v43 = vld [vmem:[%s24478_s9 + $0xe50] sm:$0xff] }
 0x9c7   :  { %12054 = vmatprep.mubr.bf16.mxu0 %v23192_v2  ;;  %11860 = vmatprep.subr.bf16.mxu1 %v16363_v17  ;;  %v16370_v2 = vcombine.low %v8695_v29, %v8699_v42  ;;  %v16404_v29 = vcombine.low %v8728_v63, %v8732_v49  ;;  %v16411_v42 = vcombine.high %v8735_v1, %v8739_v46  ;;  %v8755_v59 = vld [vmem:[%s24478_s9 + $0xe70] sm:$0xff] }
 0x9c8   :  { %12024 = vmatprep.subr.bf16.mxu0 %v16365_v19  ;;  %v16413_v19 = vcombine.high %v8736_v6, %v8740_v60  ;;  %v16427_v11 = vcombine.high %v8751_v43, %v8755_v59  ;;  %v8775_v63 = vld [vmem:[%s24478_s9 + $0xf10] sm:$0xff] }
 0x9c9   :  { %11861 = vmatpush1.bf16.msra.mxu1 %v16362_v50  ;;  %v8744_v50 = vld [vmem:[%s24478_s9 + $0xe18] sm:$0xff]  ;;  %v8779_v49 = vld [vmem:[%s24478_s9 + $0xf30] sm:$0xff] }
 0x9ca   :  { %12025 = vmatpush1.bf16.msra.mxu0 %v16364_v62  ;;  %11862 = vmatprep.subr.bf16.mxu1 %v16371_v20  ;;  %v8748_v62 = vld [vmem:[%s24478_s9 + $0xe38] sm:$0xff]  ;;  %v16410_v20 = vcombine.low %v8735_v1, %v8739_v46  ;;  %v16451_v1 = vcombine.high %v8775_v63, %v8779_v49 }
 0x9cb   :  { %12026 = vmatprep.subr.bf16.mxu0 %v16373_v0  ;;  %v16412_v0 = vcombine.low %v8736_v6, %v8740_v60  ;;  %v16421_v54 = vcombine.high %v8744_v50, %v8748_v62  ;;  %v8783_v6 = vld [vmem:[%s24478_s9 + $0xf50] sm:$0xff] }
 0x9cc   :  { %v8787_v60 = vld [vmem:[%s24478_s9 + $0xf70] sm:$0xff] }
 0x9cd   :  { %11863 = vmatpush1.bf16.msra.mxu1 %v16370_v2  ;;  %v8752_v2 = vld [vmem:[%s24478_s9 + $0xe58] sm:$0xff] }
 0x9ce   :  { %12027 = vmatpush1.bf16.msra.mxu0 %v16372_v56  ;;  %11864 = vmatprep.subr.bf16.mxu1 %v16379_v55  ;;  %v8756_v56 = vld [vmem:[%s24478_s9 + $0xe78] sm:$0xff]  ;;  %v16418_v55 = vcombine.low %v8743_v30, %v8747_v23 }
 0x9cf   :  { %12028 = vmatprep.subr.bf16.mxu0 %v16381_v10  ;;  %v16420_v10 = vcombine.low %v8744_v50, %v8748_v62  ;;  %v16429_v15 = vcombine.high %v8752_v2, %v8756_v56  ;;  %v8792_v30 = vld [vmem:[%s24478_s9 + $0xf98] sm:$0xff]  ;;  %v24147_v50 = vld [vmem:[%s24479_s10] sm:$0xff]  ;;  %v16458_v62 = vcombine.low %v8783_v6, %v8787_v60 }
 0x9d0   :  { %v8796_v23 = vld [vmem:[%s24478_s9 + $0xfb8] sm:$0xff] }
 0x9d1   :  { %11865 = vmatpush1.bf16.msra.mxu1 %v16378_v41  ;;  %v8760_v41 = vld [vmem:[%s24478_s9 + $0xe98] sm:$0xff] }
 0x9d2   :  { %12029 = vmatpush1.bf16.msra.mxu0 %v16380_v27  ;;  %11866 = vmatprep.subr.bf16.mxu1 %v16387_v3  ;;  %v8764_v27 = vld [vmem:[%s24478_s9 + $0xeb8] sm:$0xff]  ;;  %v16426_v3 = vcombine.low %v8751_v43, %v8755_v59  ;;  %v8803_v43 = vld [vmem:[%s24478_s9 + $0xff0] sm:$0xff]  ;;  %v8814_v59 = vrot.slane %v24147_v50, %v22539_v22 }
 0x9d3   :  { %12030 = vmatprep.subr.bf16.mxu0 %v16389_v37  ;;  %v16428_v37 = vcombine.low %v8752_v2, %v8756_v56  ;;  %v16437_v58 = vcombine.high %v8760_v41, %v8764_v27  ;;  %v8800_v2 = vld [vmem:[%s24478_s9 + $0xfd8] sm:$0xff] }
 0x9d4   :  { %v8804_v56 = vld [vmem:[%s24478_s9 + $0xff8] sm:$0xff] }
 0x9d5   :  { %11867 = vmatpush1.bf16.msra.mxu1 %v16386_v18  ;;  %v8768_v18 = vld [vmem:[%s24478_s9 + $0xed8] sm:$0xff] }
 0x9d6   :  { %12031 = vmatpush1.bf16.msra.mxu0 %v16388_v53  ;;  %11868 = vmatprep.subr.bf16.mxu1 %v16395_v33  ;;  %v8772_v53 = vld [vmem:[%s24478_s9 + $0xef8] sm:$0xff]  ;;  %v16434_v33 = vcombine.low %v8759_v12, %v8763_v32 }
 0x9d7   :  { %v24040_v13 = vpop.f32.mrb[12].mxu1  ;;  %v24042_v5 = vpop.f32.mrb[20].mxu0  ;;  %12032 = vmatprep.subr.bf16.mxu0 %v16397_v61  ;;  %v16436_v61 = vcombine.low %v8760_v41, %v8764_v27  ;;  %v16445_v25 = vcombine.high %v8768_v18, %v8772_v53  ;;  %v16476_v41 = vcombine.low %v8800_v2, %v8804_v56  ;;  %v18151_v27 = vld [vmem:[#allocation6 + $0x4] ss:$16 sps:$4 sm:$0xff]  }
 0x9d8   :  { %v24050_v9 = vpop.f32.mrb[13].mxu1  ;;  %v24052_v52 = vpop.f32.mrb[21].mxu0 }
 0x9d9   :  { %v11568_v24 = vpop.f32.mrb[14].mxu1  ;;  %v11732_v16 = vpop.f32.mrb[22].mxu0  ;;  %11869 = vmatpush1.bf16.msra.mxu1 %v16394_v36  ;;  %v8776_v36 = vld [vmem:[%s24478_s9 + $0xf18] sm:$0xff]  ;;  %v17788_v12 = vadd.f32 %v24050_v9, %v8814_v59 }
 0x9da   :  { %12033 = vmatpush1.bf16.msra.mxu0 %v16396_v47  ;;  %v11569_v4 = vpop.f32.mrb[15].mxu1  ;;  %v11733_v17 = vpop.f32.mrb[23].mxu0  ;;  %11870 = vmatprep.subr.bf16.mxu1 %v16403_v35  ;;  %v8780_v47 = vld [vmem:[%s24478_s9 + $0xf38] sm:$0xff]  ;;  %v16442_v35 = vcombine.low %v8767_v26, %v8771_v21 }
 0x9db   :  { %12034 = vmatprep.subr.bf16.mxu0 %v16405_v8  ;;  %v16444_v8 = vcombine.low %v8768_v18, %v8772_v53  ;;  %v16453_v46 = vcombine.high %v8776_v36, %v8780_v47  ;;  %v8784_v24 = vld [vmem:[%s24478_s9 + $0xf58] sm:$0xff]  ;;  %v16452_v4 = vcombine.low %v8776_v36, %v8780_v47  ;;  %v16459_v17 = vcombine.high %v8783_v6, %v8787_v60  ;;  %v18155_v18 = vld [vmem:[#allocation6 + $0x20] ss:$16 sps:$4 sm:$0xff]  }
 0x9dc   :  { %v8788_v16 = vld [vmem:[%s24478_s9 + $0xf78] sm:$0xff]  ;;  %v18179_v60 = vld [vmem:[#allocation6 + $0xa0] ss:$16 sps:$4 sm:$0xff]  }
 0x9dd   :  { %11871 = vmatpush1.bf16.msra.mxu1 %v16402_v31  ;;  %v16450_v31 = vcombine.low %v8775_v63, %v8779_v49  ;;  %v18157_v26 = vld [vmem:[#allocation6 + $0x24] ss:$16 sps:$4 sm:$0xff]   ;;  %v18160_v21 = vld [vmem:[#allocation6 + $0x2c] ss:$16 sps:$4 sm:$0xff]   ;;  %v18158_v53 = vld [vmem:[#allocation6 + $0x28] ss:$16 sps:$4 sm:$0xff]  }
 0x9de   :  { %12035 = vmatpush1.bf16.msra.mxu0 %v16404_v29  ;;  %11872 = vmatprep.subr.bf16.mxu1 %v16411_v42  ;;  %v16461_v29 = vcombine.high %v8784_v24, %v8788_v16  ;;  %v8791_v42 = vld [vmem:[%s24478_s9 + $0xf90] sm:$0xff]  ;;  %v18170_v36 = vld [vmem:[#allocation6 + $0x68] ss:$16 sps:$4 sm:$0xff]  }
 0x9df   :  { %12036 = vmatprep.subr.bf16.mxu0 %v16413_v19  ;;  %v8795_v19 = vld [vmem:[%s24478_s9 + $0xfb0] sm:$0xff]  ;;  %v18206_v59 = vld [vmem:[#allocation6 + $0x128] ss:$16 sps:$4 sm:$0xff]  }
 0x9e0   :  { %v18169_v63 = vld [vmem:[#allocation6 + $0x64] ss:$16 sps:$4 sm:$0xff]   ;;  %v18172_v49 = vld [vmem:[#allocation6 + $0x6c] ss:$16 sps:$4 sm:$0xff]  }
 0x9e1   :  { %11873 = vmatpush1.bf16.msra.mxu1 %v16410_v20  ;;  %v16460_v20 = vcombine.low %v8784_v24, %v8788_v16  ;;  %v18175_v47 = vld [vmem:[#allocation6 + $0x84] ss:$16 sps:$4 sm:$0xff]   ;;  %v18184_v6 = vld [vmem:[#allocation6 + $0xac] ss:$16 sps:$4 sm:$0xff]   ;;  %v18182_v24 = vld [vmem:[#allocation6 + $0xa8] ss:$16 sps:$4 sm:$0xff]  }
 0x9e2   :  { %12037 = vmatpush1.bf16.msra.mxu0 %v16412_v0  ;;  %11874 = vmatprep.subr.bf16.mxu1 %v16419_v57  ;;  %v16467_v0 = vcombine.high %v8791_v42, %v8795_v19  ;;  %v16469_v57 = vcombine.high %v8792_v30, %v8796_v23  ;;  %v18187_v16 = vld [vmem:[#allocation6 + $0xc4] ss:$16 sps:$4 sm:$0xff]  }
 0x9e3   :  { %12038 = vmatprep.subr.bf16.mxu0 %v16421_v54  ;;  %v8799_v54 = vld [vmem:[%s24478_s9 + $0xfd0] sm:$0xff] }
 0x9e4   :  { %v16474_v32 = vcombine.low %v8799_v54, %v8803_v43 }
 0x9e5   :  { %11875 = vmatpush1.bf16.msra.mxu1 %v16418_v55  ;;  %v16466_v55 = vcombine.low %v8791_v42, %v8795_v19  ;;  %v18196_v42 = vld [vmem:[#allocation6 + $0xec] ss:$16 sps:$4 sm:$0xff]   ;;  %v18191_v19 = vld [vmem:[#allocation6 + $0xe0] ss:$16 sps:$4 sm:$0xff]  }
 0x9e6   :  { %12039 = vmatpush1.bf16.msra.mxu0 %v16420_v10  ;;  %11876 = vmatprep.subr.bf16.mxu1 %v16427_v11  ;;  %v16468_v10 = vcombine.low %v8792_v30, %v8796_v23  ;;  %v16475_v11 = vcombine.high %v8799_v54, %v8803_v43  ;;  %v18194_v30 = vld [vmem:[#allocation6 + $0xe8] ss:$16 sps:$4 sm:$0xff]   ;;  %v18199_v23 = vld [vmem:[#allocation6 + $0x104] ss:$16 sps:$4 sm:$0xff]   ;;  %v18208_v54 = vld [vmem:[#allocation6 + $0x12c] ss:$16 sps:$4 sm:$0xff]  }
 0x9e7   :  { %12040 = vmatprep.subr.bf16.mxu0 %v16429_v15  ;;  %v16477_v15 = vcombine.high %v8800_v2, %v8804_v56  ;;  %v18203_v43 = vld [vmem:[#allocation6 + $0x120] ss:$16 sps:$4 sm:$0xff]   ;;  %v18211_v2 = vld [vmem:[#allocation6 + $0x144] ss:$16 sps:$4 sm:$0xff]   ;;  %v18214_v56 = vld [vmem:[#allocation6 + $0x14c] ss:$16 sps:$4 sm:$0xff]  }
 0x9e9   :  { %11877 = vmatpush1.bf16.msra.mxu1 %v16426_v3  ;;  %v18154_v3 = vld [vmem:[#allocation6 + $0xc] ss:$16 sps:$4 sm:$0xff]  }
 0x9ea   :  { %12041 = vmatpush1.bf16.msra.mxu0 %v16428_v37  ;;  %11878 = vmatprep.subr.bf16.mxu1 %v16435_v7  ;;  %v24164_v37 = vmax.f32 %v17788_v12, 0.0  ;;  %v18149_v7 = vld [vmem:[#allocation6] ss:$16 sps:$4 sm:$0xff]  }
 0x9eb   :  { %12042 = vmatprep.subr.bf16.mxu0 %v16437_v58  ;;  %v18152_v58 = vld [vmem:[#allocation6 + $0x8] ss:$16 sps:$4 sm:$0xff]   ;;  %v18215_v12 = vld [vmem:[#allocation6 + $0x160] ss:$16 sps:$4 sm:$0xff]  }
 0x9ec   :  { %v12072_v9 = vpack.c.bf16 %v24164_v37, %v24164_v37 }
 0x9ed   :  { %11879 = vmatpush1.bf16.msra.mxu1 %v16434_v33  ;;  %v18163_v33 = vld [vmem:[#allocation6 + $0x44] ss:$16 sps:$4 sm:$0xff]  }
 0x9ee   :  { %12043 = vmatpush1.bf16.msra.mxu0 %v16436_v61  ;;  %11880 = vmatprep.subr.bf16.mxu1 %v16443_v28  ;;  %v18166_v61 = vld [vmem:[#allocation6 + $0x4c] ss:$16 sps:$4 sm:$0xff]   ;;  %v18161_v28 = vld [vmem:[#allocation6 + $0x40] ss:$16 sps:$4 sm:$0xff]  }
 0x9ef   :  { %12044 = vmatprep.subr.bf16.mxu0 %v16445_v25  ;;  %v18164_v25 = vld [vmem:[#allocation6 + $0x48] ss:$16 sps:$4 sm:$0xff]  }
 0x9f1   :  { %11881 = vmatpush1.bf16.msra.mxu1 %v16442_v35  ;;  %v18178_v35 = vld [vmem:[#allocation6 + $0x8c] ss:$16 sps:$4 sm:$0xff]  }
 0x9f2   :  { %12045 = vmatpush1.bf16.msra.mxu0 %v16444_v8  ;;  %11882 = vmatprep.subr.bf16.mxu1 %v16451_v1  ;;  %v18173_v8 = vld [vmem:[#allocation6 + $0x80] ss:$16 sps:$4 sm:$0xff]   ;;  %v18176_v1 = vld [vmem:[#allocation6 + $0x88] ss:$16 sps:$4 sm:$0xff]  }
 0x9f3   :  { %12046 = vmatprep.subr.bf16.mxu0 %v16453_v46  ;;  %v18181_v46 = vld [vmem:[#allocation6 + $0xa4] ss:$16 sps:$4 sm:$0xff]  }
 0x9f5   :  { %11883 = vmatpush1.bf16.msra.mxu1 %v16450_v31  ;;  %v18190_v31 = vld [vmem:[#allocation6 + $0xcc] ss:$16 sps:$4 sm:$0xff]  }
 0x9f6   :  { %12047 = vmatpush1.bf16.msra.mxu0 %v16452_v4  ;;  %11884 = vmatprep.subr.bf16.mxu1 %v16459_v17  ;;  %v18185_v4 = vld [vmem:[#allocation6 + $0xc0] ss:$16 sps:$4 sm:$0xff]   ;;  %v18188_v17 = vld [vmem:[#allocation6 + $0xc8] ss:$16 sps:$4 sm:$0xff]  }
 0x9f7   :  { %12048 = vmatprep.subr.bf16.mxu0 %v16461_v29  ;;  %v18193_v29 = vld [vmem:[#allocation6 + $0xe4] ss:$16 sps:$4 sm:$0xff]  }
 0x9f9   :  { %11885 = vmatpush1.bf16.msra.mxu1 %v16458_v62  ;;  %v18202_v62 = vld [vmem:[#allocation6 + $0x10c] ss:$16 sps:$4 sm:$0xff]  }
 0x9fa   :  { %12049 = vmatpush1.bf16.msra.mxu0 %v16460_v20  ;;  %11886 = vmatprep.subr.bf16.mxu1 %v16467_v0  ;;  %v18197_v20 = vld [vmem:[#allocation6 + $0x100] ss:$16 sps:$4 sm:$0xff]   ;;  %v18200_v0 = vld [vmem:[#allocation6 + $0x108] ss:$16 sps:$4 sm:$0xff]  }
 0x9fb   :  { %12050 = vmatprep.subr.bf16.mxu0 %v16469_v57  ;;  %v18205_v57 = vld [vmem:[#allocation6 + $0x124] ss:$16 sps:$4 sm:$0xff]  }
 0x9fd   :  { %11887 = vmatpush1.bf16.msra.mxu1 %v16466_v55  ;;  %v18209_v55 = vld [vmem:[#allocation6 + $0x140] ss:$16 sps:$4 sm:$0xff]  }
 0x9fe   :  { %12051 = vmatpush1.bf16.msra.mxu0 %v16468_v10  ;;  %11888 = vmatprep.subr.bf16.mxu1 %v16475_v11  ;;  %v18212_v10 = vld [vmem:[#allocation6 + $0x148] ss:$16 sps:$4 sm:$0xff]   ;;  %v18217_v11 = vld [vmem:[#allocation6 + $0x164] ss:$16 sps:$4 sm:$0xff]  }
 0x9ff   :  { %12052 = vmatprep.subr.bf16.mxu0 %v16477_v15  ;;  %v18220_v15 = vld [vmem:[#allocation6 + $0x16c] ss:$16 sps:$4 sm:$0xff]  }
 0xa01   :  { %11889 = vmatpush1.bf16.msra.mxu1 %v16474_v32  ;;  %v18218_v32 = vld [vmem:[#allocation6 + $0x168] ss:$16 sps:$4 sm:$0xff]  }
 0xa02   :  { %12053 = vmatpush1.bf16.msra.mxu0 %v16476_v41  ;;  %13637 = vmatprep.subr.bf16.mxu1 %v18151_v27  ;;  %v18223_v41 = vld [vmem:[#allocation6 + $0x184] ss:$16 sps:$4 sm:$0xff]   ;;  %v18226_v27 = vld [vmem:[#allocation6 + $0x18c] ss:$16 sps:$4 sm:$0xff]  }
 0xa03   :  { %13801 = vmatprep.subr.bf16.mxu0 %v18154_v3  ;;  %v18221_v3 = vld [vmem:[#allocation6 + $0x180] ss:$16 sps:$4 sm:$0xff]  }
 0xa04   :  { %11891 = vmatmul.mubr.bf16.vlgmr.msra.gmra.mrb[16].mxu1 %v23386_v44 }
 0xa05   :  { %12055 = vmatmul.mubr.bf16.vlgmr.msra.gmra.mrb[24].mxu0 %v23386_v44  ;;  %13638 = vmatpush1.bf16.msra.mxu1 %v18149_v7  ;;  %v18167_v44 = vld [vmem:[#allocation6 + $0x60] ss:$16 sps:$4 sm:$0xff]   ;;  %v18224_v7 = vld [vmem:[#allocation6 + $0x188] ss:$16 sps:$4 sm:$0xff]  }
 0xa06   :  { %13669 = vmatprep.mubr.bf16.mxu1 %v12072_v9  ;;  %13802 = vmatpush1.bf16.msra.mxu0 %v18152_v58  ;;  %v18229_v58 = vld [vmem:[#allocation6 + $0x1a4] ss:$16 sps:$4 sm:$0xff]  }
 0xa07   :  { %13833 = vmatprep.mubr.bf16.mxu0 %v12072_v9  ;;  %13639 = vmatprep.subr.bf16.mxu1 %v18157_v26  ;;  %v18232_v26 = vld [vmem:[#allocation6 + $0x1ac] ss:$16 sps:$4 sm:$0xff]   ;;  %v18227_v9 = vld [vmem:[#allocation6 + $0x1a0] ss:$16 sps:$4 sm:$0xff]  }
 0xa08   :  { %13803 = vmatprep.subr.bf16.mxu0 %v18160_v21  ;;  %v8810_v21 = vrot.slane %v24147_v50, %v22531_v38 }
 0xa09   :  { %13640 = vmatpush1.bf16.msra.mxu1 %v18155_v18  ;;  %v18230_v18 = vld [vmem:[#allocation6 + $0x1a8] ss:$16 sps:$4 sm:$0xff]  }
 0xa0a   :  { %13804 = vmatpush1.bf16.msra.mxu0 %v18158_v53  ;;  %13641 = vmatprep.subr.bf16.mxu1 %v18163_v33  ;;  %v18235_v53 = vld [vmem:[#allocation6 + $0x1c4] ss:$16 sps:$4 sm:$0xff]   ;;  %v18238_v33 = vld [vmem:[#allocation6 + $0x1cc] ss:$16 sps:$4 sm:$0xff]  }
 0xa0b   :  { %13805 = vmatprep.subr.bf16.mxu0 %v18166_v61  ;;  %v8822_v61 = vrot.slane %v24147_v50, %v22861_v39 }
 0xa0d   :  { %13642 = vmatpush1.bf16.msra.mxu1 %v18161_v28  ;;  %v18233_v28 = vld [vmem:[#allocation6 + $0x1c0] ss:$16 sps:$4 sm:$0xff]  }
 0xa0e   :  { %13806 = vmatpush1.bf16.msra.mxu0 %v18164_v25  ;;  %13643 = vmatprep.subr.bf16.mxu1 %v18169_v63  ;;  %v17787_v25 = vadd.f32 %v24040_v13, %v8810_v21  ;;  %v18236_v63 = vld [vmem:[#allocation6 + $0x1c8] ss:$16 sps:$4 sm:$0xff]   ;;  %v18245_v13 = vld [vmem:[#allocation6 + $0x200] ss:$16 sps:$4 sm:$0xff]  }
 0xa0f   :  { %13807 = vmatprep.subr.bf16.mxu0 %v18172_v49  ;;  %v18241_v49 = vld [vmem:[#allocation6 + $0x1e4] ss:$16 sps:$4 sm:$0xff]   ;;  %v18296_v21 = vld [vmem:[#allocation6 + $0x308] ss:$16 sps:$4 sm:$0xff]  }
 0xa11   :  { %13644 = vmatpush1.bf16.msra.mxu1 %v18167_v44  ;;  %v18244_v44 = vld [vmem:[#allocation6 + $0x1ec] ss:$16 sps:$4 sm:$0xff]  }
 0xa12   :  { %13808 = vmatpush1.bf16.msra.mxu0 %v18170_v36  ;;  %13645 = vmatprep.subr.bf16.mxu1 %v18175_v47  ;;  %v17790_v36 = vadd.f32 %v24052_v52, %v8822_v61  ;;  %v18239_v47 = vld [vmem:[#allocation6 + $0x1e0] ss:$16 sps:$4 sm:$0xff]   ;;  %v18248_v52 = vld [vmem:[#allocation6 + $0x208] ss:$16 sps:$4 sm:$0xff]  }
 0xa13   :  { %13809 = vmatprep.subr.bf16.mxu0 %v18178_v35  ;;  %v24176_v35 = vmax.f32 %v17787_v25, 0.0  ;;  %v18302_v61 = vld [vmem:[#allocation6 + $0x328] ss:$16 sps:$4 sm:$0xff]   ;;  %v18310_v25 = vld [vmem:[#allocation6 + $0x34c] ss:$16 sps:$4 sm:$0xff]  }
 0xa15   :  { %13646 = vmatpush1.bf16.msra.mxu1 %v18173_v8  ;;  %v18242_v8 = vld [vmem:[#allocation6 + $0x1e8] ss:$16 sps:$4 sm:$0xff]  }
 0xa16   :  { %13810 = vmatpush1.bf16.msra.mxu0 %v18176_v1  ;;  %13647 = vmatprep.subr.bf16.mxu1 %v18181_v46  ;;  %v18247_v1 = vld [vmem:[#allocation6 + $0x204] ss:$16 sps:$4 sm:$0xff]   ;;  %v18250_v46 = vld [vmem:[#allocation6 + $0x20c] ss:$16 sps:$4 sm:$0xff]  }
 0xa17   :  { %13811 = vmatprep.subr.bf16.mxu0 %v18184_v6  ;;  %v24178_v6 = vmax.f32 %v17790_v36, 0.0  ;;  %v18316_v36 = vld [vmem:[#allocation6 + $0x36c] ss:$16 sps:$4 sm:$0xff]  }
 0xa19   :  { %13648 = vmatpush1.bf16.msra.mxu1 %v18179_v60  ;;  %v12071_v60 = vpack.c.bf16 %v24176_v35, %v24176_v35 }
 0xa1a   :  { %13812 = vmatpush1.bf16.msra.mxu0 %v18182_v24  ;;  %13649 = vmatprep.subr.bf16.mxu1 %v18187_v16  ;;  %v18253_v24 = vld [vmem:[#allocation6 + $0x224] ss:$16 sps:$4 sm:$0xff]   ;;  %v12074_v16 = vpack.c.bf16 %v24178_v6, %v24178_v6 }
 0xa1b   :  { %13813 = vmatprep.subr.bf16.mxu0 %v18190_v31  ;;  %v18256_v31 = vld [vmem:[#allocation6 + $0x22c] ss:$16 sps:$4 sm:$0xff]  }
 0xa1d   :  { %13650 = vmatpush1.bf16.msra.mxu1 %v18185_v4  ;;  %v18251_v4 = vld [vmem:[#allocation6 + $0x220] ss:$16 sps:$4 sm:$0xff]  }
 0xa1e   :  { %13814 = vmatpush1.bf16.msra.mxu0 %v18188_v17  ;;  %13651 = vmatprep.subr.bf16.mxu1 %v18193_v29  ;;  %v18254_v17 = vld [vmem:[#allocation6 + $0x228] ss:$16 sps:$4 sm:$0xff]   ;;  %v18259_v29 = vld [vmem:[#allocation6 + $0x244] ss:$16 sps:$4 sm:$0xff]  }
 0xa1f   :  { %13815 = vmatprep.subr.bf16.mxu0 %v18196_v42  ;;  %v18262_v42 = vld [vmem:[#allocation6 + $0x24c] ss:$16 sps:$4 sm:$0xff]  }
 0xa21   :  { %13652 = vmatpush1.bf16.msra.mxu1 %v18191_v19  ;;  %v18257_v19 = vld [vmem:[#allocation6 + $0x240] ss:$16 sps:$4 sm:$0xff]  }
 0xa22   :  { %13816 = vmatpush1.bf16.msra.mxu0 %v18194_v30  ;;  %13653 = vmatprep.subr.bf16.mxu1 %v18199_v23  ;;  %v18260_v30 = vld [vmem:[#allocation6 + $0x248] ss:$16 sps:$4 sm:$0xff]   ;;  %v18265_v23 = vld [vmem:[#allocation6 + $0x264] ss:$16 sps:$4 sm:$0xff]  }
 0xa23   :  { %13817 = vmatprep.subr.bf16.mxu0 %v18202_v62  ;;  %v18268_v62 = vld [vmem:[#allocation6 + $0x26c] ss:$16 sps:$4 sm:$0xff]  }
 0xa25   :  { %13654 = vmatpush1.bf16.msra.mxu1 %v18197_v20  ;;  %v18263_v20 = vld [vmem:[#allocation6 + $0x260] ss:$16 sps:$4 sm:$0xff]  }
 0xa26   :  { %13818 = vmatpush1.bf16.msra.mxu0 %v18200_v0  ;;  %13655 = vmatprep.subr.bf16.mxu1 %v18205_v57  ;;  %v18266_v0 = vld [vmem:[#allocation6 + $0x268] ss:$16 sps:$4 sm:$0xff]   ;;  %v18271_v57 = vld [vmem:[#allocation6 + $0x284] ss:$16 sps:$4 sm:$0xff]  }
 0xa27   :  { %13819 = vmatprep.subr.bf16.mxu0 %v18208_v54  ;;  %v18274_v54 = vld [vmem:[#allocation6 + $0x28c] ss:$16 sps:$4 sm:$0xff]  }
 0xa29   :  { %13656 = vmatpush1.bf16.msra.mxu1 %v18203_v43  ;;  %v18269_v43 = vld [vmem:[#allocation6 + $0x280] ss:$16 sps:$4 sm:$0xff]  }
 0xa2a   :  { %13820 = vmatpush1.bf16.msra.mxu0 %v18206_v59  ;;  %13657 = vmatprep.subr.bf16.mxu1 %v18211_v2  ;;  %v18272_v59 = vld [vmem:[#allocation6 + $0x288] ss:$16 sps:$4 sm:$0xff]   ;;  %v18277_v2 = vld [vmem:[#allocation6 + $0x2a4] ss:$16 sps:$4 sm:$0xff]  }
 0xa2b   :  { %13821 = vmatprep.subr.bf16.mxu0 %v18214_v56  ;;  %v18280_v56 = vld [vmem:[#allocation6 + $0x2ac] ss:$16 sps:$4 sm:$0xff]  }
 0xa2d   :  { %13658 = vmatpush1.bf16.msra.mxu1 %v18209_v55  ;;  %v18275_v55 = vld [vmem:[#allocation6 + $0x2a0] ss:$16 sps:$4 sm:$0xff]  }
 0xa2e   :  { %13822 = vmatpush1.bf16.msra.mxu0 %v18212_v10  ;;  %13659 = vmatprep.subr.bf16.mxu1 %v18217_v11  ;;  %v18278_v10 = vld [vmem:[#allocation6 + $0x2a8] ss:$16 sps:$4 sm:$0xff]   ;;  %v18283_v11 = vld [vmem:[#allocation6 + $0x2c4] ss:$16 sps:$4 sm:$0xff]  }
 0xa2f   :  { %13823 = vmatprep.subr.bf16.mxu0 %v18220_v15  ;;  %v18286_v15 = vld [vmem:[#allocation6 + $0x2cc] ss:$16 sps:$4 sm:$0xff]  }
 0xa31   :  { %13660 = vmatpush1.bf16.msra.mxu1 %v18215_v12  ;;  %v18281_v12 = vld [vmem:[#allocation6 + $0x2c0] ss:$16 sps:$4 sm:$0xff]  }
 0xa32   :  { %13824 = vmatpush1.bf16.msra.mxu0 %v18218_v32  ;;  %13661 = vmatprep.subr.bf16.mxu1 %v18223_v41  ;;  %v18284_v32 = vld [vmem:[#allocation6 + $0x2c8] ss:$16 sps:$4 sm:$0xff]   ;;  %v18289_v41 = vld [vmem:[#allocation6 + $0x2e4] ss:$16 sps:$4 sm:$0xff]  }
 0xa33   :  { %13825 = vmatprep.subr.bf16.mxu0 %v18226_v27  ;;  %v18292_v27 = vld [vmem:[#allocation6 + $0x2ec] ss:$16 sps:$4 sm:$0xff]  }
 0xa35   :  { %13662 = vmatpush1.bf16.msra.mxu1 %v18221_v3  ;;  %v18287_v3 = vld [vmem:[#allocation6 + $0x2e0] ss:$16 sps:$4 sm:$0xff]  }
 0xa36   :  { %13826 = vmatpush1.bf16.msra.mxu0 %v18224_v7  ;;  %13663 = vmatprep.subr.bf16.mxu1 %v18229_v58  ;;  %v18290_v7 = vld [vmem:[#allocation6 + $0x2e8] ss:$16 sps:$4 sm:$0xff]   ;;  %v18295_v58 = vld [vmem:[#allocation6 + $0x304] ss:$16 sps:$4 sm:$0xff]  }
 0xa37   :  { %13827 = vmatprep.subr.bf16.mxu0 %v18232_v26  ;;  %v18298_v26 = vld [vmem:[#allocation6 + $0x30c] ss:$16 sps:$4 sm:$0xff]  }
 0xa39   :  { %13664 = vmatpush1.bf16.msra.mxu1 %v18227_v9  ;;  %v18293_v9 = vld [vmem:[#allocation6 + $0x300] ss:$16 sps:$4 sm:$0xff]  }
 0xa3a   :  { %13828 = vmatpush1.bf16.msra.mxu0 %v18230_v18  ;;  %13665 = vmatprep.subr.bf16.mxu1 %v18235_v53  ;;  %v18301_v18 = vld [vmem:[#allocation6 + $0x324] ss:$16 sps:$4 sm:$0xff]   ;;  %v18304_v53 = vld [vmem:[#allocation6 + $0x32c] ss:$16 sps:$4 sm:$0xff]  }
 0xa3b   :  { %13829 = vmatprep.subr.bf16.mxu0 %v18238_v33  ;;  %v18299_v33 = vld [vmem:[#allocation6 + $0x320] ss:$16 sps:$4 sm:$0xff]  }
 0xa3d   :  { %13666 = vmatpush1.bf16.msra.mxu1 %v18233_v28  ;;  %v18307_v28 = vld [vmem:[#allocation6 + $0x344] ss:$16 sps:$4 sm:$0xff]  }
 0xa3e   :  { %13830 = vmatpush1.bf16.msra.mxu0 %v18236_v63  ;;  %13667 = vmatprep.subr.bf16.mxu1 %v18241_v49  ;;  %v18305_v63 = vld [vmem:[#allocation6 + $0x340] ss:$16 sps:$4 sm:$0xff]   ;;  %v18308_v49 = vld [vmem:[#allocation6 + $0x348] ss:$16 sps:$4 sm:$0xff]  }
 0xa3f   :  { %13831 = vmatprep.subr.bf16.mxu0 %v18244_v44  ;;  %v18313_v44 = vld [vmem:[#allocation6 + $0x364] ss:$16 sps:$4 sm:$0xff]  }
 0xa41   :  { %13668 = vmatpush1.bf16.msra.mxu1 %v18239_v47  ;;  %v18311_v47 = vld [vmem:[#allocation6 + $0x360] ss:$16 sps:$4 sm:$0xff]  }
 0xa42   :  { %13832 = vmatpush1.bf16.msra.mxu0 %v18242_v8  ;;  %13678 = vmatprep.subr.bf16.mxu1 %v18247_v1  ;;  %v18314_v8 = vld [vmem:[#allocation6 + $0x368] ss:$16 sps:$4 sm:$0xff]   ;;  %v18319_v1 = vld [vmem:[#allocation6 + $0x384] ss:$16 sps:$4 sm:$0xff]  }
 0xa43   :  { %13842 = vmatprep.subr.bf16.mxu0 %v18250_v46  ;;  %v18322_v46 = vld [vmem:[#allocation6 + $0x38c] ss:$16 sps:$4 sm:$0xff]  }
 0xa44   :  { %13670 = vmatmul.mubr.bf16.vlgmr.msra.gmra.mrb[20].mxu1 %v12071_v60 }
 0xa45   :  { %13834 = vmatmul.mubr.bf16.vlgmr.msra.gmra.mrb[28].mxu0 %v12071_v60  ;;  %13679 = vmatpush1.bf16.msra.mxu1 %v18245_v13  ;;  %v18317_v13 = vld [vmem:[#allocation6 + $0x380] ss:$16 sps:$4 sm:$0xff]   ;;  %v18320_v60 = vld [vmem:[#allocation6 + $0x388] ss:$16 sps:$4 sm:$0xff]  }
 0xa46   :  { %13710 = vmatprep.mubr.bf16.mxu1 %v12074_v16  ;;  %13843 = vmatpush1.bf16.msra.mxu0 %v18248_v52  ;;  %v18325_v52 = vld [vmem:[#allocation6 + $0x3a4] ss:$16 sps:$4 sm:$0xff]  }
 0xa47   :  { %13874 = vmatprep.mubr.bf16.mxu0 %v12074_v16  ;;  %13680 = vmatprep.subr.bf16.mxu1 %v18253_v24  ;;  %v18328_v24 = vld [vmem:[#allocation6 + $0x3ac] ss:$16 sps:$4 sm:$0xff]   ;;  %v18323_v16 = vld [vmem:[#allocation6 + $0x3a0] ss:$16 sps:$4 sm:$0xff]  }
 0xa48   :  { %13844 = vmatprep.subr.bf16.mxu0 %v18256_v31  ;;  %v8818_v31 = vrot.slane %v24147_v50, %v22858_v14 }
 0xa49   :  { %13681 = vmatpush1.bf16.msra.mxu1 %v18251_v4  ;;  %v18326_v4 = vld [vmem:[#allocation6 + $0x3a8] ss:$16 sps:$4 sm:$0xff]  }
 0xa4a   :  { %13845 = vmatpush1.bf16.msra.mxu0 %v18254_v17  ;;  %13682 = vmatprep.subr.bf16.mxu1 %v18259_v29  ;;  %v18331_v17 = vld [vmem:[#allocation6 + $0x3c4] ss:$16 sps:$4 sm:$0xff]   ;;  %v18334_v29 = vld [vmem:[#allocation6 + $0x3cc] ss:$16 sps:$4 sm:$0xff]  }
 0xa4b   :  { %13846 = vmatprep.subr.bf16.mxu0 %v18262_v42  ;;  %v18329_v42 = vld [vmem:[#allocation6 + $0x3c0] ss:$16 sps:$4 sm:$0xff]  }
 0xa4d   :  { %13683 = vmatpush1.bf16.msra.mxu1 %v18257_v19  ;;  %v17789_v19 = vadd.f32 %v24042_v5, %v8818_v31  ;;  %v18395_v31 = vld [vmem:[#allocation6 + $0x520] ss:$16 sps:$4 sm:$0xff]  }
 0xa4e   :  { %13847 = vmatpush1.bf16.msra.mxu0 %v18260_v30  ;;  %13684 = vmatprep.subr.bf16.mxu1 %v18265_v23  ;;  %v18332_v30 = vld [vmem:[#allocation6 + $0x3c8] ss:$16 sps:$4 sm:$0xff]   ;;  %v18337_v23 = vld [vmem:[#allocation6 + $0x3e4] ss:$16 sps:$4 sm:$0xff]  }
 0xa4f   :  { %13848 = vmatprep.subr.bf16.mxu0 %v18268_v62  ;;  %v18340_v62 = vld [vmem:[#allocation6 + $0x3ec] ss:$16 sps:$4 sm:$0xff]  }
 0xa51   :  { %13685 = vmatpush1.bf16.msra.mxu1 %v18263_v20  ;;  %v18335_v20 = vld [vmem:[#allocation6 + $0x3e0] ss:$16 sps:$4 sm:$0xff]  }
 0xa52   :  { %13849 = vmatpush1.bf16.msra.mxu0 %v18266_v0  ;;  %13686 = vmatprep.subr.bf16.mxu1 %v18271_v57  ;;  %v24187_v0 = vmax.f32 %v17789_v19, 0.0  ;;  %v18338_v57 = vld [vmem:[#allocation6 + $0x3e8] ss:$16 sps:$4 sm:$0xff]  }
 0xa53   :  { %13850 = vmatprep.subr.bf16.mxu0 %v18274_v54  ;;  %v18343_v54 = vld [vmem:[#allocation6 + $0x404] ss:$16 sps:$4 sm:$0xff]   ;;  %v18404_v19 = vld [vmem:[#allocation6 + $0x548] ss:$16 sps:$4 sm:$0xff]  }
 0xa54   :  { %v12073_v5 = vpack.c.bf16 %v24187_v0, %v24187_v0 }
 0xa55   :  { %13687 = vmatpush1.bf16.msra.mxu1 %v18269_v43  ;;  %v18346_v43 = vld [vmem:[#allocation6 + $0x40c] ss:$16 sps:$4 sm:$0xff]  }
 0xa56   :  { %13851 = vmatpush1.bf16.msra.mxu0 %v18272_v59  ;;  %13688 = vmatprep.subr.bf16.mxu1 %v18277_v2  ;;  %v18341_v59 = vld [vmem:[#allocation6 + $0x400] ss:$16 sps:$4 sm:$0xff]   ;;  %v18344_v2 = vld [vmem:[#allocation6 + $0x408] ss:$16 sps:$4 sm:$0xff]  }
 0xa57   :  { %13852 = vmatprep.subr.bf16.mxu0 %v18280_v56  ;;  %v18349_v56 = vld [vmem:[#allocation6 + $0x424] ss:$16 sps:$4 sm:$0xff]  }
 0xa59   :  { %13689 = vmatpush1.bf16.msra.mxu1 %v18275_v55  ;;  %v18352_v55 = vld [vmem:[#allocation6 + $0x42c] ss:$16 sps:$4 sm:$0xff]  }
 0xa5a   :  { %13853 = vmatpush1.bf16.msra.mxu0 %v18278_v10  ;;  %13690 = vmatprep.subr.bf16.mxu1 %v18283_v11  ;;  %v18347_v10 = vld [vmem:[#allocation6 + $0x420] ss:$16 sps:$4 sm:$0xff]   ;;  %v18350_v11 = vld [vmem:[#allocation6 + $0x428] ss:$16 sps:$4 sm:$0xff]  }
 0xa5b   :  { %13854 = vmatprep.subr.bf16.mxu0 %v18286_v15  ;;  %v18355_v15 = vld [vmem:[#allocation6 + $0x444] ss:$16 sps:$4 sm:$0xff]  }
 0xa5d   :  { %13691 = vmatpush1.bf16.msra.mxu1 %v18281_v12  ;;  %v18358_v12 = vld [vmem:[#allocation6 + $0x44c] ss:$16 sps:$4 sm:$0xff]  }
 0xa5e   :  { %13855 = vmatpush1.bf16.msra.mxu0 %v18284_v32  ;;  %13692 = vmatprep.subr.bf16.mxu1 %v18289_v41  ;;  %v18353_v32 = vld [vmem:[#allocation6 + $0x440] ss:$16 sps:$4 sm:$0xff]   ;;  %v18356_v41 = vld [vmem:[#allocation6 + $0x448] ss:$16 sps:$4 sm:$0xff]  }
 0xa5f   :  { %13856 = vmatprep.subr.bf16.mxu0 %v18292_v27  ;;  %v18361_v27 = vld [vmem:[#allocation6 + $0x464] ss:$16 sps:$4 sm:$0xff]  }
 0xa61   :  { %13693 = vmatpush1.bf16.msra.mxu1 %v18287_v3  ;;  %v18364_v3 = vld [vmem:[#allocation6 + $0x46c] ss:$16 sps:$4 sm:$0xff]  }
 0xa62   :  { %13857 = vmatpush1.bf16.msra.mxu0 %v18290_v7  ;;  %13694 = vmatprep.subr.bf16.mxu1 %v18295_v58  ;;  %v18359_v7 = vld [vmem:[#allocation6 + $0x460] ss:$16 sps:$4 sm:$0xff]   ;;  %v18362_v58 = vld [vmem:[#allocation6 + $0x468] ss:$16 sps:$4 sm:$0xff]  }
 0xa63   :  { %13858 = vmatprep.subr.bf16.mxu0 %v18298_v26  ;;  %v18367_v26 = vld [vmem:[#allocation6 + $0x484] ss:$16 sps:$4 sm:$0xff]  }
 0xa65   :  { %13695 = vmatpush1.bf16.msra.mxu1 %v18293_v9  ;;  %v18370_v9 = vld [vmem:[#allocation6 + $0x48c] ss:$16 sps:$4 sm:$0xff]  }
 0xa66   :  { %13859 = vmatpush1.bf16.msra.mxu0 %v18296_v21  ;;  %13696 = vmatprep.subr.bf16.mxu1 %v18301_v18  ;;  %v18365_v21 = vld [vmem:[#allocation6 + $0x480] ss:$16 sps:$4 sm:$0xff]   ;;  %v18368_v18 = vld [vmem:[#allocation6 + $0x488] ss:$16 sps:$4 sm:$0xff]  }
 0xa67   :  { %13860 = vmatprep.subr.bf16.mxu0 %v18304_v53  ;;  %v18373_v53 = vld [vmem:[#allocation6 + $0x4a4] ss:$16 sps:$4 sm:$0xff]  }
 0xa69   :  { %13697 = vmatpush1.bf16.msra.mxu1 %v18299_v33  ;;  %v18376_v33 = vld [vmem:[#allocation6 + $0x4ac] ss:$16 sps:$4 sm:$0xff]  }
 0xa6a   :  { %13861 = vmatpush1.bf16.msra.mxu0 %v18302_v61  ;;  %13698 = vmatprep.subr.bf16.mxu1 %v18307_v28  ;;  %v18371_v61 = vld [vmem:[#allocation6 + $0x4a0] ss:$16 sps:$4 sm:$0xff]   ;;  %v18374_v28 = vld [vmem:[#allocation6 + $0x4a8] ss:$16 sps:$4 sm:$0xff]  }
 0xa6b   :  { %13862 = vmatprep.subr.bf16.mxu0 %v18310_v25  ;;  %v18379_v25 = vld [vmem:[#allocation6 + $0x4c4] ss:$16 sps:$4 sm:$0xff]  }
 0xa6d   :  { %13699 = vmatpush1.bf16.msra.mxu1 %v18305_v63  ;;  %v18382_v63 = vld [vmem:[#allocation6 + $0x4cc] ss:$16 sps:$4 sm:$0xff]  }
 0xa6e   :  { %13863 = vmatpush1.bf16.msra.mxu0 %v18308_v49  ;;  %13700 = vmatprep.subr.bf16.mxu1 %v18313_v44  ;;  %v18377_v49 = vld [vmem:[#allocation6 + $0x4c0] ss:$16 sps:$4 sm:$0xff]   ;;  %v18380_v44 = vld [vmem:[#allocation6 + $0x4c8] ss:$16 sps:$4 sm:$0xff]  }
 0xa6f   :  { %13864 = vmatprep.subr.bf16.mxu0 %v18316_v36  ;;  %v18385_v36 = vld [vmem:[#allocation6 + $0x4e4] ss:$16 sps:$4 sm:$0xff]  }
 0xa71   :  { %13701 = vmatpush1.bf16.msra.mxu1 %v18311_v47  ;;  %v18388_v47 = vld [vmem:[#allocation6 + $0x4ec] ss:$16 sps:$4 sm:$0xff]  }
 0xa72   :  { %13865 = vmatpush1.bf16.msra.mxu0 %v18314_v8  ;;  %13702 = vmatprep.subr.bf16.mxu1 %v18319_v1  ;;  %v18383_v8 = vld [vmem:[#allocation6 + $0x4e0] ss:$16 sps:$4 sm:$0xff]   ;;  %v18386_v1 = vld [vmem:[#allocation6 + $0x4e8] ss:$16 sps:$4 sm:$0xff]  }
 0xa73   :  { %13866 = vmatprep.subr.bf16.mxu0 %v18322_v46  ;;  %v18391_v46 = vld [vmem:[#allocation6 + $0x504] ss:$16 sps:$4 sm:$0xff]  }
 0xa75   :  { %13703 = vmatpush1.bf16.msra.mxu1 %v18317_v13  ;;  %v18394_v13 = vld [vmem:[#allocation6 + $0x50c] ss:$16 sps:$4 sm:$0xff]  }
 0xa76   :  { %13867 = vmatpush1.bf16.msra.mxu0 %v18320_v60  ;;  %13704 = vmatprep.subr.bf16.mxu1 %v18325_v52  ;;  %v18389_v60 = vld [vmem:[#allocation6 + $0x500] ss:$16 sps:$4 sm:$0xff]   ;;  %v18392_v52 = vld [vmem:[#allocation6 + $0x508] ss:$16 sps:$4 sm:$0xff]  }
 0xa77   :  { %13868 = vmatprep.subr.bf16.mxu0 %v18328_v24  ;;  %v18397_v24 = vld [vmem:[#allocation6 + $0x524] ss:$16 sps:$4 sm:$0xff]  }
 0xa79   :  { %13705 = vmatpush1.bf16.msra.mxu1 %v18323_v16  ;;  %v18400_v16 = vld [vmem:[#allocation6 + $0x52c] ss:$16 sps:$4 sm:$0xff]  }
 0xa7a   :  { %13869 = vmatpush1.bf16.msra.mxu0 %v18326_v4  ;;  %13706 = vmatprep.subr.bf16.mxu1 %v18331_v17  ;;  %v18398_v4 = vld [vmem:[#allocation6 + $0x528] ss:$16 sps:$4 sm:$0xff]   ;;  %v18403_v17 = vld [vmem:[#allocation6 + $0x544] ss:$16 sps:$4 sm:$0xff]  }
 0xa7b   :  { %13870 = vmatprep.subr.bf16.mxu0 %v18334_v29  ;;  %v18406_v29 = vld [vmem:[#allocation6 + $0x54c] ss:$16 sps:$4 sm:$0xff]  }
 0xa7d   :  { %13707 = vmatpush1.bf16.msra.mxu1 %v18329_v42  ;;  %v18401_v42 = vld [vmem:[#allocation6 + $0x540] ss:$16 sps:$4 sm:$0xff]  }
 0xa7e   :  { %13871 = vmatpush1.bf16.msra.mxu0 %v18332_v30  ;;  %13708 = vmatprep.subr.bf16.mxu1 %v18337_v23  ;;  %v18409_v30 = vld [vmem:[#allocation6 + $0x564] ss:$16 sps:$4 sm:$0xff]   ;;  %v18412_v23 = vld [vmem:[#allocation6 + $0x56c] ss:$16 sps:$4 sm:$0xff]  }
 0xa7f   :  { %13872 = vmatprep.subr.bf16.mxu0 %v18340_v62  ;;  %v18407_v62 = vld [vmem:[#allocation6 + $0x560] ss:$16 sps:$4 sm:$0xff]  }
 0xa81   :  { %13709 = vmatpush1.bf16.msra.mxu1 %v18335_v20  ;;  %v18410_v20 = vld [vmem:[#allocation6 + $0x568] ss:$16 sps:$4 sm:$0xff]  }
 0xa82   :  { %13873 = vmatpush1.bf16.msra.mxu0 %v18338_v57  ;;  %13719 = vmatprep.subr.bf16.mxu1 %v18343_v54  ;;  %v18415_v57 = vld [vmem:[#allocation6 + $0x584] ss:$16 sps:$4 sm:$0xff]   ;;  %v18418_v54 = vld [vmem:[#allocation6 + $0x58c] ss:$16 sps:$4 sm:$0xff]  }
 0xa83   :  { %13883 = vmatprep.subr.bf16.mxu0 %v18346_v43  ;;  %v18413_v43 = vld [vmem:[#allocation6 + $0x580] ss:$16 sps:$4 sm:$0xff]  }
 0xa84   :  { %13711 = vmatmul.mubr.bf16.vlgmr.msra.gmra.mrb[20].mxu1 %v12073_v5 }
 0xa85   :  { %13875 = vmatmul.mubr.bf16.vlgmr.msra.gmra.mrb[28].mxu0 %v12073_v5  ;;  %13720 = vmatpush1.bf16.msra.mxu1 %v18341_v59  ;;  %v18416_v59 = vld [vmem:[#allocation6 + $0x588] ss:$16 sps:$4 sm:$0xff]   ;;  %v18421_v5 = vld [vmem:[#allocation6 + $0x5a4] ss:$16 sps:$4 sm:$0xff]  }
 0xa86   :  { %13884 = vmatpush1.bf16.msra.mxu0 %v18344_v2  ;;  %13721 = vmatprep.subr.bf16.mxu1 %v18349_v56  ;;  %v18424_v2 = vld [vmem:[#allocation6 + $0x5ac] ss:$16 sps:$4 sm:$0xff]   ;;  %v18419_v56 = vld [vmem:[#allocation6 + $0x5a0] ss:$16 sps:$4 sm:$0xff]  }
 0xa87   :  { %13885 = vmatprep.subr.bf16.mxu0 %v18352_v55  ;;  %v18422_v55 = vld [vmem:[#allocation6 + $0x5a8] ss:$16 sps:$4 sm:$0xff]  }
 0xa89   :  { %13722 = vmatpush1.bf16.msra.mxu1 %v18347_v10  ;;  %v18427_v10 = vld [vmem:[#allocation6 + $0x5c4] ss:$16 sps:$4 sm:$0xff]  }
 0xa8a   :  { %13886 = vmatpush1.bf16.msra.mxu0 %v18350_v11  ;;  %13723 = vmatprep.subr.bf16.mxu1 %v18355_v15  ;;  %v18430_v11 = vld [vmem:[#allocation6 + $0x5cc] ss:$16 sps:$4 sm:$0xff]   ;;  %v18425_v15 = vld [vmem:[#allocation6 + $0x5c0] ss:$16 sps:$4 sm:$0xff]  }
 0xa8b   :  { %13887 = vmatprep.subr.bf16.mxu0 %v18358_v12  ;;  %v18428_v12 = vld [vmem:[#allocation6 + $0x5c8] ss:$16 sps:$4 sm:$0xff]  }
 0xa8d   :  { %13724 = vmatpush1.bf16.msra.mxu1 %v18353_v32  ;;  %v18433_v32 = vld [vmem:[#allocation6 + $0x5e4] ss:$16 sps:$4 sm:$0xff]  }
 0xa8e   :  { %13888 = vmatpush1.bf16.msra.mxu0 %v18356_v41  ;;  %13725 = vmatprep.subr.bf16.mxu1 %v18361_v27  ;;  %v18436_v41 = vld [vmem:[#allocation6 + $0x5ec] ss:$16 sps:$4 sm:$0xff]   ;;  %v18431_v27 = vld [vmem:[#allocation6 + $0x5e0] ss:$16 sps:$4 sm:$0xff]  }
 0xa8f   :  { %13889 = vmatprep.subr.bf16.mxu0 %v18364_v3  ;;  %v18434_v3 = vld [vmem:[#allocation6 + $0x5e8] ss:$16 sps:$4 sm:$0xff]  }
 0xa91   :  { %13726 = vmatpush1.bf16.msra.mxu1 %v18359_v7  ;;  %v18439_v7 = vld [vmem:[#allocation6 + $0x604] ss:$16 sps:$4 sm:$0xff]  }
 0xa92   :  { %13890 = vmatpush1.bf16.msra.mxu0 %v18362_v58  ;;  %13727 = vmatprep.subr.bf16.mxu1 %v18367_v26  ;;  %v18442_v58 = vld [vmem:[#allocation6 + $0x60c] ss:$16 sps:$4 sm:$0xff]   ;;  %v8826_v26 = vrot.slane %v24147_v50, %v6647_v51 }
 0xa93   :  { %13891 = vmatprep.subr.bf16.mxu0 %v18370_v9  ;;  %v8830_v9 = vrot.slane %v24147_v50, %v6651_v40 }
 0xa95   :  { %13728 = vmatpush1.bf16.msra.mxu1 %v18365_v21  ;;  %v8838_v21 = vrot.slane %v24147_v50, %v6659_v48  ;;  %v18437_v50 = vld [vmem:[#allocation6 + $0x600] ss:$16 sps:$4 sm:$0xff]  }
 0xa96   :  { %13892 = vmatpush1.bf16.msra.mxu0 %v18368_v18  ;;  %13729 = vmatprep.subr.bf16.mxu1 %v18373_v53 }
 0xa97   :  { %13893 = vmatprep.subr.bf16.mxu0 %v18376_v33 }
 0xa99   :  { %13730 = vmatpush1.bf16.msra.mxu1 %v18371_v61 }
 0xa9a   :  { %13894 = vmatpush1.bf16.msra.mxu0 %v18374_v28  ;;  %13731 = vmatprep.subr.bf16.mxu1 %v18379_v25 }
 0xa9b   :  { %13895 = vmatprep.subr.bf16.mxu0 %v18382_v63 }
 0xa9d   :  { %13732 = vmatpush1.bf16.msra.mxu1 %v18377_v49 }
 0xa9e   :  { %13896 = vmatpush1.bf16.msra.mxu0 %v18380_v44  ;;  %13733 = vmatprep.subr.bf16.mxu1 %v18385_v36 }
 0xa9f   :  { %13897 = vmatprep.subr.bf16.mxu0 %v18388_v47 }
 0xaa1   :  { %13734 = vmatpush1.bf16.msra.mxu1 %v18383_v8 }
 0xaa2   :  { %13898 = vmatpush1.bf16.msra.mxu0 %v18386_v1  ;;  %13735 = vmatprep.subr.bf16.mxu1 %v18391_v46  ;;  %v18440_v1 = vld [vmem:[#allocation6 + $0x608] ss:$16 sps:$4 sm:$0xff]  }
 0xaa3   :  { %13899 = vmatprep.subr.bf16.mxu0 %v18394_v13  ;;  %v18445_v13 = vld [vmem:[#allocation6 + $0x624] ss:$16 sps:$4 sm:$0xff]  }
 0xaa5   :  { %13736 = vmatpush1.bf16.msra.mxu1 %v18389_v60  ;;  %v18448_v60 = vld [vmem:[#allocation6 + $0x62c] ss:$16 sps:$4 sm:$0xff]  }
 0xaa6   :  { %13900 = vmatpush1.bf16.msra.mxu0 %v18392_v52  ;;  %13737 = vmatprep.subr.bf16.mxu1 %v18397_v24  ;;  %v18443_v24 = vld [vmem:[#allocation6 + $0x620] ss:$16 sps:$4 sm:$0xff]  }
 0xaa7   :  { %13901 = vmatprep.subr.bf16.mxu0 %v18400_v16  ;;  %v18446_v16 = vld [vmem:[#allocation6 + $0x628] ss:$16 sps:$4 sm:$0xff]  }
 0xaa9   :  { %13738 = vmatpush1.bf16.msra.mxu1 %v18395_v31  ;;  %v18451_v31 = vld [vmem:[#allocation6 + $0x644] ss:$16 sps:$4 sm:$0xff]  }
 0xaaa   :  { %13902 = vmatpush1.bf16.msra.mxu0 %v18398_v4  ;;  %13739 = vmatprep.subr.bf16.mxu1 %v18403_v17  ;;  %v18454_v4 = vld [vmem:[#allocation6 + $0x64c] ss:$16 sps:$4 sm:$0xff]   ;;  %v18449_v17 = vld [vmem:[#allocation6 + $0x640] ss:$16 sps:$4 sm:$0xff]  }
 0xaab   :  { %13903 = vmatprep.subr.bf16.mxu0 %v18406_v29  ;;  %v18452_v29 = vld [vmem:[#allocation6 + $0x648] ss:$16 sps:$4 sm:$0xff]  }
 0xaad   :  { %13740 = vmatpush1.bf16.msra.mxu1 %v18401_v42  ;;  %v18457_v42 = vld [vmem:[#allocation6 + $0x664] ss:$16 sps:$4 sm:$0xff]  }
 0xaae   :  { %13904 = vmatpush1.bf16.msra.mxu0 %v18404_v19  ;;  %13741 = vmatprep.subr.bf16.mxu1 %v18409_v30  ;;  %v18460_v19 = vld [vmem:[#allocation6 + $0x66c] ss:$16 sps:$4 sm:$0xff]   ;;  %v18455_v30 = vld [vmem:[#allocation6 + $0x660] ss:$16 sps:$4 sm:$0xff]  }
 0xaaf   :  { %13905 = vmatprep.subr.bf16.mxu0 %v18412_v23  ;;  %v18458_v23 = vld [vmem:[#allocation6 + $0x668] ss:$16 sps:$4 sm:$0xff]  }
 0xab1   :  { %13742 = vmatpush1.bf16.msra.mxu1 %v18407_v62  ;;  %v18463_v62 = vld [vmem:[#allocation6 + $0x684] ss:$16 sps:$4 sm:$0xff]  }
 0xab2   :  { %13906 = vmatpush1.bf16.msra.mxu0 %v18410_v20  ;;  %13743 = vmatprep.subr.bf16.mxu1 %v18415_v57  ;;  %v18466_v20 = vld [vmem:[#allocation6 + $0x68c] ss:$16 sps:$4 sm:$0xff]   ;;  %v18461_v57 = vld [vmem:[#allocation6 + $0x680] ss:$16 sps:$4 sm:$0xff]  }
 0xab3   :  { %13907 = vmatprep.subr.bf16.mxu0 %v18418_v54  ;;  %v18464_v54 = vld [vmem:[#allocation6 + $0x688] ss:$16 sps:$4 sm:$0xff]  }
 0xab5   :  { %13744 = vmatpush1.bf16.msra.mxu1 %v18413_v43  ;;  %v18469_v43 = vld [vmem:[#allocation6 + $0x6a4] ss:$16 sps:$4 sm:$0xff]  }
 0xab6   :  { %13908 = vmatpush1.bf16.msra.mxu0 %v18416_v59  ;;  %13745 = vmatprep.subr.bf16.mxu1 %v18421_v5  ;;  %v18472_v59 = vld [vmem:[#allocation6 + $0x6ac] ss:$16 sps:$4 sm:$0xff]   ;;  %v18467_v5 = vld [vmem:[#allocation6 + $0x6a0] ss:$16 sps:$4 sm:$0xff]  }
 0xab7   :  { %13909 = vmatprep.subr.bf16.mxu0 %v18424_v2  ;;  %v18470_v2 = vld [vmem:[#allocation6 + $0x6a8] ss:$16 sps:$4 sm:$0xff]  }
 0xab9   :  { %13746 = vmatpush1.bf16.msra.mxu1 %v18419_v56  ;;  %v18475_v56 = vld [vmem:[#allocation6 + $0x6c4] ss:$16 sps:$4 sm:$0xff]  }
 0xaba   :  { %13910 = vmatpush1.bf16.msra.mxu0 %v18422_v55  ;;  %13747 = vmatprep.subr.bf16.mxu1 %v18427_v10  ;;  %v18478_v55 = vld [vmem:[#allocation6 + $0x6cc] ss:$16 sps:$4 sm:$0xff]   ;;  %v18473_v10 = vld [vmem:[#allocation6 + $0x6c0] ss:$16 sps:$4 sm:$0xff]  }
 0xabb   :  { %13911 = vmatprep.subr.bf16.mxu0 %v18430_v11  ;;  %v18476_v11 = vld [vmem:[#allocation6 + $0x6c8] ss:$16 sps:$4 sm:$0xff]  }
 0xabd   :  { %13748 = vmatpush1.bf16.msra.mxu1 %v18425_v15  ;;  %v18481_v15 = vld [vmem:[#allocation6 + $0x6e4] ss:$16 sps:$4 sm:$0xff]  }
 0xabe   :  { %13912 = vmatpush1.bf16.msra.mxu0 %v18428_v12  ;;  %13749 = vmatprep.subr.bf16.mxu1 %v18433_v32  ;;  %v18484_v12 = vld [vmem:[#allocation6 + $0x6ec] ss:$16 sps:$4 sm:$0xff]   ;;  %v18479_v32 = vld [vmem:[#allocation6 + $0x6e0] ss:$16 sps:$4 sm:$0xff]  }
 0xabf   :  { %13913 = vmatprep.subr.bf16.mxu0 %v18436_v41  ;;  %v18482_v41 = vld [vmem:[#allocation6 + $0x6e8] ss:$16 sps:$4 sm:$0xff]  }
 0xac1   :  { %13750 = vmatpush1.bf16.msra.mxu1 %v18431_v27  ;;  %v18487_v27 = vld [vmem:[#allocation6 + $0x704] ss:$16 sps:$4 sm:$0xff]  }
 0xac2   :  { %13914 = vmatpush1.bf16.msra.mxu0 %v18434_v3  ;;  %13760 = vmatprep.subr.bf16.mxu1 %v18439_v7  ;;  %v18490_v3 = vld [vmem:[#allocation6 + $0x70c] ss:$16 sps:$4 sm:$0xff]   ;;  %v18485_v7 = vld [vmem:[#allocation6 + $0x700] ss:$16 sps:$4 sm:$0xff]  }
 0xac3   :  { %13924 = vmatprep.subr.bf16.mxu0 %v18442_v58  ;;  %v18488_v58 = vld [vmem:[#allocation6 + $0x708] ss:$16 sps:$4 sm:$0xff]  }
 0xad7   :  { %v11892_v18 = vpop.f32.mrb[16].mxu1 }
 0xad8   :  { %v17791_v53 = vadd.f32 %v11892_v18, %v8826_v26  ;;  %v24200_v33 = vpop.f32.mrb[24].mxu0  ;;  %v11894_v61 = vpop.f32.mrb[17].mxu1  ;;  %v18493_v26 = vld [vmem:[#allocation6 + $0x724] ss:$16 sps:$4 sm:$0xff]   ;;  %v18494_v18 = vld [vmem:[#allocation6 + $0x728] ss:$16 sps:$4 sm:$0xff]  }
 0xad9   :  { %v17792_v28 = vadd.f32 %v11894_v61, %v8830_v9  ;;  %v12058_v25 = vpop.f32.mrb[25].mxu0  ;;  %v11896_v63 = vpop.f32.mrb[18].mxu1  ;;  %v18496_v9 = vld [vmem:[#allocation6 + $0x72c] ss:$16 sps:$4 sm:$0xff]  }
 0xada   :  { %v24202_v49 = vmax.f32 %v17791_v53, 0.0  ;;  %v17794_v44 = vadd.f32 %v12058_v25, %v8838_v21  ;;  %v12060_v51 = vpop.f32.mrb[26].mxu0  ;;  %v11897_v36 = vpop.f32.mrb[19].mxu1  ;;  %v18491_v21 = vld [vmem:[#allocation6 + $0x720] ss:$16 sps:$4 sm:$0xff]  }
 0xadb   :  { %v24204_v47 = vmax.f32 %v17792_v28, 0.0  ;;  %v12061_v40 = vpop.f32.mrb[27].mxu0  ;;  %v18499_v53 = vld [vmem:[#allocation6 + $0x744] ss:$16 sps:$4 sm:$0xff]   ;;  %v18502_v61 = vld [vmem:[#allocation6 + $0x74c] ss:$16 sps:$4 sm:$0xff]  }
 0xadc   :  { %v24206_v8 = vmax.f32 %v17794_v44, 0.0  ;;  %v12075_v46 = vpack.c.bf16 %v24202_v49, %v24202_v49  ;;  %v18497_v28 = vld [vmem:[#allocation6 + $0x740] ss:$16 sps:$4 sm:$0xff]   ;;  %v18500_v25 = vld [vmem:[#allocation6 + $0x748] ss:$16 sps:$4 sm:$0xff]  }
 0xadd   :  { %v12076_v48 = vpack.c.bf16 %v24204_v47, %v24204_v47  ;;  %v18505_v63 = vld [vmem:[#allocation6 + $0x764] ss:$16 sps:$4 sm:$0xff]   ;;  %v18508_v44 = vld [vmem:[#allocation6 + $0x76c] ss:$16 sps:$4 sm:$0xff]   ;;  %v18503_v51 = vld [vmem:[#allocation6 + $0x760] ss:$16 sps:$4 sm:$0xff]  }
 0xade   :  { %v12078_v52 = vpack.c.bf16 %v24206_v8, %v24206_v8  ;;  %v18506_v36 = vld [vmem:[#allocation6 + $0x768] ss:$16 sps:$4 sm:$0xff]   ;;  %v18511_v40 = vld [vmem:[#allocation6 + $0x784] ss:$16 sps:$4 sm:$0xff]  }
 0xadf   :  { %13751 = vmatprep.mubr.bf16.mxu1 %v12076_v48  ;;  %13915 = vmatprep.mubr.bf16.mxu0 %v12076_v48  ;;  %v18514_v48 = vld [vmem:[#allocation6 + $0x78c] ss:$16 sps:$4 sm:$0xff]  }
 0xae0   :  { %13752 = vmatmul.mubr.bf16.vlgmr.msra.gmra.mrb[20].mxu1 %v12075_v46  ;;  %13916 = vmatmul.mubr.bf16.vlgmr.msra.gmra.mrb[28].mxu0 %v12075_v46  ;;  %v18517_v46 = vld [vmem:[#allocation6 + $0x7a4] ss:$16 sps:$4 sm:$0xff]  }
 0xae1   :  { %13761 = vmatpush1.bf16.msra.mxu1 %v18437_v50  ;;  %13925 = vmatpush1.bf16.msra.mxu0 %v18440_v1  ;;  %v18509_v50 = vld [vmem:[#allocation6 + $0x780] ss:$16 sps:$4 sm:$0xff]   ;;  %v18512_v1 = vld [vmem:[#allocation6 + $0x788] ss:$16 sps:$4 sm:$0xff]  }
 0xae2   :  { %13792 = vmatprep.mubr.bf16.mxu1 %v12078_v52  ;;  %13956 = vmatprep.mubr.bf16.mxu0 %v12078_v52  ;;  %v18518_v52 = vld [vmem:[#allocation6 + $0x7a8] ss:$16 sps:$4 sm:$0xff]  }
 0xae3   :  { %13762 = vmatprep.subr.bf16.mxu1 %v18445_v13  ;;  %13926 = vmatprep.subr.bf16.mxu0 %v18448_v60  ;;  %v18520_v13 = vld [vmem:[#allocation6 + $0x7ac] ss:$16 sps:$4 sm:$0xff]   ;;  %v18515_v60 = vld [vmem:[#allocation6 + $0x7a0] ss:$16 sps:$4 sm:$0xff]  }
 0xae5   :  { %13763 = vmatpush1.bf16.msra.mxu1 %v18443_v24  ;;  %13927 = vmatpush1.bf16.msra.mxu0 %v18446_v16  ;;  %v18612_v24 = vld [vmem:[%s24479_s10] sm:$0xff] }
 0xae6   :  { %13764 = vmatprep.subr.bf16.mxu1 %v18451_v31  ;;  %13928 = vmatprep.subr.bf16.mxu0 %v18454_v4  ;;  %v8834_v16 = vrot.slane %v18612_v24, %v6655_v45  ;;  %v18523_v31 = vld [vmem:[#allocation6 + $0x7c4] ss:$16 sps:$4 sm:$0xff]   ;;  %v18526_v4 = vld [vmem:[#allocation6 + $0x7cc] ss:$16 sps:$4 sm:$0xff]  }
 0xae7   :  { %v18543_v24 = vld [vmem:[%s24484_s15 + $0x10] sm:$0xff]  }
 0xae9   :  { %13765 = vmatpush1.bf16.msra.mxu1 %v18449_v17  ;;  %13929 = vmatpush1.bf16.msra.mxu0 %v18452_v29  ;;  %v18521_v17 = vld [vmem:[#allocation6 + $0x7c0] ss:$16 sps:$4 sm:$0xff]   ;;  %v18524_v29 = vld [vmem:[#allocation6 + $0x7c8] ss:$16 sps:$4 sm:$0xff]  }
 0xaea   :  { %13766 = vmatprep.subr.bf16.mxu1 %v18457_v42  ;;  %13930 = vmatprep.subr.bf16.mxu0 %v18460_v19  ;;  %v17793_v42 = vadd.f32 %v24200_v33, %v8834_v16  ;;  %v18529_v19 = vld [vmem:[#allocation6 + $0x7e4] ss:$16 sps:$4 sm:$0xff]   ;;  %v12335_v33 = vld [vmem:[%s24481_s12] sm:$0xf] }
 0xaeb   :  { %v18544_v16 = vld [vmem:[%s24484_s15 + $0x90] sm:$0xff]  }
 0xaec   :  { %v24220_v34 = vmax.f32 %v17793_v42, 0.0  ;;  %v16734_v42 = vld [vmem:[#allocation5] ss:$0 sm:$0xff] }
 0xaed   :  { %13767 = vmatpush1.bf16.msra.mxu1 %v18455_v30  ;;  %13931 = vmatpush1.bf16.msra.mxu0 %v18458_v23  ;;  %v18532_v30 = vld [vmem:[#allocation6 + $0x7ec] ss:$16 sps:$4 sm:$0xff]   ;;  %v18527_v23 = vld [vmem:[#allocation6 + $0x7e0] ss:$16 sps:$4 sm:$0xff]  }
 0xaee   :  { %13768 = vmatprep.subr.bf16.mxu1 %v18463_v62  ;;  %13932 = vmatprep.subr.bf16.mxu0 %v18466_v20  ;;  %v18530_v62 = vld [vmem:[#allocation6 + $0x7e8] ss:$16 sps:$4 sm:$0xff]   ;;  %v12077_v45 = vpack.c.bf16 %v24220_v34, %v24220_v34  ;;  %v12340_v20 = vrot.slane %v12335_v33, %v22531_v38 }
 0xaf1   :  { %13769 = vmatpush1.bf16.msra.mxu1 %v18461_v57  ;;  %13933 = vmatpush1.bf16.msra.mxu0 %v18464_v54  ;;  %v12348_v57 = vrot.slane %v12335_v33, %v22858_v14  ;;  %v12344_v54 = vrot.slane %v12335_v33, %v22539_v22 }
 0xaf2   :  { %13770 = vmatprep.subr.bf16.mxu1 %v18469_v43  ;;  %13934 = vmatprep.subr.bf16.mxu0 %v18472_v59  ;;  %v12352_v43 = vrot.slane %v12335_v33, %v22861_v39 }
 0xaf5   :  { %13771 = vmatpush1.bf16.msra.mxu1 %v18467_v5  ;;  %13935 = vmatpush1.bf16.msra.mxu0 %v18470_v2 }
 0xaf6   :  { %13772 = vmatprep.subr.bf16.mxu1 %v18475_v56  ;;  %13936 = vmatprep.subr.bf16.mxu0 %v18478_v55 }
 0xaf9   :  { %13773 = vmatpush1.bf16.msra.mxu1 %v18473_v10  ;;  %13937 = vmatpush1.bf16.msra.mxu0 %v18476_v11 }
 0xafa   :  { %13774 = vmatprep.subr.bf16.mxu1 %v18481_v15  ;;  %13938 = vmatprep.subr.bf16.mxu0 %v18484_v12 }
 0xafd   :  { %13775 = vmatpush1.bf16.msra.mxu1 %v18479_v32  ;;  %13939 = vmatpush1.bf16.msra.mxu0 %v18482_v41 }
 0xafe   :  { %13776 = vmatprep.subr.bf16.mxu1 %v18487_v27  ;;  %13940 = vmatprep.subr.bf16.mxu0 %v18490_v3  ;;  %v13969_v3 = vld [vmem:[%s24482_s13] sm:$0xf] }
 0xb01   :  { %13777 = vmatpush1.bf16.msra.mxu1 %v18485_v7  ;;  %13941 = vmatpush1.bf16.msra.mxu0 %v18488_v58  ;;  %v13974_v7 = vrot.slane %v13969_v3, %v22531_v38  ;;  %v13978_v58 = vrot.slane %v13969_v3, %v22539_v22  ;;  %v18533_v38 = vld [vmem:[%s24484_s15 + $0x40] sm:$0xff]  }
 0xb02   :  { %13778 = vmatprep.subr.bf16.mxu1 %v18493_v26  ;;  %13942 = vmatprep.subr.bf16.mxu0 %v18496_v9  ;;  %v18534_v22 = vld [vmem:[%s24484_s15 + $0xc0] sm:$0xff]  }
 0xb05   :  { %13779 = vmatpush1.bf16.msra.mxu1 %v18491_v21  ;;  %13943 = vmatpush1.bf16.msra.mxu0 %v18494_v18  ;;  %v13982_v21 = vrot.slane %v13969_v3, %v22858_v14  ;;  %v18535_v14 = vld [vmem:[%s24484_s15] sm:$0xff]  }
 0xb06   :  { %13780 = vmatprep.subr.bf16.mxu1 %v18499_v53  ;;  %13944 = vmatprep.subr.bf16.mxu0 %v18502_v61  ;;  %v13986_v61 = vrot.slane %v13969_v3, %v22861_v39  ;;  %v18536_v39 = vld [vmem:[%s24484_s15 + $0x80] sm:$0xff]  }
 0xb07   :  { %v18550_v3 = vld [vmem:[%s24484_s15 + $0xe0] sm:$0xff]  }
 0xb09   :  { %13781 = vmatpush1.bf16.msra.mxu1 %v18497_v28  ;;  %13945 = vmatpush1.bf16.msra.mxu0 %v18500_v25 }
 0xb0a   :  { %13782 = vmatprep.subr.bf16.mxu1 %v18505_v63  ;;  %13946 = vmatprep.subr.bf16.mxu0 %v18508_v44 }
 0xb0d   :  { %13783 = vmatpush1.bf16.msra.mxu1 %v18503_v51  ;;  %13947 = vmatpush1.bf16.msra.mxu0 %v18506_v36 }
 0xb0e   :  { %13784 = vmatprep.subr.bf16.mxu1 %v18511_v40  ;;  %13948 = vmatprep.subr.bf16.mxu0 %v18514_v48  ;;  %v18682_v48 = vmov 0  }
 0xb0f   :  { %18076 = vset.pattern.permute.xlu0 %v18682_v48  ;;  %v18566_v48 = vld [vmem:[%s24484_s15 + $0x1c0] sm:$0xff]  }
 0xb11   :  { %13785 = vmatpush1.bf16.msra.mxu1 %v18509_v50  ;;  %13949 = vmatpush1.bf16.msra.mxu0 %v18512_v1  ;;  %v18537_v50 = vld [vmem:[%s24484_s15 + $0x48] sm:$0xff]  }
 0xb12   :  { %13786 = vmatprep.subr.bf16.mxu1 %v18517_v46  ;;  %13950 = vmatprep.subr.bf16.mxu0 %v18520_v13  ;;  %v18538_v1 = vld [vmem:[%s24484_s15 + $0xc8] sm:$0xff]  }
 0xb13   :  { %v18539_v46 = vld [vmem:[%s24484_s15 + $0x8] sm:$0xff]  }
 0xb14   :  { %v18540_v13 = vld [vmem:[%s24484_s15 + $0x88] sm:$0xff]  }
 0xb15   :  { %13787 = vmatpush1.bf16.msra.mxu1 %v18515_v60  ;;  %13951 = vmatpush1.bf16.msra.mxu0 %v18518_v52  ;;  %v18541_v60 = vld [vmem:[%s24484_s15 + $0x50] sm:$0xff]  }
 0xb16   :  { %13788 = vmatprep.subr.bf16.mxu1 %v18523_v31  ;;  %13952 = vmatprep.subr.bf16.mxu0 %v18526_v4  ;;  %v18542_v52 = vld [vmem:[%s24484_s15 + $0xd0] sm:$0xff]   ;;  %v18545_v31 = vld [vmem:[%s24484_s15 + $0x58] sm:$0xff]  }
 0xb17   :  { %v18546_v4 = vld [vmem:[%s24484_s15 + $0xd8] sm:$0xff]  }
 0xb19   :  { %13789 = vmatpush1.bf16.msra.mxu1 %v18521_v17  ;;  %13953 = vmatpush1.bf16.msra.mxu0 %v18524_v29  ;;  %v18547_v17 = vld [vmem:[%s24484_s15 + $0x18] sm:$0xff]  }
 0xb1a   :  { %13790 = vmatprep.subr.bf16.mxu1 %v18529_v19  ;;  %13954 = vmatprep.subr.bf16.mxu0 %v18532_v30  ;;  %v18548_v29 = vld [vmem:[%s24484_s15 + $0x98] sm:$0xff]  }
 0xb1d   :  { %13791 = vmatpush1.bf16.msra.mxu1 %v18527_v23  ;;  %13955 = vmatpush1.bf16.msra.mxu0 %v18530_v62 }
 0xb1e   :  { %17051 = vmatprep.subr.bf16.mxu1 %v18533_v38  ;;  %17073 = vmatprep.subr.bf16.mxu0 %v18534_v22 }
 0xb20   :  { %13793 = vmatmul.mubr.bf16.vlgmr.msra.gmra.mrb[20].mxu1 %v12077_v45  ;;  %13957 = vmatmul.mubr.bf16.vlgmr.msra.gmra.mrb[28].mxu0 %v12077_v45 }
 0xb21   :  { %17052 = vmatpush3.bf16.msra.mxu1 %v18535_v14  ;;  %17074 = vmatpush3.bf16.msra.mxu0 %v18536_v39 }
 0xb22   :  { %17053 = vmatprep.subr.bf16.mxu1 %v18537_v50  ;;  %17075 = vmatprep.subr.bf16.mxu0 %v18538_v1 }
 0xb25   :  { %17054 = vmatpush3.bf16.msra.mxu1 %v18539_v46  ;;  %17076 = vmatpush3.bf16.msra.mxu0 %v18540_v13 }
 0xb26   :  { %17055 = vmatprep.subr.bf16.mxu1 %v18541_v60  ;;  %17077 = vmatprep.subr.bf16.mxu0 %v18542_v52 }
 0xb29   :  { %17056 = vmatpush3.bf16.msra.mxu1 %v18543_v24  ;;  %17078 = vmatpush3.bf16.msra.mxu0 %v18544_v16 }
 0xb2a   :  { %17057 = vmatprep.subr.bf16.mxu1 %v18545_v31  ;;  %17079 = vmatprep.subr.bf16.mxu0 %v18546_v4 }
 0xb2d   :  { %17058 = vmatpush3.bf16.msra.mxu1 %v18547_v17  ;;  %17080 = vmatpush3.bf16.msra.mxu0 %v18548_v29 }
 0xb2e   :  { %17081 = vmatprep.subr.bf16.mxu0 %v18550_v3 }
 0xbf3   :  { %v13794_v59 = vpop.f32.mrb[20].mxu1  ;;  %v13958_v5 = vpop.f32.mrb[28].mxu0 }
 0xbf4   :  { %v17795_v2 = vadd.f32 %v13794_v59, %v12340_v20  ;;  %v17797_v56 = vadd.f32 %v13958_v5, %v12348_v57  ;;  %v13796_v55 = vpop.f32.mrb[21].mxu1  ;;  %v13960_v10 = vpop.f32.mrb[29].mxu0 }
 0xbf5   :  { %v17796_v11 = vadd.f32 %v13796_v55, %v12344_v54  ;;  %v13798_v15 = vpop.f32.mrb[22].mxu1  ;;  %v13962_v12 = vpop.f32.mrb[30].mxu0  ;;  %v17798_v32 = vadd.f32 %v13960_v10, %v12352_v43 }
 0xbf6   :  { %18597 = vtanh.f32 %v17795_v2  ;;  %v13799_v41 = vpop.f32.mrb[23].mxu1  ;;  %v13963_v27 = vpop.f32.mrb[31].mxu0 }
 0xbf7   :  { %18599 = vtanh.f32 %v17797_v56  ;;  %v18549_v27 = vld [vmem:[%s24484_s15 + $0x60] sm:$0xff]  }
 0xbf8   :  { %18601 = vtanh.f32 %v17796_v11  ;;  %17059 = vmatprep.subr.bf16.mxu1 %v18549_v27 }
 0xbf9   :  { %18603 = vtanh.f32 %v17798_v32 }
 0xc00   :  { %v18598_v26 = vpop.eup %18597 }
 0xc01   :  { %v18600_v9 = vpop.eup %18599  ;;  %v13991_v18 = vmul.f32 %v18598_v26, %v13974_v7  ;;  %v18551_v7 = vld [vmem:[%s24484_s15 + $0x20] sm:$0xff]   ;;  %v18553_v26 = vld [vmem:[%s24484_s15 + $0x68] sm:$0xff]  }
 0xc02   :  { %v18602_v53 = vpop.eup %18601  ;;  %v13993_v63 = vmul.f32 %v18600_v9, %v13982_v21  ;;  %v18554_v9 = vld [vmem:[%s24484_s15 + $0xe8] sm:$0xff]   ;;  %17060 = vmatpush3.bf16.msra.mxu1 %v18551_v7 }
 0xc03   :  { %v13992_v28 = vmul.f32 %v18602_v53, %v13978_v58  ;;  %v18604_v25 = vpop.eup %18603  ;;  %v18552_v58 = vld [vmem:[%s24484_s15 + $0xa0] sm:$0xff]   ;;  %v18555_v21 = vld [vmem:[%s24484_s15 + $0x28] sm:$0xff]   ;;  %17061 = vmatprep.subr.bf16.mxu1 %v18553_v26  ;;  %v18557_v53 = vld [vmem:[%s24484_s15 + $0x70] sm:$0xff]  }
 0xc04   :  { %v13994_v51 = vmul.f32 %v18604_v25, %v13986_v61  ;;  %17082 = vmatpush3.bf16.msra.mxu0 %v18552_v58  ;;  %v18558_v61 = vld [vmem:[%s24484_s15 + $0xf0] sm:$0xff]   ;;  %v18567_v58 = vld [vmem:[%s24484_s15 + $0x100] sm:$0xff]  }
 0xc05   :  { %v13995_v44 = vadd.f32 %v13992_v28, %v13991_v18  ;;  %v18556_v18 = vld [vmem:[%s24484_s15 + $0xa8] sm:$0xff]   ;;  %17083 = vmatprep.subr.bf16.mxu0 %v18554_v9  ;;  %v18559_v28 = vld [vmem:[%s24484_s15 + $0x30] sm:$0xff]   ;;  %v18568_v26 = vld [vmem:[%s24484_s15 + $0x180] sm:$0xff]  }
 0xc06   :  { %17062 = vmatpush3.bf16.msra.mxu1 %v18555_v21  ;;  %v18560_v25 = vld [vmem:[%s24484_s15 + $0xb0] sm:$0xff]   ;;  %v18569_v9 = vld [vmem:[%s24484_s15 + $0x148] sm:$0xff]  }
 0xc07   :  { %v13996_v36 = vadd.f32 %v13995_v44, %v13993_v63  ;;  %17063 = vmatprep.subr.bf16.mxu1 %v18557_v53  ;;  %v18561_v63 = vld [vmem:[%s24484_s15 + $0x78] sm:$0xff]   ;;  %v18570_v21 = vld [vmem:[%s24484_s15 + $0x1c8] sm:$0xff]  }
 0xc08   :  { %17084 = vmatpush3.bf16.msra.mxu0 %v18556_v18  ;;  %v18562_v44 = vld [vmem:[%s24484_s15 + $0xf8] sm:$0xff]  }
 0xc09   :  { %v13997_v40 = vadd.f32 %v13996_v36, %v13994_v51  ;;  %17085 = vmatprep.subr.bf16.mxu0 %v18558_v61  ;;  %v18563_v51 = vld [vmem:[%s24484_s15 + $0x38] sm:$0xff]   ;;  %v18571_v61 = vld [vmem:[%s24484_s15 + $0x108] sm:$0xff]  }
 0xc0a   :  { %17064 = vmatpush3.bf16.msra.mxu1 %v18559_v28  ;;  %v18564_v36 = vld [vmem:[%s24484_s15 + $0xb8] sm:$0xff]   ;;  %v18572_v28 = vld [vmem:[%s24484_s15 + $0x188] sm:$0xff]  }
 0xc0b   :  { %13998 = vadd.xlane.f32.xlu0 %v13997_v40  ;;  %17065 = vmatprep.subr.bf16.mxu1 %v18561_v63  ;;  %v18565_v40 = vld [vmem:[%s24484_s15 + $0x140] sm:$0xff]   ;;  %v18574_v63 = vld [vmem:[%s24484_s15 + $0x1d0] sm:$0xff]  }
 0xc0c   :  { %17086 = vmatpush3.bf16.msra.mxu0 %v18560_v25  ;;  %v18573_v25 = vld [vmem:[%s24484_s15 + $0x150] sm:$0xff]  }
 0xc0d   :  { %17087 = vmatprep.subr.bf16.mxu0 %v18562_v44 }
 0xc0e   :  { %17066 = vmatpush3.bf16.msra.mxu1 %v18563_v51 }
 0xc0f   :  { %17095 = vmatprep.subr.bf16.mxu1 %v18565_v40  ;;  %v18576_v40 = vld [vmem:[%s24484_s15 + $0x190] sm:$0xff]  }
 0xc10   :  { %17088 = vmatpush3.bf16.msra.mxu0 %v18564_v36  ;;  %v18575_v36 = vld [vmem:[%s24484_s15 + $0x110] sm:$0xff]  }
 0xc11   :  { %17117 = vmatprep.subr.bf16.mxu0 %v18566_v48 }
 0xc98   :  { %v13999_v19 = vpop.xlane.xlu0 %13998 }
 0xc99   :  { %v14007_v30 = vadd.f32 %v16734_v42, %v13999_v19 }
 0xc9b   :  { %v14009_v23 = vsel %vm14008_vm1, %v14007_v30, -inf }
 0xc9c   :  { %v14010_v62 = vrot.slane %v14009_v23, 4 }
 0xc9e   :  { %v14011_v45 = vmax.f32 %v14009_v23, %v14010_v62 }
 0xca0   :  { %v14012_v33 = vrot.slane %v14011_v45, 2 }
 0xca2   :  { %v14013_v20 = vmax.f32 %v14011_v45, %v14012_v33 }
 0xca4   :  { %v14014_v57 = vrot.slane %v14013_v20, 1 }
 0xca6   :  { %v14015_v54 = vmax.f32 %v14013_v20, %v14014_v57 }
 0xca8   :  { %v14016_v43 = vsub.f32 %v14007_v30, %v14015_v54 }
 0xcaa   :  { %v14017_v59 = vmul.f32 1.442695, %v14016_v43 }
 0xcac   :  { %18605 = vpow2.f32 %v14017_v59 }
 0xcb6   :  { %v18606_v5 = vpop.eup %18605 }
 0xcb7   :  { %v14019_v2 = vsel %vm14008_vm1, %v18606_v5, 0.0 }
 0xcb8   :  { %v14020_v56 = vrot.slane %v14019_v2, 4 }
 0xcba   :  { %v14021_v55 = vadd.f32 %v14020_v56, %v14019_v2 }
 0xcbc   :  { %v14022_v10 = vrot.slane %v14021_v55, 2 }
 0xcbe   :  { %v14023_v11 = vadd.f32 %v14022_v10, %v14021_v55 }
 0xcc0   :  { %v14024_v15 = vrot.slane %v14023_v11, 1 }
 0xcc2   :  { %v14025_v12 = vadd.f32 %v14024_v15, %v14023_v11 }
 0xcc4   :  { %18607 = vrcp.f32 %v14025_v12 }
 0xcce   :  { %v18608_v32 = vpop.eup %18607 }
 0xccf   :  { %v14027_v41 = vmul.f32 %v18608_v32, %v18606_v5 }
 0xcd1   :  { %14031 = vperm.xlu0 %18076, %v14027_v41   ;;  %14028 = vst.msk [vmem:[%s24487_s18] sm:$0xff] %vm14008_vm1, %v14027_v41 }
 0xd50   :  { %v24346_v38 = vpop.permute.xlu0 %14031 }
 0xd51   :  { %v14035_v22 = vmul.f32 %v24346_v38, %v24164_v37  ;;  %v14037_v14 = vmul.f32 %v24346_v38, %v24178_v6  ;;  %v14034_v39 = vmul.f32 %v24346_v38, %v24176_v35  ;;  %v14036_v50 = vmul.f32 %v24346_v38, %v24187_v0 }
 0xd52   :  { %v14039_v1 = vmul.f32 %v24346_v38, %v24204_v47  ;;  %v14041_v46 = vmul.f32 %v24346_v38, %v24206_v8  ;;  %v14038_v44 = vmul.f32 %v24346_v38, %v24202_v49  ;;  %v14040_v51 = vmul.f32 %v24346_v38, %v24220_v34  ;;  %v18577_v49 = vld [vmem:[%s24484_s15 + $0x158] sm:$0xff]  }
 0xd53   :  { %v14048_v13 = vrot.slane %v14035_v22, 4  ;;  %v14060_v60 = vrot.slane %v14037_v14, 4  ;;  %v14042_v52 = vrot.slane %v14034_v39, 4  ;;  %v14054_v24 = vrot.slane %v14036_v50, 4  ;;  %v18578_v34 = vld [vmem:[%s24484_s15 + $0x1d8] sm:$0xff]  }
 0xd54   :  { %v14072_v37 = vrot.slane %v14039_v1, 4  ;;  %v14084_v16 = vrot.slane %v14041_v46, 4  ;;  %v14066_v48 = vrot.slane %v14038_v44, 4  ;;  %v14078_v38 = vrot.slane %v14040_v51, 4 }
 0xd55   :  { %v14049_v31 = vadd.f32 %v14048_v13, %v14035_v22  ;;  %v14061_v6 = vadd.f32 %v14060_v60, %v14037_v14  ;;  %v14043_v4 = vadd.f32 %v14042_v52, %v14034_v39  ;;  %v14055_v17 = vadd.f32 %v14054_v24, %v14036_v50  ;;  %v18579_v22 = vld [vmem:[%s24484_s15 + $0x118] sm:$0xff]   ;;  %v18581_v39 = vld [vmem:[%s24484_s15 + $0x160] sm:$0xff]   ;;  %v18585_v52 = vld [vmem:[%s24484_s15 + $0x168] sm:$0xff]  }
 0xd56   :  { %v14073_v35 = vadd.f32 %v14072_v37, %v14039_v1  ;;  %v14085_v29 = vadd.f32 %v14084_v16, %v14041_v46  ;;  %v18580_v14 = vld [vmem:[%s24484_s15 + $0x198] sm:$0xff]   ;;  %v18582_v50 = vld [vmem:[%s24484_s15 + $0x1e0] sm:$0xff]   ;;  %v14067_v1 = vadd.f32 %v14066_v48, %v14038_v44  ;;  %v14079_v46 = vadd.f32 %v14078_v38, %v14040_v51  ;;  %v18586_v24 = vld [vmem:[%s24484_s15 + $0x1e8] sm:$0xff]  }
 0xd57   :  { %v14050_v42 = vrot.slane %v14049_v31, 2  ;;  %v14062_v0 = vrot.slane %v14061_v6, 2  ;;  %v14044_v19 = vrot.slane %v14043_v4, 2  ;;  %v14056_v30 = vrot.slane %v14055_v17, 2  ;;  %v18583_v13 = vld [vmem:[%s24484_s15 + $0x120] sm:$0xff]  }
 0xd58   :  { %v14074_v47 = vrot.slane %v14073_v35, 2  ;;  %v14086_v23 = vrot.slane %v14085_v29, 2  ;;  %v18584_v60 = vld [vmem:[%s24484_s15 + $0x1a0] sm:$0xff]   ;;  %v14068_v37 = vrot.slane %v14067_v1, 2  ;;  %v14080_v16 = vrot.slane %v14079_v46, 2 }
 0xd59   :  { %v14051_v62 = vadd.f32 %v14050_v42, %v14049_v31  ;;  %v14063_v8 = vadd.f32 %v14062_v0, %v14061_v6  ;;  %v14045_v45 = vadd.f32 %v14044_v19, %v14043_v4  ;;  %v14057_v33 = vadd.f32 %v14056_v30, %v14055_v17  ;;  %v18587_v31 = vld [vmem:[%s24484_s15 + $0x128] sm:$0xff]   ;;  %v18589_v4 = vld [vmem:[%s24484_s15 + $0x170] sm:$0xff]   ;;  %v18593_v19 = vld [vmem:[%s24484_s15 + $0x178] sm:$0xff]  }
 0xd5a   :  { %v14075_v20 = vadd.f32 %v14074_v47, %v14073_v35  ;;  %v14087_v57 = vadd.f32 %v14086_v23, %v14085_v29  ;;  %v18588_v6 = vld [vmem:[%s24484_s15 + $0x1a8] sm:$0xff]   ;;  %v18590_v17 = vld [vmem:[%s24484_s15 + $0x1f0] sm:$0xff]   ;;  %v14069_v35 = vadd.f32 %v14068_v37, %v14067_v1  ;;  %v14081_v29 = vadd.f32 %v14080_v16, %v14079_v46  ;;  %v18594_v30 = vld [vmem:[%s24484_s15 + $0x1f8] sm:$0xff]  }
 0xd5b   :  { %v14052_v54 = vrot.slane %v14051_v62, 1  ;;  %v14064_v43 = vrot.slane %v14063_v8, 1  ;;  %v14046_v59 = vrot.slane %v14045_v45, 1  ;;  %v14058_v5 = vrot.slane %v14057_v33, 1  ;;  %v18591_v42 = vld [vmem:[%s24484_s15 + $0x130] sm:$0xff]  }
 0xd5c   :  { %v14076_v2 = vrot.slane %v14075_v20, 1  ;;  %v14088_v56 = vrot.slane %v14087_v57, 1  ;;  %v18592_v0 = vld [vmem:[%s24484_s15 + $0x1b0] sm:$0xff]   ;;  %v14070_v47 = vrot.slane %v14069_v35, 1  ;;  %v14082_v23 = vrot.slane %v14081_v29, 1 }
 0xd5d   :  { %v14053_v55 = vadd.f32 %v14052_v54, %v14051_v62  ;;  %v14065_v10 = vadd.f32 %v14064_v43, %v14063_v8  ;;  %v14047_v11 = vadd.f32 %v14046_v59, %v14045_v45  ;;  %v14059_v15 = vadd.f32 %v14058_v5, %v14057_v33  ;;  %v18595_v62 = vld [vmem:[%s24484_s15 + $0x138] sm:$0xff]   ;;  %v14226_v59 = vld [vmem:[%s24485_s16] sm:$0x1] }
 0xd5e   :  { %v14077_v12 = vadd.f32 %v14076_v2, %v14075_v20  ;;  %v14089_v32 = vadd.f32 %v14088_v56, %v14087_v57  ;;  %v18596_v8 = vld [vmem:[%s24484_s15 + $0x1b8] sm:$0xff]   ;;  %v14071_v45 = vadd.f32 %v14070_v47, %v14069_v35  ;;  %v14083_v33 = vadd.f32 %v14082_v23, %v14081_v29  ;;  %s18683_s15 = smov [#allocation9]  }
 0xd5f   :  { %v14091_v41 = vpack.c.bf16 %v14053_v55, %v14053_v55  ;;  %v14093_v27 = vpack.c.bf16 %v14065_v10, %v14065_v10  ;;  %v14090_v3 = vpack.c.bf16 %v14047_v11, %v14047_v11  ;;  %v14092_v7 = vpack.c.bf16 %v14059_v15, %v14059_v15  ;;  %s14779_s16 = sshll.u32 %s18683_s15, 4  ;;  %s14780_s16 = int_to_ptr.vmem [resolvable:$true] %s14779_s16 }
 0xd60   :  { %v14095_v18 = vpack.c.bf16 %v14077_v12, %v14077_v12  ;;  %v14097_v53 = vpack.c.bf16 %v14089_v32, %v14089_v32  ;;  %v14094_v20 = vpack.c.bf16 %v14071_v45, %v14071_v45  ;;  %v14096_v57 = vpack.c.bf16 %v14083_v33, %v14083_v33  ;;  %s18635_s18 = scalar_lea.vmem %s14780_s16, 16  ;;  %s18639_s9 = scalar_lea.vmem %s14780_s16, 32 }
 0xd61   :  { %14643 = vmatprep.mubr.bf16.mxu1 %v14091_v41  ;;  %14683 = vmatprep.mubr.bf16.mxu0 %v14093_v27  ;;  %p18636_p10 = scmp.ne.s32.totalorder %s14780_s16, %s18635_s18  ;;  %p18640_p11 = scmp.lt.s32.totalorder %s14780_s16, %s14780_s16 }
 0xd62   :  { %14644 = vmatmul.mubr.bf16.vlgmr.msra.gmra.mrb[24].mxu1 %v14090_v3  ;;  %14684 = vmatmul.mubr.bf16.vlgmr.msra.gmra.mrb[32].mxu0 %v14092_v7  ;;  %p18641_p12 = scmp.lt.s32.totalorder %s18639_s9, %s18635_s18 }
 0xd63   :  { %17096 = vmatpush3.bf16.msra.mxu1 %v18567_v58  ;;  %17118 = vmatpush3.bf16.msra.mxu0 %v18568_v26 }
 0xd64   :  { %14723 = vmatprep.mubr.bf16.mxu1 %v14095_v18  ;;  %14763 = vmatprep.mubr.bf16.mxu0 %v14097_v53  ;;  %p18642_p13 = por %p18641_p12, %p18640_p11 }
 0xd65   :  { %17097 = vmatprep.subr.bf16.mxu1 %v18569_v9  ;;  %17119 = vmatprep.subr.bf16.mxu0 %v18570_v21 }
 0xd66   :  { %p18643_p0 = pnand %p18642_p13, %p18636_p10 }
 0xd67   :  { %17098 = vmatpush3.bf16.msra.mxu1 %v18571_v61  ;;  %17120 = vmatpush3.bf16.msra.mxu0 %v18572_v28 }
 0xd68   :  { %17099 = vmatprep.subr.bf16.mxu1 %v18573_v25  ;;  %17121 = vmatprep.subr.bf16.mxu0 %v18574_v63 }
 0xd6b   :  { %17100 = vmatpush3.bf16.msra.mxu1 %v18575_v36  ;;  %17122 = vmatpush3.bf16.msra.mxu0 %v18576_v40 }
 0xd6c   :  { %17101 = vmatprep.subr.bf16.mxu1 %v18577_v49  ;;  %17123 = vmatprep.subr.bf16.mxu0 %v18578_v34 }
 0xd6f   :  { %17102 = vmatpush3.bf16.msra.mxu1 %v18579_v22  ;;  %17124 = vmatpush3.bf16.msra.mxu0 %v18580_v14 }
 0xd70   :  { %17103 = vmatprep.subr.bf16.mxu1 %v18581_v39  ;;  %17125 = vmatprep.subr.bf16.mxu0 %v18582_v50 }
 0xd73   :  { %17104 = vmatpush3.bf16.msra.mxu1 %v18583_v13  ;;  %17126 = vmatpush3.bf16.msra.mxu0 %v18584_v60 }
 0xd74   :  { %17105 = vmatprep.subr.bf16.mxu1 %v18585_v52  ;;  %17127 = vmatprep.subr.bf16.mxu0 %v18586_v24 }
 0xd77   :  { %17106 = vmatpush3.bf16.msra.mxu1 %v18587_v31  ;;  %17128 = vmatpush3.bf16.msra.mxu0 %v18588_v6 }
 0xd78   :  { %17107 = vmatprep.subr.bf16.mxu1 %v18589_v4  ;;  %17129 = vmatprep.subr.bf16.mxu0 %v18590_v17 }
 0xd7b   :  { %17108 = vmatpush3.bf16.msra.mxu1 %v18591_v42  ;;  %17130 = vmatpush3.bf16.msra.mxu0 %v18592_v0 }
 0xd7c   :  { %17109 = vmatprep.subr.bf16.mxu1 %v18593_v19  ;;  %17131 = vmatprep.subr.bf16.mxu0 %v18594_v30 }
 0xd7f   :  { %17110 = vmatpush3.bf16.msra.mxu1 %v18595_v62  ;;  %17132 = vmatpush3.bf16.msra.mxu0 %v18596_v8 }
 0xd82   :  { %14724 = vmatmul.mubr.bf16.vlgmr.msra.gmra.mrb[28].mxu1 %v14094_v20  ;;  %14764 = vmatmul.mubr.bf16.vlgmr.msra.gmra.mrb[36].mxu0 %v14096_v57 }
 0xe35   :  { %v17067_v54 = vpop.f32.mrb[24].mxu1  ;;  %v17089_v43 = vpop.f32.mrb[32].mxu0 }
 0xe36   :  { %v17068_v5 = vpop.f32.mrb[25].mxu1  ;;  %v17090_v2 = vpop.f32.mrb[33].mxu0 }
 0xe37   :  { %v17069_v56 = vadd.f32 %v17068_v5, %v17067_v54  ;;  %v17091_v55 = vadd.f32 %v17090_v2, %v17089_v43  ;;  %v17070_v10 = vpop.f32.mrb[26].mxu1  ;;  %v17092_v11 = vpop.f32.mrb[34].mxu0 }
 0xe38   :  { %v17071_v15 = vpop.f32.mrb[27].mxu1  ;;  %v17093_v12 = vpop.f32.mrb[35].mxu0 }
 0xe39   :  { %v14646_v32 = vadd.f32 %v17069_v56, %v14226_v59 }
 0xe3b   :  { %v14686_v41 = vadd.f32 %v17091_v55, %v14646_v32 }
 0xe55   :  { %v17111_v27 = vpop.f32.mrb[28].mxu1  ;;  %v17133_v3 = vpop.f32.mrb[36].mxu0 }
 0xe56   :  { %v17112_v7 = vpop.f32.mrb[29].mxu1  ;;  %v17134_v58 = vpop.f32.mrb[37].mxu0 }
 0xe57   :  { %v17113_v26 = vadd.f32 %v17112_v7, %v17111_v27  ;;  %v17135_v9 = vadd.f32 %v17134_v58, %v17133_v3  ;;  %v17114_v21 = vpop.f32.mrb[30].mxu1  ;;  %v17136_v18 = vpop.f32.mrb[38].mxu0 }
 0xe58   :  { %v17115_v53 = vpop.f32.mrb[31].mxu1  ;;  %v17137_v61 = vpop.f32.mrb[39].mxu0 }
 0xe59   :  { %v14726_v28 = vadd.f32 %v17113_v26, %v14686_v41 }
 0xe5b   :  { %v14766_v25 = vadd.f32 %v17135_v9, %v14726_v28 }
 0xe5d   :  { %14772 = vst.msk [vmem:[#allocation9] sm:$0x1] %vm14771_vm2, %v14766_v25 }
 0xe5e   :  { %18646 = shalt.err (!%p18643_p0)
}
 0xe5f   :  { %s18647_s0 = scalar_lea.hbm %s24486_s17, 16 }
 0xe60   :  { %p18648_p1 = scmp.ne.s32.totalorder %s24486_s17, %s18647_s0  ;;  %p18651_p2 = scmp.lt.u32.totalorder %s18647_s0, %s24486_s17 }
 0xe62   :  { %p18653_p3 = pnand %p18651_p2, %p18648_p1 }
 0xe64   :  { %18656 = shalt.err (!%p18653_p3)
}
 0xe65   :  { %14782 = dma.vmem_to_hbm [thread:$0]  %s14780_s16, 16, %s24486_s17, [#allocation8]  }
 0xe66   :  { %18667 = dma.done.wait [#allocation8], 16  }
 0xe67   :  { %18668 = vsyncadd [#allocation8], 4294967280 }
 0xe68   :  { %14790 = vsyncpa [#allocation7], 1 }
 0xe69   :  { %14791 = vsyncpa [#allocation8], 1 }

</bundles_post_ra>
